<compile_context>
chip_gen: v5e
topology: v5e:2x2
jax: 0.10.0
libtpu: 0.0.40
codegen_flags: <defaults>
</compile_context>

<pallas_src>
import functools

import jax
import jax.numpy as jnp
from jax.experimental import pallas as pl
from jax.experimental.pallas import tpu as pltpu


# ------------------------------ tiling helpers ------------------------------

def _pick_chunk(n, candidates=(64, 32, 16, 8)):
    """Largest aligned chunk of the attention-batch axis that divides n."""
    for c in candidates:
        if n >= c and n % c == 0:
            return c
    return n


def _pick_row_block(m, candidates=(512, 256, 128, 64, 32, 16, 8)):
    """Row-tile for the FFN kernel (keeps weights resident, pipelines rows)."""
    for c in candidates:
        if m >= c and m % c == 0:
            return c
    return m


# ------------------------- fused attention-block kernel ----------------------

def _attn_block_kernel(xq2_ref, xm2_ref, x3_ref,
                       wcq_ref, bcq_ref, wck_ref, bck_ref,
                       wi_ref, bi_ref, wo_ref, bo_ref,
                       g_ref, b_ref, o_ref, *, nheads, eps):
    # Per grid step (one chunk of BC attention batches):
    #   xq2_ref: (BC*N, E)  query rows  x[b, n, :], flattened b-major
    #   xm2_ref: (BC*N, E)  key/value rows m[b, n, :]
    #   x3_ref : (L, BC, E) residual columns x[:, b, :]
    #   wcq/wck: (K*E, E)   unfolded causal-conv weights (k-major, Cin minor)
    #   wi     : (E, 3E)    in_proj_weight^T (q | k | v);  bi: (1, 3E)
    #   wo     : (E, E)     out_proj weight^T
    #   o_ref  : (L, BC, E) LayerNorm(residual + attention) columns
    mc, e = xq2_ref.shape
    l, bc, _ = x3_ref.shape
    n = mc // bc
    ksize = wcq_ref.shape[0] // e
    hd = e // nheads
    scale = float(hd) ** -0.5

    xq = xq2_ref[...].astype(jnp.float32)
    xm = xm2_ref[...].astype(jnp.float32)

    # position-within-sequence index for each flattened row (causal boundary mask)
    ridx = jax.lax.broadcasted_iota(jnp.int32, (mc, e), 0)
    if n & (n - 1) == 0:
        seg = ridx & (n - 1)
    else:
        seg = ridx % n

    def causal_unfold(x2):
        # (BC*N, E) -> (BC*N, K*E); column block k holds x shifted back by K-1-k,
        # zero-filled at the causal boundary (left padding handled in-kernel).
        pieces = []
        for k in range(ksize):
            shift = ksize - 1 - k
            if shift == 0:
                pieces.append(x2)
            else:
                sh = jnp.concatenate(
                    [jnp.zeros((shift, e), jnp.float32), x2[:mc - shift, :]],
                    axis=0)
                pieces.append(jnp.where(seg < shift, 0.0, sh))
        return jnp.concatenate(pieces, axis=1)

    # causal Conv1d (PyTorch conv over the batch axis of the seq-first inputs)
    # as one unfolded matmul per conv.
    qc = (jnp.dot(causal_unfold(xq), wcq_ref[...],
                  preferred_element_type=jnp.float32) + bcq_ref[...])
    kc = (jnp.dot(causal_unfold(xm), wck_ref[...],
                  preferred_element_type=jnp.float32) + bck_ref[...])

    # in-projection (q from conv(query), k from conv(key), v from raw value).
    wi = wi_ref[...]
    bi = bi_ref[...]
    qp = jnp.dot(qc, wi[:, 0:e], preferred_element_type=jnp.float32) + bi[:, 0:e]
    kp = (jnp.dot(kc, wi[:, e:2 * e], preferred_element_type=jnp.float32)
          + bi[:, e:2 * e])
    vp = (jnp.dot(xm, wi[:, 2 * e:3 * e], preferred_element_type=jnp.float32)
          + bi[:, 2 * e:3 * e])

    # per-(attention batch) softmax attention, heads statically unrolled.
    cols = []
    for bl in range(bc):
        r0 = bl * n
        qb = qp[r0:r0 + n, :]
        kb = kp[r0:r0 + n, :]
        vb = vp[r0:r0 + n, :]
        heads = []
        for h in range(nheads):
            c0 = h * hd
            qh = qb[:, c0:c0 + hd] * scale
            kh = kb[:, c0:c0 + hd]
            vh = vb[:, c0:c0 + hd]
            sc = jax.lax.dot_general(qh, kh, (((1,), (1,)), ((), ())),
                                     preferred_element_type=jnp.float32)
            sc = sc - jnp.max(sc, axis=-1, keepdims=True)
            p = jnp.exp(sc)
            p = p / jnp.sum(p, axis=-1, keepdims=True)
            heads.append(jnp.dot(p, vh, preferred_element_type=jnp.float32))
        cols.append(jnp.concatenate(heads, axis=1))          # (N, E)
    attn = jnp.concatenate(cols, axis=0)                     # (BC*N, E), b-major
    attn = (jnp.dot(attn, wo_ref[...], preferred_element_type=jnp.float32)
            + bo_ref[...])

    # residual + LayerNorm, written column by column: the reference mixes the
    # (L, N, E) residual with the (N, L, E) attention output (needs L == N == S).
    gamma = g_ref[...].astype(jnp.float32)
    beta = b_ref[...].astype(jnp.float32)
    for bl in range(bc):
        a_col = attn[bl * n:(bl + 1) * n, :]                 # (N, E) == (L, E)
        x_col = x3_ref[:, bl, :].astype(jnp.float32)         # (L, E)
        y = x_col + a_col
        mu = jnp.mean(y, axis=-1, keepdims=True)
        yc = y - mu
        var = jnp.mean(yc * yc, axis=-1, keepdims=True)
        y = yc * jax.lax.rsqrt(var + eps)
        o_ref[:, bl, :] = (y * gamma + beta).astype(o_ref.dtype)


def attention_block_pallas(x, m, ap, gamma2, beta2, *, nhead, eps):
    """Fused conv-MHA + residual + LayerNorm.  x: (L,N,E) query/residual,
    m: (S,N,E) key/value source.  Returns LayerNorm(x + attn) as (L,N,E)."""
    l, n, e = x.shape
    s_len, n2, e2 = m.shape
    assert l == n == s_len and n2 == n and e2 == e, \
        "reference forward requires L == S == N"
    ksize = ap['conv_q_wu'].shape[0] // e

    nb = l                               # attention batch count (bsz = L)
    bc = _pick_chunk(nb)
    grid = (nb // bc,)

    x2 = x.reshape(l * n, e)             # free row-major view
    m2 = m.reshape(s_len * n, e)

    kernel = functools.partial(_attn_block_kernel, nheads=nhead, eps=eps)
    return pl.pallas_call(
        kernel,
        grid=grid,
        in_specs=[
            pl.BlockSpec((bc * n, e), lambda c: (c, 0)),        # query rows
            pl.BlockSpec((bc * n, e), lambda c: (c, 0)),        # key/value rows
            pl.BlockSpec((l, bc, e), lambda c: (0, c, 0)),      # residual columns
            pl.BlockSpec((ksize * e, e), lambda c: (0, 0)),     # conv_q (unfolded)
            pl.BlockSpec((1, e), lambda c: (0, 0)),
            pl.BlockSpec((ksize * e, e), lambda c: (0, 0)),     # conv_k (unfolded)
            pl.BlockSpec((1, e), lambda c: (0, 0)),
            pl.BlockSpec((e, 3 * e), lambda c: (0, 0)),         # in_proj^T
            pl.BlockSpec((1, 3 * e), lambda c: (0, 0)),
            pl.BlockSpec((e, e), lambda c: (0, 0)),             # out_proj^T
            pl.BlockSpec((1, e), lambda c: (0, 0)),
            pl.BlockSpec((1, e), lambda c: (0, 0)),             # LN gamma
            pl.BlockSpec((1, e), lambda c: (0, 0)),             # LN beta
        ],
        out_specs=pl.BlockSpec((l, bc, e), lambda c: (0, c, 0)),
        out_shape=jax.ShapeDtypeStruct((l, n, e), x.dtype),
        compiler_params=pltpu.CompilerParams(
            dimension_semantics=("parallel",)),
    )(x2, m2, x,
      ap['conv_q_wu'], ap['conv_q_b'], ap['conv_k_wu'], ap['conv_k_b'],
      ap['in_proj_wt'], ap['in_proj_b'], ap['out_proj_wt'], ap['out_proj_b'],
      gamma2, beta2)


# ------------------------------ fused FFN kernel -----------------------------

def _ffn_block_kernel(x_ref, w1_ref, b1_ref, w2_ref, b2_ref, g_ref, bt_ref,
                      o_ref, *, eps):
    # y = LayerNorm(x + linear2(relu(linear1(x))))
    x = x_ref[...].astype(jnp.float32)
    h = jnp.dot(x, w1_ref[...], preferred_element_type=jnp.float32) + b1_ref[...]
    h = jnp.maximum(h, 0.0)
    f = jnp.dot(h, w2_ref[...], preferred_element_type=jnp.float32) + b2_ref[...]
    y = x + f
    mu = jnp.mean(y, axis=-1, keepdims=True)
    yc = y - mu
    var = jnp.mean(yc * yc, axis=-1, keepdims=True)
    y = yc * jax.lax.rsqrt(var + eps)
    o_ref[...] = (y * g_ref[...] + bt_ref[...]).astype(o_ref.dtype)


def ffn_block_pallas(x, w1t, b1, w2t, b2, gamma2, beta2, *, eps):
    l, n, e = x.shape
    m = l * n
    dff = w1t.shape[1]
    bm = _pick_row_block(m)
    x2 = x.reshape(m, e)
    # NOTE: at realistic (E, Dff, M) sizes, tile Dff with an accumulator and set
    # pltpu.CompilerParams(vmem_limit_bytes=...) for v7x's 64 MiB VMEM.
    out = pl.pallas_call(
        functools.partial(_ffn_block_kernel, eps=eps),
        grid=(m // bm,),
        in_specs=[
            pl.BlockSpec((bm, e), lambda i: (i, 0)),
            pl.BlockSpec((e, dff), lambda i: (0, 0)),
            pl.BlockSpec((1, dff), lambda i: (0, 0)),
            pl.BlockSpec((dff, e), lambda i: (0, 0)),
            pl.BlockSpec((1, e), lambda i: (0, 0)),
            pl.BlockSpec((1, e), lambda i: (0, 0)),
            pl.BlockSpec((1, e), lambda i: (0, 0)),
        ],
        out_specs=pl.BlockSpec((bm, e), lambda i: (i, 0)),
        out_shape=jax.ShapeDtypeStruct((m, e), x.dtype),
        compiler_params=pltpu.CompilerParams(
            dimension_semantics=("parallel",)),
    )(x2, w1t, b1, w2t, b2, gamma2, beta2)
    return out.reshape(l, n, e)


# ------------------------------ decoder layer --------------------------------

def decoder_layer_forward(tgt, memory, kp, *, nhead, eps):
    # self-attn block (dropout1 = identity, eval mode)
    x1 = attention_block_pallas(tgt, tgt, kp['self_attn'],
                                kp['norm1_w'], kp['norm1_b'],
                                nhead=nhead, eps=eps)
    # cross-attn block (dropout2 = identity)
    x2 = attention_block_pallas(x1, memory, kp['cross_attn'],
                                kp['norm2_w'], kp['norm2_b'],
                                nhead=nhead, eps=eps)
    # feed-forward block (dropout / dropout3 = identity)
    x3 = ffn_block_pallas(x2, kp['lin1_wt'], kp['lin1_b'],
                          kp['lin2_wt'], kp['lin2_b'],
                          kp['norm3_w'], kp['norm3_b'], eps=eps)
    return x3


# -------------------------------- params -------------------------------------

def _uniform(key, shape, scale):
    return jax.random.uniform(key, shape, jnp.float32, -scale, scale)


def init_attn_params(key, d_model, ksize=3):
    """PyTorch-layout parameters (Conv1d (Cout,Cin,K), Linear (Dout,Din))."""
    ks = jax.random.split(key, 6)
    xav = (6.0 / (4.0 * d_model)) ** 0.5
    lin = (1.0 / d_model) ** 0.5
    cnv = (1.0 / (d_model * ksize)) ** 0.5
    return {
        'in_proj_w': _uniform(ks[0], (3 * d_model, d_model), xav),
        'in_proj_b': jnp.zeros((3 * d_model,), jnp.float32),
        'out_proj_w': _uniform(ks[1], (d_model, d_model), lin),
        'out_proj_b': jnp.zeros((d_model,), jnp.float32),
        'conv_q_w': _uniform(ks[2], (d_model, d_model, ksize), cnv),
        'conv_q_b': _uniform(ks[3], (d_model,), cnv),
        'conv_k_w': _uniform(ks[4], (d_model, d_model, ksize), cnv),
        'conv_k_b': _uniform(ks[5], (d_model,), cnv),
    }


def init_params(key, d_model, dim_ff):
    ks = jax.random.split(key, 6)
    return {
        'self_attn': init_attn_params(ks[0], d_model),
        'cross_attn': init_attn_params(ks[1], d_model),
        'lin1_w': _uniform(ks[2], (dim_ff, d_model), (1.0 / d_model) ** 0.5),
        'lin1_b': _uniform(ks[3], (dim_ff,), (1.0 / d_model) ** 0.5),
        'lin2_w': _uniform(ks[4], (d_model, dim_ff), (1.0 / dim_ff) ** 0.5),
        'lin2_b': _uniform(ks[5], (d_model,), (1.0 / dim_ff) ** 0.5),
        'norm1_w': jnp.ones((d_model,), jnp.float32),
        'norm1_b': jnp.zeros((d_model,), jnp.float32),
        'norm2_w': jnp.ones((d_model,), jnp.float32),
        'norm2_b': jnp.zeros((d_model,), jnp.float32),
        'norm3_w': jnp.ones((d_model,), jnp.float32),
        'norm3_b': jnp.zeros((d_model,), jnp.float32),
    }


def prepare_attn_params(p):
    """One-time conversion of PyTorch-layout weights to kernel layout."""
    e = p['out_proj_w'].shape[0]
    k = p['conv_q_w'].shape[-1]
    return {
        # Conv1d (Cout,Cin,K) -> unfolded (K*Cin, Cout), k-major.
        'conv_q_wu': jnp.transpose(p['conv_q_w'], (2, 1, 0)).reshape(k * e, e),
        'conv_q_b': p['conv_q_b'].reshape(1, e),
        'conv_k_wu': jnp.transpose(p['conv_k_w'], (2, 1, 0)).reshape(k * e, e),
        'conv_k_b': p['conv_k_b'].reshape(1, e),
        'in_proj_wt': jnp.transpose(p['in_proj_w']),        # (E, 3E)
        'in_proj_b': p['in_proj_b'].reshape(1, 3 * e),
        'out_proj_wt': jnp.transpose(p['out_proj_w']),      # (E, E)
        'out_proj_b': p['out_proj_b'].reshape(1, e),
    }


def prepare_params(params):
    e = params['norm1_w'].shape[0]
    return {
        'self_attn': prepare_attn_params(params['self_attn']),
        'cross_attn': prepare_attn_params(params['cross_attn']),
        'lin1_wt': jnp.transpose(params['lin1_w']),         # (E, Dff)
        'lin1_b': params['lin1_b'].reshape(1, -1),
        'lin2_wt': jnp.transpose(params['lin2_w']),         # (Dff, E)
        'lin2_b': params['lin2_b'].reshape(1, -1),
        'norm1_w': params['norm1_w'].reshape(1, e),
        'norm1_b': params['norm1_b'].reshape(1, e),
        'norm2_w': params['norm2_w'].reshape(1, e),
        'norm2_b': params['norm2_b'].reshape(1, e),
        'norm3_w': params['norm3_w'].reshape(1, e),
        'norm3_b': params['norm3_b'].reshape(1, e),
    }


# --------------------------------- main ---------------------------------------

if __name__ == "__main__":
    d_model, nhead, dim_ff = 32, 4, 64
    T = 8  # L == S == N (the reference forward's residual add & bmm require it)

    key = jax.random.PRNGKey(0)
    k_tgt, k_mem, k_par = jax.random.split(key, 3)
    tgt = jax.random.normal(k_tgt, (T, T, d_model), jnp.float32)     # (L, N, E)
    memory = jax.random.normal(k_mem, (T, T, d_model), jnp.float32)  # (S, N, E)

    params = init_params(k_par, d_model, dim_ff)       # PyTorch layout
    kparams = prepare_params(params)                   # pre-transposed ONCE

    fwd = jax.jit(functools.partial(decoder_layer_forward, nhead=nhead, eps=1e-5))
    out = fwd(tgt, memory, kparams)
    jax.block_until_ready(out)

    assert out.shape == (T, T, d_model)
    assert bool(jnp.all(jnp.isfinite(out)))
    print("KERNEL_OK")
</pallas_src>

<mosaic_0001>
module attributes {stable_mosaic.version = 11 : i64} {
  func.func @_attn_block_kernel(%arg0: i32, %arg1: memref<64x32xf32, #tpu.memory_space<vmem>>, %arg2: memref<64x32xf32, #tpu.memory_space<vmem>>, %arg3: memref<8x8x32xf32, #tpu.memory_space<vmem>>, %arg4: memref<96x32xf32, #tpu.memory_space<vmem>>, %arg5: memref<1x32xf32, #tpu.memory_space<vmem>>, %arg6: memref<96x32xf32, #tpu.memory_space<vmem>>, %arg7: memref<1x32xf32, #tpu.memory_space<vmem>>, %arg8: memref<32x96xf32, #tpu.memory_space<vmem>>, %arg9: memref<1x96xf32, #tpu.memory_space<vmem>>, %arg10: memref<32x32xf32, #tpu.memory_space<vmem>>, %arg11: memref<1x32xf32, #tpu.memory_space<vmem>>, %arg12: memref<1x32xf32, #tpu.memory_space<vmem>>, %arg13: memref<1x32xf32, #tpu.memory_space<vmem>>, %arg14: memref<8x8x32xf32, #tpu.memory_space<vmem>>) attributes {dimension_semantics = [#tpu.dimension_semantics<parallel>], iteration_bounds = array<i64: 1>, scalar_prefetch = 0 : i64, scratch_operands = 0 : i64, tpu.core_type = #tpu.core_type<tc>, window_params = [{transform_indices = @transform_0, window_bounds = array<i64: 64, 32>}, {transform_indices = @transform_1, window_bounds = array<i64: 64, 32>}, {transform_indices = @transform_2, window_bounds = array<i64: 8, 8, 32>}, {pipeline_mode = #tpu.pipeline_mode<synchronous>, transform_indices = @transform_3, window_bounds = array<i64: 96, 32>}, {pipeline_mode = #tpu.pipeline_mode<synchronous>, transform_indices = @transform_4, window_bounds = array<i64: 1, 32>}, {pipeline_mode = #tpu.pipeline_mode<synchronous>, transform_indices = @transform_5, window_bounds = array<i64: 96, 32>}, {pipeline_mode = #tpu.pipeline_mode<synchronous>, transform_indices = @transform_6, window_bounds = array<i64: 1, 32>}, {pipeline_mode = #tpu.pipeline_mode<synchronous>, transform_indices = @transform_7, window_bounds = array<i64: 32, 96>}, {pipeline_mode = #tpu.pipeline_mode<synchronous>, transform_indices = @transform_8, window_bounds = array<i64: 1, 96>}, {pipeline_mode = #tpu.pipeline_mode<synchronous>, transform_indices = @transform_9, window_bounds = array<i64: 32, 32>}, {pipeline_mode = #tpu.pipeline_mode<synchronous>, transform_indices = @transform_10, window_bounds = array<i64: 1, 32>}, {pipeline_mode = #tpu.pipeline_mode<synchronous>, transform_indices = @transform_11, window_bounds = array<i64: 1, 32>}, {pipeline_mode = #tpu.pipeline_mode<synchronous>, transform_indices = @transform_12, window_bounds = array<i64: 1, 32>}, {transform_indices = @transform_13, window_bounds = array<i64: 8, 8, 32>}]} {
    %c0 = arith.constant 0 : index
    %c0_0 = arith.constant 0 : index
    %0 = vector.load %arg1[%c0, %c0_0] : memref<64x32xf32, #tpu.memory_space<vmem>>, vector<64x32xf32>
    %c0_1 = arith.constant 0 : index
    %c0_2 = arith.constant 0 : index
    %1 = vector.load %arg2[%c0_1, %c0_2] : memref<64x32xf32, #tpu.memory_space<vmem>>, vector<64x32xf32>
    %2 = tpu.iota {dimensions = array<i32: 0>} : vector<64x32xi32>
    %c7_i32 = arith.constant 7 : i32
    %3 = vector.broadcast %c7_i32 : i32 to vector<64x32xi32>
    %4 = arith.andi %2, %3 : vector<64x32xi32>
    %cst = arith.constant 0.000000e+00 : f32
    %5 = vector.broadcast %cst : f32 to vector<2x32xf32>
    %6 = vector.extract_strided_slice %0 {offsets = [0, 0], sizes = [62, 32], strides = [1, 1]} : vector<64x32xf32> to vector<62x32xf32>
    %7 = tpu.concatenate %5, %6 in 0 : vector<2x32xf32>, vector<62x32xf32> -> vector<64x32xf32>
    %c2_i32 = arith.constant 2 : i32
    %8 = vector.broadcast %c2_i32 : i32 to vector<64x32xi32>
    %9 = arith.cmpi slt, %4, %8 : vector<64x32xi32>
    %cst_3 = arith.constant 0.000000e+00 : f32
    %10 = vector.broadcast %cst_3 : f32 to vector<64x32xf32>
    %11 = arith.select %9, %10, %7 : vector<64x32xi1>, vector<64x32xf32>
    %cst_4 = arith.constant 0.000000e+00 : f32
    %12 = vector.broadcast %cst_4 : f32 to vector<1x32xf32>
    %13 = vector.extract_strided_slice %0 {offsets = [0, 0], sizes = [63, 32], strides = [1, 1]} : vector<64x32xf32> to vector<63x32xf32>
    %14 = tpu.concatenate %12, %13 in 0 : vector<1x32xf32>, vector<63x32xf32> -> vector<64x32xf32>
    %c1_i32 = arith.constant 1 : i32
    %15 = vector.broadcast %c1_i32 : i32 to vector<64x32xi32>
    %16 = arith.cmpi slt, %4, %15 : vector<64x32xi32>
    %cst_5 = arith.constant 0.000000e+00 : f32
    %17 = vector.broadcast %cst_5 : f32 to vector<64x32xf32>
    %18 = arith.select %16, %17, %14 : vector<64x32xi1>, vector<64x32xf32>
    %19 = tpu.concatenate %11, %18, %0 in 1 : vector<64x32xf32>, vector<64x32xf32>, vector<64x32xf32> -> vector<64x96xf32>
    %c0_6 = arith.constant 0 : index
    %c0_7 = arith.constant 0 : index
    %20 = vector.load %arg4[%c0_6, %c0_7] : memref<96x32xf32, #tpu.memory_space<vmem>>, vector<96x32xf32>
    %cst_8 = arith.constant dense<0.000000e+00> : vector<64x32xf32>
    %21 = tpu.matmul %19, %20, %cst_8 {dimension_numbers = #tpu.dot_dimension_numbers<[1], [0], [0], [1], [0, 0, 1, 1], [], []>} : vector<64x96xf32>, vector<96x32xf32>, vector<64x32xf32> -> vector<64x32xf32>
    %c0_9 = arith.constant 0 : index
    %c0_10 = arith.constant 0 : index
    %22 = vector.load %arg5[%c0_9, %c0_10] : memref<1x32xf32, #tpu.memory_space<vmem>>, vector<1x32xf32>
    %23 = vector.broadcast %22 : vector<1x32xf32> to vector<64x32xf32>
    %24 = arith.addf %21, %23 : vector<64x32xf32>
    %cst_11 = arith.constant 0.000000e+00 : f32
    %25 = vector.broadcast %cst_11 : f32 to vector<2x32xf32>
    %26 = vector.extract_strided_slice %1 {offsets = [0, 0], sizes = [62, 32], strides = [1, 1]} : vector<64x32xf32> to vector<62x32xf32>
    %27 = tpu.concatenate %25, %26 in 0 : vector<2x32xf32>, vector<62x32xf32> -> vector<64x32xf32>
    %c2_i32_12 = arith.constant 2 : i32
    %28 = vector.broadcast %c2_i32_12 : i32 to vector<64x32xi32>
    %29 = arith.cmpi slt, %4, %28 : vector<64x32xi32>
    %cst_13 = arith.constant 0.000000e+00 : f32
    %30 = vector.broadcast %cst_13 : f32 to vector<64x32xf32>
    %31 = arith.select %29, %30, %27 : vector<64x32xi1>, vector<64x32xf32>
    %cst_14 = arith.constant 0.000000e+00 : f32
    %32 = vector.broadcast %cst_14 : f32 to vector<1x32xf32>
    %33 = vector.extract_strided_slice %1 {offsets = [0, 0], sizes = [63, 32], strides = [1, 1]} : vector<64x32xf32> to vector<63x32xf32>
    %34 = tpu.concatenate %32, %33 in 0 : vector<1x32xf32>, vector<63x32xf32> -> vector<64x32xf32>
    %c1_i32_15 = arith.constant 1 : i32
    %35 = vector.broadcast %c1_i32_15 : i32 to vector<64x32xi32>
    %36 = arith.cmpi slt, %4, %35 : vector<64x32xi32>
    %cst_16 = arith.constant 0.000000e+00 : f32
    %37 = vector.broadcast %cst_16 : f32 to vector<64x32xf32>
    %38 = arith.select %36, %37, %34 : vector<64x32xi1>, vector<64x32xf32>
    %39 = tpu.concatenate %31, %38, %1 in 1 : vector<64x32xf32>, vector<64x32xf32>, vector<64x32xf32> -> vector<64x96xf32>
    %c0_17 = arith.constant 0 : index
    %c0_18 = arith.constant 0 : index
    %40 = vector.load %arg6[%c0_17, %c0_18] : memref<96x32xf32, #tpu.memory_space<vmem>>, vector<96x32xf32>
    %cst_19 = arith.constant dense<0.000000e+00> : vector<64x32xf32>
    %41 = tpu.matmul %39, %40, %cst_19 {dimension_numbers = #tpu.dot_dimension_numbers<[1], [0], [0], [1], [0, 0, 1, 1], [], []>} : vector<64x96xf32>, vector<96x32xf32>, vector<64x32xf32> -> vector<64x32xf32>
    %c0_20 = arith.constant 0 : index
    %c0_21 = arith.constant 0 : index
    %42 = vector.load %arg7[%c0_20, %c0_21] : memref<1x32xf32, #tpu.memory_space<vmem>>, vector<1x32xf32>
    %43 = vector.broadcast %42 : vector<1x32xf32> to vector<64x32xf32>
    %44 = arith.addf %41, %43 : vector<64x32xf32>
    %c0_22 = arith.constant 0 : index
    %c0_23 = arith.constant 0 : index
    %45 = vector.load %arg8[%c0_22, %c0_23] : memref<32x96xf32, #tpu.memory_space<vmem>>, vector<32x96xf32>
    %c0_24 = arith.constant 0 : index
    %c0_25 = arith.constant 0 : index
    %46 = vector.load %arg9[%c0_24, %c0_25] : memref<1x96xf32, #tpu.memory_space<vmem>>, vector<1x96xf32>
    %47 = vector.extract_strided_slice %45 {offsets = [0, 0], sizes = [32, 32], strides = [1, 1]} : vector<32x96xf32> to vector<32x32xf32>
    %cst_26 = arith.constant dense<0.000000e+00> : vector<64x32xf32>
    %48 = tpu.matmul %24, %47, %cst_26 {dimension_numbers = #tpu.dot_dimension_numbers<[1], [0], [0], [1], [0, 0, 1, 1], [], []>} : vector<64x32xf32>, vector<32x32xf32>, vector<64x32xf32> -> vector<64x32xf32>
    %49 = vector.extract_strided_slice %46 {offsets = [0, 0], sizes = [1, 32], strides = [1, 1]} : vector<1x96xf32> to vector<1x32xf32>
    %50 = vector.broadcast %49 : vector<1x32xf32> to vector<64x32xf32>
    %51 = arith.addf %48, %50 : vector<64x32xf32>
    %52 = vector.extract_strided_slice %45 {offsets = [0, 32], sizes = [32, 32], strides = [1, 1]} : vector<32x96xf32> to vector<32x32xf32>
    %cst_27 = arith.constant dense<0.000000e+00> : vector<64x32xf32>
    %53 = tpu.matmul %44, %52, %cst_27 {dimension_numbers = #tpu.dot_dimension_numbers<[1], [0], [0], [1], [0, 0, 1, 1], [], []>} : vector<64x32xf32>, vector<32x32xf32>, vector<64x32xf32> -> vector<64x32xf32>
    %54 = vector.extract_strided_slice %46 {offsets = [0, 32], sizes = [1, 32], strides = [1, 1]} : vector<1x96xf32> to vector<1x32xf32>
    %55 = vector.broadcast %54 : vector<1x32xf32> to vector<64x32xf32>
    %56 = arith.addf %53, %55 : vector<64x32xf32>
    %57 = vector.extract_strided_slice %45 {offsets = [0, 64], sizes = [32, 32], strides = [1, 1]} : vector<32x96xf32> to vector<32x32xf32>
    %cst_28 = arith.constant dense<0.000000e+00> : vector<64x32xf32>
    %58 = tpu.matmul %1, %57, %cst_28 {dimension_numbers = #tpu.dot_dimension_numbers<[1], [0], [0], [1], [0, 0, 1, 1], [], []>} : vector<64x32xf32>, vector<32x32xf32>, vector<64x32xf32> -> vector<64x32xf32>
    %59 = vector.extract_strided_slice %46 {offsets = [0, 64], sizes = [1, 32], strides = [1, 1]} : vector<1x96xf32> to vector<1x32xf32>
    %60 = vector.broadcast %59 : vector<1x32xf32> to vector<64x32xf32>
    %61 = arith.addf %58, %60 : vector<64x32xf32>
    %62 = vector.extract_strided_slice %51 {offsets = [0, 0], sizes = [8, 32], strides = [1, 1]} : vector<64x32xf32> to vector<8x32xf32>
    %63 = vector.extract_strided_slice %56 {offsets = [0, 0], sizes = [8, 32], strides = [1, 1]} : vector<64x32xf32> to vector<8x32xf32>
    %64 = vector.extract_strided_slice %61 {offsets = [0, 0], sizes = [8, 32], strides = [1, 1]} : vector<64x32xf32> to vector<8x32xf32>
    %65 = vector.extract_strided_slice %62 {offsets = [0, 0], sizes = [8, 8], strides = [1, 1]} : vector<8x32xf32> to vector<8x8xf32>
    %cst_29 = arith.constant 0.353553385 : f32
    %66 = vector.broadcast %cst_29 : f32 to vector<8x8xf32>
    %67 = arith.mulf %65, %66 : vector<8x8xf32>
    %68 = vector.extract_strided_slice %63 {offsets = [0, 0], sizes = [8, 8], strides = [1, 1]} : vector<8x32xf32> to vector<8x8xf32>
    %69 = vector.extract_strided_slice %64 {offsets = [0, 0], sizes = [8, 8], strides = [1, 1]} : vector<8x32xf32> to vector<8x8xf32>
    %cst_30 = arith.constant dense<0.000000e+00> : vector<8x8xf32>
    %70 = tpu.matmul %67, %68, %cst_30 {dimension_numbers = #tpu.dot_dimension_numbers<[1], [1], [0], [0], [0, 0, 1, 0], [], []>} : vector<8x8xf32>, vector<8x8xf32>, vector<8x8xf32> -> vector<8x8xf32>
    %cst_31 = arith.constant dense<0xFF800000> : vector<8xf32>
    %71 = vector.multi_reduction <maximumf>, %70, %cst_31 [1] : vector<8x8xf32> to vector<8xf32>
    %72 = vector.shape_cast %71 : vector<8xf32> to vector<8x1xf32>
    %73 = vector.broadcast %72 : vector<8x1xf32> to vector<8x8xf32>
    %74 = arith.subf %70, %73 : vector<8x8xf32>
    %75 = math.exp %74 : vector<8x8xf32>
    %cst_32 = arith.constant dense<0.000000e+00> : vector<8xf32>
    %76 = vector.multi_reduction <add>, %75, %cst_32 [1] : vector<8x8xf32> to vector<8xf32>
    %77 = vector.shape_cast %76 : vector<8xf32> to vector<8x1xf32>
    %78 = vector.broadcast %77 : vector<8x1xf32> to vector<8x8xf32>
    %79 = arith.divf %75, %78 : vector<8x8xf32>
    %cst_33 = arith.constant dense<0.000000e+00> : vector<8x8xf32>
    %80 = tpu.matmul %79, %69, %cst_33 {dimension_numbers = #tpu.dot_dimension_numbers<[1], [0], [0], [1], [0, 0, 1, 1], [], []>} : vector<8x8xf32>, vector<8x8xf32>, vector<8x8xf32> -> vector<8x8xf32>
    %81 = vector.extract_strided_slice %62 {offsets = [0, 8], sizes = [8, 8], strides = [1, 1]} : vector<8x32xf32> to vector<8x8xf32>
    %cst_34 = arith.constant 0.353553385 : f32
    %82 = vector.broadcast %cst_34 : f32 to vector<8x8xf32>
    %83 = arith.mulf %81, %82 : vector<8x8xf32>
    %84 = vector.extract_strided_slice %63 {offsets = [0, 8], sizes = [8, 8], strides = [1, 1]} : vector<8x32xf32> to vector<8x8xf32>
    %85 = vector.extract_strided_slice %64 {offsets = [0, 8], sizes = [8, 8], strides = [1, 1]} : vector<8x32xf32> to vector<8x8xf32>
    %cst_35 = arith.constant dense<0.000000e+00> : vector<8x8xf32>
    %86 = tpu.matmul %83, %84, %cst_35 {dimension_numbers = #tpu.dot_dimension_numbers<[1], [1], [0], [0], [0, 0, 1, 0], [], []>} : vector<8x8xf32>, vector<8x8xf32>, vector<8x8xf32> -> vector<8x8xf32>
    %cst_36 = arith.constant dense<0xFF800000> : vector<8xf32>
    %87 = vector.multi_reduction <maximumf>, %86, %cst_36 [1] : vector<8x8xf32> to vector<8xf32>
    %88 = vector.shape_cast %87 : vector<8xf32> to vector<8x1xf32>
    %89 = vector.broadcast %88 : vector<8x1xf32> to vector<8x8xf32>
    %90 = arith.subf %86, %89 : vector<8x8xf32>
    %91 = math.exp %90 : vector<8x8xf32>
    %cst_37 = arith.constant dense<0.000000e+00> : vector<8xf32>
    %92 = vector.multi_reduction <add>, %91, %cst_37 [1] : vector<8x8xf32> to vector<8xf32>
    %93 = vector.shape_cast %92 : vector<8xf32> to vector<8x1xf32>
    %94 = vector.broadcast %93 : vector<8x1xf32> to vector<8x8xf32>
    %95 = arith.divf %91, %94 : vector<8x8xf32>
    %cst_38 = arith.constant dense<0.000000e+00> : vector<8x8xf32>
    %96 = tpu.matmul %95, %85, %cst_38 {dimension_numbers = #tpu.dot_dimension_numbers<[1], [0], [0], [1], [0, 0, 1, 1], [], []>} : vector<8x8xf32>, vector<8x8xf32>, vector<8x8xf32> -> vector<8x8xf32>
    %97 = vector.extract_strided_slice %62 {offsets = [0, 16], sizes = [8, 8], strides = [1, 1]} : vector<8x32xf32> to vector<8x8xf32>
    %cst_39 = arith.constant 0.353553385 : f32
    %98 = vector.broadcast %cst_39 : f32 to vector<8x8xf32>
    %99 = arith.mulf %97, %98 : vector<8x8xf32>
    %100 = vector.extract_strided_slice %63 {offsets = [0, 16], sizes = [8, 8], strides = [1, 1]} : vector<8x32xf32> to vector<8x8xf32>
    %101 = vector.extract_strided_slice %64 {offsets = [0, 16], sizes = [8, 8], strides = [1, 1]} : vector<8x32xf32> to vector<8x8xf32>
    %cst_40 = arith.constant dense<0.000000e+00> : vector<8x8xf32>
    %102 = tpu.matmul %99, %100, %cst_40 {dimension_numbers = #tpu.dot_dimension_numbers<[1], [1], [0], [0], [0, 0, 1, 0], [], []>} : vector<8x8xf32>, vector<8x8xf32>, vector<8x8xf32> -> vector<8x8xf32>
    %cst_41 = arith.constant dense<0xFF800000> : vector<8xf32>
    %103 = vector.multi_reduction <maximumf>, %102, %cst_41 [1] : vector<8x8xf32> to vector<8xf32>
    %104 = vector.shape_cast %103 : vector<8xf32> to vector<8x1xf32>
    %105 = vector.broadcast %104 : vector<8x1xf32> to vector<8x8xf32>
    %106 = arith.subf %102, %105 : vector<8x8xf32>
    %107 = math.exp %106 : vector<8x8xf32>
    %cst_42 = arith.constant dense<0.000000e+00> : vector<8xf32>
    %108 = vector.multi_reduction <add>, %107, %cst_42 [1] : vector<8x8xf32> to vector<8xf32>
    %109 = vector.shape_cast %108 : vector<8xf32> to vector<8x1xf32>
    %110 = vector.broadcast %109 : vector<8x1xf32> to vector<8x8xf32>
    %111 = arith.divf %107, %110 : vector<8x8xf32>
    %cst_43 = arith.constant dense<0.000000e+00> : vector<8x8xf32>
    %112 = tpu.matmul %111, %101, %cst_43 {dimension_numbers = #tpu.dot_dimension_numbers<[1], [0], [0], [1], [0, 0, 1, 1], [], []>} : vector<8x8xf32>, vector<8x8xf32>, vector<8x8xf32> -> vector<8x8xf32>
    %113 = vector.extract_strided_slice %62 {offsets = [0, 24], sizes = [8, 8], strides = [1, 1]} : vector<8x32xf32> to vector<8x8xf32>
    %cst_44 = arith.constant 0.353553385 : f32
    %114 = vector.broadcast %cst_44 : f32 to vector<8x8xf32>
    %115 = arith.mulf %113, %114 : vector<8x8xf32>
    %116 = vector.extract_strided_slice %63 {offsets = [0, 24], sizes = [8, 8], strides = [1, 1]} : vector<8x32xf32> to vector<8x8xf32>
    %117 = vector.extract_strided_slice %64 {offsets = [0, 24], sizes = [8, 8], strides = [1, 1]} : vector<8x32xf32> to vector<8x8xf32>
    %cst_45 = arith.constant dense<0.000000e+00> : vector<8x8xf32>
    %118 = tpu.matmul %115, %116, %cst_45 {dimension_numbers = #tpu.dot_dimension_numbers<[1], [1], [0], [0], [0, 0, 1, 0], [], []>} : vector<8x8xf32>, vector<8x8xf32>, vector<8x8xf32> -> vector<8x8xf32>
    %cst_46 = arith.constant dense<0xFF800000> : vector<8xf32>
    %119 = vector.multi_reduction <maximumf>, %118, %cst_46 [1] : vector<8x8xf32> to vector<8xf32>
    %120 = vector.shape_cast %119 : vector<8xf32> to vector<8x1xf32>
    %121 = vector.broadcast %120 : vector<8x1xf32> to vector<8x8xf32>
    %122 = arith.subf %118, %121 : vector<8x8xf32>
    %123 = math.exp %122 : vector<8x8xf32>
    %cst_47 = arith.constant dense<0.000000e+00> : vector<8xf32>
    %124 = vector.multi_reduction <add>, %123, %cst_47 [1] : vector<8x8xf32> to vector<8xf32>
    %125 = vector.shape_cast %124 : vector<8xf32> to vector<8x1xf32>
    %126 = vector.broadcast %125 : vector<8x1xf32> to vector<8x8xf32>
    %127 = arith.divf %123, %126 : vector<8x8xf32>
    %cst_48 = arith.constant dense<0.000000e+00> : vector<8x8xf32>
    %128 = tpu.matmul %127, %117, %cst_48 {dimension_numbers = #tpu.dot_dimension_numbers<[1], [0], [0], [1], [0, 0, 1, 1], [], []>} : vector<8x8xf32>, vector<8x8xf32>, vector<8x8xf32> -> vector<8x8xf32>
    %129 = tpu.concatenate %80, %96, %112, %128 in 1 : vector<8x8xf32>, vector<8x8xf32>, vector<8x8xf32>, vector<8x8xf32> -> vector<8x32xf32>
    %130 = vector.extract_strided_slice %51 {offsets = [8, 0], sizes = [8, 32], strides = [1, 1]} : vector<64x32xf32> to vector<8x32xf32>
    %131 = vector.extract_strided_slice %56 {offsets = [8, 0], sizes = [8, 32], strides = [1, 1]} : vector<64x32xf32> to vector<8x32xf32>
    %132 = vector.extract_strided_slice %61 {offsets = [8, 0], sizes = [8, 32], strides = [1, 1]} : vector<64x32xf32> to vector<8x32xf32>
    %133 = vector.extract_strided_slice %130 {offsets = [0, 0], sizes = [8, 8], strides = [1, 1]} : vector<8x32xf32> to vector<8x8xf32>
    %cst_49 = arith.constant 0.353553385 : f32
    %134 = vector.broadcast %cst_49 : f32 to vector<8x8xf32>
    %135 = arith.mulf %133, %134 : vector<8x8xf32>
    %136 = vector.extract_strided_slice %131 {offsets = [0, 0], sizes = [8, 8], strides = [1, 1]} : vector<8x32xf32> to vector<8x8xf32>
    %137 = vector.extract_strided_slice %132 {offsets = [0, 0], sizes = [8, 8], strides = [1, 1]} : vector<8x32xf32> to vector<8x8xf32>
    %cst_50 = arith.constant dense<0.000000e+00> : vector<8x8xf32>
    %138 = tpu.matmul %135, %136, %cst_50 {dimension_numbers = #tpu.dot_dimension_numbers<[1], [1], [0], [0], [0, 0, 1, 0], [], []>} : vector<8x8xf32>, vector<8x8xf32>, vector<8x8xf32> -> vector<8x8xf32>
    %cst_51 = arith.constant dense<0xFF800000> : vector<8xf32>
    %139 = vector.multi_reduction <maximumf>, %138, %cst_51 [1] : vector<8x8xf32> to vector<8xf32>
    %140 = vector.shape_cast %139 : vector<8xf32> to vector<8x1xf32>
    %141 = vector.broadcast %140 : vector<8x1xf32> to vector<8x8xf32>
    %142 = arith.subf %138, %141 : vector<8x8xf32>
    %143 = math.exp %142 : vector<8x8xf32>
    %cst_52 = arith.constant dense<0.000000e+00> : vector<8xf32>
    %144 = vector.multi_reduction <add>, %143, %cst_52 [1] : vector<8x8xf32> to vector<8xf32>
    %145 = vector.shape_cast %144 : vector<8xf32> to vector<8x1xf32>
    %146 = vector.broadcast %145 : vector<8x1xf32> to vector<8x8xf32>
    %147 = arith.divf %143, %146 : vector<8x8xf32>
    %cst_53 = arith.constant dense<0.000000e+00> : vector<8x8xf32>
    %148 = tpu.matmul %147, %137, %cst_53 {dimension_numbers = #tpu.dot_dimension_numbers<[1], [0], [0], [1], [0, 0, 1, 1], [], []>} : vector<8x8xf32>, vector<8x8xf32>, vector<8x8xf32> -> vector<8x8xf32>
    %149 = vector.extract_strided_slice %130 {offsets = [0, 8], sizes = [8, 8], strides = [1, 1]} : vector<8x32xf32> to vector<8x8xf32>
    %cst_54 = arith.constant 0.353553385 : f32
    %150 = vector.broadcast %cst_54 : f32 to vector<8x8xf32>
    %151 = arith.mulf %149, %150 : vector<8x8xf32>
    %152 = vector.extract_strided_slice %131 {offsets = [0, 8], sizes = [8, 8], strides = [1, 1]} : vector<8x32xf32> to vector<8x8xf32>
    %153 = vector.extract_strided_slice %132 {offsets = [0, 8], sizes = [8, 8], strides = [1, 1]} : vector<8x32xf32> to vector<8x8xf32>
    %cst_55 = arith.constant dense<0.000000e+00> : vector<8x8xf32>
    %154 = tpu.matmul %151, %152, %cst_55 {dimension_numbers = #tpu.dot_dimension_numbers<[1], [1], [0], [0], [0, 0, 1, 0], [], []>} : vector<8x8xf32>, vector<8x8xf32>, vector<8x8xf32> -> vector<8x8xf32>
    %cst_56 = arith.constant dense<0xFF800000> : vector<8xf32>
    %155 = vector.multi_reduction <maximumf>, %154, %cst_56 [1] : vector<8x8xf32> to vector<8xf32>
    %156 = vector.shape_cast %155 : vector<8xf32> to vector<8x1xf32>
    %157 = vector.broadcast %156 : vector<8x1xf32> to vector<8x8xf32>
    %158 = arith.subf %154, %157 : vector<8x8xf32>
    %159 = math.exp %158 : vector<8x8xf32>
    %cst_57 = arith.constant dense<0.000000e+00> : vector<8xf32>
    %160 = vector.multi_reduction <add>, %159, %cst_57 [1] : vector<8x8xf32> to vector<8xf32>
    %161 = vector.shape_cast %160 : vector<8xf32> to vector<8x1xf32>
    %162 = vector.broadcast %161 : vector<8x1xf32> to vector<8x8xf32>
    %163 = arith.divf %159, %162 : vector<8x8xf32>
    %cst_58 = arith.constant dense<0.000000e+00> : vector<8x8xf32>
    %164 = tpu.matmul %163, %153, %cst_58 {dimension_numbers = #tpu.dot_dimension_numbers<[1], [0], [0], [1], [0, 0, 1, 1], [], []>} : vector<8x8xf32>, vector<8x8xf32>, vector<8x8xf32> -> vector<8x8xf32>
    %165 = vector.extract_strided_slice %130 {offsets = [0, 16], sizes = [8, 8], strides = [1, 1]} : vector<8x32xf32> to vector<8x8xf32>
    %cst_59 = arith.constant 0.353553385 : f32
    %166 = vector.broadcast %cst_59 : f32 to vector<8x8xf32>
    %167 = arith.mulf %165, %166 : vector<8x8xf32>
    %168 = vector.extract_strided_slice %131 {offsets = [0, 16], sizes = [8, 8], strides = [1, 1]} : vector<8x32xf32> to vector<8x8xf32>
    %169 = vector.extract_strided_slice %132 {offsets = [0, 16], sizes = [8, 8], strides = [1, 1]} : vector<8x32xf32> to vector<8x8xf32>
    %cst_60 = arith.constant dense<0.000000e+00> : vector<8x8xf32>
    %170 = tpu.matmul %167, %168, %cst_60 {dimension_numbers = #tpu.dot_dimension_numbers<[1], [1], [0], [0], [0, 0, 1, 0], [], []>} : vector<8x8xf32>, vector<8x8xf32>, vector<8x8xf32> -> vector<8x8xf32>
    %cst_61 = arith.constant dense<0xFF800000> : vector<8xf32>
    %171 = vector.multi_reduction <maximumf>, %170, %cst_61 [1] : vector<8x8xf32> to vector<8xf32>
    %172 = vector.shape_cast %171 : vector<8xf32> to vector<8x1xf32>
    %173 = vector.broadcast %172 : vector<8x1xf32> to vector<8x8xf32>
    %174 = arith.subf %170, %173 : vector<8x8xf32>
    %175 = math.exp %174 : vector<8x8xf32>
    %cst_62 = arith.constant dense<0.000000e+00> : vector<8xf32>
    %176 = vector.multi_reduction <add>, %175, %cst_62 [1] : vector<8x8xf32> to vector<8xf32>
    %177 = vector.shape_cast %176 : vector<8xf32> to vector<8x1xf32>
    %178 = vector.broadcast %177 : vector<8x1xf32> to vector<8x8xf32>
    %179 = arith.divf %175, %178 : vector<8x8xf32>
    %cst_63 = arith.constant dense<0.000000e+00> : vector<8x8xf32>
    %180 = tpu.matmul %179, %169, %cst_63 {dimension_numbers = #tpu.dot_dimension_numbers<[1], [0], [0], [1], [0, 0, 1, 1], [], []>} : vector<8x8xf32>, vector<8x8xf32>, vector<8x8xf32> -> vector<8x8xf32>
    %181 = vector.extract_strided_slice %130 {offsets = [0, 24], sizes = [8, 8], strides = [1, 1]} : vector<8x32xf32> to vector<8x8xf32>
    %cst_64 = arith.constant 0.353553385 : f32
    %182 = vector.broadcast %cst_64 : f32 to vector<8x8xf32>
    %183 = arith.mulf %181, %182 : vector<8x8xf32>
    %184 = vector.extract_strided_slice %131 {offsets = [0, 24], sizes = [8, 8], strides = [1, 1]} : vector<8x32xf32> to vector<8x8xf32>
    %185 = vector.extract_strided_slice %132 {offsets = [0, 24], sizes = [8, 8], strides = [1, 1]} : vector<8x32xf32> to vector<8x8xf32>
    %cst_65 = arith.constant dense<0.000000e+00> : vector<8x8xf32>
    %186 = tpu.matmul %183, %184, %cst_65 {dimension_numbers = #tpu.dot_dimension_numbers<[1], [1], [0], [0], [0, 0, 1, 0], [], []>} : vector<8x8xf32>, vector<8x8xf32>, vector<8x8xf32> -> vector<8x8xf32>
    %cst_66 = arith.constant dense<0xFF800000> : vector<8xf32>
    %187 = vector.multi_reduction <maximumf>, %186, %cst_66 [1] : vector<8x8xf32> to vector<8xf32>
    %188 = vector.shape_cast %187 : vector<8xf32> to vector<8x1xf32>
    %189 = vector.broadcast %188 : vector<8x1xf32> to vector<8x8xf32>
    %190 = arith.subf %186, %189 : vector<8x8xf32>
    %191 = math.exp %190 : vector<8x8xf32>
    %cst_67 = arith.constant dense<0.000000e+00> : vector<8xf32>
    %192 = vector.multi_reduction <add>, %191, %cst_67 [1] : vector<8x8xf32> to vector<8xf32>
    %193 = vector.shape_cast %192 : vector<8xf32> to vector<8x1xf32>
    %194 = vector.broadcast %193 : vector<8x1xf32> to vector<8x8xf32>
    %195 = arith.divf %191, %194 : vector<8x8xf32>
    %cst_68 = arith.constant dense<0.000000e+00> : vector<8x8xf32>
    %196 = tpu.matmul %195, %185, %cst_68 {dimension_numbers = #tpu.dot_dimension_numbers<[1], [0], [0], [1], [0, 0, 1, 1], [], []>} : vector<8x8xf32>, vector<8x8xf32>, vector<8x8xf32> -> vector<8x8xf32>
    %197 = tpu.concatenate %148, %164, %180, %196 in 1 : vector<8x8xf32>, vector<8x8xf32>, vector<8x8xf32>, vector<8x8xf32> -> vector<8x32xf32>
    %198 = vector.extract_strided_slice %51 {offsets = [16, 0], sizes = [8, 32], strides = [1, 1]} : vector<64x32xf32> to vector<8x32xf32>
    %199 = vector.extract_strided_slice %56 {offsets = [16, 0], sizes = [8, 32], strides = [1, 1]} : vector<64x32xf32> to vector<8x32xf32>
    %200 = vector.extract_strided_slice %61 {offsets = [16, 0], sizes = [8, 32], strides = [1, 1]} : vector<64x32xf32> to vector<8x32xf32>
    %201 = vector.extract_strided_slice %198 {offsets = [0, 0], sizes = [8, 8], strides = [1, 1]} : vector<8x32xf32> to vector<8x8xf32>
    %cst_69 = arith.constant 0.353553385 : f32
    %202 = vector.broadcast %cst_69 : f32 to vector<8x8xf32>
    %203 = arith.mulf %201, %202 : vector<8x8xf32>
    %204 = vector.extract_strided_slice %199 {offsets = [0, 0], sizes = [8, 8], strides = [1, 1]} : vector<8x32xf32> to vector<8x8xf32>
    %205 = vector.extract_strided_slice %200 {offsets = [0, 0], sizes = [8, 8], strides = [1, 1]} : vector<8x32xf32> to vector<8x8xf32>
    %cst_70 = arith.constant dense<0.000000e+00> : vector<8x8xf32>
    %206 = tpu.matmul %203, %204, %cst_70 {dimension_numbers = #tpu.dot_dimension_numbers<[1], [1], [0], [0], [0, 0, 1, 0], [], []>} : vector<8x8xf32>, vector<8x8xf32>, vector<8x8xf32> -> vector<8x8xf32>
    %cst_71 = arith.constant dense<0xFF800000> : vector<8xf32>
    %207 = vector.multi_reduction <maximumf>, %206, %cst_71 [1] : vector<8x8xf32> to vector<8xf32>
    %208 = vector.shape_cast %207 : vector<8xf32> to vector<8x1xf32>
    %209 = vector.broadcast %208 : vector<8x1xf32> to vector<8x8xf32>
    %210 = arith.subf %206, %209 : vector<8x8xf32>
    %211 = math.exp %210 : vector<8x8xf32>
    %cst_72 = arith.constant dense<0.000000e+00> : vector<8xf32>
    %212 = vector.multi_reduction <add>, %211, %cst_72 [1] : vector<8x8xf32> to vector<8xf32>
    %213 = vector.shape_cast %212 : vector<8xf32> to vector<8x1xf32>
    %214 = vector.broadcast %213 : vector<8x1xf32> to vector<8x8xf32>
    %215 = arith.divf %211, %214 : vector<8x8xf32>
    %cst_73 = arith.constant dense<0.000000e+00> : vector<8x8xf32>
    %216 = tpu.matmul %215, %205, %cst_73 {dimension_numbers = #tpu.dot_dimension_numbers<[1], [0], [0], [1], [0, 0, 1, 1], [], []>} : vector<8x8xf32>, vector<8x8xf32>, vector<8x8xf32> -> vector<8x8xf32>
    %217 = vector.extract_strided_slice %198 {offsets = [0, 8], sizes = [8, 8], strides = [1, 1]} : vector<8x32xf32> to vector<8x8xf32>
    %cst_74 = arith.constant 0.353553385 : f32
    %218 = vector.broadcast %cst_74 : f32 to vector<8x8xf32>
    %219 = arith.mulf %217, %218 : vector<8x8xf32>
    %220 = vector.extract_strided_slice %199 {offsets = [0, 8], sizes = [8, 8], strides = [1, 1]} : vector<8x32xf32> to vector<8x8xf32>
    %221 = vector.extract_strided_slice %200 {offsets = [0, 8], sizes = [8, 8], strides = [1, 1]} : vector<8x32xf32> to vector<8x8xf32>
    %cst_75 = arith.constant dense<0.000000e+00> : vector<8x8xf32>
    %222 = tpu.matmul %219, %220, %cst_75 {dimension_numbers = #tpu.dot_dimension_numbers<[1], [1], [0], [0], [0, 0, 1, 0], [], []>} : vector<8x8xf32>, vector<8x8xf32>, vector<8x8xf32> -> vector<8x8xf32>
    %cst_76 = arith.constant dense<0xFF800000> : vector<8xf32>
    %223 = vector.multi_reduction <maximumf>, %222, %cst_76 [1] : vector<8x8xf32> to vector<8xf32>
    %224 = vector.shape_cast %223 : vector<8xf32> to vector<8x1xf32>
    %225 = vector.broadcast %224 : vector<8x1xf32> to vector<8x8xf32>
    %226 = arith.subf %222, %225 : vector<8x8xf32>
    %227 = math.exp %226 : vector<8x8xf32>
    %cst_77 = arith.constant dense<0.000000e+00> : vector<8xf32>
    %228 = vector.multi_reduction <add>, %227, %cst_77 [1] : vector<8x8xf32> to vector<8xf32>
    %229 = vector.shape_cast %228 : vector<8xf32> to vector<8x1xf32>
    %230 = vector.broadcast %229 : vector<8x1xf32> to vector<8x8xf32>
    %231 = arith.divf %227, %230 : vector<8x8xf32>
    %cst_78 = arith.constant dense<0.000000e+00> : vector<8x8xf32>
    %232 = tpu.matmul %231, %221, %cst_78 {dimension_numbers = #tpu.dot_dimension_numbers<[1], [0], [0], [1], [0, 0, 1, 1], [], []>} : vector<8x8xf32>, vector<8x8xf32>, vector<8x8xf32> -> vector<8x8xf32>
    %233 = vector.extract_strided_slice %198 {offsets = [0, 16], sizes = [8, 8], strides = [1, 1]} : vector<8x32xf32> to vector<8x8xf32>
    %cst_79 = arith.constant 0.353553385 : f32
    %234 = vector.broadcast %cst_79 : f32 to vector<8x8xf32>
    %235 = arith.mulf %233, %234 : vector<8x8xf32>
    %236 = vector.extract_strided_slice %199 {offsets = [0, 16], sizes = [8, 8], strides = [1, 1]} : vector<8x32xf32> to vector<8x8xf32>
    %237 = vector.extract_strided_slice %200 {offsets = [0, 16], sizes = [8, 8], strides = [1, 1]} : vector<8x32xf32> to vector<8x8xf32>
    %cst_80 = arith.constant dense<0.000000e+00> : vector<8x8xf32>
    %238 = tpu.matmul %235, %236, %cst_80 {dimension_numbers = #tpu.dot_dimension_numbers<[1], [1], [0], [0], [0, 0, 1, 0], [], []>} : vector<8x8xf32>, vector<8x8xf32>, vector<8x8xf32> -> vector<8x8xf32>
    %cst_81 = arith.constant dense<0xFF800000> : vector<8xf32>
    %239 = vector.multi_reduction <maximumf>, %238, %cst_81 [1] : vector<8x8xf32> to vector<8xf32>
    %240 = vector.shape_cast %239 : vector<8xf32> to vector<8x1xf32>
    %241 = vector.broadcast %240 : vector<8x1xf32> to vector<8x8xf32>
    %242 = arith.subf %238, %241 : vector<8x8xf32>
    %243 = math.exp %242 : vector<8x8xf32>
    %cst_82 = arith.constant dense<0.000000e+00> : vector<8xf32>
    %244 = vector.multi_reduction <add>, %243, %cst_82 [1] : vector<8x8xf32> to vector<8xf32>
    %245 = vector.shape_cast %244 : vector<8xf32> to vector<8x1xf32>
    %246 = vector.broadcast %245 : vector<8x1xf32> to vector<8x8xf32>
    %247 = arith.divf %243, %246 : vector<8x8xf32>
    %cst_83 = arith.constant dense<0.000000e+00> : vector<8x8xf32>
    %248 = tpu.matmul %247, %237, %cst_83 {dimension_numbers = #tpu.dot_dimension_numbers<[1], [0], [0], [1], [0, 0, 1, 1], [], []>} : vector<8x8xf32>, vector<8x8xf32>, vector<8x8xf32> -> vector<8x8xf32>
    %249 = vector.extract_strided_slice %198 {offsets = [0, 24], sizes = [8, 8], strides = [1, 1]} : vector<8x32xf32> to vector<8x8xf32>
    %cst_84 = arith.constant 0.353553385 : f32
    %250 = vector.broadcast %cst_84 : f32 to vector<8x8xf32>
    %251 = arith.mulf %249, %250 : vector<8x8xf32>
    %252 = vector.extract_strided_slice %199 {offsets = [0, 24], sizes = [8, 8], strides = [1, 1]} : vector<8x32xf32> to vector<8x8xf32>
    %253 = vector.extract_strided_slice %200 {offsets = [0, 24], sizes = [8, 8], strides = [1, 1]} : vector<8x32xf32> to vector<8x8xf32>
    %cst_85 = arith.constant dense<0.000000e+00> : vector<8x8xf32>
    %254 = tpu.matmul %251, %252, %cst_85 {dimension_numbers = #tpu.dot_dimension_numbers<[1], [1], [0], [0], [0, 0, 1, 0], [], []>} : vector<8x8xf32>, vector<8x8xf32>, vector<8x8xf32> -> vector<8x8xf32>
    %cst_86 = arith.constant dense<0xFF800000> : vector<8xf32>
    %255 = vector.multi_reduction <maximumf>, %254, %cst_86 [1] : vector<8x8xf32> to vector<8xf32>
    %256 = vector.shape_cast %255 : vector<8xf32> to vector<8x1xf32>
    %257 = vector.broadcast %256 : vector<8x1xf32> to vector<8x8xf32>
    %258 = arith.subf %254, %257 : vector<8x8xf32>
    %259 = math.exp %258 : vector<8x8xf32>
    %cst_87 = arith.constant dense<0.000000e+00> : vector<8xf32>
    %260 = vector.multi_reduction <add>, %259, %cst_87 [1] : vector<8x8xf32> to vector<8xf32>
    %261 = vector.shape_cast %260 : vector<8xf32> to vector<8x1xf32>
    %262 = vector.broadcast %261 : vector<8x1xf32> to vector<8x8xf32>
    %263 = arith.divf %259, %262 : vector<8x8xf32>
    %cst_88 = arith.constant dense<0.000000e+00> : vector<8x8xf32>
    %264 = tpu.matmul %263, %253, %cst_88 {dimension_numbers = #tpu.dot_dimension_numbers<[1], [0], [0], [1], [0, 0, 1, 1], [], []>} : vector<8x8xf32>, vector<8x8xf32>, vector<8x8xf32> -> vector<8x8xf32>
    %265 = tpu.concatenate %216, %232, %248, %264 in 1 : vector<8x8xf32>, vector<8x8xf32>, vector<8x8xf32>, vector<8x8xf32> -> vector<8x32xf32>
    %266 = vector.extract_strided_slice %51 {offsets = [24, 0], sizes = [8, 32], strides = [1, 1]} : vector<64x32xf32> to vector<8x32xf32>
    %267 = vector.extract_strided_slice %56 {offsets = [24, 0], sizes = [8, 32], strides = [1, 1]} : vector<64x32xf32> to vector<8x32xf32>
    %268 = vector.extract_strided_slice %61 {offsets = [24, 0], sizes = [8, 32], strides = [1, 1]} : vector<64x32xf32> to vector<8x32xf32>
    %269 = vector.extract_strided_slice %266 {offsets = [0, 0], sizes = [8, 8], strides = [1, 1]} : vector<8x32xf32> to vector<8x8xf32>
    %cst_89 = arith.constant 0.353553385 : f32
    %270 = vector.broadcast %cst_89 : f32 to vector<8x8xf32>
    %271 = arith.mulf %269, %270 : vector<8x8xf32>
    %272 = vector.extract_strided_slice %267 {offsets = [0, 0], sizes = [8, 8], strides = [1, 1]} : vector<8x32xf32> to vector<8x8xf32>
    %273 = vector.extract_strided_slice %268 {offsets = [0, 0], sizes = [8, 8], strides = [1, 1]} : vector<8x32xf32> to vector<8x8xf32>
    %cst_90 = arith.constant dense<0.000000e+00> : vector<8x8xf32>
    %274 = tpu.matmul %271, %272, %cst_90 {dimension_numbers = #tpu.dot_dimension_numbers<[1], [1], [0], [0], [0, 0, 1, 0], [], []>} : vector<8x8xf32>, vector<8x8xf32>, vector<8x8xf32> -> vector<8x8xf32>
    %cst_91 = arith.constant dense<0xFF800000> : vector<8xf32>
    %275 = vector.multi_reduction <maximumf>, %274, %cst_91 [1] : vector<8x8xf32> to vector<8xf32>
    %276 = vector.shape_cast %275 : vector<8xf32> to vector<8x1xf32>
    %277 = vector.broadcast %276 : vector<8x1xf32> to vector<8x8xf32>
    %278 = arith.subf %274, %277 : vector<8x8xf32>
    %279 = math.exp %278 : vector<8x8xf32>
    %cst_92 = arith.constant dense<0.000000e+00> : vector<8xf32>
    %280 = vector.multi_reduction <add>, %279, %cst_92 [1] : vector<8x8xf32> to vector<8xf32>
    %281 = vector.shape_cast %280 : vector<8xf32> to vector<8x1xf32>
    %282 = vector.broadcast %281 : vector<8x1xf32> to vector<8x8xf32>
    %283 = arith.divf %279, %282 : vector<8x8xf32>
    %cst_93 = arith.constant dense<0.000000e+00> : vector<8x8xf32>
    %284 = tpu.matmul %283, %273, %cst_93 {dimension_numbers = #tpu.dot_dimension_numbers<[1], [0], [0], [1], [0, 0, 1, 1], [], []>} : vector<8x8xf32>, vector<8x8xf32>, vector<8x8xf32> -> vector<8x8xf32>
    %285 = vector.extract_strided_slice %266 {offsets = [0, 8], sizes = [8, 8], strides = [1, 1]} : vector<8x32xf32> to vector<8x8xf32>
    %cst_94 = arith.constant 0.353553385 : f32
    %286 = vector.broadcast %cst_94 : f32 to vector<8x8xf32>
    %287 = arith.mulf %285, %286 : vector<8x8xf32>
    %288 = vector.extract_strided_slice %267 {offsets = [0, 8], sizes = [8, 8], strides = [1, 1]} : vector<8x32xf32> to vector<8x8xf32>
    %289 = vector.extract_strided_slice %268 {offsets = [0, 8], sizes = [8, 8], strides = [1, 1]} : vector<8x32xf32> to vector<8x8xf32>
    %cst_95 = arith.constant dense<0.000000e+00> : vector<8x8xf32>
    %290 = tpu.matmul %287, %288, %cst_95 {dimension_numbers = #tpu.dot_dimension_numbers<[1], [1], [0], [0], [0, 0, 1, 0], [], []>} : vector<8x8xf32>, vector<8x8xf32>, vector<8x8xf32> -> vector<8x8xf32>
    %cst_96 = arith.constant dense<0xFF800000> : vector<8xf32>
    %291 = vector.multi_reduction <maximumf>, %290, %cst_96 [1] : vector<8x8xf32> to vector<8xf32>
    %292 = vector.shape_cast %291 : vector<8xf32> to vector<8x1xf32>
    %293 = vector.broadcast %292 : vector<8x1xf32> to vector<8x8xf32>
    %294 = arith.subf %290, %293 : vector<8x8xf32>
    %295 = math.exp %294 : vector<8x8xf32>
    %cst_97 = arith.constant dense<0.000000e+00> : vector<8xf32>
    %296 = vector.multi_reduction <add>, %295, %cst_97 [1] : vector<8x8xf32> to vector<8xf32>
    %297 = vector.shape_cast %296 : vector<8xf32> to vector<8x1xf32>
    %298 = vector.broadcast %297 : vector<8x1xf32> to vector<8x8xf32>
    %299 = arith.divf %295, %298 : vector<8x8xf32>
    %cst_98 = arith.constant dense<0.000000e+00> : vector<8x8xf32>
    %300 = tpu.matmul %299, %289, %cst_98 {dimension_numbers = #tpu.dot_dimension_numbers<[1], [0], [0], [1], [0, 0, 1, 1], [], []>} : vector<8x8xf32>, vector<8x8xf32>, vector<8x8xf32> -> vector<8x8xf32>
    %301 = vector.extract_strided_slice %266 {offsets = [0, 16], sizes = [8, 8], strides = [1, 1]} : vector<8x32xf32> to vector<8x8xf32>
    %cst_99 = arith.constant 0.353553385 : f32
    %302 = vector.broadcast %cst_99 : f32 to vector<8x8xf32>
    %303 = arith.mulf %301, %302 : vector<8x8xf32>
    %304 = vector.extract_strided_slice %267 {offsets = [0, 16], sizes = [8, 8], strides = [1, 1]} : vector<8x32xf32> to vector<8x8xf32>
    %305 = vector.extract_strided_slice %268 {offsets = [0, 16], sizes = [8, 8], strides = [1, 1]} : vector<8x32xf32> to vector<8x8xf32>
    %cst_100 = arith.constant dense<0.000000e+00> : vector<8x8xf32>
    %306 = tpu.matmul %303, %304, %cst_100 {dimension_numbers = #tpu.dot_dimension_numbers<[1], [1], [0], [0], [0, 0, 1, 0], [], []>} : vector<8x8xf32>, vector<8x8xf32>, vector<8x8xf32> -> vector<8x8xf32>
    %cst_101 = arith.constant dense<0xFF800000> : vector<8xf32>
    %307 = vector.multi_reduction <maximumf>, %306, %cst_101 [1] : vector<8x8xf32> to vector<8xf32>
    %308 = vector.shape_cast %307 : vector<8xf32> to vector<8x1xf32>
    %309 = vector.broadcast %308 : vector<8x1xf32> to vector<8x8xf32>
    %310 = arith.subf %306, %309 : vector<8x8xf32>
    %311 = math.exp %310 : vector<8x8xf32>
    %cst_102 = arith.constant dense<0.000000e+00> : vector<8xf32>
    %312 = vector.multi_reduction <add>, %311, %cst_102 [1] : vector<8x8xf32> to vector<8xf32>
    %313 = vector.shape_cast %312 : vector<8xf32> to vector<8x1xf32>
    %314 = vector.broadcast %313 : vector<8x1xf32> to vector<8x8xf32>
    %315 = arith.divf %311, %314 : vector<8x8xf32>
    %cst_103 = arith.constant dense<0.000000e+00> : vector<8x8xf32>
    %316 = tpu.matmul %315, %305, %cst_103 {dimension_numbers = #tpu.dot_dimension_numbers<[1], [0], [0], [1], [0, 0, 1, 1], [], []>} : vector<8x8xf32>, vector<8x8xf32>, vector<8x8xf32> -> vector<8x8xf32>
    %317 = vector.extract_strided_slice %266 {offsets = [0, 24], sizes = [8, 8], strides = [1, 1]} : vector<8x32xf32> to vector<8x8xf32>
    %cst_104 = arith.constant 0.353553385 : f32
    %318 = vector.broadcast %cst_104 : f32 to vector<8x8xf32>
    %319 = arith.mulf %317, %318 : vector<8x8xf32>
    %320 = vector.extract_strided_slice %267 {offsets = [0, 24], sizes = [8, 8], strides = [1, 1]} : vector<8x32xf32> to vector<8x8xf32>
    %321 = vector.extract_strided_slice %268 {offsets = [0, 24], sizes = [8, 8], strides = [1, 1]} : vector<8x32xf32> to vector<8x8xf32>
    %cst_105 = arith.constant dense<0.000000e+00> : vector<8x8xf32>
    %322 = tpu.matmul %319, %320, %cst_105 {dimension_numbers = #tpu.dot_dimension_numbers<[1], [1], [0], [0], [0, 0, 1, 0], [], []>} : vector<8x8xf32>, vector<8x8xf32>, vector<8x8xf32> -> vector<8x8xf32>
    %cst_106 = arith.constant dense<0xFF800000> : vector<8xf32>
    %323 = vector.multi_reduction <maximumf>, %322, %cst_106 [1] : vector<8x8xf32> to vector<8xf32>
    %324 = vector.shape_cast %323 : vector<8xf32> to vector<8x1xf32>
    %325 = vector.broadcast %324 : vector<8x1xf32> to vector<8x8xf32>
    %326 = arith.subf %322, %325 : vector<8x8xf32>
    %327 = math.exp %326 : vector<8x8xf32>
    %cst_107 = arith.constant dense<0.000000e+00> : vector<8xf32>
    %328 = vector.multi_reduction <add>, %327, %cst_107 [1] : vector<8x8xf32> to vector<8xf32>
    %329 = vector.shape_cast %328 : vector<8xf32> to vector<8x1xf32>
    %330 = vector.broadcast %329 : vector<8x1xf32> to vector<8x8xf32>
    %331 = arith.divf %327, %330 : vector<8x8xf32>
    %cst_108 = arith.constant dense<0.000000e+00> : vector<8x8xf32>
    %332 = tpu.matmul %331, %321, %cst_108 {dimension_numbers = #tpu.dot_dimension_numbers<[1], [0], [0], [1], [0, 0, 1, 1], [], []>} : vector<8x8xf32>, vector<8x8xf32>, vector<8x8xf32> -> vector<8x8xf32>
    %333 = tpu.concatenate %284, %300, %316, %332 in 1 : vector<8x8xf32>, vector<8x8xf32>, vector<8x8xf32>, vector<8x8xf32> -> vector<8x32xf32>
    %334 = vector.extract_strided_slice %51 {offsets = [32, 0], sizes = [8, 32], strides = [1, 1]} : vector<64x32xf32> to vector<8x32xf32>
    %335 = vector.extract_strided_slice %56 {offsets = [32, 0], sizes = [8, 32], strides = [1, 1]} : vector<64x32xf32> to vector<8x32xf32>
    %336 = vector.extract_strided_slice %61 {offsets = [32, 0], sizes = [8, 32], strides = [1, 1]} : vector<64x32xf32> to vector<8x32xf32>
    %337 = vector.extract_strided_slice %334 {offsets = [0, 0], sizes = [8, 8], strides = [1, 1]} : vector<8x32xf32> to vector<8x8xf32>
    %cst_109 = arith.constant 0.353553385 : f32
    %338 = vector.broadcast %cst_109 : f32 to vector<8x8xf32>
    %339 = arith.mulf %337, %338 : vector<8x8xf32>
    %340 = vector.extract_strided_slice %335 {offsets = [0, 0], sizes = [8, 8], strides = [1, 1]} : vector<8x32xf32> to vector<8x8xf32>
    %341 = vector.extract_strided_slice %336 {offsets = [0, 0], sizes = [8, 8], strides = [1, 1]} : vector<8x32xf32> to vector<8x8xf32>
    %cst_110 = arith.constant dense<0.000000e+00> : vector<8x8xf32>
    %342 = tpu.matmul %339, %340, %cst_110 {dimension_numbers = #tpu.dot_dimension_numbers<[1], [1], [0], [0], [0, 0, 1, 0], [], []>} : vector<8x8xf32>, vector<8x8xf32>, vector<8x8xf32> -> vector<8x8xf32>
    %cst_111 = arith.constant dense<0xFF800000> : vector<8xf32>
    %343 = vector.multi_reduction <maximumf>, %342, %cst_111 [1] : vector<8x8xf32> to vector<8xf32>
    %344 = vector.shape_cast %343 : vector<8xf32> to vector<8x1xf32>
    %345 = vector.broadcast %344 : vector<8x1xf32> to vector<8x8xf32>
    %346 = arith.subf %342, %345 : vector<8x8xf32>
    %347 = math.exp %346 : vector<8x8xf32>
    %cst_112 = arith.constant dense<0.000000e+00> : vector<8xf32>
    %348 = vector.multi_reduction <add>, %347, %cst_112 [1] : vector<8x8xf32> to vector<8xf32>
    %349 = vector.shape_cast %348 : vector<8xf32> to vector<8x1xf32>
    %350 = vector.broadcast %349 : vector<8x1xf32> to vector<8x8xf32>
    %351 = arith.divf %347, %350 : vector<8x8xf32>
    %cst_113 = arith.constant dense<0.000000e+00> : vector<8x8xf32>
    %352 = tpu.matmul %351, %341, %cst_113 {dimension_numbers = #tpu.dot_dimension_numbers<[1], [0], [0], [1], [0, 0, 1, 1], [], []>} : vector<8x8xf32>, vector<8x8xf32>, vector<8x8xf32> -> vector<8x8xf32>
    %353 = vector.extract_strided_slice %334 {offsets = [0, 8], sizes = [8, 8], strides = [1, 1]} : vector<8x32xf32> to vector<8x8xf32>
    %cst_114 = arith.constant 0.353553385 : f32
    %354 = vector.broadcast %cst_114 : f32 to vector<8x8xf32>
    %355 = arith.mulf %353, %354 : vector<8x8xf32>
    %356 = vector.extract_strided_slice %335 {offsets = [0, 8], sizes = [8, 8], strides = [1, 1]} : vector<8x32xf32> to vector<8x8xf32>
    %357 = vector.extract_strided_slice %336 {offsets = [0, 8], sizes = [8, 8], strides = [1, 1]} : vector<8x32xf32> to vector<8x8xf32>
    %cst_115 = arith.constant dense<0.000000e+00> : vector<8x8xf32>
    %358 = tpu.matmul %355, %356, %cst_115 {dimension_numbers = #tpu.dot_dimension_numbers<[1], [1], [0], [0], [0, 0, 1, 0], [], []>} : vector<8x8xf32>, vector<8x8xf32>, vector<8x8xf32> -> vector<8x8xf32>
    %cst_116 = arith.constant dense<0xFF800000> : vector<8xf32>
    %359 = vector.multi_reduction <maximumf>, %358, %cst_116 [1] : vector<8x8xf32> to vector<8xf32>
    %360 = vector.shape_cast %359 : vector<8xf32> to vector<8x1xf32>
    %361 = vector.broadcast %360 : vector<8x1xf32> to vector<8x8xf32>
    %362 = arith.subf %358, %361 : vector<8x8xf32>
    %363 = math.exp %362 : vector<8x8xf32>
    %cst_117 = arith.constant dense<0.000000e+00> : vector<8xf32>
    %364 = vector.multi_reduction <add>, %363, %cst_117 [1] : vector<8x8xf32> to vector<8xf32>
    %365 = vector.shape_cast %364 : vector<8xf32> to vector<8x1xf32>
    %366 = vector.broadcast %365 : vector<8x1xf32> to vector<8x8xf32>
    %367 = arith.divf %363, %366 : vector<8x8xf32>
    %cst_118 = arith.constant dense<0.000000e+00> : vector<8x8xf32>
    %368 = tpu.matmul %367, %357, %cst_118 {dimension_numbers = #tpu.dot_dimension_numbers<[1], [0], [0], [1], [0, 0, 1, 1], [], []>} : vector<8x8xf32>, vector<8x8xf32>, vector<8x8xf32> -> vector<8x8xf32>
    %369 = vector.extract_strided_slice %334 {offsets = [0, 16], sizes = [8, 8], strides = [1, 1]} : vector<8x32xf32> to vector<8x8xf32>
    %cst_119 = arith.constant 0.353553385 : f32
    %370 = vector.broadcast %cst_119 : f32 to vector<8x8xf32>
    %371 = arith.mulf %369, %370 : vector<8x8xf32>
    %372 = vector.extract_strided_slice %335 {offsets = [0, 16], sizes = [8, 8], strides = [1, 1]} : vector<8x32xf32> to vector<8x8xf32>
    %373 = vector.extract_strided_slice %336 {offsets = [0, 16], sizes = [8, 8], strides = [1, 1]} : vector<8x32xf32> to vector<8x8xf32>
    %cst_120 = arith.constant dense<0.000000e+00> : vector<8x8xf32>
    %374 = tpu.matmul %371, %372, %cst_120 {dimension_numbers = #tpu.dot_dimension_numbers<[1], [1], [0], [0], [0, 0, 1, 0], [], []>} : vector<8x8xf32>, vector<8x8xf32>, vector<8x8xf32> -> vector<8x8xf32>
    %cst_121 = arith.constant dense<0xFF800000> : vector<8xf32>
    %375 = vector.multi_reduction <maximumf>, %374, %cst_121 [1] : vector<8x8xf32> to vector<8xf32>
    %376 = vector.shape_cast %375 : vector<8xf32> to vector<8x1xf32>
    %377 = vector.broadcast %376 : vector<8x1xf32> to vector<8x8xf32>
    %378 = arith.subf %374, %377 : vector<8x8xf32>
    %379 = math.exp %378 : vector<8x8xf32>
    %cst_122 = arith.constant dense<0.000000e+00> : vector<8xf32>
    %380 = vector.multi_reduction <add>, %379, %cst_122 [1] : vector<8x8xf32> to vector<8xf32>
    %381 = vector.shape_cast %380 : vector<8xf32> to vector<8x1xf32>
    %382 = vector.broadcast %381 : vector<8x1xf32> to vector<8x8xf32>
    %383 = arith.divf %379, %382 : vector<8x8xf32>
    %cst_123 = arith.constant dense<0.000000e+00> : vector<8x8xf32>
    %384 = tpu.matmul %383, %373, %cst_123 {dimension_numbers = #tpu.dot_dimension_numbers<[1], [0], [0], [1], [0, 0, 1, 1], [], []>} : vector<8x8xf32>, vector<8x8xf32>, vector<8x8xf32> -> vector<8x8xf32>
    %385 = vector.extract_strided_slice %334 {offsets = [0, 24], sizes = [8, 8], strides = [1, 1]} : vector<8x32xf32> to vector<8x8xf32>
    %cst_124 = arith.constant 0.353553385 : f32
    %386 = vector.broadcast %cst_124 : f32 to vector<8x8xf32>
    %387 = arith.mulf %385, %386 : vector<8x8xf32>
    %388 = vector.extract_strided_slice %335 {offsets = [0, 24], sizes = [8, 8], strides = [1, 1]} : vector<8x32xf32> to vector<8x8xf32>
    %389 = vector.extract_strided_slice %336 {offsets = [0, 24], sizes = [8, 8], strides = [1, 1]} : vector<8x32xf32> to vector<8x8xf32>
    %cst_125 = arith.constant dense<0.000000e+00> : vector<8x8xf32>
    %390 = tpu.matmul %387, %388, %cst_125 {dimension_numbers = #tpu.dot_dimension_numbers<[1], [1], [0], [0], [0, 0, 1, 0], [], []>} : vector<8x8xf32>, vector<8x8xf32>, vector<8x8xf32> -> vector<8x8xf32>
    %cst_126 = arith.constant dense<0xFF800000> : vector<8xf32>
    %391 = vector.multi_reduction <maximumf>, %390, %cst_126 [1] : vector<8x8xf32> to vector<8xf32>
    %392 = vector.shape_cast %391 : vector<8xf32> to vector<8x1xf32>
    %393 = vector.broadcast %392 : vector<8x1xf32> to vector<8x8xf32>
    %394 = arith.subf %390, %393 : vector<8x8xf32>
    %395 = math.exp %394 : vector<8x8xf32>
    %cst_127 = arith.constant dense<0.000000e+00> : vector<8xf32>
    %396 = vector.multi_reduction <add>, %395, %cst_127 [1] : vector<8x8xf32> to vector<8xf32>
    %397 = vector.shape_cast %396 : vector<8xf32> to vector<8x1xf32>
    %398 = vector.broadcast %397 : vector<8x1xf32> to vector<8x8xf32>
    %399 = arith.divf %395, %398 : vector<8x8xf32>
    %cst_128 = arith.constant dense<0.000000e+00> : vector<8x8xf32>
    %400 = tpu.matmul %399, %389, %cst_128 {dimension_numbers = #tpu.dot_dimension_numbers<[1], [0], [0], [1], [0, 0, 1, 1], [], []>} : vector<8x8xf32>, vector<8x8xf32>, vector<8x8xf32> -> vector<8x8xf32>
    %401 = tpu.concatenate %352, %368, %384, %400 in 1 : vector<8x8xf32>, vector<8x8xf32>, vector<8x8xf32>, vector<8x8xf32> -> vector<8x32xf32>
    %402 = vector.extract_strided_slice %51 {offsets = [40, 0], sizes = [8, 32], strides = [1, 1]} : vector<64x32xf32> to vector<8x32xf32>
    %403 = vector.extract_strided_slice %56 {offsets = [40, 0], sizes = [8, 32], strides = [1, 1]} : vector<64x32xf32> to vector<8x32xf32>
    %404 = vector.extract_strided_slice %61 {offsets = [40, 0], sizes = [8, 32], strides = [1, 1]} : vector<64x32xf32> to vector<8x32xf32>
    %405 = vector.extract_strided_slice %402 {offsets = [0, 0], sizes = [8, 8], strides = [1, 1]} : vector<8x32xf32> to vector<8x8xf32>
    %cst_129 = arith.constant 0.353553385 : f32
    %406 = vector.broadcast %cst_129 : f32 to vector<8x8xf32>
    %407 = arith.mulf %405, %406 : vector<8x8xf32>
    %408 = vector.extract_strided_slice %403 {offsets = [0, 0], sizes = [8, 8], strides = [1, 1]} : vector<8x32xf32> to vector<8x8xf32>
    %409 = vector.extract_strided_slice %404 {offsets = [0, 0], sizes = [8, 8], strides = [1, 1]} : vector<8x32xf32> to vector<8x8xf32>
    %cst_130 = arith.constant dense<0.000000e+00> : vector<8x8xf32>
    %410 = tpu.matmul %407, %408, %cst_130 {dimension_numbers = #tpu.dot_dimension_numbers<[1], [1], [0], [0], [0, 0, 1, 0], [], []>} : vector<8x8xf32>, vector<8x8xf32>, vector<8x8xf32> -> vector<8x8xf32>
    %cst_131 = arith.constant dense<0xFF800000> : vector<8xf32>
    %411 = vector.multi_reduction <maximumf>, %410, %cst_131 [1] : vector<8x8xf32> to vector<8xf32>
    %412 = vector.shape_cast %411 : vector<8xf32> to vector<8x1xf32>
    %413 = vector.broadcast %412 : vector<8x1xf32> to vector<8x8xf32>
    %414 = arith.subf %410, %413 : vector<8x8xf32>
    %415 = math.exp %414 : vector<8x8xf32>
    %cst_132 = arith.constant dense<0.000000e+00> : vector<8xf32>
    %416 = vector.multi_reduction <add>, %415, %cst_132 [1] : vector<8x8xf32> to vector<8xf32>
    %417 = vector.shape_cast %416 : vector<8xf32> to vector<8x1xf32>
    %418 = vector.broadcast %417 : vector<8x1xf32> to vector<8x8xf32>
    %419 = arith.divf %415, %418 : vector<8x8xf32>
    %cst_133 = arith.constant dense<0.000000e+00> : vector<8x8xf32>
    %420 = tpu.matmul %419, %409, %cst_133 {dimension_numbers = #tpu.dot_dimension_numbers<[1], [0], [0], [1], [0, 0, 1, 1], [], []>} : vector<8x8xf32>, vector<8x8xf32>, vector<8x8xf32> -> vector<8x8xf32>
    %421 = vector.extract_strided_slice %402 {offsets = [0, 8], sizes = [8, 8], strides = [1, 1]} : vector<8x32xf32> to vector<8x8xf32>
    %cst_134 = arith.constant 0.353553385 : f32
    %422 = vector.broadcast %cst_134 : f32 to vector<8x8xf32>
    %423 = arith.mulf %421, %422 : vector<8x8xf32>
    %424 = vector.extract_strided_slice %403 {offsets = [0, 8], sizes = [8, 8], strides = [1, 1]} : vector<8x32xf32> to vector<8x8xf32>
    %425 = vector.extract_strided_slice %404 {offsets = [0, 8], sizes = [8, 8], strides = [1, 1]} : vector<8x32xf32> to vector<8x8xf32>
    %cst_135 = arith.constant dense<0.000000e+00> : vector<8x8xf32>
    %426 = tpu.matmul %423, %424, %cst_135 {dimension_numbers = #tpu.dot_dimension_numbers<[1], [1], [0], [0], [0, 0, 1, 0], [], []>} : vector<8x8xf32>, vector<8x8xf32>, vector<8x8xf32> -> vector<8x8xf32>
    %cst_136 = arith.constant dense<0xFF800000> : vector<8xf32>
    %427 = vector.multi_reduction <maximumf>, %426, %cst_136 [1] : vector<8x8xf32> to vector<8xf32>
    %428 = vector.shape_cast %427 : vector<8xf32> to vector<8x1xf32>
    %429 = vector.broadcast %428 : vector<8x1xf32> to vector<8x8xf32>
    %430 = arith.subf %426, %429 : vector<8x8xf32>
    %431 = math.exp %430 : vector<8x8xf32>
    %cst_137 = arith.constant dense<0.000000e+00> : vector<8xf32>
    %432 = vector.multi_reduction <add>, %431, %cst_137 [1] : vector<8x8xf32> to vector<8xf32>
    %433 = vector.shape_cast %432 : vector<8xf32> to vector<8x1xf32>
    %434 = vector.broadcast %433 : vector<8x1xf32> to vector<8x8xf32>
    %435 = arith.divf %431, %434 : vector<8x8xf32>
    %cst_138 = arith.constant dense<0.000000e+00> : vector<8x8xf32>
    %436 = tpu.matmul %435, %425, %cst_138 {dimension_numbers = #tpu.dot_dimension_numbers<[1], [0], [0], [1], [0, 0, 1, 1], [], []>} : vector<8x8xf32>, vector<8x8xf32>, vector<8x8xf32> -> vector<8x8xf32>
    %437 = vector.extract_strided_slice %402 {offsets = [0, 16], sizes = [8, 8], strides = [1, 1]} : vector<8x32xf32> to vector<8x8xf32>
    %cst_139 = arith.constant 0.353553385 : f32
    %438 = vector.broadcast %cst_139 : f32 to vector<8x8xf32>
    %439 = arith.mulf %437, %438 : vector<8x8xf32>
    %440 = vector.extract_strided_slice %403 {offsets = [0, 16], sizes = [8, 8], strides = [1, 1]} : vector<8x32xf32> to vector<8x8xf32>
    %441 = vector.extract_strided_slice %404 {offsets = [0, 16], sizes = [8, 8], strides = [1, 1]} : vector<8x32xf32> to vector<8x8xf32>
    %cst_140 = arith.constant dense<0.000000e+00> : vector<8x8xf32>
    %442 = tpu.matmul %439, %440, %cst_140 {dimension_numbers = #tpu.dot_dimension_numbers<[1], [1], [0], [0], [0, 0, 1, 0], [], []>} : vector<8x8xf32>, vector<8x8xf32>, vector<8x8xf32> -> vector<8x8xf32>
    %cst_141 = arith.constant dense<0xFF800000> : vector<8xf32>
    %443 = vector.multi_reduction <maximumf>, %442, %cst_141 [1] : vector<8x8xf32> to vector<8xf32>
    %444 = vector.shape_cast %443 : vector<8xf32> to vector<8x1xf32>
    %445 = vector.broadcast %444 : vector<8x1xf32> to vector<8x8xf32>
    %446 = arith.subf %442, %445 : vector<8x8xf32>
    %447 = math.exp %446 : vector<8x8xf32>
    %cst_142 = arith.constant dense<0.000000e+00> : vector<8xf32>
    %448 = vector.multi_reduction <add>, %447, %cst_142 [1] : vector<8x8xf32> to vector<8xf32>
    %449 = vector.shape_cast %448 : vector<8xf32> to vector<8x1xf32>
    %450 = vector.broadcast %449 : vector<8x1xf32> to vector<8x8xf32>
    %451 = arith.divf %447, %450 : vector<8x8xf32>
    %cst_143 = arith.constant dense<0.000000e+00> : vector<8x8xf32>
    %452 = tpu.matmul %451, %441, %cst_143 {dimension_numbers = #tpu.dot_dimension_numbers<[1], [0], [0], [1], [0, 0, 1, 1], [], []>} : vector<8x8xf32>, vector<8x8xf32>, vector<8x8xf32> -> vector<8x8xf32>
    %453 = vector.extract_strided_slice %402 {offsets = [0, 24], sizes = [8, 8], strides = [1, 1]} : vector<8x32xf32> to vector<8x8xf32>
    %cst_144 = arith.constant 0.353553385 : f32
    %454 = vector.broadcast %cst_144 : f32 to vector<8x8xf32>
    %455 = arith.mulf %453, %454 : vector<8x8xf32>
    %456 = vector.extract_strided_slice %403 {offsets = [0, 24], sizes = [8, 8], strides = [1, 1]} : vector<8x32xf32> to vector<8x8xf32>
    %457 = vector.extract_strided_slice %404 {offsets = [0, 24], sizes = [8, 8], strides = [1, 1]} : vector<8x32xf32> to vector<8x8xf32>
    %cst_145 = arith.constant dense<0.000000e+00> : vector<8x8xf32>
    %458 = tpu.matmul %455, %456, %cst_145 {dimension_numbers = #tpu.dot_dimension_numbers<[1], [1], [0], [0], [0, 0, 1, 0], [], []>} : vector<8x8xf32>, vector<8x8xf32>, vector<8x8xf32> -> vector<8x8xf32>
    %cst_146 = arith.constant dense<0xFF800000> : vector<8xf32>
    %459 = vector.multi_reduction <maximumf>, %458, %cst_146 [1] : vector<8x8xf32> to vector<8xf32>
    %460 = vector.shape_cast %459 : vector<8xf32> to vector<8x1xf32>
    %461 = vector.broadcast %460 : vector<8x1xf32> to vector<8x8xf32>
    %462 = arith.subf %458, %461 : vector<8x8xf32>
    %463 = math.exp %462 : vector<8x8xf32>
    %cst_147 = arith.constant dense<0.000000e+00> : vector<8xf32>
    %464 = vector.multi_reduction <add>, %463, %cst_147 [1] : vector<8x8xf32> to vector<8xf32>
    %465 = vector.shape_cast %464 : vector<8xf32> to vector<8x1xf32>
    %466 = vector.broadcast %465 : vector<8x1xf32> to vector<8x8xf32>
    %467 = arith.divf %463, %466 : vector<8x8xf32>
    %cst_148 = arith.constant dense<0.000000e+00> : vector<8x8xf32>
    %468 = tpu.matmul %467, %457, %cst_148 {dimension_numbers = #tpu.dot_dimension_numbers<[1], [0], [0], [1], [0, 0, 1, 1], [], []>} : vector<8x8xf32>, vector<8x8xf32>, vector<8x8xf32> -> vector<8x8xf32>
    %469 = tpu.concatenate %420, %436, %452, %468 in 1 : vector<8x8xf32>, vector<8x8xf32>, vector<8x8xf32>, vector<8x8xf32> -> vector<8x32xf32>
    %470 = vector.extract_strided_slice %51 {offsets = [48, 0], sizes = [8, 32], strides = [1, 1]} : vector<64x32xf32> to vector<8x32xf32>
    %471 = vector.extract_strided_slice %56 {offsets = [48, 0], sizes = [8, 32], strides = [1, 1]} : vector<64x32xf32> to vector<8x32xf32>
    %472 = vector.extract_strided_slice %61 {offsets = [48, 0], sizes = [8, 32], strides = [1, 1]} : vector<64x32xf32> to vector<8x32xf32>
    %473 = vector.extract_strided_slice %470 {offsets = [0, 0], sizes = [8, 8], strides = [1, 1]} : vector<8x32xf32> to vector<8x8xf32>
    %cst_149 = arith.constant 0.353553385 : f32
    %474 = vector.broadcast %cst_149 : f32 to vector<8x8xf32>
    %475 = arith.mulf %473, %474 : vector<8x8xf32>
    %476 = vector.extract_strided_slice %471 {offsets = [0, 0], sizes = [8, 8], strides = [1, 1]} : vector<8x32xf32> to vector<8x8xf32>
    %477 = vector.extract_strided_slice %472 {offsets = [0, 0], sizes = [8, 8], strides = [1, 1]} : vector<8x32xf32> to vector<8x8xf32>
    %cst_150 = arith.constant dense<0.000000e+00> : vector<8x8xf32>
    %478 = tpu.matmul %475, %476, %cst_150 {dimension_numbers = #tpu.dot_dimension_numbers<[1], [1], [0], [0], [0, 0, 1, 0], [], []>} : vector<8x8xf32>, vector<8x8xf32>, vector<8x8xf32> -> vector<8x8xf32>
    %cst_151 = arith.constant dense<0xFF800000> : vector<8xf32>
    %479 = vector.multi_reduction <maximumf>, %478, %cst_151 [1] : vector<8x8xf32> to vector<8xf32>
    %480 = vector.shape_cast %479 : vector<8xf32> to vector<8x1xf32>
    %481 = vector.broadcast %480 : vector<8x1xf32> to vector<8x8xf32>
    %482 = arith.subf %478, %481 : vector<8x8xf32>
    %483 = math.exp %482 : vector<8x8xf32>
    %cst_152 = arith.constant dense<0.000000e+00> : vector<8xf32>
    %484 = vector.multi_reduction <add>, %483, %cst_152 [1] : vector<8x8xf32> to vector<8xf32>
    %485 = vector.shape_cast %484 : vector<8xf32> to vector<8x1xf32>
    %486 = vector.broadcast %485 : vector<8x1xf32> to vector<8x8xf32>
    %487 = arith.divf %483, %486 : vector<8x8xf32>
    %cst_153 = arith.constant dense<0.000000e+00> : vector<8x8xf32>
    %488 = tpu.matmul %487, %477, %cst_153 {dimension_numbers = #tpu.dot_dimension_numbers<[1], [0], [0], [1], [0, 0, 1, 1], [], []>} : vector<8x8xf32>, vector<8x8xf32>, vector<8x8xf32> -> vector<8x8xf32>
    %489 = vector.extract_strided_slice %470 {offsets = [0, 8], sizes = [8, 8], strides = [1, 1]} : vector<8x32xf32> to vector<8x8xf32>
    %cst_154 = arith.constant 0.353553385 : f32
    %490 = vector.broadcast %cst_154 : f32 to vector<8x8xf32>
    %491 = arith.mulf %489, %490 : vector<8x8xf32>
    %492 = vector.extract_strided_slice %471 {offsets = [0, 8], sizes = [8, 8], strides = [1, 1]} : vector<8x32xf32> to vector<8x8xf32>
    %493 = vector.extract_strided_slice %472 {offsets = [0, 8], sizes = [8, 8], strides = [1, 1]} : vector<8x32xf32> to vector<8x8xf32>
    %cst_155 = arith.constant dense<0.000000e+00> : vector<8x8xf32>
    %494 = tpu.matmul %491, %492, %cst_155 {dimension_numbers = #tpu.dot_dimension_numbers<[1], [1], [0], [0], [0, 0, 1, 0], [], []>} : vector<8x8xf32>, vector<8x8xf32>, vector<8x8xf32> -> vector<8x8xf32>
    %cst_156 = arith.constant dense<0xFF800000> : vector<8xf32>
    %495 = vector.multi_reduction <maximumf>, %494, %cst_156 [1] : vector<8x8xf32> to vector<8xf32>
    %496 = vector.shape_cast %495 : vector<8xf32> to vector<8x1xf32>
    %497 = vector.broadcast %496 : vector<8x1xf32> to vector<8x8xf32>
    %498 = arith.subf %494, %497 : vector<8x8xf32>
    %499 = math.exp %498 : vector<8x8xf32>
    %cst_157 = arith.constant dense<0.000000e+00> : vector<8xf32>
    %500 = vector.multi_reduction <add>, %499, %cst_157 [1] : vector<8x8xf32> to vector<8xf32>
    %501 = vector.shape_cast %500 : vector<8xf32> to vector<8x1xf32>
    %502 = vector.broadcast %501 : vector<8x1xf32> to vector<8x8xf32>
    %503 = arith.divf %499, %502 : vector<8x8xf32>
    %cst_158 = arith.constant dense<0.000000e+00> : vector<8x8xf32>
    %504 = tpu.matmul %503, %493, %cst_158 {dimension_numbers = #tpu.dot_dimension_numbers<[1], [0], [0], [1], [0, 0, 1, 1], [], []>} : vector<8x8xf32>, vector<8x8xf32>, vector<8x8xf32> -> vector<8x8xf32>
    %505 = vector.extract_strided_slice %470 {offsets = [0, 16], sizes = [8, 8], strides = [1, 1]} : vector<8x32xf32> to vector<8x8xf32>
    %cst_159 = arith.constant 0.353553385 : f32
    %506 = vector.broadcast %cst_159 : f32 to vector<8x8xf32>
    %507 = arith.mulf %505, %506 : vector<8x8xf32>
    %508 = vector.extract_strided_slice %471 {offsets = [0, 16], sizes = [8, 8], strides = [1, 1]} : vector<8x32xf32> to vector<8x8xf32>
    %509 = vector.extract_strided_slice %472 {offsets = [0, 16], sizes = [8, 8], strides = [1, 1]} : vector<8x32xf32> to vector<8x8xf32>
    %cst_160 = arith.constant dense<0.000000e+00> : vector<8x8xf32>
    %510 = tpu.matmul %507, %508, %cst_160 {dimension_numbers = #tpu.dot_dimension_numbers<[1], [1], [0], [0], [0, 0, 1, 0], [], []>} : vector<8x8xf32>, vector<8x8xf32>, vector<8x8xf32> -> vector<8x8xf32>
    %cst_161 = arith.constant dense<0xFF800000> : vector<8xf32>
    %511 = vector.multi_reduction <maximumf>, %510, %cst_161 [1] : vector<8x8xf32> to vector<8xf32>
    %512 = vector.shape_cast %511 : vector<8xf32> to vector<8x1xf32>
    %513 = vector.broadcast %512 : vector<8x1xf32> to vector<8x8xf32>
    %514 = arith.subf %510, %513 : vector<8x8xf32>
    %515 = math.exp %514 : vector<8x8xf32>
    %cst_162 = arith.constant dense<0.000000e+00> : vector<8xf32>
    %516 = vector.multi_reduction <add>, %515, %cst_162 [1] : vector<8x8xf32> to vector<8xf32>
    %517 = vector.shape_cast %516 : vector<8xf32> to vector<8x1xf32>
    %518 = vector.broadcast %517 : vector<8x1xf32> to vector<8x8xf32>
    %519 = arith.divf %515, %518 : vector<8x8xf32>
    %cst_163 = arith.constant dense<0.000000e+00> : vector<8x8xf32>
    %520 = tpu.matmul %519, %509, %cst_163 {dimension_numbers = #tpu.dot_dimension_numbers<[1], [0], [0], [1], [0, 0, 1, 1], [], []>} : vector<8x8xf32>, vector<8x8xf32>, vector<8x8xf32> -> vector<8x8xf32>
    %521 = vector.extract_strided_slice %470 {offsets = [0, 24], sizes = [8, 8], strides = [1, 1]} : vector<8x32xf32> to vector<8x8xf32>
    %cst_164 = arith.constant 0.353553385 : f32
    %522 = vector.broadcast %cst_164 : f32 to vector<8x8xf32>
    %523 = arith.mulf %521, %522 : vector<8x8xf32>
    %524 = vector.extract_strided_slice %471 {offsets = [0, 24], sizes = [8, 8], strides = [1, 1]} : vector<8x32xf32> to vector<8x8xf32>
    %525 = vector.extract_strided_slice %472 {offsets = [0, 24], sizes = [8, 8], strides = [1, 1]} : vector<8x32xf32> to vector<8x8xf32>
    %cst_165 = arith.constant dense<0.000000e+00> : vector<8x8xf32>
    %526 = tpu.matmul %523, %524, %cst_165 {dimension_numbers = #tpu.dot_dimension_numbers<[1], [1], [0], [0], [0, 0, 1, 0], [], []>} : vector<8x8xf32>, vector<8x8xf32>, vector<8x8xf32> -> vector<8x8xf32>
    %cst_166 = arith.constant dense<0xFF800000> : vector<8xf32>
    %527 = vector.multi_reduction <maximumf>, %526, %cst_166 [1] : vector<8x8xf32> to vector<8xf32>
    %528 = vector.shape_cast %527 : vector<8xf32> to vector<8x1xf32>
    %529 = vector.broadcast %528 : vector<8x1xf32> to vector<8x8xf32>
    %530 = arith.subf %526, %529 : vector<8x8xf32>
    %531 = math.exp %530 : vector<8x8xf32>
    %cst_167 = arith.constant dense<0.000000e+00> : vector<8xf32>
    %532 = vector.multi_reduction <add>, %531, %cst_167 [1] : vector<8x8xf32> to vector<8xf32>
    %533 = vector.shape_cast %532 : vector<8xf32> to vector<8x1xf32>
    %534 = vector.broadcast %533 : vector<8x1xf32> to vector<8x8xf32>
    %535 = arith.divf %531, %534 : vector<8x8xf32>
    %cst_168 = arith.constant dense<0.000000e+00> : vector<8x8xf32>
    %536 = tpu.matmul %535, %525, %cst_168 {dimension_numbers = #tpu.dot_dimension_numbers<[1], [0], [0], [1], [0, 0, 1, 1], [], []>} : vector<8x8xf32>, vector<8x8xf32>, vector<8x8xf32> -> vector<8x8xf32>
    %537 = tpu.concatenate %488, %504, %520, %536 in 1 : vector<8x8xf32>, vector<8x8xf32>, vector<8x8xf32>, vector<8x8xf32> -> vector<8x32xf32>
    %538 = vector.extract_strided_slice %51 {offsets = [56, 0], sizes = [8, 32], strides = [1, 1]} : vector<64x32xf32> to vector<8x32xf32>
    %539 = vector.extract_strided_slice %56 {offsets = [56, 0], sizes = [8, 32], strides = [1, 1]} : vector<64x32xf32> to vector<8x32xf32>
    %540 = vector.extract_strided_slice %61 {offsets = [56, 0], sizes = [8, 32], strides = [1, 1]} : vector<64x32xf32> to vector<8x32xf32>
    %541 = vector.extract_strided_slice %538 {offsets = [0, 0], sizes = [8, 8], strides = [1, 1]} : vector<8x32xf32> to vector<8x8xf32>
    %cst_169 = arith.constant 0.353553385 : f32
    %542 = vector.broadcast %cst_169 : f32 to vector<8x8xf32>
    %543 = arith.mulf %541, %542 : vector<8x8xf32>
    %544 = vector.extract_strided_slice %539 {offsets = [0, 0], sizes = [8, 8], strides = [1, 1]} : vector<8x32xf32> to vector<8x8xf32>
    %545 = vector.extract_strided_slice %540 {offsets = [0, 0], sizes = [8, 8], strides = [1, 1]} : vector<8x32xf32> to vector<8x8xf32>
    %cst_170 = arith.constant dense<0.000000e+00> : vector<8x8xf32>
    %546 = tpu.matmul %543, %544, %cst_170 {dimension_numbers = #tpu.dot_dimension_numbers<[1], [1], [0], [0], [0, 0, 1, 0], [], []>} : vector<8x8xf32>, vector<8x8xf32>, vector<8x8xf32> -> vector<8x8xf32>
    %cst_171 = arith.constant dense<0xFF800000> : vector<8xf32>
    %547 = vector.multi_reduction <maximumf>, %546, %cst_171 [1] : vector<8x8xf32> to vector<8xf32>
    %548 = vector.shape_cast %547 : vector<8xf32> to vector<8x1xf32>
    %549 = vector.broadcast %548 : vector<8x1xf32> to vector<8x8xf32>
    %550 = arith.subf %546, %549 : vector<8x8xf32>
    %551 = math.exp %550 : vector<8x8xf32>
    %cst_172 = arith.constant dense<0.000000e+00> : vector<8xf32>
    %552 = vector.multi_reduction <add>, %551, %cst_172 [1] : vector<8x8xf32> to vector<8xf32>
    %553 = vector.shape_cast %552 : vector<8xf32> to vector<8x1xf32>
    %554 = vector.broadcast %553 : vector<8x1xf32> to vector<8x8xf32>
    %555 = arith.divf %551, %554 : vector<8x8xf32>
    %cst_173 = arith.constant dense<0.000000e+00> : vector<8x8xf32>
    %556 = tpu.matmul %555, %545, %cst_173 {dimension_numbers = #tpu.dot_dimension_numbers<[1], [0], [0], [1], [0, 0, 1, 1], [], []>} : vector<8x8xf32>, vector<8x8xf32>, vector<8x8xf32> -> vector<8x8xf32>
    %557 = vector.extract_strided_slice %538 {offsets = [0, 8], sizes = [8, 8], strides = [1, 1]} : vector<8x32xf32> to vector<8x8xf32>
    %cst_174 = arith.constant 0.353553385 : f32
    %558 = vector.broadcast %cst_174 : f32 to vector<8x8xf32>
    %559 = arith.mulf %557, %558 : vector<8x8xf32>
    %560 = vector.extract_strided_slice %539 {offsets = [0, 8], sizes = [8, 8], strides = [1, 1]} : vector<8x32xf32> to vector<8x8xf32>
    %561 = vector.extract_strided_slice %540 {offsets = [0, 8], sizes = [8, 8], strides = [1, 1]} : vector<8x32xf32> to vector<8x8xf32>
    %cst_175 = arith.constant dense<0.000000e+00> : vector<8x8xf32>
    %562 = tpu.matmul %559, %560, %cst_175 {dimension_numbers = #tpu.dot_dimension_numbers<[1], [1], [0], [0], [0, 0, 1, 0], [], []>} : vector<8x8xf32>, vector<8x8xf32>, vector<8x8xf32> -> vector<8x8xf32>
    %cst_176 = arith.constant dense<0xFF800000> : vector<8xf32>
    %563 = vector.multi_reduction <maximumf>, %562, %cst_176 [1] : vector<8x8xf32> to vector<8xf32>
    %564 = vector.shape_cast %563 : vector<8xf32> to vector<8x1xf32>
    %565 = vector.broadcast %564 : vector<8x1xf32> to vector<8x8xf32>
    %566 = arith.subf %562, %565 : vector<8x8xf32>
    %567 = math.exp %566 : vector<8x8xf32>
    %cst_177 = arith.constant dense<0.000000e+00> : vector<8xf32>
    %568 = vector.multi_reduction <add>, %567, %cst_177 [1] : vector<8x8xf32> to vector<8xf32>
    %569 = vector.shape_cast %568 : vector<8xf32> to vector<8x1xf32>
    %570 = vector.broadcast %569 : vector<8x1xf32> to vector<8x8xf32>
    %571 = arith.divf %567, %570 : vector<8x8xf32>
    %cst_178 = arith.constant dense<0.000000e+00> : vector<8x8xf32>
    %572 = tpu.matmul %571, %561, %cst_178 {dimension_numbers = #tpu.dot_dimension_numbers<[1], [0], [0], [1], [0, 0, 1, 1], [], []>} : vector<8x8xf32>, vector<8x8xf32>, vector<8x8xf32> -> vector<8x8xf32>
    %573 = vector.extract_strided_slice %538 {offsets = [0, 16], sizes = [8, 8], strides = [1, 1]} : vector<8x32xf32> to vector<8x8xf32>
    %cst_179 = arith.constant 0.353553385 : f32
    %574 = vector.broadcast %cst_179 : f32 to vector<8x8xf32>
    %575 = arith.mulf %573, %574 : vector<8x8xf32>
    %576 = vector.extract_strided_slice %539 {offsets = [0, 16], sizes = [8, 8], strides = [1, 1]} : vector<8x32xf32> to vector<8x8xf32>
    %577 = vector.extract_strided_slice %540 {offsets = [0, 16], sizes = [8, 8], strides = [1, 1]} : vector<8x32xf32> to vector<8x8xf32>
    %cst_180 = arith.constant dense<0.000000e+00> : vector<8x8xf32>
    %578 = tpu.matmul %575, %576, %cst_180 {dimension_numbers = #tpu.dot_dimension_numbers<[1], [1], [0], [0], [0, 0, 1, 0], [], []>} : vector<8x8xf32>, vector<8x8xf32>, vector<8x8xf32> -> vector<8x8xf32>
    %cst_181 = arith.constant dense<0xFF800000> : vector<8xf32>
    %579 = vector.multi_reduction <maximumf>, %578, %cst_181 [1] : vector<8x8xf32> to vector<8xf32>
    %580 = vector.shape_cast %579 : vector<8xf32> to vector<8x1xf32>
    %581 = vector.broadcast %580 : vector<8x1xf32> to vector<8x8xf32>
    %582 = arith.subf %578, %581 : vector<8x8xf32>
    %583 = math.exp %582 : vector<8x8xf32>
    %cst_182 = arith.constant dense<0.000000e+00> : vector<8xf32>
    %584 = vector.multi_reduction <add>, %583, %cst_182 [1] : vector<8x8xf32> to vector<8xf32>
    %585 = vector.shape_cast %584 : vector<8xf32> to vector<8x1xf32>
    %586 = vector.broadcast %585 : vector<8x1xf32> to vector<8x8xf32>
    %587 = arith.divf %583, %586 : vector<8x8xf32>
    %cst_183 = arith.constant dense<0.000000e+00> : vector<8x8xf32>
    %588 = tpu.matmul %587, %577, %cst_183 {dimension_numbers = #tpu.dot_dimension_numbers<[1], [0], [0], [1], [0, 0, 1, 1], [], []>} : vector<8x8xf32>, vector<8x8xf32>, vector<8x8xf32> -> vector<8x8xf32>
    %589 = vector.extract_strided_slice %538 {offsets = [0, 24], sizes = [8, 8], strides = [1, 1]} : vector<8x32xf32> to vector<8x8xf32>
    %cst_184 = arith.constant 0.353553385 : f32
    %590 = vector.broadcast %cst_184 : f32 to vector<8x8xf32>
    %591 = arith.mulf %589, %590 : vector<8x8xf32>
    %592 = vector.extract_strided_slice %539 {offsets = [0, 24], sizes = [8, 8], strides = [1, 1]} : vector<8x32xf32> to vector<8x8xf32>
    %593 = vector.extract_strided_slice %540 {offsets = [0, 24], sizes = [8, 8], strides = [1, 1]} : vector<8x32xf32> to vector<8x8xf32>
    %cst_185 = arith.constant dense<0.000000e+00> : vector<8x8xf32>
    %594 = tpu.matmul %591, %592, %cst_185 {dimension_numbers = #tpu.dot_dimension_numbers<[1], [1], [0], [0], [0, 0, 1, 0], [], []>} : vector<8x8xf32>, vector<8x8xf32>, vector<8x8xf32> -> vector<8x8xf32>
    %cst_186 = arith.constant dense<0xFF800000> : vector<8xf32>
    %595 = vector.multi_reduction <maximumf>, %594, %cst_186 [1] : vector<8x8xf32> to vector<8xf32>
    %596 = vector.shape_cast %595 : vector<8xf32> to vector<8x1xf32>
    %597 = vector.broadcast %596 : vector<8x1xf32> to vector<8x8xf32>
    %598 = arith.subf %594, %597 : vector<8x8xf32>
    %599 = math.exp %598 : vector<8x8xf32>
    %cst_187 = arith.constant dense<0.000000e+00> : vector<8xf32>
    %600 = vector.multi_reduction <add>, %599, %cst_187 [1] : vector<8x8xf32> to vector<8xf32>
    %601 = vector.shape_cast %600 : vector<8xf32> to vector<8x1xf32>
    %602 = vector.broadcast %601 : vector<8x1xf32> to vector<8x8xf32>
    %603 = arith.divf %599, %602 : vector<8x8xf32>
    %cst_188 = arith.constant dense<0.000000e+00> : vector<8x8xf32>
    %604 = tpu.matmul %603, %593, %cst_188 {dimension_numbers = #tpu.dot_dimension_numbers<[1], [0], [0], [1], [0, 0, 1, 1], [], []>} : vector<8x8xf32>, vector<8x8xf32>, vector<8x8xf32> -> vector<8x8xf32>
    %605 = tpu.concatenate %556, %572, %588, %604 in 1 : vector<8x8xf32>, vector<8x8xf32>, vector<8x8xf32>, vector<8x8xf32> -> vector<8x32xf32>
    %606 = tpu.concatenate %129, %197, %265, %333, %401, %469, %537, %605 in 0 : vector<8x32xf32>, vector<8x32xf32>, vector<8x32xf32>, vector<8x32xf32>, vector<8x32xf32>, vector<8x32xf32>, vector<8x32xf32>, vector<8x32xf32> -> vector<64x32xf32>
    %c0_189 = arith.constant 0 : index
    %c0_190 = arith.constant 0 : index
    %607 = vector.load %arg10[%c0_189, %c0_190] : memref<32x32xf32, #tpu.memory_space<vmem>>, vector<32x32xf32>
    %cst_191 = arith.constant dense<0.000000e+00> : vector<64x32xf32>
    %608 = tpu.matmul %606, %607, %cst_191 {dimension_numbers = #tpu.dot_dimension_numbers<[1], [0], [0], [1], [0, 0, 1, 1], [], []>} : vector<64x32xf32>, vector<32x32xf32>, vector<64x32xf32> -> vector<64x32xf32>
    %c0_192 = arith.constant 0 : index
    %c0_193 = arith.constant 0 : index
    %609 = vector.load %arg11[%c0_192, %c0_193] : memref<1x32xf32, #tpu.memory_space<vmem>>, vector<1x32xf32>
    %610 = vector.broadcast %609 : vector<1x32xf32> to vector<64x32xf32>
    %611 = arith.addf %608, %610 : vector<64x32xf32>
    %c0_194 = arith.constant 0 : index
    %c0_195 = arith.constant 0 : index
    %612 = vector.load %arg12[%c0_194, %c0_195] : memref<1x32xf32, #tpu.memory_space<vmem>>, vector<1x32xf32>
    %c0_196 = arith.constant 0 : index
    %c0_197 = arith.constant 0 : index
    %613 = vector.load %arg13[%c0_196, %c0_197] : memref<1x32xf32, #tpu.memory_space<vmem>>, vector<1x32xf32>
    %614 = vector.extract_strided_slice %611 {offsets = [0, 0], sizes = [8, 32], strides = [1, 1]} : vector<64x32xf32> to vector<8x32xf32>
    %c0_198 = arith.constant 0 : index
    %c0_199 = arith.constant 0 : index
    %c0_200 = arith.constant 0 : index
    %615 = vector.load %arg3[%c0_198, %c0_199, %c0_200] : memref<8x8x32xf32, #tpu.memory_space<vmem>>, vector<8x1x32xf32>
    %616 = vector.shape_cast %615 : vector<8x1x32xf32> to vector<8x32xf32>
    %617 = arith.addf %616, %614 : vector<8x32xf32>
    %cst_201 = arith.constant dense<0.000000e+00> : vector<8xf32>
    %618 = vector.multi_reduction <add>, %617, %cst_201 [1] : vector<8x32xf32> to vector<8xf32>
    %619 = vector.shape_cast %618 : vector<8xf32> to vector<8x1xf32>
    %cst_202 = arith.constant 3.200000e+01 : f32
    %620 = vector.broadcast %cst_202 : f32 to vector<8x1xf32>
    %621 = arith.divf %619, %620 : vector<8x1xf32>
    %622 = vector.broadcast %621 : vector<8x1xf32> to vector<8x32xf32>
    %623 = arith.subf %617, %622 : vector<8x32xf32>
    %624 = arith.mulf %623, %623 : vector<8x32xf32>
    %cst_203 = arith.constant dense<0.000000e+00> : vector<8xf32>
    %625 = vector.multi_reduction <add>, %624, %cst_203 [1] : vector<8x32xf32> to vector<8xf32>
    %626 = vector.shape_cast %625 : vector<8xf32> to vector<8x1xf32>
    %cst_204 = arith.constant 3.200000e+01 : f32
    %627 = vector.broadcast %cst_204 : f32 to vector<8x1xf32>
    %628 = arith.divf %626, %627 : vector<8x1xf32>
    %cst_205 = arith.constant 9.99999974E-6 : f32
    %629 = vector.broadcast %cst_205 : f32 to vector<8x1xf32>
    %630 = arith.addf %628, %629 : vector<8x1xf32>
    %631 = math.rsqrt %630 : vector<8x1xf32>
    %632 = vector.broadcast %631 : vector<8x1xf32> to vector<8x32xf32>
    %633 = arith.mulf %623, %632 : vector<8x32xf32>
    %634 = vector.broadcast %612 : vector<1x32xf32> to vector<8x32xf32>
    %635 = arith.mulf %633, %634 : vector<8x32xf32>
    %636 = vector.broadcast %613 : vector<1x32xf32> to vector<8x32xf32>
    %637 = arith.addf %635, %636 : vector<8x32xf32>
    %c0_206 = arith.constant 0 : index
    %c0_207 = arith.constant 0 : index
    %c0_208 = arith.constant 0 : index
    %638 = vector.load %arg14[%c0_206, %c0_207, %c0_208] : memref<8x8x32xf32, #tpu.memory_space<vmem>>, vector<8x1x32xf32>
    %639 = vector.shape_cast %638 : vector<8x1x32xf32> to vector<8x32xf32>
    %640 = vector.shape_cast %637 : vector<8x32xf32> to vector<8x1x32xf32>
    tpu.vector_store %arg14[%c0_206, %c0_207, %c0_208], %640 {strides = array<i32>} : memref<8x8x32xf32, #tpu.memory_space<vmem>>, vector<8x1x32xf32>,
    %641 = vector.extract_strided_slice %611 {offsets = [8, 0], sizes = [8, 32], strides = [1, 1]} : vector<64x32xf32> to vector<8x32xf32>
    %c0_209 = arith.constant 0 : index
    %c1 = arith.constant 1 : index
    %c0_210 = arith.constant 0 : index
    %642 = vector.load %arg3[%c0_209, %c1, %c0_210] : memref<8x8x32xf32, #tpu.memory_space<vmem>>, vector<8x1x32xf32>
    %643 = vector.shape_cast %642 : vector<8x1x32xf32> to vector<8x32xf32>
    %644 = arith.addf %643, %641 : vector<8x32xf32>
    %cst_211 = arith.constant dense<0.000000e+00> : vector<8xf32>
    %645 = vector.multi_reduction <add>, %644, %cst_211 [1] : vector<8x32xf32> to vector<8xf32>
    %646 = vector.shape_cast %645 : vector<8xf32> to vector<8x1xf32>
    %cst_212 = arith.constant 3.200000e+01 : f32
    %647 = vector.broadcast %cst_212 : f32 to vector<8x1xf32>
    %648 = arith.divf %646, %647 : vector<8x1xf32>
    %649 = vector.broadcast %648 : vector<8x1xf32> to vector<8x32xf32>
    %650 = arith.subf %644, %649 : vector<8x32xf32>
    %651 = arith.mulf %650, %650 : vector<8x32xf32>
    %cst_213 = arith.constant dense<0.000000e+00> : vector<8xf32>
    %652 = vector.multi_reduction <add>, %651, %cst_213 [1] : vector<8x32xf32> to vector<8xf32>
    %653 = vector.shape_cast %652 : vector<8xf32> to vector<8x1xf32>
    %cst_214 = arith.constant 3.200000e+01 : f32
    %654 = vector.broadcast %cst_214 : f32 to vector<8x1xf32>
    %655 = arith.divf %653, %654 : vector<8x1xf32>
    %cst_215 = arith.constant 9.99999974E-6 : f32
    %656 = vector.broadcast %cst_215 : f32 to vector<8x1xf32>
    %657 = arith.addf %655, %656 : vector<8x1xf32>
    %658 = math.rsqrt %657 : vector<8x1xf32>
    %659 = vector.broadcast %658 : vector<8x1xf32> to vector<8x32xf32>
    %660 = arith.mulf %650, %659 : vector<8x32xf32>
    %661 = vector.broadcast %612 : vector<1x32xf32> to vector<8x32xf32>
    %662 = arith.mulf %660, %661 : vector<8x32xf32>
    %663 = vector.broadcast %613 : vector<1x32xf32> to vector<8x32xf32>
    %664 = arith.addf %662, %663 : vector<8x32xf32>
    %c0_216 = arith.constant 0 : index
    %c1_217 = arith.constant 1 : index
    %c0_218 = arith.constant 0 : index
    %665 = vector.load %arg14[%c0_216, %c1_217, %c0_218] : memref<8x8x32xf32, #tpu.memory_space<vmem>>, vector<8x1x32xf32>
    %666 = vector.shape_cast %665 : vector<8x1x32xf32> to vector<8x32xf32>
    %667 = vector.shape_cast %664 : vector<8x32xf32> to vector<8x1x32xf32>
    tpu.vector_store %arg14[%c0_216, %c1_217, %c0_218], %667 {strides = array<i32>} : memref<8x8x32xf32, #tpu.memory_space<vmem>>, vector<8x1x32xf32>,
    %668 = vector.extract_strided_slice %611 {offsets = [16, 0], sizes = [8, 32], strides = [1, 1]} : vector<64x32xf32> to vector<8x32xf32>
    %c0_219 = arith.constant 0 : index
    %c2 = arith.constant 2 : index
    %c0_220 = arith.constant 0 : index
    %669 = vector.load %arg3[%c0_219, %c2, %c0_220] : memref<8x8x32xf32, #tpu.memory_space<vmem>>, vector<8x1x32xf32>
    %670 = vector.shape_cast %669 : vector<8x1x32xf32> to vector<8x32xf32>
    %671 = arith.addf %670, %668 : vector<8x32xf32>
    %cst_221 = arith.constant dense<0.000000e+00> : vector<8xf32>
    %672 = vector.multi_reduction <add>, %671, %cst_221 [1] : vector<8x32xf32> to vector<8xf32>
    %673 = vector.shape_cast %672 : vector<8xf32> to vector<8x1xf32>
    %cst_222 = arith.constant 3.200000e+01 : f32
    %674 = vector.broadcast %cst_222 : f32 to vector<8x1xf32>
    %675 = arith.divf %673, %674 : vector<8x1xf32>
    %676 = vector.broadcast %675 : vector<8x1xf32> to vector<8x32xf32>
    %677 = arith.subf %671, %676 : vector<8x32xf32>
    %678 = arith.mulf %677, %677 : vector<8x32xf32>
    %cst_223 = arith.constant dense<0.000000e+00> : vector<8xf32>
    %679 = vector.multi_reduction <add>, %678, %cst_223 [1] : vector<8x32xf32> to vector<8xf32>
    %680 = vector.shape_cast %679 : vector<8xf32> to vector<8x1xf32>
    %cst_224 = arith.constant 3.200000e+01 : f32
    %681 = vector.broadcast %cst_224 : f32 to vector<8x1xf32>
    %682 = arith.divf %680, %681 : vector<8x1xf32>
    %cst_225 = arith.constant 9.99999974E-6 : f32
    %683 = vector.broadcast %cst_225 : f32 to vector<8x1xf32>
    %684 = arith.addf %682, %683 : vector<8x1xf32>
    %685 = math.rsqrt %684 : vector<8x1xf32>
    %686 = vector.broadcast %685 : vector<8x1xf32> to vector<8x32xf32>
    %687 = arith.mulf %677, %686 : vector<8x32xf32>
    %688 = vector.broadcast %612 : vector<1x32xf32> to vector<8x32xf32>
    %689 = arith.mulf %687, %688 : vector<8x32xf32>
    %690 = vector.broadcast %613 : vector<1x32xf32> to vector<8x32xf32>
    %691 = arith.addf %689, %690 : vector<8x32xf32>
    %c0_226 = arith.constant 0 : index
    %c2_227 = arith.constant 2 : index
    %c0_228 = arith.constant 0 : index
    %692 = vector.load %arg14[%c0_226, %c2_227, %c0_228] : memref<8x8x32xf32, #tpu.memory_space<vmem>>, vector<8x1x32xf32>
    %693 = vector.shape_cast %692 : vector<8x1x32xf32> to vector<8x32xf32>
    %694 = vector.shape_cast %691 : vector<8x32xf32> to vector<8x1x32xf32>
    tpu.vector_store %arg14[%c0_226, %c2_227, %c0_228], %694 {strides = array<i32>} : memref<8x8x32xf32, #tpu.memory_space<vmem>>, vector<8x1x32xf32>,
    %695 = vector.extract_strided_slice %611 {offsets = [24, 0], sizes = [8, 32], strides = [1, 1]} : vector<64x32xf32> to vector<8x32xf32>
    %c0_229 = arith.constant 0 : index
    %c3 = arith.constant 3 : index
    %c0_230 = arith.constant 0 : index
    %696 = vector.load %arg3[%c0_229, %c3, %c0_230] : memref<8x8x32xf32, #tpu.memory_space<vmem>>, vector<8x1x32xf32>
    %697 = vector.shape_cast %696 : vector<8x1x32xf32> to vector<8x32xf32>
    %698 = arith.addf %697, %695 : vector<8x32xf32>
    %cst_231 = arith.constant dense<0.000000e+00> : vector<8xf32>
    %699 = vector.multi_reduction <add>, %698, %cst_231 [1] : vector<8x32xf32> to vector<8xf32>
    %700 = vector.shape_cast %699 : vector<8xf32> to vector<8x1xf32>
    %cst_232 = arith.constant 3.200000e+01 : f32
    %701 = vector.broadcast %cst_232 : f32 to vector<8x1xf32>
    %702 = arith.divf %700, %701 : vector<8x1xf32>
    %703 = vector.broadcast %702 : vector<8x1xf32> to vector<8x32xf32>
    %704 = arith.subf %698, %703 : vector<8x32xf32>
    %705 = arith.mulf %704, %704 : vector<8x32xf32>
    %cst_233 = arith.constant dense<0.000000e+00> : vector<8xf32>
    %706 = vector.multi_reduction <add>, %705, %cst_233 [1] : vector<8x32xf32> to vector<8xf32>
    %707 = vector.shape_cast %706 : vector<8xf32> to vector<8x1xf32>
    %cst_234 = arith.constant 3.200000e+01 : f32
    %708 = vector.broadcast %cst_234 : f32 to vector<8x1xf32>
    %709 = arith.divf %707, %708 : vector<8x1xf32>
    %cst_235 = arith.constant 9.99999974E-6 : f32
    %710 = vector.broadcast %cst_235 : f32 to vector<8x1xf32>
    %711 = arith.addf %709, %710 : vector<8x1xf32>
    %712 = math.rsqrt %711 : vector<8x1xf32>
    %713 = vector.broadcast %712 : vector<8x1xf32> to vector<8x32xf32>
    %714 = arith.mulf %704, %713 : vector<8x32xf32>
    %715 = vector.broadcast %612 : vector<1x32xf32> to vector<8x32xf32>
    %716 = arith.mulf %714, %715 : vector<8x32xf32>
    %717 = vector.broadcast %613 : vector<1x32xf32> to vector<8x32xf32>
    %718 = arith.addf %716, %717 : vector<8x32xf32>
    %c0_236 = arith.constant 0 : index
    %c3_237 = arith.constant 3 : index
    %c0_238 = arith.constant 0 : index
    %719 = vector.load %arg14[%c0_236, %c3_237, %c0_238] : memref<8x8x32xf32, #tpu.memory_space<vmem>>, vector<8x1x32xf32>
    %720 = vector.shape_cast %719 : vector<8x1x32xf32> to vector<8x32xf32>
    %721 = vector.shape_cast %718 : vector<8x32xf32> to vector<8x1x32xf32>
    tpu.vector_store %arg14[%c0_236, %c3_237, %c0_238], %721 {strides = array<i32>} : memref<8x8x32xf32, #tpu.memory_space<vmem>>, vector<8x1x32xf32>,
    %722 = vector.extract_strided_slice %611 {offsets = [32, 0], sizes = [8, 32], strides = [1, 1]} : vector<64x32xf32> to vector<8x32xf32>
    %c0_239 = arith.constant 0 : index
    %c4 = arith.constant 4 : index
    %c0_240 = arith.constant 0 : index
    %723 = vector.load %arg3[%c0_239, %c4, %c0_240] : memref<8x8x32xf32, #tpu.memory_space<vmem>>, vector<8x1x32xf32>
    %724 = vector.shape_cast %723 : vector<8x1x32xf32> to vector<8x32xf32>
    %725 = arith.addf %724, %722 : vector<8x32xf32>
    %cst_241 = arith.constant dense<0.000000e+00> : vector<8xf32>
    %726 = vector.multi_reduction <add>, %725, %cst_241 [1] : vector<8x32xf32> to vector<8xf32>
    %727 = vector.shape_cast %726 : vector<8xf32> to vector<8x1xf32>
    %cst_242 = arith.constant 3.200000e+01 : f32
    %728 = vector.broadcast %cst_242 : f32 to vector<8x1xf32>
    %729 = arith.divf %727, %728 : vector<8x1xf32>
    %730 = vector.broadcast %729 : vector<8x1xf32> to vector<8x32xf32>
    %731 = arith.subf %725, %730 : vector<8x32xf32>
    %732 = arith.mulf %731, %731 : vector<8x32xf32>
    %cst_243 = arith.constant dense<0.000000e+00> : vector<8xf32>
    %733 = vector.multi_reduction <add>, %732, %cst_243 [1] : vector<8x32xf32> to vector<8xf32>
    %734 = vector.shape_cast %733 : vector<8xf32> to vector<8x1xf32>
    %cst_244 = arith.constant 3.200000e+01 : f32
    %735 = vector.broadcast %cst_244 : f32 to vector<8x1xf32>
    %736 = arith.divf %734, %735 : vector<8x1xf32>
    %cst_245 = arith.constant 9.99999974E-6 : f32
    %737 = vector.broadcast %cst_245 : f32 to vector<8x1xf32>
    %738 = arith.addf %736, %737 : vector<8x1xf32>
    %739 = math.rsqrt %738 : vector<8x1xf32>
    %740 = vector.broadcast %739 : vector<8x1xf32> to vector<8x32xf32>
    %741 = arith.mulf %731, %740 : vector<8x32xf32>
    %742 = vector.broadcast %612 : vector<1x32xf32> to vector<8x32xf32>
    %743 = arith.mulf %741, %742 : vector<8x32xf32>
    %744 = vector.broadcast %613 : vector<1x32xf32> to vector<8x32xf32>
    %745 = arith.addf %743, %744 : vector<8x32xf32>
    %c0_246 = arith.constant 0 : index
    %c4_247 = arith.constant 4 : index
    %c0_248 = arith.constant 0 : index
    %746 = vector.load %arg14[%c0_246, %c4_247, %c0_248] : memref<8x8x32xf32, #tpu.memory_space<vmem>>, vector<8x1x32xf32>
    %747 = vector.shape_cast %746 : vector<8x1x32xf32> to vector<8x32xf32>
    %748 = vector.shape_cast %745 : vector<8x32xf32> to vector<8x1x32xf32>
    tpu.vector_store %arg14[%c0_246, %c4_247, %c0_248], %748 {strides = array<i32>} : memref<8x8x32xf32, #tpu.memory_space<vmem>>, vector<8x1x32xf32>,
    %749 = vector.extract_strided_slice %611 {offsets = [40, 0], sizes = [8, 32], strides = [1, 1]} : vector<64x32xf32> to vector<8x32xf32>
    %c0_249 = arith.constant 0 : index
    %c5 = arith.constant 5 : index
    %c0_250 = arith.constant 0 : index
    %750 = vector.load %arg3[%c0_249, %c5, %c0_250] : memref<8x8x32xf32, #tpu.memory_space<vmem>>, vector<8x1x32xf32>
    %751 = vector.shape_cast %750 : vector<8x1x32xf32> to vector<8x32xf32>
    %752 = arith.addf %751, %749 : vector<8x32xf32>
    %cst_251 = arith.constant dense<0.000000e+00> : vector<8xf32>
    %753 = vector.multi_reduction <add>, %752, %cst_251 [1] : vector<8x32xf32> to vector<8xf32>
    %754 = vector.shape_cast %753 : vector<8xf32> to vector<8x1xf32>
    %cst_252 = arith.constant 3.200000e+01 : f32
    %755 = vector.broadcast %cst_252 : f32 to vector<8x1xf32>
    %756 = arith.divf %754, %755 : vector<8x1xf32>
    %757 = vector.broadcast %756 : vector<8x1xf32> to vector<8x32xf32>
    %758 = arith.subf %752, %757 : vector<8x32xf32>
    %759 = arith.mulf %758, %758 : vector<8x32xf32>
    %cst_253 = arith.constant dense<0.000000e+00> : vector<8xf32>
    %760 = vector.multi_reduction <add>, %759, %cst_253 [1] : vector<8x32xf32> to vector<8xf32>
    %761 = vector.shape_cast %760 : vector<8xf32> to vector<8x1xf32>
    %cst_254 = arith.constant 3.200000e+01 : f32
    %762 = vector.broadcast %cst_254 : f32 to vector<8x1xf32>
    %763 = arith.divf %761, %762 : vector<8x1xf32>
    %cst_255 = arith.constant 9.99999974E-6 : f32
    %764 = vector.broadcast %cst_255 : f32 to vector<8x1xf32>
    %765 = arith.addf %763, %764 : vector<8x1xf32>
    %766 = math.rsqrt %765 : vector<8x1xf32>
    %767 = vector.broadcast %766 : vector<8x1xf32> to vector<8x32xf32>
    %768 = arith.mulf %758, %767 : vector<8x32xf32>
    %769 = vector.broadcast %612 : vector<1x32xf32> to vector<8x32xf32>
    %770 = arith.mulf %768, %769 : vector<8x32xf32>
    %771 = vector.broadcast %613 : vector<1x32xf32> to vector<8x32xf32>
    %772 = arith.addf %770, %771 : vector<8x32xf32>
    %c0_256 = arith.constant 0 : index
    %c5_257 = arith.constant 5 : index
    %c0_258 = arith.constant 0 : index
    %773 = vector.load %arg14[%c0_256, %c5_257, %c0_258] : memref<8x8x32xf32, #tpu.memory_space<vmem>>, vector<8x1x32xf32>
    %774 = vector.shape_cast %773 : vector<8x1x32xf32> to vector<8x32xf32>
    %775 = vector.shape_cast %772 : vector<8x32xf32> to vector<8x1x32xf32>
    tpu.vector_store %arg14[%c0_256, %c5_257, %c0_258], %775 {strides = array<i32>} : memref<8x8x32xf32, #tpu.memory_space<vmem>>, vector<8x1x32xf32>,
    %776 = vector.extract_strided_slice %611 {offsets = [48, 0], sizes = [8, 32], strides = [1, 1]} : vector<64x32xf32> to vector<8x32xf32>
    %c0_259 = arith.constant 0 : index
    %c6 = arith.constant 6 : index
    %c0_260 = arith.constant 0 : index
    %777 = vector.load %arg3[%c0_259, %c6, %c0_260] : memref<8x8x32xf32, #tpu.memory_space<vmem>>, vector<8x1x32xf32>
    %778 = vector.shape_cast %777 : vector<8x1x32xf32> to vector<8x32xf32>
    %779 = arith.addf %778, %776 : vector<8x32xf32>
    %cst_261 = arith.constant dense<0.000000e+00> : vector<8xf32>
    %780 = vector.multi_reduction <add>, %779, %cst_261 [1] : vector<8x32xf32> to vector<8xf32>
    %781 = vector.shape_cast %780 : vector<8xf32> to vector<8x1xf32>
    %cst_262 = arith.constant 3.200000e+01 : f32
    %782 = vector.broadcast %cst_262 : f32 to vector<8x1xf32>
    %783 = arith.divf %781, %782 : vector<8x1xf32>
    %784 = vector.broadcast %783 : vector<8x1xf32> to vector<8x32xf32>
    %785 = arith.subf %779, %784 : vector<8x32xf32>
    %786 = arith.mulf %785, %785 : vector<8x32xf32>
    %cst_263 = arith.constant dense<0.000000e+00> : vector<8xf32>
    %787 = vector.multi_reduction <add>, %786, %cst_263 [1] : vector<8x32xf32> to vector<8xf32>
    %788 = vector.shape_cast %787 : vector<8xf32> to vector<8x1xf32>
    %cst_264 = arith.constant 3.200000e+01 : f32
    %789 = vector.broadcast %cst_264 : f32 to vector<8x1xf32>
    %790 = arith.divf %788, %789 : vector<8x1xf32>
    %cst_265 = arith.constant 9.99999974E-6 : f32
    %791 = vector.broadcast %cst_265 : f32 to vector<8x1xf32>
    %792 = arith.addf %790, %791 : vector<8x1xf32>
    %793 = math.rsqrt %792 : vector<8x1xf32>
    %794 = vector.broadcast %793 : vector<8x1xf32> to vector<8x32xf32>
    %795 = arith.mulf %785, %794 : vector<8x32xf32>
    %796 = vector.broadcast %612 : vector<1x32xf32> to vector<8x32xf32>
    %797 = arith.mulf %795, %796 : vector<8x32xf32>
    %798 = vector.broadcast %613 : vector<1x32xf32> to vector<8x32xf32>
    %799 = arith.addf %797, %798 : vector<8x32xf32>
    %c0_266 = arith.constant 0 : index
    %c6_267 = arith.constant 6 : index
    %c0_268 = arith.constant 0 : index
    %800 = vector.load %arg14[%c0_266, %c6_267, %c0_268] : memref<8x8x32xf32, #tpu.memory_space<vmem>>, vector<8x1x32xf32>
    %801 = vector.shape_cast %800 : vector<8x1x32xf32> to vector<8x32xf32>
    %802 = vector.shape_cast %799 : vector<8x32xf32> to vector<8x1x32xf32>
    tpu.vector_store %arg14[%c0_266, %c6_267, %c0_268], %802 {strides = array<i32>} : memref<8x8x32xf32, #tpu.memory_space<vmem>>, vector<8x1x32xf32>,
    %803 = vector.extract_strided_slice %611 {offsets = [56, 0], sizes = [8, 32], strides = [1, 1]} : vector<64x32xf32> to vector<8x32xf32>
    %c0_269 = arith.constant 0 : index
    %c7 = arith.constant 7 : index
    %c0_270 = arith.constant 0 : index
    %804 = vector.load %arg3[%c0_269, %c7, %c0_270] : memref<8x8x32xf32, #tpu.memory_space<vmem>>, vector<8x1x32xf32>
    %805 = vector.shape_cast %804 : vector<8x1x32xf32> to vector<8x32xf32>
    %806 = arith.addf %805, %803 : vector<8x32xf32>
    %cst_271 = arith.constant dense<0.000000e+00> : vector<8xf32>
    %807 = vector.multi_reduction <add>, %806, %cst_271 [1] : vector<8x32xf32> to vector<8xf32>
    %808 = vector.shape_cast %807 : vector<8xf32> to vector<8x1xf32>
    %cst_272 = arith.constant 3.200000e+01 : f32
    %809 = vector.broadcast %cst_272 : f32 to vector<8x1xf32>
    %810 = arith.divf %808, %809 : vector<8x1xf32>
    %811 = vector.broadcast %810 : vector<8x1xf32> to vector<8x32xf32>
    %812 = arith.subf %806, %811 : vector<8x32xf32>
    %813 = arith.mulf %812, %812 : vector<8x32xf32>
    %cst_273 = arith.constant dense<0.000000e+00> : vector<8xf32>
    %814 = vector.multi_reduction <add>, %813, %cst_273 [1] : vector<8x32xf32> to vector<8xf32>
    %815 = vector.shape_cast %814 : vector<8xf32> to vector<8x1xf32>
    %cst_274 = arith.constant 3.200000e+01 : f32
    %816 = vector.broadcast %cst_274 : f32 to vector<8x1xf32>
    %817 = arith.divf %815, %816 : vector<8x1xf32>
    %cst_275 = arith.constant 9.99999974E-6 : f32
    %818 = vector.broadcast %cst_275 : f32 to vector<8x1xf32>
    %819 = arith.addf %817, %818 : vector<8x1xf32>
    %820 = math.rsqrt %819 : vector<8x1xf32>
    %821 = vector.broadcast %820 : vector<8x1xf32> to vector<8x32xf32>
    %822 = arith.mulf %812, %821 : vector<8x32xf32>
    %823 = vector.broadcast %612 : vector<1x32xf32> to vector<8x32xf32>
    %824 = arith.mulf %822, %823 : vector<8x32xf32>
    %825 = vector.broadcast %613 : vector<1x32xf32> to vector<8x32xf32>
    %826 = arith.addf %824, %825 : vector<8x32xf32>
    %c0_276 = arith.constant 0 : index
    %c7_277 = arith.constant 7 : index
    %c0_278 = arith.constant 0 : index
    %827 = vector.load %arg14[%c0_276, %c7_277, %c0_278] : memref<8x8x32xf32, #tpu.memory_space<vmem>>, vector<8x1x32xf32>
    %828 = vector.shape_cast %827 : vector<8x1x32xf32> to vector<8x32xf32>
    %829 = vector.shape_cast %826 : vector<8x32xf32> to vector<8x1x32xf32>
    tpu.vector_store %arg14[%c0_276, %c7_277, %c0_278], %829 {strides = array<i32>} : memref<8x8x32xf32, #tpu.memory_space<vmem>>, vector<8x1x32xf32>,
    return
  }
  func.func @transform_0(%arg0: i32) -> (i32, i32) {
    %c0_i32 = arith.constant 0 : i32
    %c0_i32_0 = arith.constant 0 : i32
    return %arg0, %c0_i32 : i32, i32
  }
  func.func @transform_1(%arg0: i32) -> (i32, i32) {
    %c0_i32 = arith.constant 0 : i32
    %c0_i32_0 = arith.constant 0 : i32
    return %arg0, %c0_i32 : i32, i32
  }
  func.func @transform_2(%arg0: i32) -> (i32, i32, i32) {
    %c0_i32 = arith.constant 0 : i32
    %c0_i32_0 = arith.constant 0 : i32
    %c0_i32_1 = arith.constant 0 : i32
    return %c0_i32, %arg0, %c0_i32_0 : i32, i32, i32
  }
  func.func @transform_3(%arg0: i32) -> (i32, i32) {
    %c0_i32 = arith.constant 0 : i32
    %c0_i32_0 = arith.constant 0 : i32
    %c0_i32_1 = arith.constant 0 : i32
    return %c0_i32, %c0_i32_0 : i32, i32
  }
  func.func @transform_4(%arg0: i32) -> (i32, i32) {
    %c0_i32 = arith.constant 0 : i32
    %c0_i32_0 = arith.constant 0 : i32
    %c0_i32_1 = arith.constant 0 : i32
    return %c0_i32, %c0_i32_0 : i32, i32
  }
  func.func @transform_5(%arg0: i32) -> (i32, i32) {
    %c0_i32 = arith.constant 0 : i32
    %c0_i32_0 = arith.constant 0 : i32
    %c0_i32_1 = arith.constant 0 : i32
    return %c0_i32, %c0_i32_0 : i32, i32
  }
  func.func @transform_6(%arg0: i32) -> (i32, i32) {
    %c0_i32 = arith.constant 0 : i32
    %c0_i32_0 = arith.constant 0 : i32
    %c0_i32_1 = arith.constant 0 : i32
    return %c0_i32, %c0_i32_0 : i32, i32
  }
  func.func @transform_7(%arg0: i32) -> (i32, i32) {
    %c0_i32 = arith.constant 0 : i32
    %c0_i32_0 = arith.constant 0 : i32
    %c0_i32_1 = arith.constant 0 : i32
    return %c0_i32, %c0_i32_0 : i32, i32
  }
  func.func @transform_8(%arg0: i32) -> (i32, i32) {
    %c0_i32 = arith.constant 0 : i32
    %c0_i32_0 = arith.constant 0 : i32
    %c0_i32_1 = arith.constant 0 : i32
    return %c0_i32, %c0_i32_0 : i32, i32
  }
  func.func @transform_9(%arg0: i32) -> (i32, i32) {
    %c0_i32 = arith.constant 0 : i32
    %c0_i32_0 = arith.constant 0 : i32
    %c0_i32_1 = arith.constant 0 : i32
    return %c0_i32, %c0_i32_0 : i32, i32
  }
  func.func @transform_10(%arg0: i32) -> (i32, i32) {
    %c0_i32 = arith.constant 0 : i32
    %c0_i32_0 = arith.constant 0 : i32
    %c0_i32_1 = arith.constant 0 : i32
    return %c0_i32, %c0_i32_0 : i32, i32
  }
  func.func @transform_11(%arg0: i32) -> (i32, i32) {
    %c0_i32 = arith.constant 0 : i32
    %c0_i32_0 = arith.constant 0 : i32
    %c0_i32_1 = arith.constant 0 : i32
    return %c0_i32, %c0_i32_0 : i32, i32
  }
  func.func @transform_12(%arg0: i32) -> (i32, i32) {
    %c0_i32 = arith.constant 0 : i32
    %c0_i32_0 = arith.constant 0 : i32
    %c0_i32_1 = arith.constant 0 : i32
    return %c0_i32, %c0_i32_0 : i32, i32
  }
  func.func @transform_13(%arg0: i32) -> (i32, i32, i32) {
    %c0_i32 = arith.constant 0 : i32
    %c0_i32_0 = arith.constant 0 : i32
    %c0_i32_1 = arith.constant 0 : i32
    return %c0_i32, %arg0, %c0_i32_0 : i32, i32, i32
  }
}

module attributes {stable_mosaic.version = 11 : i64} {
  func.func @_ffn_block_kernel(%arg0: i32, %arg1: memref<64x32xf32, #tpu.memory_space<vmem>>, %arg2: memref<32x64xf32, #tpu.memory_space<vmem>>, %arg3: memref<1x64xf32, #tpu.memory_space<vmem>>, %arg4: memref<64x32xf32, #tpu.memory_space<vmem>>, %arg5: memref<1x32xf32, #tpu.memory_space<vmem>>, %arg6: memref<1x32xf32, #tpu.memory_space<vmem>>, %arg7: memref<1x32xf32, #tpu.memory_space<vmem>>, %arg8: memref<64x32xf32, #tpu.memory_space<vmem>>) attributes {dimension_semantics = [#tpu.dimension_semantics<parallel>], iteration_bounds = array<i64: 1>, scalar_prefetch = 0 : i64, scratch_operands = 0 : i64, tpu.core_type = #tpu.core_type<tc>, window_params = [{transform_indices = @transform_0, window_bounds = array<i64: 64, 32>}, {pipeline_mode = #tpu.pipeline_mode<synchronous>, transform_indices = @transform_1, window_bounds = array<i64: 32, 64>}, {pipeline_mode = #tpu.pipeline_mode<synchronous>, transform_indices = @transform_2, window_bounds = array<i64: 1, 64>}, {pipeline_mode = #tpu.pipeline_mode<synchronous>, transform_indices = @transform_3, window_bounds = array<i64: 64, 32>}, {pipeline_mode = #tpu.pipeline_mode<synchronous>, transform_indices = @transform_4, window_bounds = array<i64: 1, 32>}, {pipeline_mode = #tpu.pipeline_mode<synchronous>, transform_indices = @transform_5, window_bounds = array<i64: 1, 32>}, {pipeline_mode = #tpu.pipeline_mode<synchronous>, transform_indices = @transform_6, window_bounds = array<i64: 1, 32>}, {transform_indices = @transform_7, window_bounds = array<i64: 64, 32>}]} {
    %c0 = arith.constant 0 : index
    %c0_0 = arith.constant 0 : index
    %0 = vector.load %arg1[%c0, %c0_0] : memref<64x32xf32, #tpu.memory_space<vmem>>, vector<64x32xf32>
    %c0_1 = arith.constant 0 : index
    %c0_2 = arith.constant 0 : index
    %1 = vector.load %arg2[%c0_1, %c0_2] : memref<32x64xf32, #tpu.memory_space<vmem>>, vector<32x64xf32>
    %cst = arith.constant dense<0.000000e+00> : vector<64x64xf32>
    %2 = tpu.matmul %0, %1, %cst {dimension_numbers = #tpu.dot_dimension_numbers<[1], [0], [0], [1], [0, 0, 1, 1], [], []>} : vector<64x32xf32>, vector<32x64xf32>, vector<64x64xf32> -> vector<64x64xf32>
    %c0_3 = arith.constant 0 : index
    %c0_4 = arith.constant 0 : index
    %3 = vector.load %arg3[%c0_3, %c0_4] : memref<1x64xf32, #tpu.memory_space<vmem>>, vector<1x64xf32>
    %4 = vector.broadcast %3 : vector<1x64xf32> to vector<64x64xf32>
    %5 = arith.addf %2, %4 : vector<64x64xf32>
    %cst_5 = arith.constant 0.000000e+00 : f32
    %6 = vector.broadcast %cst_5 : f32 to vector<64x64xf32>
    %7 = arith.maximumf %5, %6 : vector<64x64xf32>
    %c0_6 = arith.constant 0 : index
    %c0_7 = arith.constant 0 : index
    %8 = vector.load %arg4[%c0_6, %c0_7] : memref<64x32xf32, #tpu.memory_space<vmem>>, vector<64x32xf32>
    %cst_8 = arith.constant dense<0.000000e+00> : vector<64x32xf32>
    %9 = tpu.matmul %7, %8, %cst_8 {dimension_numbers = #tpu.dot_dimension_numbers<[1], [0], [0], [1], [0, 0, 1, 1], [], []>} : vector<64x64xf32>, vector<64x32xf32>, vector<64x32xf32> -> vector<64x32xf32>
    %c0_9 = arith.constant 0 : index
    %c0_10 = arith.constant 0 : index
    %10 = vector.load %arg5[%c0_9, %c0_10] : memref<1x32xf32, #tpu.memory_space<vmem>>, vector<1x32xf32>
    %11 = vector.broadcast %10 : vector<1x32xf32> to vector<64x32xf32>
    %12 = arith.addf %9, %11 : vector<64x32xf32>
    %13 = arith.addf %0, %12 : vector<64x32xf32>
    %cst_11 = arith.constant dense<0.000000e+00> : vector<64xf32>
    %14 = vector.multi_reduction <add>, %13, %cst_11 [1] : vector<64x32xf32> to vector<64xf32>
    %15 = vector.shape_cast %14 : vector<64xf32> to vector<64x1xf32>
    %cst_12 = arith.constant 3.200000e+01 : f32
    %16 = vector.broadcast %cst_12 : f32 to vector<64x1xf32>
    %17 = arith.divf %15, %16 : vector<64x1xf32>
    %18 = vector.broadcast %17 : vector<64x1xf32> to vector<64x32xf32>
    %19 = arith.subf %13, %18 : vector<64x32xf32>
    %20 = arith.mulf %19, %19 : vector<64x32xf32>
    %cst_13 = arith.constant dense<0.000000e+00> : vector<64xf32>
    %21 = vector.multi_reduction <add>, %20, %cst_13 [1] : vector<64x32xf32> to vector<64xf32>
    %22 = vector.shape_cast %21 : vector<64xf32> to vector<64x1xf32>
    %cst_14 = arith.constant 3.200000e+01 : f32
    %23 = vector.broadcast %cst_14 : f32 to vector<64x1xf32>
    %24 = arith.divf %22, %23 : vector<64x1xf32>
    %cst_15 = arith.constant 9.99999974E-6 : f32
    %25 = vector.broadcast %cst_15 : f32 to vector<64x1xf32>
    %26 = arith.addf %24, %25 : vector<64x1xf32>
    %27 = math.rsqrt %26 : vector<64x1xf32>
    %28 = vector.broadcast %27 : vector<64x1xf32> to vector<64x32xf32>
    %29 = arith.mulf %19, %28 : vector<64x32xf32>
    %c0_16 = arith.constant 0 : index
    %c0_17 = arith.constant 0 : index
    %30 = vector.load %arg6[%c0_16, %c0_17] : memref<1x32xf32, #tpu.memory_space<vmem>>, vector<1x32xf32>
    %31 = vector.broadcast %30 : vector<1x32xf32> to vector<64x32xf32>
    %32 = arith.mulf %29, %31 : vector<64x32xf32>
    %c0_18 = arith.constant 0 : index
    %c0_19 = arith.constant 0 : index
    %33 = vector.load %arg7[%c0_18, %c0_19] : memref<1x32xf32, #tpu.memory_space<vmem>>, vector<1x32xf32>
    %34 = vector.broadcast %33 : vector<1x32xf32> to vector<64x32xf32>
    %35 = arith.addf %32, %34 : vector<64x32xf32>
    %c0_20 = arith.constant 0 : index
    %c0_21 = arith.constant 0 : index
    %36 = vector.load %arg8[%c0_20, %c0_21] : memref<64x32xf32, #tpu.memory_space<vmem>>, vector<64x32xf32>
    tpu.vector_store %arg8[%c0_20, %c0_21], %35 {strides = array<i32>} : memref<64x32xf32, #tpu.memory_space<vmem>>, vector<64x32xf32>,
    return
  }
  func.func @transform_0(%arg0: i32) -> (i32, i32) {
    %c0_i32 = arith.constant 0 : i32
    %c0_i32_0 = arith.constant 0 : i32
    return %arg0, %c0_i32 : i32, i32
  }
  func.func @transform_1(%arg0: i32) -> (i32, i32) {
    %c0_i32 = arith.constant 0 : i32
    %c0_i32_0 = arith.constant 0 : i32
    %c0_i32_1 = arith.constant 0 : i32
    return %c0_i32, %c0_i32_0 : i32, i32
  }
  func.func @transform_2(%arg0: i32) -> (i32, i32) {
    %c0_i32 = arith.constant 0 : i32
    %c0_i32_0 = arith.constant 0 : i32
    %c0_i32_1 = arith.constant 0 : i32
    return %c0_i32, %c0_i32_0 : i32, i32
  }
  func.func @transform_3(%arg0: i32) -> (i32, i32) {
    %c0_i32 = arith.constant 0 : i32
    %c0_i32_0 = arith.constant 0 : i32
    %c0_i32_1 = arith.constant 0 : i32
    return %c0_i32, %c0_i32_0 : i32, i32
  }
  func.func @transform_4(%arg0: i32) -> (i32, i32) {
    %c0_i32 = arith.constant 0 : i32
    %c0_i32_0 = arith.constant 0 : i32
    %c0_i32_1 = arith.constant 0 : i32
    return %c0_i32, %c0_i32_0 : i32, i32
  }
  func.func @transform_5(%arg0: i32) -> (i32, i32) {
    %c0_i32 = arith.constant 0 : i32
    %c0_i32_0 = arith.constant 0 : i32
    %c0_i32_1 = arith.constant 0 : i32
    return %c0_i32, %c0_i32_0 : i32, i32
  }
  func.func @transform_6(%arg0: i32) -> (i32, i32) {
    %c0_i32 = arith.constant 0 : i32
    %c0_i32_0 = arith.constant 0 : i32
    %c0_i32_1 = arith.constant 0 : i32
    return %c0_i32, %c0_i32_0 : i32, i32
  }
  func.func @transform_7(%arg0: i32) -> (i32, i32) {
    %c0_i32 = arith.constant 0 : i32
    %c0_i32_0 = arith.constant 0 : i32
    return %arg0, %c0_i32 : i32, i32
  }
}

</mosaic_0001>

<bundles_post_ra>
// kernel: decoder_layer_forward.5
= control target key start
LH: loop header
LB: loop body
LE: loop exit
PB: predicated region body
PF: predicated region fallthrough
CT: control target
= control target key end

     0   :  { %s785_s0 = inlined_call_operand.vmem [shape: f32[64,32], index: 0, kind: input, shape index: {}]   ;;  %s786_s1 = inlined_call_operand.vmem [shape: f32[32,64], index: 1, kind: input, shape index: {}]   ;;  %s787_s2 = inlined_call_operand.vmem [shape: f32[1,64], index: 2, kind: input, shape index: {}]   ;;  %s788_s3 = inlined_call_operand.vmem [shape: f32[64,32], index: 3, kind: input, shape index: {}]   ;;  %s789_s4 = inlined_call_operand.vmem [shape: f32[1,32], index: 4, kind: input, shape index: {}]   ;;  %s790_s5 = inlined_call_operand.vmem [shape: f32[1,32], index: 5, kind: input, shape index: {}]   ;;  %s791_s6 = inlined_call_operand.vmem [shape: f32[1,32], index: 6, kind: input, shape index: {}]   ;;  %s792_s7 = inlined_call_operand.hbm [shape: f32[64,32], index: 7, kind: output, shape index: {}]  }
   0x1   :  { %v38_v0 = vld [vmem:[%s786_s1 + $0x18] sm:$0xff]  ;;  %v37_v1 = vld [vmem:[%s786_s1 + $0x10] sm:$0xff]  ;;  %v36_v2 = vld [vmem:[%s786_s1 + $0x8] sm:$0xff] }
   0x2   :  { %80 = vmatpush.msra.mxu0 %v38_v0  ;;  %452 = vmatpush.msra.mxu3 %v38_v0  ;;  %v35_v3 = vld [vmem:[%s786_s1] sm:$0xff] }
   0x4   :  { %81 = vmatpush.msra.mxu0 %v37_v1  ;;  %453 = vmatpush.msra.mxu3 %v37_v1 }
   0x5   :  { %12 = vsyncpa [#allocation3], 0  ;;  %v575_v4 = vld [vmem:[%s785_s0] sm:$0xff]  ;;  %vm43_vm0 = vcmask 261120   ;;  %v582_v5 = vld [vmem:[%s785_s0 + $0x28] sm:$0xff]  ;;  %vm129_vm1 = vcmask 523264  }
   0x6   :  { %82 = vmatpush.msra.mxu0 %v36_v2  ;;  %454 = vmatpush.msra.mxu3 %v36_v2  ;;  %v124_v6 = vld [vmem:[%s788_s3 + $0x38] sm:$0xff]  ;;  %v123_v7 = vld [vmem:[%s788_s3 + $0x30] sm:$0xff]  ;;  %v122_v8 = vld [vmem:[%s788_s3 + $0x28] sm:$0xff]  ;;  %s424_s22 = sshll.u32 %s792_s7, 4  ;;  %s518_s23 = smov 128   ;;  %s425_s22 = int_to_ptr.hbm [resolvable:$true] %s424_s22 }
   0x7   :  { %162 = vmatpush.msra.mxu1 %v124_v6  ;;  %456 = vmatpush.msra.mxu2 %v124_v6  ;;  %v598_v9 = vld [vmem:[%s785_s0 + $0x8] sm:$0xff]  ;;  %v121_v10 = vld [vmem:[%s788_s3 + $0x20] sm:$0xff]  ;;  %v606_v11 = vld [vmem:[%s785_s0 + $0x30] sm:$0xff]  ;;  %s519_s24 = smov 8  }
   0x8   :  { %83 = vmatpush.msra.mxu0 %v35_v3  ;;  %455 = vmatpush.msra.mxu3 %v35_v3  ;;  %v120_v12 = vld [vmem:[%s788_s3 + $0x18] sm:$0xff]  ;;  %v618_v13 = vld [vmem:[%s785_s0 + $0x10] sm:$0xff]  ;;  %v639_v16 = vld [vmem:[%s785_s0 + $0x20] sm:$0xff] }
   0x9   :  { %436 = vmatmul.msk.f32.vlgmr.msra.gmra.mxu0 %vm43_vm0, %v575_v4  ;;  %441 = vmatmul.msk.f32.vlgmr.msra.gmra.mxu3 %vm43_vm0, %v582_v5  ;;  %v623_v14 = vld [vmem:[%s785_s0 + $0x38] sm:$0xff]  ;;  %v119_v17 = vld [vmem:[%s788_s3 + $0x10] sm:$0xff]  ;;  %v118_v18 = vld [vmem:[%s788_s3 + $0x8] sm:$0xff] }
   0xa   :  { %163 = vmatpush.msra.mxu1 %v123_v7  ;;  %457 = vmatpush.msra.mxu2 %v123_v7  ;;  %v632_v15 = vld [vmem:[%s785_s0 + $0x18] sm:$0xff]  ;;  %v117_v19 = vld [vmem:[%s788_s3] sm:$0xff] }
   0xb   :  { %v468_v20 = vld [vmem:[%s787_s2] ss:$0 sm:$0xff] }
   0xc   :  { %164 = vmatpush.msra.mxu1 %v122_v8  ;;  %458 = vmatpush.msra.mxu2 %v122_v8  ;;  %v469_v45 = vld [vmem:[%s789_s4] ss:$0 sm:$0xff] }
   0xe   :  { %165 = vmatpush.msra.mxu1 %v121_v10  ;;  %459 = vmatpush.msra.mxu2 %v121_v10 }
  0x10   :  { %166 = vmatpush.msra.mxu1 %v120_v12  ;;  %460 = vmatpush.msra.mxu2 %v120_v12 }
  0x11   :  { %437 = vmatmul.msk.f32.gmra.mxu0 %vm43_vm0, %v598_v9  ;;  %442 = vmatmul.msk.f32.gmra.mxu3 %vm43_vm0, %v606_v11 }
  0x12   :  { %167 = vmatpush.msra.mxu1 %v119_v17  ;;  %461 = vmatpush.msra.mxu2 %v119_v17  ;;  %v516_v17 = vmov 32.0  }
  0x13   :  { %472 = vrcp.f32 %v516_v17  ;;  %v738_v17 = vld [vmem:[%s790_s5] ss:$0 sm:$0xff]  ;;  %s517_s5 = smov [#allocation2]  }
  0x14   :  { %168 = vmatpush.msra.mxu1 %v118_v18  ;;  %462 = vmatpush.msra.mxu2 %v118_v18 }
  0x16   :  { %169 = vmatpush.msra.mxu1 %v117_v19  ;;  %463 = vmatpush.msra.mxu2 %v117_v19 }
  0x19   :  { %438 = vmatmul.msk.f32.gmra.mxu0 %vm43_vm0, %v618_v13  ;;  %443 = vmatmul.msk.f32.gmra.mxu3 %vm43_vm0, %v623_v14 }
  0x21   :  { %439 = vmatmul.msk.f32.gmra.mxu0 %vm43_vm0, %v632_v15 }
  0x29   :  { %440 = vmatmul.msk.f32.gmra.mxu0 %vm43_vm0, %v639_v16 }
  0x86   :  { %v85_v21 = vpop.f32.mrf.mxu0 }
  0x87   :  { %v86_v22 = vadd.f32 %v468_v20, %v85_v21 }
  0x89   :  { %v109_v23 = vmax.f32 %v86_v22, 0.0 }
  0x8b   :  { %444 = vmatmul.msk.f32.vlgmr.msra.gmra.mxu1 %vm129_vm1, %v109_v23 }
  0x8c   :  { %v100_v33 = vpop.f32.mrf.mxu3 }
  0x8d   :  { %v101_v37 = vadd.f32 %v468_v20, %v100_v33 }
  0x8e   :  { %v88_v24 = vpop.f32.mrf.mxu0 }
  0x8f   :  { %v89_v25 = vadd.f32 %v468_v20, %v88_v24  ;;  %v114_v39 = vmax.f32 %v101_v37, 0.0 }
  0x91   :  { %v110_v26 = vmax.f32 %v89_v25, 0.0 }
  0x93   :  { %445 = vmatmul.msk.f32.gmra.mxu1 %vm129_vm1, %v110_v26 }
  0x94   :  { %v103_v38 = vpop.f32.mrf.mxu3 }
  0x95   :  { %v104_v40 = vadd.f32 %v468_v20, %v103_v38 }
  0x96   :  { %v91_v27 = vpop.f32.mrf.mxu0 }
  0x97   :  { %v92_v28 = vadd.f32 %v468_v20, %v91_v27  ;;  %v115_v41 = vmax.f32 %v104_v40, 0.0 }
  0x99   :  { %v111_v29 = vmax.f32 %v92_v28, 0.0 }
  0x9b   :  { %446 = vmatmul.msk.f32.gmra.mxu1 %vm129_vm1, %v111_v29 }
  0x9c   :  { %v106_v42 = vpop.f32.mrf.mxu3 }
  0x9d   :  { %v107_v43 = vadd.f32 %v468_v20, %v106_v42 }
  0x9e   :  { %v94_v30 = vpop.f32.mrf.mxu0 }
  0x9f   :  { %v95_v31 = vadd.f32 %v468_v20, %v94_v30  ;;  %v116_v44 = vmax.f32 %v107_v43, 0.0 }
  0xa1   :  { %v112_v32 = vmax.f32 %v95_v31, 0.0 }
  0xa3   :  { %447 = vmatmul.msk.f32.gmra.mxu1 %vm129_vm1, %v112_v32 }
  0xa6   :  { %v97_v34 = vpop.f32.mrf.mxu0 }
  0xa7   :  { %v98_v35 = vadd.f32 %v468_v20, %v97_v34 }
  0xa9   :  { %v113_v36 = vmax.f32 %v98_v35, 0.0 }
  0xab   :  { %448 = vmatmul.msk.f32.vlgmr.msra.gmra.mxu2 %vm129_vm1, %v113_v36 }
  0xb3   :  { %449 = vmatmul.msk.f32.gmra.mxu2 %vm129_vm1, %v114_v39 }
  0xbb   :  { %450 = vmatmul.msk.f32.gmra.mxu2 %vm129_vm1, %v115_v41 }
  0xc3   :  { %451 = vmatmul.msk.f32.gmra.mxu2 %vm129_vm1, %v116_v44 }
 0x108   :  { %v171_v46 = vpop.f32.mrf.mxu1 }
 0x109   :  { %v172_v47 = vadd.f32 %v469_v45, %v171_v46 }
 0x10b   :  { %v195_v48 = vadd.f32 %v172_v47, %v575_v4 }
 0x10d   :  { %v203_v49 = vsel %vm43_vm0, %v195_v48, 0.0 }
 0x10e   :  { %204 = vadd.xlane.f32.xlu0 %v203_v49 }
 0x110   :  { %v174_v50 = vpop.f32.mrf.mxu1 }
 0x111   :  { %v175_v51 = vadd.f32 %v469_v45, %v174_v50 }
 0x113   :  { %v196_v52 = vadd.f32 %v175_v51, %v598_v9 }
 0x115   :  { %v206_v53 = vsel %vm43_vm0, %v196_v52, 0.0 }
 0x116   :  { %207 = vadd.xlane.f32.xlu0 %v206_v53 }
 0x118   :  { %v177_v54 = vpop.f32.mrf.mxu1 }
 0x119   :  { %v178_v55 = vadd.f32 %v469_v45, %v177_v54 }
 0x11b   :  { %v197_v56 = vadd.f32 %v178_v55, %v618_v13 }
 0x11d   :  { %v209_v57 = vsel %vm43_vm0, %v197_v56, 0.0 }
 0x11e   :  { %210 = vadd.xlane.f32.xlu1 %v209_v57 }
 0x120   :  { %v180_v58 = vpop.f32.mrf.mxu1 }
 0x121   :  { %v181_v59 = vadd.f32 %v469_v45, %v180_v58 }
 0x123   :  { %v198_v60 = vadd.f32 %v181_v59, %v632_v15 }
 0x125   :  { %v212_v61 = vsel %vm43_vm0, %v198_v60, 0.0 }
 0x126   :  { %213 = vadd.xlane.f32.xlu1 %v212_v61 }
 0x12e   :  { %v183_v62 = vpop.f32.mrf.mxu2 }
 0x12f   :  { %v184_v63 = vadd.f32 %v469_v45, %v183_v62 }
 0x131   :  { %v199_v0 = vadd.f32 %v184_v63, %v639_v16 }
 0x133   :  { %v215_v1 = vsel %vm43_vm0, %v199_v0, 0.0 }
 0x134   :  { %216 = vadd.xlane.f32.xlu2 %v215_v1 }
 0x136   :  { %v186_v2 = vpop.f32.mrf.mxu2 }
 0x137   :  { %v187_v3 = vadd.f32 %v469_v45, %v186_v2 }
 0x139   :  { %v200_v4 = vadd.f32 %v187_v3, %v582_v5  ;;  %v473_v5 = vpop.eup %472 }
 0x13a   :  { %v228_v18 = vmul.f32 32.0, %v473_v5  ;;  %vm232_vm2 = vweird.f32 %v473_v5 }
 0x13b   :  { %v218_v6 = vsel %vm43_vm0, %v200_v4, 0.0 }
 0x13c   :  { %219 = vadd.xlane.f32.xlu2 %v218_v6  ;;  %v229_v19 = vsub.f32 1.0, %v228_v18 }
 0x13e   :  { %v189_v7 = vpop.f32.mrf.mxu2  ;;  %v230_v20 = vmul.f32 %v473_v5, %v229_v19  ;;  %v743_v19 = vld [vmem:[%s791_s6] ss:$0 sm:$0xff]  ;;  %s422_s6 = sshll.u32 %s517_s5, 4  ;;  %s423_s6 = int_to_ptr.vmem [resolvable:$true] %s422_s6 }
 0x13f   :  { %v190_v8 = vadd.f32 %v469_v45, %v189_v7 }
 0x140   :  { %v231_v21 = vadd.f32 %v473_v5, %v230_v20 }
 0x141   :  { %v201_v9 = vadd.f32 %v190_v8, %v606_v11 }
 0x142   :  { %v682_v22 = vsel %vm232_vm2, %v473_v5, %v231_v21 }
 0x143   :  { %v221_v10 = vsel %vm43_vm0, %v201_v9, 0.0 }
 0x144   :  { %222 = vadd.xlane.f32.xlu0 %v221_v10 }
 0x146   :  { %v192_v12 = vpop.f32.mrf.mxu2 }
 0x147   :  { %v193_v13 = vadd.f32 %v469_v45, %v192_v12 }
 0x149   :  { %v202_v15 = vadd.f32 %v193_v13, %v623_v14 }
 0x14b   :  { %v224_v16 = vsel %vm43_vm0, %v202_v15, 0.0 }
 0x14c   :  { %225 = vadd.xlane.f32.xlu1 %v224_v16 }
 0x181   :  { %v205_v11 = vpop.xlane.xlu0 %204 }
 0x182   :  { %v234_v23 = vmul.f32 %v682_v22, %v205_v11 }
 0x184   :  { %v685_v24 = vsub.f32 %v195_v48, %v234_v23 }
 0x186   :  { %v250_v14 = vmul.f32 %v685_v24, %v685_v24 }
 0x188   :  { %v258_v25 = vsel %vm43_vm0, %v250_v14, 0.0 }
 0x189   :  { %259 = vadd.xlane.f32.xlu2 %v258_v25  ;;  %v208_v26 = vpop.xlane.xlu0 %207 }
 0x18a   :  { %v235_v27 = vmul.f32 %v682_v22, %v208_v26 }
 0x18c   :  { %v691_v28 = vsub.f32 %v196_v52, %v235_v27 }
 0x18e   :  { %v251_v29 = vmul.f32 %v691_v28, %v691_v28 }
 0x190   :  { %v261_v30 = vsel %vm43_vm0, %v251_v29, 0.0 }
 0x191   :  { %v211_v31 = vpop.xlane.xlu1 %210  ;;  %262 = vadd.xlane.f32.xlu0 %v261_v30 }
 0x192   :  { %v236_v32 = vmul.f32 %v682_v22, %v211_v31 }
 0x194   :  { %v697_v33 = vsub.f32 %v197_v56, %v236_v32 }
 0x196   :  { %v252_v34 = vmul.f32 %v697_v33, %v697_v33 }
 0x198   :  { %v264_v35 = vsel %vm43_vm0, %v252_v34, 0.0 }
 0x199   :  { %265 = vadd.xlane.f32.xlu1 %v264_v35  ;;  %v214_v36 = vpop.xlane.xlu1 %213 }
 0x19a   :  { %v237_v37 = vmul.f32 %v682_v22, %v214_v36 }
 0x19c   :  { %v703_v38 = vsub.f32 %v198_v60, %v237_v37 }
 0x19e   :  { %v253_v39 = vmul.f32 %v703_v38, %v703_v38 }
 0x1a0   :  { %v267_v40 = vsel %vm43_vm0, %v253_v39, 0.0 }
 0x1a1   :  { %268 = vadd.xlane.f32.xlu2 %v267_v40 }
 0x1a7   :  { %v217_v41 = vpop.xlane.xlu2 %216 }
 0x1a8   :  { %v238_v42 = vmul.f32 %v682_v22, %v217_v41 }
 0x1aa   :  { %v709_v43 = vsub.f32 %v199_v0, %v238_v42 }
 0x1ac   :  { %v254_v44 = vmul.f32 %v709_v43, %v709_v43 }
 0x1ae   :  { %v270_v45 = vsel %vm43_vm0, %v254_v44, 0.0 }
 0x1af   :  { %v220_v46 = vpop.xlane.xlu2 %219  ;;  %271 = vadd.xlane.f32.xlu0 %v270_v45 }
 0x1b0   :  { %v239_v47 = vmul.f32 %v682_v22, %v220_v46 }
 0x1b2   :  { %v715_v48 = vsub.f32 %v200_v4, %v239_v47 }
 0x1b4   :  { %v255_v49 = vmul.f32 %v715_v48, %v715_v48 }
 0x1b6   :  { %v273_v50 = vsel %vm43_vm0, %v255_v49, 0.0 }
 0x1b7   :  { %274 = vadd.xlane.f32.xlu1 %v273_v50  ;;  %v223_v51 = vpop.xlane.xlu0 %222 }
 0x1b8   :  { %v240_v52 = vmul.f32 %v682_v22, %v223_v51 }
 0x1ba   :  { %v721_v53 = vsub.f32 %v201_v9, %v240_v52 }
 0x1bc   :  { %v256_v54 = vmul.f32 %v721_v53, %v721_v53 }
 0x1be   :  { %v276_v55 = vsel %vm43_vm0, %v256_v54, 0.0 }
 0x1bf   :  { %v226_v56 = vpop.xlane.xlu1 %225  ;;  %277 = vadd.xlane.f32.xlu2 %v276_v55 }
 0x1c0   :  { %v241_v57 = vmul.f32 %v682_v22, %v226_v56 }
 0x1c2   :  { %v727_v58 = vsub.f32 %v202_v15, %v241_v57 }
 0x1c4   :  { %v257_v59 = vmul.f32 %v727_v58, %v727_v58 }
 0x1c6   :  { %v279_v60 = vsel %vm43_vm0, %v257_v59, 0.0 }
 0x1c7   :  { %280 = vadd.xlane.f32.xlu0 %v279_v60 }
 0x1fc   :  { %v260_v61 = vpop.xlane.xlu2 %259 }
 0x1fd   :  { %v282_v62 = vmul.f32 %v260_v61, %v682_v22 }
 0x1ff   :  { %v290_v63 = vadd.f32 1e-05, %v282_v62 }
 0x201   :  { %474 = vrsqrt.f32 %v290_v63  ;;  %vm304_vm4 = vweird.f32 %v290_v63 }
 0x204   :  { %v263_v0 = vpop.xlane.xlu0 %262 }
 0x205   :  { %v283_v1 = vmul.f32 %v263_v0, %v682_v22 }
 0x207   :  { %v475_v2 = vpop.eup %474  ;;  %v291_v3 = vadd.f32 1e-05, %v283_v1 }
 0x208   :  { %v299_v4 = vmul.f32 %v475_v2, %v290_v63  ;;  %vm305_vm3 = vweird.f32 %v475_v2 }
 0x209   :  { %476 = vrsqrt.f32 %v291_v3  ;;  %vm306_vm5 = vmor %vm304_vm4, %vm305_vm3  ;;  %vm314_vm7 = vweird.f32 %v291_v3 }
 0x20a   :  { %v300_v6 = vmul.f32 %v475_v2, %v299_v4 }
 0x20c   :  { %v301_v7 = vmul.f32 0.5, %v300_v6  ;;  %v266_v8 = vpop.xlane.xlu1 %265 }
 0x20d   :  { %v284_v9 = vmul.f32 %v266_v8, %v682_v22 }
 0x20e   :  { %v302_v10 = vsub.f32 1.5, %v301_v7 }
 0x20f   :  { %v477_v12 = vpop.eup %476  ;;  %v292_v13 = vadd.f32 1e-05, %v284_v9 }
 0x210   :  { %v303_v15 = vmul.f32 %v475_v2, %v302_v10  ;;  %v309_v16 = vmul.f32 %v477_v12, %v291_v3  ;;  %vm315_vm6 = vweird.f32 %v477_v12 }
 0x211   :  { %478 = vrsqrt.f32 %v292_v13  ;;  %vm316_vm8 = vmor %vm314_vm7, %vm315_vm6  ;;  %vm324_vm10 = vweird.f32 %v292_v13 }
 0x212   :  { %v307_v5 = vsel %vm306_vm5, %v475_v2, %v303_v15  ;;  %v310_v18 = vmul.f32 %v477_v12, %v309_v16 }
 0x213   :  { %v378_v20 = vmul.f32 %v307_v5, %v685_v24 }
 0x214   :  { %v311_v21 = vmul.f32 0.5, %v310_v18  ;;  %v269_v11 = vpop.xlane.xlu2 %268 }
 0x215   :  { %v390_v23 = vmul.f32 %v738_v17, %v378_v20  ;;  %v285_v14 = vmul.f32 %v269_v11, %v682_v22 }
 0x216   :  { %v312_v25 = vsub.f32 1.5, %v311_v21 }
 0x217   :  { %v479_v26 = vpop.eup %478  ;;  %v402_v27 = vadd.f32 %v743_v19, %v390_v23  ;;  %v293_v29 = vadd.f32 1e-05, %v285_v14 }
 0x218   :  { %v313_v30 = vmul.f32 %v477_v12, %v312_v25  ;;  %v319_v31 = vmul.f32 %v479_v26, %v292_v13  ;;  %vm325_vm9 = vweird.f32 %v479_v26 }
 0x219   :  { %410 = vst.msk [vmem:[#allocation2] sm:$0xff] %vm43_vm0, %v402_v27  ;;  %480 = vrsqrt.f32 %v293_v29  ;;  %vm326_vm11 = vmor %vm324_vm10, %vm325_vm9  ;;  %vm334_vm13 = vweird.f32 %v293_v29 }
 0x21a   :  { %v317_v24 = vsel %vm316_vm8, %v477_v12, %v313_v30  ;;  %v320_v32 = vmul.f32 %v479_v26, %v319_v31 }
 0x21b   :  { %v379_v34 = vmul.f32 %v317_v24, %v691_v28 }
 0x21c   :  { %v321_v35 = vmul.f32 0.5, %v320_v32 }
 0x21d   :  { %v391_v36 = vmul.f32 %v738_v17, %v379_v34 }
 0x21e   :  { %v322_v37 = vsub.f32 1.5, %v321_v35 }
 0x21f   :  { %v481_v39 = vpop.eup %480  ;;  %v403_v40 = vadd.f32 %v743_v19, %v391_v36 }
 0x220   :  { %v323_v41 = vmul.f32 %v479_v26, %v322_v37  ;;  %v329_v42 = vmul.f32 %v481_v39, %v293_v29  ;;  %vm335_vm12 = vweird.f32 %v481_v39 }
 0x221   :  { %411 = vst.msk [vmem:[#allocation2 + $0x8] sm:$0xff] %vm43_vm0, %v403_v40  ;;  %vm336_vm14 = vmor %vm334_vm13, %vm335_vm12 }
 0x222   :  { %v327_v44 = vsel %vm326_vm11, %v479_v26, %v323_v41  ;;  %v330_v45 = vmul.f32 %v481_v39, %v329_v42  ;;  %v272_v46 = vpop.xlane.xlu0 %271 }
 0x223   :  { %v380_v47 = vmul.f32 %v327_v44, %v697_v33  ;;  %v286_v28 = vmul.f32 %v272_v46, %v682_v22 }
 0x224   :  { %v331_v49 = vmul.f32 0.5, %v330_v45 }
 0x225   :  { %v392_v50 = vmul.f32 %v738_v17, %v380_v47  ;;  %v294_v51 = vadd.f32 1e-05, %v286_v28 }
 0x226   :  { %v332_v52 = vsub.f32 1.5, %v331_v49 }
 0x227   :  { %v404_v54 = vadd.f32 %v743_v19, %v392_v50  ;;  %482 = vrsqrt.f32 %v294_v51  ;;  %vm344_vm1 = vweird.f32 %v294_v51 }
 0x228   :  { %v333_v55 = vmul.f32 %v481_v39, %v332_v52 }
 0x229   :  { %412 = vst.msk [vmem:[#allocation2 + $0x10] sm:$0xff] %vm43_vm0, %v404_v54 }
 0x22a   :  { %v337_v56 = vsel %vm336_vm14, %v481_v39, %v333_v55  ;;  %v275_v57 = vpop.xlane.xlu1 %274 }
 0x22b   :  { %v381_v33 = vmul.f32 %v337_v56, %v703_v38  ;;  %v287_v59 = vmul.f32 %v275_v57, %v682_v22 }
 0x22d   :  { %v483_v60 = vpop.eup %482  ;;  %v393_v61 = vmul.f32 %v738_v17, %v381_v33  ;;  %v295_v62 = vadd.f32 1e-05, %v287_v59 }
 0x22e   :  { %v339_v63 = vmul.f32 %v483_v60, %v294_v51  ;;  %vm345_vm15 = vweird.f32 %v483_v60 }
 0x22f   :  { %v405_v0 = vadd.f32 %v743_v19, %v393_v61  ;;  %484 = vrsqrt.f32 %v295_v62  ;;  %vm346_vm2 = vmor %vm344_vm1, %vm345_vm15  ;;  %vm354_vm4 = vweird.f32 %v295_v62 }
 0x230   :  { %v340_v1 = vmul.f32 %v483_v60, %v339_v63 }
 0x231   :  { %413 = vst.msk [vmem:[#allocation2 + $0x18] sm:$0xff] %vm43_vm0, %v405_v0 }
 0x232   :  { %v341_v2 = vmul.f32 0.5, %v340_v1  ;;  %v278_v3 = vpop.xlane.xlu2 %277 }
 0x233   :  { %v288_v4 = vmul.f32 %v278_v3, %v682_v22 }
 0x234   :  { %v342_v6 = vsub.f32 1.5, %v341_v2 }
 0x235   :  { %v485_v38 = vpop.eup %484  ;;  %v296_v7 = vadd.f32 1e-05, %v288_v4 }
 0x236   :  { %v343_v8 = vmul.f32 %v483_v60, %v342_v6  ;;  %v349_v9 = vmul.f32 %v485_v38, %v295_v62  ;;  %vm355_vm3 = vweird.f32 %v485_v38 }
 0x237   :  { %486 = vrsqrt.f32 %v296_v7  ;;  %vm356_vm5 = vmor %vm354_vm4, %vm355_vm3  ;;  %vm364_vm7 = vweird.f32 %v296_v7 }
 0x238   :  { %v347_v10 = vsel %vm346_vm2, %v483_v60, %v343_v8  ;;  %v350_v12 = vmul.f32 %v485_v38, %v349_v9 }
 0x239   :  { %v382_v13 = vmul.f32 %v347_v10, %v709_v43 }
 0x23a   :  { %v351_v15 = vmul.f32 0.5, %v350_v12  ;;  %v281_v16 = vpop.xlane.xlu0 %280 }
 0x23b   :  { %v394_v5 = vmul.f32 %v738_v17, %v382_v13  ;;  %v289_v18 = vmul.f32 %v281_v16, %v682_v22 }
 0x23c   :  { %v352_v20 = vsub.f32 1.5, %v351_v15 }
 0x23d   :  { %v487_v21 = vpop.eup %486  ;;  %v406_v11 = vadd.f32 %v743_v19, %v394_v5  ;;  %v297_v23 = vadd.f32 1e-05, %v289_v18 }
 0x23e   :  { %v353_v14 = vmul.f32 %v485_v38, %v352_v20  ;;  %v359_v25 = vmul.f32 %v487_v21, %v296_v7  ;;  %vm365_vm6 = vweird.f32 %v487_v21 }
 0x23f   :  { %414 = vst.msk [vmem:[#allocation2 + $0x20] sm:$0xff] %vm43_vm0, %v406_v11  ;;  %488 = vrsqrt.f32 %v297_v23  ;;  %vm366_vm8 = vmor %vm364_vm7, %vm365_vm6  ;;  %vm374_vm10 = vweird.f32 %v297_v23 }
 0x240   :  { %v357_v43 = vsel %vm356_vm5, %v485_v38, %v353_v14  ;;  %v360_v26 = vmul.f32 %v487_v21, %v359_v25 }
 0x241   :  { %v383_v27 = vmul.f32 %v357_v43, %v715_v48 }
 0x242   :  { %v361_v29 = vmul.f32 0.5, %v360_v26 }
 0x243   :  { %v395_v22 = vmul.f32 %v738_v17, %v383_v27 }
 0x244   :  { %v362_v30 = vsub.f32 1.5, %v361_v29 }
 0x245   :  { %v489_v31 = vpop.eup %488  ;;  %v407_v24 = vadd.f32 %v743_v19, %v395_v22 }
 0x246   :  { %v363_v32 = vmul.f32 %v487_v21, %v362_v30  ;;  %v369_v34 = vmul.f32 %v489_v31, %v297_v23  ;;  %vm375_vm9 = vweird.f32 %v489_v31 }
 0x247   :  { %415 = vst.msk [vmem:[#allocation2 + $0x28] sm:$0xff] %vm43_vm0, %v407_v24  ;;  %vm376_vm11 = vmor %vm374_vm10, %vm375_vm9 }
 0x248   :  { %v367_v35 = vsel %vm366_vm8, %v487_v21, %v363_v32  ;;  %v370_v36 = vmul.f32 %v489_v31, %v369_v34 }
 0x249   :  { %v384_v37 = vmul.f32 %v367_v35, %v721_v53 }
 0x24a   :  { %v371_v39 = vmul.f32 0.5, %v370_v36 }
 0x24b   :  { %v396_v48 = vmul.f32 %v738_v17, %v384_v37 }
 0x24c   :  { %v372_v40 = vsub.f32 1.5, %v371_v39 }
 0x24d   :  { %v408_v41 = vadd.f32 %v743_v19, %v396_v48 }
 0x24e   :  { %v373_v42 = vmul.f32 %v489_v31, %v372_v40 }
 0x24f   :  { %416 = vst.msk [vmem:[#allocation2 + $0x30] sm:$0xff] %vm43_vm0, %v408_v41 }
 0x250   :  { %v377_v44 = vsel %vm376_vm11, %v489_v31, %v373_v42 }
 0x251   :  { %v385_v45 = vmul.f32 %v377_v44, %v727_v58 }
 0x253   :  { %v397_v53 = vmul.f32 %v738_v17, %v385_v45 }
 0x255   :  { %v409_v46 = vadd.f32 %v743_v19, %v397_v53 }
 0x257   :  { %417 = vst.msk [vmem:[#allocation2 + $0x38] sm:$0xff] %vm43_vm0, %v409_v46 }
 0x258   :  { %430 = dma.vmem_to_hbm [thread:$0]  %s423_s6, 1024, %s425_s22, [#allocation3], %s518_s23, %s518_s23, %s519_s24  }
 0x259   :  { %514 = dma.done.wait [#allocation3], 1024  }
 0x25a   :  { %515 = vsyncadd [#allocation3], 4294966272 }
 0x25b   :  { %435 = vsyncpa [#allocation3], 1 }

// kernel: decoder_layer_forward.3
= control target key start
LH: loop header
LB: loop body
LE: loop exit
PB: predicated region body
PF: predicated region fallthrough
CT: control target
= control target key end

     0   :  { %v60_v0 = vlaneseq  ;;  %s5279_s14 = smov 64   ;;  %vm126_vm0 = vcmask 1040384   ;;  %s5280_s23 = smov 32   ;;  %vm85_vm9 = vcmask 1041408   ;;  %vm223_vm12 = vcmask 261120   ;;  %s8349_s0 = inlined_call_operand.vmem [shape: f32[64,32], index: 0, kind: input, shape index: {}, may-alias: {0,1,2}]   ;;  %s8350_s1 = inlined_call_operand.vmem [shape: f32[64,32], index: 1, kind: input, shape index: {}, may-alias: {0,1,2}]   ;;  %s8351_s7 = inlined_call_operand.vmem [shape: f32[32,96], index: 7, kind: input, shape index: {}]   ;;  %s8352_s3 = inlined_call_operand.vmem [shape: f32[96,32], index: 3, kind: input, shape index: {}]   ;;  %s8353_s4 = inlined_call_operand.vmem [shape: f32[1,32], index: 4, kind: input, shape index: {}]   ;;  %s8354_s5 = inlined_call_operand.vmem [shape: f32[96,32], index: 5, kind: input, shape index: {}]   ;;  %s8355_s6 = inlined_call_operand.vmem [shape: f32[1,32], index: 6, kind: input, shape index: {}]   ;;  %s8356_s8 = inlined_call_operand.vmem [shape: f32[1,96], index: 8, kind: input, shape index: {}]   ;;  %s8357_s9 = inlined_call_operand.vmem [shape: f32[32,32], index: 9, kind: input, shape index: {}]   ;;  %s8358_s10 = inlined_call_operand.vmem [shape: f32[1,32], index: 10, kind: input, shape index: {}]   ;;  %s8359_s2 = inlined_call_operand.vmem [shape: f32[8,8,32], index: 2, kind: input, shape index: {}, may-alias: {0,1,2}]   ;;  %s8360_s11 = inlined_call_operand.vmem [shape: f32[1,32], index: 11, kind: input, shape index: {}]   ;;  %s8361_s12 = inlined_call_operand.vmem [shape: f32[1,32], index: 12, kind: input, shape index: {}]   ;;  %s8362_s13 = inlined_call_operand.vmem [shape: f32[8,8,32], index: 13, kind: output, shape index: {}]  }
   0x1   :  { %v5362_v1 = vld [vmem:[%s8349_s0 + $0x28] sm:$0xff]  ;;  %v5367_v2 = vld [vmem:[%s8349_s0 + $0x10] sm:$0xff]  ;;  %v5372_v3 = vld [vmem:[%s8349_s0 + $0x20] sm:$0xff]  ;;  %vm257_vm13 = vcmask 785408   ;;  %vm232_vm15 = vcmask 523264   ;;  %s5286_s30 = smov 16  }
   0x2   :  { %209 = vrot.lane.b32.xlu0 %v5362_v1, %s5279_s14  ;;  %v136_v4 = vrot.slane %v5362_v1, 7  ;;  %203 = vrot.lane.b32.xlu1 %v5367_v2, %s5279_s14  ;;  %v5382_v5 = vld [vmem:[%s8349_s0 + $0x8] sm:$0xff]  ;;  %v130_v6 = vrot.slane %v5367_v2, 7  ;;  %v5385_v7 = vshrl.u32 %v60_v0, 7  ;;  %v134_v8 = vrot.slane %v5372_v3, 7  ;;  %v5392_v10 = vld [vmem:[%s8349_s0 + $0x30] sm:$0xff] }
   0x3   :  { %v128_v9 = vrot.slane %v5382_v5, 7  ;;  %211 = vrot.lane.b32.xlu2 %v5392_v10, %s5279_s14  ;;  %v138_v11 = vrot.slane %v5392_v10, 7  ;;  %v5406_v14 = vld [vmem:[%s8349_s0 + $0x18] sm:$0xff]  ;;  %v5497_v45 = vld [vmem:[%s8350_s1] sm:$0xff]  ;;  %v5524_v54 = vld [vmem:[%s8350_s1 + $0x8] sm:$0xff]  ;;  %s5287_s15 = smov 24  }
   0x4   :  { %v5398_v12 = vadd.s32 40, %v5385_v7  ;;  %v5401_v13 = vadd.s32 16, %v5385_v7  ;;  %v5409_v15 = vadd.s32 24, %v5385_v7  ;;  %v5412_v16 = vadd.s32 48, %v5385_v7  ;;  %v5443_v29 = vld [vmem:[%s8349_s0 + $0x38] sm:$0xff]  ;;  %v5502_v46 = vld [vmem:[%s8349_s0] sm:$0xff] }
   0x5   :  { %v137_v18 = vsel %vm126_vm0, %v134_v8, %v136_v4  ;;  %v131_v20 = vsel %vm126_vm0, %v128_v9, %v130_v6  ;;  %v139_v22 = vsel %vm126_vm0, %v136_v4, %v138_v11  ;;  %v132_v26 = vrot.slane %v5406_v14, 7  ;;  %v5542_v61 = vld [vmem:[%s8350_s1 + $0x10] sm:$0xff]  ;;  %v5553_v0 = vld [vmem:[%s8350_s1 + $0x18] sm:$0xff]  ;;  %v5619_v44 = vld [vmem:[%s8351_s7 + $0x8] sm:$0xff] }
   0x6   :  { %v74_v17 = vand.u32 7, %v5398_v12  ;;  %v71_v19 = vand.u32 7, %v5401_v13  ;;  %v75_v21 = vand.u32 7, %v5412_v16  ;;  %v72_v25 = vand.u32 7, %v5409_v15  ;;  %v5576_v24 = vld [vmem:[%s8351_s7 + $0x18] sm:$0xff]  ;;  %v247_v23 = vld [vmem:[%s8352_s3 + $0x30] sm:$0xff] }
   0x7   :  { %v140_v31 = vrot.slane %v5443_v29, 7  ;;  %v133_v33 = vsel %vm126_vm0, %v130_v6, %v132_v26  ;;  %v5465_v35 = vadd.s32 32, %v5385_v7  ;;  %v5468_v36 = vadd.s32 56, %v5385_v7  ;;  %5056 = vmatpush.msra.mxu3 %v5576_v24  ;;  %v252_v34 = vld [vmem:[%s8352_s3 + $0x58] sm:$0xff]  ;;  %v243_v59 = vld [vmem:[%s8352_s3 + $0x10] sm:$0xff] }
   0x8   :  { %vm5424_vm1 = vcmp.lt.s32.totalorder %v74_v17, 1  ;;  %vm5430_vm2 = vcmp.lt.s32.totalorder %v71_v19, 1  ;;  %vm5447_vm3 = vcmp.lt.s32.totalorder %v75_v21, 1  ;;  %vm5460_vm4 = vcmp.lt.s32.totalorder %v72_v25, 1  ;;  %5032 = vmatpush.msra.mxu1 %v252_v34  ;;  %5033 = vmatpush.msra.mxu2 %v252_v34  ;;  %v5652_v30 = vld [vmem:[%s8350_s1 + $0x38] sm:$0xff] }
   0x9   :  { %v164_v27 = vsel %vm5424_vm1, 0.0, %v137_v18  ;;  %v161_v28 = vsel %vm5430_vm2, 0.0, %v131_v20  ;;  %v165_v32 = vsel %vm5447_vm3, 0.0, %v139_v22  ;;  %v76_v37 = vand.u32 7, %v5468_v36  ;;  %v5565_v18 = vld [vmem:[%s8350_s1 + $0x20] sm:$0xff]  ;;  %286 = vmatpush.msra.mxu0 %v252_v34  ;;  %v244_v41 = vld [vmem:[%s8352_s3 + $0x18] sm:$0xff] }
   0xa   :  { %185 = vrot.lane.b32.xlu0 %v164_v27, %s5280_s23  ;;  %179 = vrot.lane.b32.xlu1 %v161_v28, %s5280_s23  ;;  %v141_v38 = vsel %vm126_vm0, %v138_v11, %v140_v31  ;;  %v162_v39 = vsel %vm5460_vm4, 0.0, %v133_v33  ;;  %v73_v40 = vand.u32 7, %v5465_v35  ;;  %v135_v43 = vsel %vm126_vm0, %v132_v26, %v134_v8  ;;  %v5584_v27 = vld [vmem:[%s8351_s7 + $0x10] sm:$0xff]  ;;  %v5589_v28 = vld [vmem:[%s8350_s1 + $0x28] sm:$0xff] }
   0xb   :  { %187 = vrot.lane.b32.xlu2 %v165_v32, %s5280_s23  ;;  %vm5477_vm5 = vcmp.lt.s32.totalorder %v76_v37, 1  ;;  %v69_v48 = vand.u32 7, %v5385_v7  ;;  %v363_v49 = vrot.slane %v5497_v45, 7  ;;  %v127_v50 = vrot.slane %v5502_v46, 7  ;;  %5057 = vmatpush.msra.mxu3 %v5584_v27  ;;  %v5601_v33 = vld [vmem:[%s8350_s1 + $0x30] sm:$0xff]  ;;  %s5281_s1 = smov 96  }
   0xc   :  { %v166_v42 = vsel %vm5477_vm5, 0.0, %v141_v38  ;;  %vm5490_vm6 = vcmp.lt.s32.totalorder %v73_v40, 1  ;;  %v5519_v53 = vadd.s32 8, %v5385_v7  ;;  %v364_v58 = vrot.slane %v5524_v54, 7 }
   0xd   :  { %v163_v47 = vsel %vm5490_vm6, 0.0, %v135_v43  ;;  %vm151_vm7 = vcmp.lt.s32.totalorder %v69_v48, 1  ;;  %v386_v51 = vsel %vm126_vm0, 0.0, %v363_v49  ;;  %v150_v52 = vsel %vm126_vm0, 0.0, %v127_v50  ;;  %5058 = vmatpush.msra.mxu3 %v5619_v44 }
   0xe   :  { %v387_v55 = vsel %vm151_vm7, 0.0, %v386_v51  ;;  %v159_v56 = vsel %vm151_vm7, 0.0, %v150_v52  ;;  %v70_v57 = vand.u32 7, %v5519_v53  ;;  %v365_v60 = vsel %vm126_vm0, %v363_v49, %v364_v58  ;;  %v5629_v49 = vld [vmem:[%s8351_s7] sm:$0xff] }
   0xf   :  { %v366_v63 = vrot.slane %v5542_v61, 7  ;;  %v368_v4 = vrot.slane %v5553_v0, 7  ;;  %v370_v22 = vrot.slane %v5565_v18, 7  ;;  %v372_v32 = vrot.slane %v5589_v28, 7  ;;  %5059 = vmatpush.msra.mxu3 %v5629_v49 }
  0x10   :  { %vm5534_vm8 = vcmp.lt.s32.totalorder %v70_v57, 1  ;;  %v129_v38 = vsel %vm126_vm0, %v127_v50, %v128_v9  ;;  %v250_v9 = vld [vmem:[%s8352_s3 + $0x48] sm:$0xff]  ;;  %v249_v50 = vld [vmem:[%s8352_s3 + $0x40] sm:$0xff]  ;;  %v99_v34 = vrot.slane %v5443_v29, 6  ;;  %vm5752_vm10 = vcmp.lt.s32.totalorder %v74_v17, 2 }
  0x11   :  { %v388_v62 = vsel %vm5534_vm8, 0.0, %v365_v60  ;;  %v367_v6 = vsel %vm126_vm0, %v364_v58, %v366_v63  ;;  %v369_v8 = vsel %vm126_vm0, %v366_v63, %v368_v4  ;;  %v371_v26 = vsel %vm126_vm0, %v368_v4, %v370_v22 }
  0x12   :  { %181 = vrot.lane.b32.xlu0 %v162_v39, %s5280_s23  ;;  %205 = vrot.lane.b32.xlu1 %v5406_v14, %s5279_s14  ;;  %v389_v11 = vsel %vm5430_vm2, 0.0, %v367_v6  ;;  %v390_v20 = vsel %vm5460_vm4, 0.0, %v369_v8  ;;  %v391_v31 = vsel %vm5490_vm6, 0.0, %v371_v26  ;;  %v374_v39 = vrot.slane %v5601_v33, 7  ;;  %v241_v26 = vld [vmem:[%s8352_s3] sm:$0xff] }
  0x13   :  { %189 = vrot.lane.b32.xlu2 %v166_v42, %s5280_s23  ;;  %v251_v42 = vld [vmem:[%s8352_s3 + $0x50] sm:$0xff]  ;;  %v373_v43 = vsel %vm126_vm0, %v370_v22, %v372_v32  ;;  %v5659_v58 = vpack.i.bf16 %v5584_v27, %v5576_v24  ;;  %v5663_v60 = vpack.i.bf16 %v5629_v49, %v5619_v44  ;;  %v95_v6 = vrot.slane %v5362_v1, 6  ;;  %v242_v22 = vld [vmem:[%s8352_s3 + $0x8] sm:$0xff] }
  0x14   :  { %5034 = vmatpush.msra.mxu1 %v251_v42  ;;  %5035 = vmatpush.msra.mxu2 %v251_v42  ;;  %v392_v51 = vsel %vm5424_vm1, 0.0, %v373_v43  ;;  %v97_v8 = vrot.slane %v5392_v10, 6  ;;  %v472_v43 = vld [vmem:[%s8354_s5 + $0x28] sm:$0xff]  ;;  %vm5761_vm11 = vcmp.lt.s32.totalorder %v71_v19, 2  ;;  %v91_v1 = vrot.slane %v5406_v14, 6 }
  0x15   :  { %287 = vmatpush.msra.mxu0 %v251_v42  ;;  %v473_v42 = vld [vmem:[%s8354_s5 + $0x30] sm:$0xff]  ;;  %vm5775_vm14 = vcmp.lt.s32.totalorder %v75_v21, 2  ;;  %vm5800_vm1 = vcmp.lt.s32.totalorder %v76_v37, 2  ;;  %vm5814_vm2 = vcmp.lt.s32.totalorder %v73_v40, 2  ;;  %vm5848_vm4 = vcmp.lt.s32.totalorder %v70_v57, 2 }
  0x16   :  { %5036 = vmatpush.msra.mxu1 %v250_v9  ;;  %5037 = vmatpush.msra.mxu2 %v250_v9  ;;  %v5692_v10 = vsel %vm85_vm9, %v95_v6, %v97_v8 }
  0x17   :  { %288 = vmatpush.msra.mxu0 %v250_v9  ;;  %v470_v9 = vld [vmem:[%s8354_s5 + $0x18] sm:$0xff]  ;;  %v124_v21 = vsel %vm5775_vm14, 0.0, %v5692_v10 }
  0x18   :  { %5038 = vmatpush.msra.mxu1 %v249_v50  ;;  %5039 = vmatpush.msra.mxu2 %v249_v50 }
  0x19   :  { %289 = vmatpush.msra.mxu0 %v249_v50  ;;  %v89_v50 = vrot.slane %v5367_v2, 6 }
  0x1a   :  { %213 = vrot.lane.b32.xlu0 %v5443_v29, %s5279_s14  ;;  %183 = vrot.lane.b32.xlu1 %v163_v47, %s5280_s23  ;;  %v375_v47 = vsel %vm126_vm0, %v372_v32, %v374_v39  ;;  %v477_v32 = vld [vmem:[%s8354_s5 + $0x50] sm:$0xff]  ;;  %v474_v29 = vld [vmem:[%s8354_s5 + $0x38] sm:$0xff] }
  0x1b   :  { %207 = vrot.lane.b32.xlu2 %v5372_v3, %s5279_s14  ;;  %v393_v52 = vsel %vm5447_vm3, 0.0, %v375_v47  ;;  %v92_v16 = vsel %vm85_vm9, %v89_v50, %v91_v1  ;;  %vm5828_vm3 = vcmp.lt.s32.totalorder %v69_v48, 2 }
  0x22   :  { %403 = vrot.lane.b32.xlu0 %v387_v55, %s5280_s23  ;;  %175 = vrot.lane.b32.xlu1 %v159_v56, %s5280_s23  ;;  %v248_v55 = vld [vmem:[%s8352_s3 + $0x38] sm:$0xff]  ;;  %v246_v56 = vld [vmem:[%s8352_s3 + $0x28] sm:$0xff] }
  0x23   :  { %427 = vrot.lane.b32.xlu2 %v5497_v45, %s5279_s14  ;;  %5040 = vmatpush.msra.mxu1 %v248_v55 }
  0x24   :  { %5041 = vmatpush.msra.mxu2 %v248_v55  ;;  %290 = vmatpush.msra.mxu0 %v248_v55  ;;  %v93_v55 = vrot.slane %v5372_v3, 6 }
  0x25   :  { %5042 = vmatpush.msra.mxu1 %v247_v23 }
  0x26   :  { %5043 = vmatpush.msra.mxu2 %v247_v23  ;;  %291 = vmatpush.msra.mxu0 %v247_v23  ;;  %v87_v23 = vrot.slane %v5382_v5, 6  ;;  %v96_v3 = vsel %vm85_vm9, %v93_v55, %v95_v6 }
  0x27   :  { %5044 = vmatpush.msra.mxu1 %v246_v56  ;;  %v123_v12 = vsel %vm5752_vm10, 0.0, %v96_v3 }
  0x28   :  { %5045 = vmatpush.msra.mxu2 %v246_v56  ;;  %292 = vmatpush.msra.mxu0 %v246_v56  ;;  %v468_v56 = vld [vmem:[%s8354_s5 + $0x8] sm:$0xff] }
  0x2a   :  { %199 = vrot.lane.b32.xlu0 %v5502_v46, %s5279_s14  ;;  %405 = vrot.lane.b32.xlu1 %v388_v62, %s5280_s23  ;;  %v376_v62 = vrot.slane %v5652_v30, 7 }
  0x2b   :  { %429 = vrot.lane.b32.xlu2 %v5524_v54, %s5279_s14 }
  0x2c   :  { %v377_v63 = vsel %vm126_vm0, %v374_v39, %v376_v62  ;;  %v467_v62 = vld [vmem:[%s8354_s5] sm:$0xff]  ;;  %vm5787_vm0 = vcmp.lt.s32.totalorder %v72_v25, 2 }
  0x2d   :  { %v394_v4 = vsel %vm5477_vm5, 0.0, %v377_v63  ;;  %vm778_vm5 = vcmask 64512  }
  0x32   :  { %407 = vrot.lane.b32.xlu0 %v389_v11, %s5280_s23  ;;  %431 = vrot.lane.b32.xlu1 %v5542_v61, %s5279_s14  ;;  %v160_v11 = vsel %vm5534_vm8, 0.0, %v129_v38  ;;  %v476_v38 = vld [vmem:[%s8354_s5 + $0x48] sm:$0xff] }
  0x33   :  { %409 = vrot.lane.b32.xlu2 %v390_v20, %s5280_s23  ;;  %v245_v20 = vld [vmem:[%s8352_s3 + $0x20] sm:$0xff] }
  0x34   :  { %5046 = vmatpush.msra.mxu1 %v245_v20  ;;  %5047 = vmatpush.msra.mxu2 %v245_v20 }
  0x35   :  { %293 = vmatpush.msra.mxu0 %v245_v20 }
  0x36   :  { %5048 = vmatpush.msra.mxu1 %v244_v41  ;;  %5049 = vmatpush.msra.mxu2 %v244_v41 }
  0x37   :  { %294 = vmatpush.msra.mxu0 %v244_v41 }
  0x38   :  { %5050 = vmatpush.msra.mxu1 %v243_v59  ;;  %5051 = vmatpush.msra.mxu2 %v243_v59 }
  0x39   :  { %295 = vmatpush.msra.mxu0 %v243_v59 }
  0x3a   :  { %433 = vrot.lane.b32.xlu0 %v5553_v0, %s5279_s14  ;;  %411 = vrot.lane.b32.xlu1 %v391_v31, %s5280_s23  ;;  %v478_v31 = vld [vmem:[%s8354_s5 + $0x58] sm:$0xff] }
  0x3b   :  { %435 = vrot.lane.b32.xlu2 %v5565_v18, %s5279_s14  ;;  %5052 = vmatpush.msra.mxu1 %v242_v22 }
  0x3c   :  { %5053 = vmatpush.msra.mxu2 %v242_v22  ;;  %296 = vmatpush.msra.mxu0 %v242_v22  ;;  %v121_v22 = vsel %vm5787_vm0, 0.0, %v92_v16  ;;  %v336_v16 = vrot.slane %v5553_v0, 6 }
  0x3d   :  { %5054 = vmatpush.msra.mxu1 %v241_v26 }
  0x3e   :  { %5055 = vmatpush.msra.mxu2 %v241_v26  ;;  %297 = vmatpush.msra.mxu0 %v241_v26 }
  0x3f   :  { %511 = vmatpush.msrb.mxu1 %v478_v31 }
  0x40   :  { %592 = vmatpush.msrb.mxu2 %v5576_v24  ;;  %v475_v24 = vld [vmem:[%s8354_s5 + $0x40] sm:$0xff] }
  0x41   :  { %512 = vmatpush.msrb.mxu1 %v477_v32 }
  0x42   :  { %413 = vrot.lane.b32.xlu0 %v392_v51, %s5280_s23  ;;  %437 = vrot.lane.b32.xlu1 %v5589_v28, %s5279_s14 }
  0x43   :  { %415 = vrot.lane.b32.xlu2 %v393_v52, %s5280_s23  ;;  %593 = vmatpush.msrb.mxu2 %v5584_v27  ;;  %v100_v27 = vsel %vm85_vm9, %v97_v8, %v99_v34 }
  0x44   :  { %513 = vmatpush.msrb.mxu1 %v476_v38 }
  0x45   :  { %594 = vmatpush.msrb.mxu2 %v5619_v44  ;;  %v471_v44 = vld [vmem:[%s8354_s5 + $0x20] sm:$0xff] }
  0x46   :  { %514 = vmatpush.msrb.mxu1 %v475_v24  ;;  %v125_v24 = vsel %vm5800_vm1, 0.0, %v100_v27 }
  0x47   :  { %595 = vmatpush.msrb.mxu2 %v5629_v49  ;;  %v469_v49 = vld [vmem:[%s8354_s5 + $0x10] sm:$0xff] }
  0x48   :  { %515 = vmatpush.msrb.mxu1 %v474_v29  ;;  %v94_v29 = vsel %vm85_vm9, %v91_v1, %v93_v55 }
  0x4a   :  { %439 = vrot.lane.b32.xlu0 %v5601_v33, %s5279_s14  ;;  %5071 = vrot.lane.b32.xlu1 %v5659_v58, %s5281_s1 }
  0x4b   :  { %5076 = vrot.lane.b32.xlu2 %v5663_v60, %s5281_s1  ;;  %516 = vmatpush.msrb.mxu1 %v473_v42  ;;  %v331_v42 = vrot.slane %v5497_v45, 6 }
  0x4d   :  { %517 = vmatpush.msrb.mxu1 %v472_v43 }
  0x4f   :  { %518 = vmatpush.msrb.mxu1 %v471_v44 }
  0x51   :  { %519 = vmatpush.msrb.mxu1 %v470_v9 }
  0x52   :  { %417 = vrot.lane.b32.xlu0 %v394_v4, %s5280_s23  ;;  %441 = vrot.lane.b32.xlu1 %v5652_v30, %s5279_s14  ;;  %v90_v4 = vsel %vm85_vm9, %v87_v23, %v89_v50  ;;  %v86_v50 = vrot.slane %v5502_v46, 6 }
  0x53   :  { %177 = vrot.lane.b32.xlu2 %v160_v11, %s5280_s23  ;;  %520 = vmatpush.msrb.mxu1 %v469_v49  ;;  %v120_v17 = vsel %vm5761_vm11, 0.0, %v90_v4  ;;  %v354_v49 = vsel %vm85_vm9, 0.0, %v331_v42 }
  0x54   :  { %v109_v7 = vsel %vm85_vm9, 0.0, %v86_v50 }
  0x55   :  { %521 = vmatpush.msrb.mxu1 %v468_v56  ;;  %v118_v4 = vsel %vm5828_vm3, 0.0, %v109_v7 }
  0x57   :  { %522 = vmatpush.msrb.mxu1 %v467_v62 }
  0x5a   :  { %201 = vrot.lane.b32.xlu0 %v5382_v5, %s5279_s14 }
  0x5b   :  { %5081 = vrot.lane.b32.xlu2 %v5659_v58, %s5279_s14 }
  0x5d   :  { %v212_v39 = vpop.permute.xlu2 %211 }
  0x62   :  { %5086 = vrot.lane.b32.xlu0 %v5663_v60, %s5279_s14 }
  0x65   :  { %v188_v47 = vpop.permute.xlu2 %187 }
  0x66   :  { %v230_v26 = vsel %vm223_vm12, %v124_v21, %v188_v47 }
  0x67   :  { %v239_v38 = vsel %vm232_vm15, %v230_v26, %v212_v39  ;;  %v122_v39 = vsel %vm5814_vm2, 0.0, %v94_v29 }
  0x6d   :  { %v190_v8 = vpop.permute.xlu2 %189 }
  0x6e   :  { %v231_v37 = vsel %vm223_vm12, %v125_v24, %v190_v8 }
  0x74   :  { %v210_v51 = vpop.permute.xlu0 %209  ;;  %v204_v52 = vpop.permute.xlu1 %203 }
  0x75   :  { %v208_v31 = vpop.permute.xlu2 %207 }
  0x7c   :  { %v186_v6 = vpop.permute.xlu0 %185  ;;  %v180_v13 = vpop.permute.xlu1 %179 }
  0x7d   :  { %v229_v11 = vsel %vm223_vm12, %v123_v12, %v186_v6  ;;  %v226_v20 = vsel %vm223_vm12, %v120_v17, %v180_v13  ;;  %v428_v47 = vpop.permute.xlu2 %427  ;;  %v334_v6 = vrot.slane %v5542_v61, 6 }
  0x7e   :  { %v235_v41 = vsel %vm232_vm15, %v226_v20, %v204_v52  ;;  %v238_v59 = vsel %vm232_vm15, %v229_v11, %v210_v51  ;;  %v355_v51 = vsel %vm5828_vm3, 0.0, %v354_v49  ;;  %v332_v52 = vrot.slane %v5524_v54, 6 }
  0x7f   :  { %4890 = vmatmul.msk.f32.vlgmr.msra.gmra.mxu1 %vm257_vm13, %v235_v41  ;;  %4893 = vmatmul.msk.f32.vlgmr.msra.gmra.mxu2 %vm257_vm13, %v238_v59  ;;  %v337_v26 = vsel %vm85_vm9, %v334_v6, %v336_v16  ;;  %v342_v49 = vrot.slane %v5601_v33, 6 }
  0x80   :  { %v333_v12 = vsel %vm85_vm9, %v331_v42, %v332_v52  ;;  %v335_v57 = vsel %vm85_vm9, %v332_v52, %v334_v6 }
  0x81   :  { %v356_v1 = vsel %vm5848_vm4, 0.0, %v333_v12  ;;  %v357_v21 = vsel %vm5761_vm11, 0.0, %v335_v57  ;;  %v88_v12 = vsel %vm85_vm9, %v86_v50, %v87_v23 }
  0x82   :  { %v119_v6 = vsel %vm5848_vm4, 0.0, %v88_v12 }
  0x84   :  { %v182_v32 = vpop.permute.xlu0 %181  ;;  %v206_v34 = vpop.permute.xlu1 %205 }
  0x85   :  { %v227_v25 = vsel %vm223_vm12, %v121_v22, %v182_v32  ;;  %v430_v62 = vpop.permute.xlu2 %429 }
  0x86   :  { %v236_v10 = vsel %vm232_vm15, %v227_v25, %v206_v34  ;;  %v358_v25 = vsel %vm5787_vm0, 0.0, %v337_v26 }
  0x87   :  { %4894 = vmatmul.msk.f32.gmra.mxu2 %vm257_vm13, %v239_v38  ;;  %4891 = vmatmul.msk.f32.gmra.mxu1 %vm257_vm13, %v236_v10  ;;  %v338_v38 = vrot.slane %v5565_v18, 6 }
  0x89   :  { %v339_v63 = vsel %vm85_vm9, %v336_v16, %v338_v38  ;;  %v5125_v16 = vld [vmem:[%s8353_s4] ss:$0 sm:$0xff] }
  0x8a   :  { %v359_v42 = vsel %vm5814_vm2, 0.0, %v339_v63 }
  0x8c   :  { %v214_v43 = vpop.permute.xlu0 %213  ;;  %v184_v44 = vpop.permute.xlu1 %183 }
  0x8d   :  { %v240_v9 = vsel %vm232_vm15, %v231_v37, %v214_v43  ;;  %v228_v27 = vsel %vm223_vm12, %v122_v39, %v184_v44  ;;  %v410_v59 = vpop.permute.xlu2 %409  ;;  %v340_v43 = vrot.slane %v5589_v28, 6 }
  0x8e   :  { %v237_v35 = vsel %vm232_vm15, %v228_v27, %v208_v31  ;;  %v454_v24 = vsel %vm223_vm12, %v358_v25, %v410_v59  ;;  %v5126_v25 = vld [vmem:[%s8355_s6] ss:$0 sm:$0xff]  ;;  %s5282_s6 = smov 120  }
  0x8f   :  { %4895 = vmatmul.msk.f32.gmra.mxu2 %vm257_vm13, %v240_v9  ;;  %4892 = vmatmul.msk.f32.gmra.mxu1 %vm257_vm13, %v237_v35  ;;  %v341_v44 = vsel %vm85_vm9, %v338_v38, %v340_v43 }
  0x90   :  { %v360_v40 = vsel %vm5752_vm10, 0.0, %v341_v44 }
  0x94   :  { %v404_v55 = vpop.permute.xlu0 %403  ;;  %v176_v56 = vpop.permute.xlu1 %175 }
  0x95   :  { %v451_v48 = vsel %vm223_vm12, %v355_v51, %v404_v55  ;;  %v224_v17 = vsel %vm223_vm12, %v118_v4, %v176_v56  ;;  %v436_v10 = vpop.permute.xlu2 %435  ;;  %v343_v51 = vsel %vm85_vm9, %v340_v43, %v342_v49 }
  0x96   :  { %v459_v3 = vsel %vm232_vm15, %v451_v48, %v428_v47  ;;  %v361_v7 = vsel %vm5775_vm14, 0.0, %v343_v51  ;;  %v344_v48 = vrot.slane %v5652_v30, 6 }
  0x97   :  { %4896 = vmatmul.msk.f32.vlgmr.msrb.gmra.mxu1 %vm257_vm13, %v459_v3 }
  0x98   :  { %v345_v3 = vsel %vm85_vm9, %v342_v49, %v344_v48 }
  0x99   :  { %v362_v19 = vsel %vm5800_vm1, 0.0, %v345_v3 }
  0x9c   :  { %v200_v13 = vpop.permute.xlu0 %199  ;;  %v406_v11 = vpop.permute.xlu1 %405 }
  0x9d   :  { %v233_v20 = vsel %vm232_vm15, %v224_v17, %v200_v13  ;;  %v452_v41 = vsel %vm223_vm12, %v356_v1, %v406_v11  ;;  %v416_v9 = vpop.permute.xlu2 %415 }
  0x9e   :  { %4888 = vmatmul.msk.f32.vlgmr.msra.gmra.mxu0 %vm257_vm13, %v233_v20  ;;  %v460_v53 = vsel %vm232_vm15, %v452_v41, %v430_v62  ;;  %v457_v62 = vsel %vm223_vm12, %v361_v7, %v416_v9 }
  0x9f   :  { %4897 = vmatmul.msk.f32.gmra.mxu1 %vm257_vm13, %v460_v53 }
  0xa4   :  { %v408_v22 = vpop.permute.xlu0 %407  ;;  %v432_v31 = vpop.permute.xlu1 %431 }
  0xa5   :  { %v453_v32 = vsel %vm223_vm12, %v357_v21, %v408_v22  ;;  %v5077_v56 = vpop.permute.xlu2 %5076 }
  0xa6   :  { %v461_v34 = vsel %vm232_vm15, %v453_v32, %v432_v31  ;;  %v5078_v8 = vunpack.i.l.bf16 %v5077_v56  ;;  %v5079_v41 = vunpack.i.h.bf16 %v5077_v56  ;;  %v5921_v31 = vld [vmem:[%s8356_s8] ss:$0 sm:$0xff]  ;;  %s5283_s8 = smov 112  }
  0xa7   :  { %4898 = vmatmul.msk.f32.gmra.mxu1 %vm257_vm13, %v461_v34  ;;  %637 = vrot.lane.b32.xlu1 %v5921_v31, %s5281_s1  ;;  %s5285_s1 = smov 8  }
  0xa8   :  { %717 = vrot.lane.b32.xlu0 %v5921_v31, %s5279_s14  ;;  %s5284_s14 = smov 104  }
  0xac   :  { %v434_v29 = vpop.permute.xlu0 %433  ;;  %v412_v37 = vpop.permute.xlu1 %411 }
  0xad   :  { %v462_v39 = vsel %vm232_vm15, %v454_v24, %v434_v29  ;;  %v455_v14 = vsel %vm223_vm12, %v359_v42, %v412_v37  ;;  %v178_v1 = vpop.permute.xlu2 %177 }
  0xae   :  { %v463_v47 = vsel %vm232_vm15, %v455_v14, %v436_v10  ;;  %v225_v5 = vsel %vm223_vm12, %v119_v6, %v178_v1 }
  0xaf   :  { %4899 = vmatmul.msk.f32.gmra.mxu1 %vm257_vm13, %v462_v39 }
  0xb4   :  { %v414_v27 = vpop.permute.xlu0 %413  ;;  %v438_v35 = vpop.permute.xlu1 %437 }
  0xb5   :  { %v456_v36 = vsel %vm223_vm12, %v360_v40, %v414_v27  ;;  %v5082_v7 = vpop.permute.xlu2 %5081 }
  0xb6   :  { %v464_v55 = vsel %vm232_vm15, %v456_v36, %v438_v35  ;;  %v5084_v48 = vunpack.i.h.bf16 %v5082_v7 }
  0xb7   :  { %4900 = vmatmul.msk.f32.gmra.mxu1 %vm257_vm13, %v463_v47 }
  0xbc   :  { %v440_v52 = vpop.permute.xlu0 %439  ;;  %v5072_v2 = vpop.permute.xlu1 %5071 }
  0xbd   :  { %v465_v17 = vsel %vm232_vm15, %v457_v62, %v440_v52  ;;  %v5073_v15 = vunpack.i.l.bf16 %v5072_v2  ;;  %v5074_v50 = vunpack.i.h.bf16 %v5072_v2  ;;  %v5083_v2 = vunpack.i.l.bf16 %v5082_v7 }
  0xbf   :  { %4901 = vmatmul.msk.f32.gmra.mxu1 %vm257_vm13, %v464_v55  ;;  %676 = vmatpush.msrb.mxu3 %v5073_v15 }
  0xc0   :  { %748 = vmatpush.msra.mxu2 %v5083_v2 }
  0xc1   :  { %677 = vmatpush.msrb.mxu3 %v5074_v50 }
  0xc2   :  { %749 = vmatpush.msra.mxu2 %v5084_v48 }
  0xc3   :  { %678 = vmatpush.msrb.mxu3 %v5078_v8 }
  0xc4   :  { %v418_v4 = vpop.permute.xlu0 %417  ;;  %v442_v11 = vpop.permute.xlu1 %441 }
  0xc5   :  { %v458_v13 = vsel %vm223_vm12, %v362_v19, %v418_v4  ;;  %679 = vmatpush.msrb.mxu3 %v5079_v41 }
  0xc6   :  { %v466_v46 = vsel %vm232_vm15, %v458_v13, %v442_v11 }
  0xc7   :  { %4902 = vmatmul.msk.f32.gmra.mxu1 %vm257_vm13, %v465_v17 }
  0xcc   :  { %v202_v20 = vpop.permute.xlu0 %201 }
  0xcd   :  { %v234_v23 = vsel %vm232_vm15, %v225_v5, %v202_v20 }
  0xce   :  { %4889 = vmatmul.msk.f32.gmra.mxu0 %vm257_vm13, %v234_v23 }
  0xcf   :  { %4903 = vmatmul.msk.f32.gmra.mxu1 %vm257_vm13, %v466_v46 }
  0xd4   :  { %v5087_v62 = vpop.permute.xlu0 %5086 }
  0xd5   :  { %v5088_v3 = vunpack.i.l.bf16 %v5087_v62  ;;  %v5089_v4 = vunpack.i.h.bf16 %v5087_v62 }
  0xd7   :  { %750 = vmatpush.msra.mxu2 %v5088_v3 }
  0xd9   :  { %751 = vmatpush.msra.mxu2 %v5089_v4 }
  0xfc   :  { %v305_v53 = vpop.f32.mrf.mxu1 }
  0xfd   :  { %v306_v51 = vadd.f32 %v5125_v16, %v305_v53 }
 0x102   :  { %v314_v57 = vpop.f32.mrf.mxu2 }
 0x103   :  { %v315_v56 = vadd.f32 %v5125_v16, %v314_v57 }
 0x104   :  { %v308_v59 = vpop.f32.mrf.mxu1 }
 0x105   :  { %v309_v52 = vadd.f32 %v5125_v16, %v308_v59 }
 0x10a   :  { %v317_v21 = vpop.f32.mrf.mxu2 }
 0x10b   :  { %v318_v22 = vadd.f32 %v5125_v16, %v317_v21 }
 0x10c   :  { %v311_v26 = vpop.f32.mrf.mxu1 }
 0x10d   :  { %4910 = vmatmul.msk.f32.vlgmr.msra.gmra.mxu3 %vm223_vm12, %v318_v22  ;;  %v312_v55 = vadd.f32 %v5125_v16, %v311_v26 }
 0x112   :  { %v320_v60 = vpop.f32.mrf.mxu2 }
 0x113   :  { %v321_v32 = vadd.f32 %v5125_v16, %v320_v60 }
 0x114   :  { %v524_v34 = vpop.f32.mrf.mxu1 }
 0x115   :  { %4911 = vmatmul.msk.f32.gmra.mxu3 %vm223_vm12, %v321_v32  ;;  %v525_v38 = vadd.f32 %v5126_v25, %v524_v34 }
 0x119   :  { %v5960_v19 = vpop.permute.xlu1 %637 }
 0x11b   :  { %v299_v10 = vpop.f32.mrf.mxu0 }
 0x11c   :  { %v300_v24 = vadd.f32 %v5125_v16, %v299_v10  ;;  %v527_v63 = vpop.f32.mrf.mxu1 }
 0x11d   :  { %4912 = vmatmul.msk.f32.vlgmr.msrb.gmra.mxu3 %vm223_vm12, %v525_v38  ;;  %v528_v29 = vadd.f32 %v5126_v25, %v527_v63 }
 0x11e   :  { %4904 = vmatmul.msk.f32.vlgmr.msrb.gmra.mxu2 %vm223_vm12, %v300_v24 }
 0x124   :  { %v530_v37 = vpop.f32.mrf.mxu1 }
 0x125   :  { %4913 = vmatmul.msk.f32.gmra.mxu3 %vm223_vm12, %v528_v29  ;;  %v531_v39 = vadd.f32 %v5126_v25, %v530_v37 }
 0x12c   :  { %v533_v42 = vpop.f32.mrf.mxu1 }
 0x12d   :  { %4914 = vmatmul.msk.f32.gmra.mxu3 %vm223_vm12, %v531_v39  ;;  %v534_v43 = vadd.f32 %v5126_v25, %v533_v42 }
 0x134   :  { %v536_v14 = vpop.f32.mrf.mxu1 }
 0x135   :  { %4915 = vmatmul.msk.f32.gmra.mxu3 %vm223_vm12, %v534_v43  ;;  %v537_v58 = vadd.f32 %v5126_v25, %v536_v14 }
 0x13c   :  { %v539_v44 = vpop.f32.mrf.mxu1 }
 0x13d   :  { %4916 = vmatmul.msk.f32.gmra.mxu3 %vm223_vm12, %v537_v58  ;;  %v540_v9 = vadd.f32 %v5126_v25, %v539_v44 }
 0x144   :  { %v542_v27 = vpop.f32.mrf.mxu1 }
 0x145   :  { %4917 = vmatmul.msk.f32.gmra.mxu3 %vm223_vm12, %v540_v9  ;;  %v543_v47 = vadd.f32 %v5126_v25, %v542_v27 }
 0x14b   :  { %v302_v35 = vpop.f32.mrf.mxu0 }
 0x14c   :  { %v303_v40 = vadd.f32 %v5125_v16, %v302_v35  ;;  %v545_v49 = vpop.f32.mrf.mxu1 }
 0x14d   :  { %4918 = vmatmul.msk.f32.gmra.mxu3 %vm223_vm12, %v543_v47  ;;  %v546_v36 = vadd.f32 %v5126_v25, %v545_v49 }
 0x14e   :  { %4905 = vmatmul.msk.f32.gmra.mxu2 %vm223_vm12, %v303_v40 }
 0x155   :  { %4919 = vmatmul.msk.f32.gmra.mxu3 %vm223_vm12, %v546_v36 }
 0x156   :  { %4906 = vmatmul.msk.f32.gmra.mxu2 %vm223_vm12, %v306_v51 }
 0x15e   :  { %4907 = vmatmul.msk.f32.gmra.mxu2 %vm223_vm12, %v309_v52 }
 0x166   :  { %4908 = vmatmul.msk.f32.gmra.mxu2 %vm223_vm12, %v312_v55 }
 0x16e   :  { %4909 = vmatmul.msk.f32.gmra.mxu2 %vm223_vm12, %v315_v56 }
 0x176   :  { %4920 = vmatmul.msk.f32.vlgmr.msra.gmra.mxu2 %vm223_vm12, %v5497_v45 }
 0x17e   :  { %4921 = vmatmul.msk.f32.gmra.mxu2 %vm223_vm12, %v5524_v54 }
 0x186   :  { %4922 = vmatmul.msk.f32.gmra.mxu2 %vm223_vm12, %v5542_v61 }
 0x18e   :  { %4923 = vmatmul.msk.f32.gmra.mxu2 %vm223_vm12, %v5553_v0 }
 0x190   :  { %v5954_v12 = vpop.f32.mrf.mxu3 }
 0x196   :  { %4924 = vmatmul.msk.f32.gmra.mxu2 %vm223_vm12, %v5565_v18 }
 0x198   :  { %v5958_v17 = vpop.f32.mrf.mxu3 }
 0x19e   :  { %4925 = vmatmul.msk.f32.gmra.mxu2 %vm223_vm12, %v5589_v28 }
 0x1a0   :  { %v681_v1 = vpop.f32.mrf.mxu3 }
 0x1a1   :  { %v682_v45 = vadd.f32 %v681_v1, %v5960_v19  ;;  %v597_v54 = vpop.f32.mrf.mxu2 }
 0x1a2   :  { %v598_v6 = vadd.f32 %v5921_v31, %v597_v54 }
 0x1a3   :  { %854 = vrot.lane.b32.xlu0 %v682_v45, %s5282_s6  ;;  %4928 = vmatpush.xpose.msk.msra.mxu3 %vm778_vm5, %v682_v45 }
 0x1a4   :  { %v5968_v61 = vmul.f32 0.35355338, %v598_v6 }
 0x1a6   :  { %4929 = vmatmul.msk.f32.vlgmr.msra.gmra.mxu3 %vm778_vm5, %v5968_v61  ;;  %4926 = vmatmul.msk.f32.gmra.mxu2 %vm223_vm12, %v5601_v33 }
 0x1a8   :  { %v5987_v28 = vpop.f32.mrf.mxu3 }
 0x1ab   :  { %852 = vrot.lane.b32.xlu0 %v5968_v61, %s5282_s6 }
 0x1ae   :  { %4927 = vmatmul.msk.f32.gmra.mxu2 %vm223_vm12, %v5652_v30  ;;  %v5999_v30 = vpop.permute.xlu0 %717 }
 0x1b0   :  { %v5991_v11 = vpop.f32.mrf.mxu3 }
 0x1b3   :  { %933 = vrot.lane.b32.xlu0 %v682_v45, %s5283_s8 }
 0x1b8   :  { %v5995_v5 = vpop.f32.mrf.mxu3 }
 0x1bb   :  { %931 = vrot.lane.b32.xlu0 %v5968_v61, %s5283_s8 }
 0x1c0   :  { %v6001_v23 = vpop.f32.mrf.mxu3 }
 0x1c8   :  { %v6007_v50 = vpop.f32.mrf.mxu3 }
 0x1d0   :  { %v6010_v41 = vpop.f32.mrf.mxu3 }
 0x1d1   :  { %v5983_v0 = vpop.f32.mrf.mxu2 }
 0x1d8   :  { %v6013_v57 = vpop.f32.mrf.mxu3 }
 0x1d9   :  { %v5985_v18 = vpop.f32.mrf.mxu2 }
 0x1e1   :  { %v5989_v13 = vpop.f32.mrf.mxu2 }
 0x1e9   :  { %v5993_v33 = vpop.f32.mrf.mxu2 }
 0x1f1   :  { %v5997_v20 = vpop.f32.mrf.mxu2 }
 0x1f9   :  { %v753_v46 = vpop.f32.mrf.mxu2 }
 0x1fa   :  { %v6004_v15 = vadd.f32 %v753_v46, %v5999_v30 }
 0x1fc   :  { %847 = vmatpush.msrb.mxu3 %v6004_v15 }
 0x215   :  { %v855_v8 = vpop.permute.xlu0 %854 }
 0x216   :  { %4931 = vmatpush.xpose.msk.msrb.mxu0 %vm778_vm5, %v855_v8 }
 0x21d   :  { %v853_v53 = vpop.permute.xlu0 %852 }
 0x21e   :  { %4932 = vmatmul.msk.f32.vlgmr.msrb.gmra.mxu0 %vm778_vm5, %v853_v53 }
 0x225   :  { %v934_v59 = vpop.permute.xlu0 %933 }
 0x226   :  { %4934 = vmatpush.xpose.msk.msra.mxu3 %vm778_vm5, %v934_v59 }
 0x229   :  { %v802_v16 = vpop.f32.mrf.mxu3 }
 0x22a   :  { %v805_v21 = vsel %vm778_vm5, %v802_v16, -inf }
 0x22b   :  { %806 = vmax.xlane.f32.xlu1 %v805_v21 }
 0x22d   :  { %v932_v36 = vpop.permute.xlu0 %931 }
 0x29b   :  { %v877_v25 = vpop.f32.mrf.mxu0 }
 0x29c   :  { %v880_v38 = vsel %vm778_vm5, %v877_v25, -inf }
 0x29e   :  { %v807_v22 = vpop.xlane.xlu1 %806 }
 0x29f   :  { %v808_v26 = vsub.f32 %v802_v16, %v807_v22  ;;  %v756_v22 = vpop.f32.mrf.mxu2 }
 0x2a1   :  { %v809_v60 = vmul.f32 1.442695, %v808_v26  ;;  %v6032_v26 = vadd.f32 %v756_v22, %v5999_v30 }
 0x2a3   :  { %5131 = vpow2.f32 %v809_v60 }
 0x2a9   :  { %v5132_v32 = vpop.eup %5131 }
 0x2aa   :  { %v811_v34 = vsel %vm778_vm5, %v5132_v32, 0.0 }
 0x2ab   :  { %812 = vadd.xlane.f32.xlu2 %v811_v34 }
 0x2b3   :  { %881 = vmax.xlane.f32.xlu2 %v880_v38  ;;  %v6042_v38 = vadd.f32 %v5987_v28, %v5960_v19 }
 0x2cb   :  { %1011 = vrot.lane.b32.xlu2 %v682_v45, %s5284_s14 }
 0x31e   :  { %v813_v10 = vpop.xlane.xlu2 %812 }
 0x31f   :  { %5133 = vrcp.f32 %v813_v10  ;;  %v825_v42 = vand.u32 2147483648, %v813_v10  ;;  %v823_v58 = vand.u32 2147483647, %v813_v10  ;;  %vm819_vm7 = vweird.f32 %v813_v10 }
 0x321   :  { %v826_v9 = vor.u32 1.1754944e-38, %v825_v42  ;;  %vm824_vm9 = vcmp.eq.f32.partialorder %v823_v58, 8.507059e+37 }
 0x325   :  { %v5134_v24 = vpop.eup %5133 }
 0x326   :  { %v815_v63 = vmul.f32 %v5134_v24, %v813_v10  ;;  %v882_v29 = vpop.xlane.xlu2 %881  ;;  %vm820_vm6 = vweird.f32 %v5134_v24 }
 0x327   :  { %v883_v37 = vsub.f32 %v877_v25, %v882_v29  ;;  %vm821_vm8 = vmor %vm819_vm7, %vm820_vm6 }
 0x328   :  { %v816_v39 = vsub.f32 1.0, %v815_v63 }
 0x329   :  { %v884_v43 = vmul.f32 1.442695, %v883_v37 }
 0x32a   :  { %v817_v14 = vmul.f32 %v5134_v24, %v816_v39 }
 0x32b   :  { %5135 = vpow2.f32 %v884_v43 }
 0x32c   :  { %v818_v44 = vadd.f32 %v5134_v24, %v817_v14 }
 0x32e   :  { %v822_v27 = vsel %vm821_vm8, %v5134_v24, %v818_v44  ;;  %v1012_v60 = vpop.permute.xlu2 %1011  ;;  %v601_v44 = vadd.f32 %v5921_v31, %v5983_v0 }
 0x32f   :  { %v827_v47 = vsel %vm824_vm9, %v826_v9, %v822_v27 }
 0x330   :  { %v828_v35 = vmul.f32 %v5132_v32, %v827_v47  ;;  %v6051_v27 = vmul.f32 0.35355338, %v601_v44 }
 0x331   :  { %v5136_v40 = vpop.eup %5135 }
 0x332   :  { %4930 = vmatmul.msk.f32.vlgmr.msrb.gmra.mxu3 %vm778_vm5, %v828_v35  ;;  %v886_v49 = vsel %vm778_vm5, %v5136_v40, 0.0 }
 0x333   :  { %887 = vadd.xlane.f32.xlu0 %v886_v49 }
 0x33a   :  { %4935 = vmatmul.msk.f32.vlgmr.msra.gmra.mxu3 %vm778_vm5, %v932_v36 }
 0x3a6   :  { %v888_v56 = vpop.xlane.xlu0 %887 }
 0x3a7   :  { %5137 = vrcp.f32 %v888_v56  ;;  %v900_v46 = vand.u32 2147483648, %v888_v56  ;;  %vm894_vm11 = vweird.f32 %v888_v56  ;;  %v898_v8 = vand.u32 2147483647, %v888_v56 }
 0x3a9   :  { %v901_v53 = vor.u32 1.1754944e-38, %v900_v46  ;;  %vm899_vm14 = vcmp.eq.f32.partialorder %v898_v8, 8.507059e+37 }
 0x3ad   :  { %v5138_v7 = vpop.eup %5137 }
 0x3ae   :  { %v890_v62 = vmul.f32 %v5138_v7, %v888_v56  ;;  %vm895_vm10 = vweird.f32 %v5138_v7 }
 0x3af   :  { %vm896_vm13 = vmor %vm894_vm11, %vm895_vm10 }
 0x3b0   :  { %v891_v4 = vsub.f32 1.0, %v890_v62 }
 0x3b2   :  { %v892_v1 = vmul.f32 %v5138_v7, %v891_v4 }
 0x3b4   :  { %v893_v6 = vadd.f32 %v5138_v7, %v892_v1 }
 0x3b5   :  { %v6023_v51 = vpop.f32.mrf.mxu3 }
 0x3bd   :  { %v956_v52 = vpop.f32.mrf.mxu3 }
 0x3be   :  { %v959_v55 = vsel %vm778_vm5, %v956_v52, -inf }
 0x3bf   :  { %960 = vmax.xlane.f32.xlu1 %v959_v55 }
 0x3d8   :  { %905 = vrot.lane.b32.xlu1 %v6004_v15, %s5282_s6 }
 0x3e0   :  { %1009 = vrot.lane.b32.xlu1 %v5968_v61, %s5284_s14  ;;  %v897_v61 = vsel %vm896_vm13, %v5138_v7, %v893_v6 }
 0x3e1   :  { %v902_v59 = vsel %vm899_vm14, %v901_v53, %v897_v61 }
 0x3e2   :  { %v903_v21 = vmul.f32 %v5136_v40, %v902_v59 }
 0x432   :  { %v961_v48 = vpop.xlane.xlu1 %960 }
 0x433   :  { %v962_v2 = vsub.f32 %v956_v52, %v961_v48 }
 0x435   :  { %v963_v3 = vmul.f32 1.442695, %v962_v2 }
 0x437   :  { %5139 = vpow2.f32 %v963_v3 }
 0x43d   :  { %v5140_v45 = vpop.eup %5139 }
 0x43e   :  { %v965_v54 = vsel %vm778_vm5, %v5140_v45, 0.0 }
 0x43f   :  { %966 = vadd.xlane.f32.xlu2 %v965_v54 }
 0x44a   :  { %v906_v16 = vpop.permute.xlu1 %905 }
 0x44b   :  { %926 = vmatpush.msra.mxu1 %v906_v16 }
 0x44c   :  { %4933 = vmatmul.msk.f32.vlgmr.msra.gmra.mxu1 %vm778_vm5, %v903_v21 }
 0x44d   :  { %4937 = vmatpush.xpose.msk.msrb.mxu1 %vm778_vm5, %v1012_v60 }
 0x451   :  { %1173 = vmatpush.msra.mxu1 %v6032_v26 }
 0x452   :  { %v1010_v32 = vpop.permute.xlu1 %1009 }
 0x454   :  { %4938 = vmatmul.msk.f32.vlgmr.msrb.gmra.mxu1 %vm778_vm5, %v1010_v32 }
 0x457   :  { %983 = vrot.lane.b32.xlu2 %v6004_v15, %s5283_s8 }
 0x4b2   :  { %v967_v34 = vpop.xlane.xlu2 %966 }
 0x4b3   :  { %5141 = vrcp.f32 %v967_v34  ;;  %v979_v29 = vand.u32 2147483648, %v967_v34  ;;  %v977_v39 = vand.u32 2147483647, %v967_v34  ;;  %vm973_vm0 = vweird.f32 %v967_v34 }
 0x4b5   :  { %v980_v43 = vor.u32 1.1754944e-38, %v979_v29  ;;  %vm978_vm2 = vcmp.eq.f32.partialorder %v977_v39, 8.507059e+37 }
 0x4b9   :  { %v5142_v25 = vpop.eup %5141 }
 0x4ba   :  { %v969_v10 = vmul.f32 %v5142_v25, %v967_v34  ;;  %v984_v24 = vpop.permute.xlu2 %983  ;;  %vm974_vm15 = vweird.f32 %v5142_v25 }
 0x4bb   :  { %1004 = vmatpush.msra.mxu0 %v984_v24  ;;  %vm975_vm1 = vmor %vm973_vm0, %vm974_vm15 }
 0x4bc   :  { %v970_v63 = vsub.f32 1.0, %v969_v10 }
 0x4bd   :  { %4940 = vmatpush.xpose.msk.msrb.mxu0 %vm778_vm5, %v6042_v38 }
 0x4be   :  { %v971_v37 = vmul.f32 %v5142_v25, %v970_v63 }
 0x4c0   :  { %v972_v42 = vadd.f32 %v5142_v25, %v971_v37 }
 0x4c2   :  { %v976_v14 = vsel %vm975_vm1, %v5142_v25, %v972_v42 }
 0x4c3   :  { %v981_v58 = vsel %vm978_vm2, %v980_v43, %v976_v14 }
 0x4c4   :  { %v982_v28 = vmul.f32 %v5140_v45, %v981_v58 }
 0x4c6   :  { %4936 = vmatmul.msk.f32.vlgmr.msra.gmra.mxu0 %vm778_vm5, %v982_v28 }
 0x4c9   :  { %v6049_v9 = vpop.f32.mrf.mxu1 }
 0x4ce   :  { %4941 = vmatmul.msk.f32.vlgmr.msrb.gmra.mxu0 %vm778_vm5, %v6051_v27 }
 0x4d1   :  { %v1034_v47 = vpop.f32.mrf.mxu1 }
 0x4d2   :  { %v1037_v35 = vsel %vm778_vm5, %v1034_v47, -inf }
 0x4d3   :  { %1038 = vmax.xlane.f32.xlu1 %v1037_v35 }
 0x4ec   :  { %1180 = vrot.lane.b32.xlu1 %v6042_v38, %s5282_s6 }
 0x543   :  { %v6058_v40 = vpop.f32.mrf.mxu0 }
 0x546   :  { %v1039_v49 = vpop.xlane.xlu1 %1038 }
 0x547   :  { %v1040_v36 = vsub.f32 %v1034_v47, %v1039_v49 }
 0x549   :  { %v1041_v52 = vmul.f32 1.442695, %v1040_v36 }
 0x54b   :  { %5143 = vpow2.f32 %v1041_v52  ;;  %v1128_v0 = vpop.f32.mrf.mxu0 }
 0x54c   :  { %v1131_v55 = vsel %vm778_vm5, %v1128_v0, -inf }
 0x54d   :  { %1132 = vmax.xlane.f32.xlu2 %v1131_v55 }
 0x551   :  { %v5144_v56 = vpop.eup %5143 }
 0x552   :  { %v1043_v7 = vsel %vm778_vm5, %v5144_v56, 0.0 }
 0x553   :  { %1044 = vadd.xlane.f32.xlu0 %v1043_v7 }
 0x55e   :  { %v1181_v32 = vpop.permute.xlu1 %1180 }
 0x565   :  { %1259 = vrot.lane.b32.xlu2 %v6042_v38, %s5283_s8 }
 0x567   :  { %1061 = vrot.lane.b32.xlu0 %v6004_v15, %s5284_s14 }
 0x56f   :  { %1178 = vrot.lane.b32.xlu0 %v6051_v27, %s5282_s6 }
 0x5c0   :  { %v1133_v48 = vpop.xlane.xlu2 %1132 }
 0x5c1   :  { %v1134_v2 = vsub.f32 %v1128_v0, %v1133_v48 }
 0x5c3   :  { %v1135_v62 = vmul.f32 1.442695, %v1134_v2 }
 0x5c5   :  { %5145 = vpow2.f32 %v1135_v62 }
 0x5c6   :  { %v1045_v3 = vpop.xlane.xlu0 %1044 }
 0x5c7   :  { %5147 = vrcp.f32 %v1045_v3  ;;  %v1057_v15 = vand.u32 2147483648, %v1045_v3  ;;  %v1055_v61 = vand.u32 2147483647, %v1045_v3  ;;  %vm1051_vm4 = vweird.f32 %v1045_v3 }
 0x5c8   :  { %v1260_v4 = vpop.permute.xlu2 %1259 }
 0x5c9   :  { %4946 = vmatpush.xpose.msk.msrb.mxu1 %vm778_vm5, %v1260_v4  ;;  %v1058_v59 = vor.u32 1.1754944e-38, %v1057_v15  ;;  %vm1056_vm7 = vcmp.eq.f32.partialorder %v1055_v61, 8.507059e+37 }
 0x5cb   :  { %v5146_v1 = vpop.eup %5145 }
 0x5cc   :  { %v1137_v45 = vsel %vm778_vm5, %v5146_v1, 0.0 }
 0x5cd   :  { %v5148_v54 = vpop.eup %5147  ;;  %1138 = vadd.xlane.f32.xlu0 %v1137_v45  ;;  %v688_v45 = vadd.f32 %v5991_v11, %v5960_v19 }
 0x5ce   :  { %v1047_v6 = vmul.f32 %v5148_v54, %v1045_v3  ;;  %vm1052_vm3 = vweird.f32 %v5148_v54  ;;  %v759_v3 = vpop.f32.mrf.mxu2 }
 0x5cf   :  { %vm1053_vm6 = vmor %vm1051_vm4, %vm1052_vm3  ;;  %v6091_v4 = vadd.f32 %v759_v3, %v5999_v30 }
 0x5d0   :  { %v1048_v46 = vsub.f32 1.0, %v1047_v6 }
 0x5d2   :  { %v1049_v8 = vmul.f32 %v5148_v54, %v1048_v46 }
 0x5d4   :  { %v1050_v53 = vadd.f32 %v5148_v54, %v1049_v8 }
 0x5d6   :  { %v1054_v16 = vsel %vm1053_vm6, %v5148_v54, %v1050_v53  ;;  %vm1100_vm6 = vcmask 130048  }
 0x5d7   :  { %v1059_v21 = vsel %vm1056_vm7, %v1058_v59, %v1054_v16  ;;  %vm1102_vm7 = vcmask 195584  }
 0x5d8   :  { %v1060_v22 = vmul.f32 %v5144_v56, %v1059_v21 }
 0x5d9   :  { %v1062_v60 = vpop.permute.xlu0 %1061 }
 0x5da   :  { %1082 = vmatpush.msrb.mxu3 %v1062_v60 }
 0x5db   :  { %4939 = vmatmul.msk.f32.vlgmr.msrb.gmra.mxu3 %vm778_vm5, %v1060_v22 }
 0x5dc   :  { %4943 = vmatpush.xpose.msk.msra.mxu3 %vm778_vm5, %v1181_v32 }
 0x5e1   :  { %v1179_v34 = vpop.permute.xlu0 %1178  ;;  %1257 = vrot.lane.b32.xlu0 %v6051_v27, %s5283_s8 }
 0x5e3   :  { %4944 = vmatmul.msk.f32.vlgmr.msra.gmra.mxu3 %vm778_vm5, %v1179_v34 }
 0x640   :  { %v1139_v25 = vpop.xlane.xlu0 %1138 }
 0x641   :  { %5149 = vrcp.f32 %v1139_v25  ;;  %v1151_v29 = vand.u32 2147483648, %v1139_v25  ;;  %v1149_v39 = vand.u32 2147483647, %v1139_v25  ;;  %vm1145_vm9 = vweird.f32 %v1139_v25 }
 0x643   :  { %v1152_v43 = vor.u32 1.1754944e-38, %v1151_v29  ;;  %vm1150_vm11 = vcmp.eq.f32.partialorder %v1149_v39, 8.507059e+37 }
 0x647   :  { %v5150_v10 = vpop.eup %5149 }
 0x648   :  { %v1141_v24 = vmul.f32 %v5150_v10, %v1139_v25  ;;  %vm1146_vm8 = vweird.f32 %v5150_v10 }
 0x649   :  { %vm1147_vm10 = vmor %vm1145_vm9, %vm1146_vm8 }
 0x64a   :  { %v1142_v63 = vsub.f32 1.0, %v1141_v24 }
 0x64c   :  { %v1143_v37 = vmul.f32 %v5150_v10, %v1142_v63 }
 0x64e   :  { %v1144_v42 = vadd.f32 %v5150_v10, %v1143_v37 }
 0x650   :  { %v1148_v14 = vsel %vm1147_vm10, %v5150_v10, %v1144_v42 }
 0x651   :  { %v1153_v58 = vsel %vm1150_vm11, %v1152_v43, %v1148_v14 }
 0x652   :  { %v1154_v28 = vmul.f32 %v5146_v1, %v1153_v58  ;;  %v5090_v1 = vpack.i.bf16 %v6091_v4, %v6032_v26 }
 0x653   :  { %v1258_v44 = vpop.permute.xlu0 %1257 }
 0x654   :  { %4942 = vmatmul.msk.f32.vlgmr.msra.gmra.mxu1 %vm778_vm5, %v1154_v28 }
 0x65c   :  { %4947 = vmatmul.msk.f32.vlgmr.msrb.gmra.mxu1 %vm778_vm5, %v1258_v44 }
 0x65e   :  { %v6077_v47 = vpop.f32.mrf.mxu3 }
 0x666   :  { %v1203_v35 = vpop.f32.mrf.mxu3 }
 0x667   :  { %v1206_v49 = vsel %vm778_vm5, %v1203_v35, -inf }
 0x668   :  { %1207 = vmax.xlane.f32.xlu0 %v1206_v49 }
 0x67c   :  { %1231 = vrot.lane.b32.xlu0 %v6032_v26, %s5282_s6 }
 0x6d1   :  { %v6082_v36 = vpop.f32.mrf.mxu1 }
 0x6d9   :  { %v1282_v52 = vpop.f32.mrf.mxu1 }
 0x6da   :  { %v1285_v0 = vsel %vm778_vm5, %v1282_v52, -inf }
 0x6db   :  { %v1208_v55 = vpop.xlane.xlu0 %1207  ;;  %1286 = vmax.xlane.f32.xlu1 %v1285_v0 }
 0x6dc   :  { %v1209_v56 = vsub.f32 %v1203_v35, %v1208_v55 }
 0x6de   :  { %v1210_v7 = vmul.f32 1.442695, %v1209_v56 }
 0x6e0   :  { %5151 = vpow2.f32 %v1210_v7 }
 0x6e6   :  { %v5152_v48 = vpop.eup %5151 }
 0x6e7   :  { %v1212_v2 = vsel %vm778_vm5, %v5152_v48, 0.0 }
 0x6e8   :  { %1213 = vadd.xlane.f32.xlu2 %v1212_v2 }
 0x6ee   :  { %v1232_v62 = vpop.permute.xlu0 %1231 }
 0x6ef   :  { %1252 = vmatpush.msra.mxu0 %v1232_v62 }
 0x6f4   :  { %1337 = vrot.lane.b32.xlu1 %v6042_v38, %s5284_s14  ;;  %v604_v38 = vadd.f32 %v5921_v31, %v5985_v18 }
 0x6f6   :  { %v6101_v54 = vmul.f32 0.35355338, %v604_v38 }
 0x700   :  { %1309 = vrot.lane.b32.xlu2 %v6032_v26, %s5283_s8 }
 0x708   :  { %5091 = vrot.lane.b32.xlu2 %v5090_v1, %s5284_s14 }
 0x710   :  { %1504 = vrot.lane.b32.xlu2 %v688_v45, %s5282_s6 }
 0x718   :  { %1659 = vrot.lane.b32.xlu2 %v6101_v54, %s5284_s14 }
 0x720   :  { %1583 = vrot.lane.b32.xlu2 %v688_v45, %s5283_s8 }
 0x74e   :  { %v1287_v6 = vpop.xlane.xlu1 %1286 }
 0x74f   :  { %v1288_v46 = vsub.f32 %v1282_v52, %v1287_v6 }
 0x751   :  { %v1289_v26 = vmul.f32 1.442695, %v1288_v46 }
 0x753   :  { %5153 = vpow2.f32 %v1289_v26 }
 0x759   :  { %v5154_v15 = vpop.eup %5153 }
 0x75a   :  { %v1291_v8 = vsel %vm778_vm5, %v5154_v15, 0.0 }
 0x75b   :  { %1292 = vadd.xlane.f32.xlu0 %v1291_v8  ;;  %v1214_v11 = vpop.xlane.xlu2 %1213  ;;  %v6164_v8 = vadd.f32 %v6001_v23, %v5960_v19  ;;  %v610_v23 = vadd.f32 %v5921_v31, %v5993_v33  ;;  %v613_v33 = vadd.f32 %v5921_v31, %v5997_v20 }
 0x75c   :  { %5155 = vrcp.f32 %v1214_v11  ;;  %v1226_v16 = vand.u32 2147483648, %v1214_v11  ;;  %v1224_v60 = vand.u32 2147483647, %v1214_v11  ;;  %vm1220_vm14 = vweird.f32 %v1214_v11 }
 0x75e   :  { %v1227_v34 = vor.u32 1.1754944e-38, %v1226_v16  ;;  %vm1225_vm0 = vcmp.eq.f32.partialorder %v1224_v60, 8.507059e+37 }
 0x762   :  { %v5156_v61 = vpop.eup %5155 }
 0x763   :  { %v1216_v53 = vmul.f32 %v5156_v61, %v1214_v11  ;;  %v1310_v18 = vpop.permute.xlu2 %1309  ;;  %vm1221_vm13 = vweird.f32 %v5156_v61  ;;  %v6202_v11 = vmul.f32 0.35355338, %v613_v33 }
 0x764   :  { %1330 = vmatpush.msrb.mxu3 %v1310_v18  ;;  %vm1222_vm15 = vmor %vm1220_vm14, %vm1221_vm13 }
 0x765   :  { %v1217_v59 = vsub.f32 1.0, %v1216_v53 }
 0x766   :  { %4952 = vmatpush.xpose.msk.msra.mxu3 %vm778_vm5, %v688_v45  ;;  %v1338_v21 = vpop.permute.xlu1 %1337 }
 0x767   :  { %v1218_v22 = vmul.f32 %v5156_v61, %v1217_v59  ;;  %4949 = vmatpush.xpose.msk.msrb.mxu0 %vm778_vm5, %v1338_v21 }
 0x769   :  { %v1219_v32 = vadd.f32 %v5156_v61, %v1218_v22 }
 0x76b   :  { %v1223_v25 = vsel %vm1222_vm15, %v5156_v61, %v1219_v32  ;;  %v6109_v10 = vpop.permute.xlu2 %5091  ;;  %v619_v61 = vadd.f32 %v5921_v31, %v5958_v17 }
 0x76c   :  { %v1228_v24 = vsel %vm1225_vm0, %v1227_v34, %v1223_v25  ;;  %v5093_v63 = vunpack.i.l.bf16 %v6109_v10 }
 0x76d   :  { %v1229_v29 = vmul.f32 %v5152_v48, %v1228_v24  ;;  %v6214_v53 = vmul.f32 0.35355338, %v619_v61 }
 0x76e   :  { %1408 = vmatpush.msra.mxu1 %v5093_v63 }
 0x76f   :  { %1335 = vrot.lane.b32.xlu0 %v6051_v27, %s5284_s14  ;;  %4945 = vmatmul.msk.f32.vlgmr.msra.gmra.mxu0 %vm778_vm5, %v1229_v29  ;;  %v607_v27 = vadd.f32 %v5921_v31, %v5989_v13 }
 0x770   :  { %1497 = vmatpush.msra.mxu0 %v6091_v4 }
 0x771   :  { %v6126_v39 = vmul.f32 0.35355338, %v607_v27 }
 0x773   :  { %v1505_v37 = vpop.permute.xlu2 %1504 }
 0x774   :  { %4955 = vmatpush.xpose.msk.msrb.mxu1 %vm778_vm5, %v1505_v37  ;;  %v616_v37 = vadd.f32 %v5921_v31, %v5954_v12 }
 0x777   :  { %1088 = vrot.lane.b32.xlu0 %v6049_v9, %s5285_s1 }
 0x77b   :  { %v1660_v14 = vpop.permute.xlu2 %1659 }
 0x77f   :  { %1092 = vrot.lane.b32.xlu0 %v6058_v40, %s5286_s30 }
 0x783   :  { %v1584_v55 = vpop.permute.xlu2 %1583 }
 0x787   :  { %1096 = vrot.lane.b32.xlu0 %v6077_v47, %s5287_s15 }
 0x78f   :  { %1661 = vrot.lane.b32.xlu0 %v688_v45, %s5284_s14 }
 0x797   :  { %1826 = vrot.lane.b32.xlu0 %v6126_v39, %s5282_s6 }
 0x7ce   :  { %v1293_v42 = vpop.xlane.xlu0 %1292 }
 0x7cf   :  { %5157 = vrcp.f32 %v1293_v42  ;;  %v1305_v58 = vand.u32 2147483648, %v1293_v42  ;;  %v1303_v44 = vand.u32 2147483647, %v1293_v42  ;;  %vm1299_vm2 = vweird.f32 %v1293_v42 }
 0x7d1   :  { %v1306_v35 = vor.u32 1.1754944e-38, %v1305_v58  ;;  %vm1304_vm4 = vcmp.eq.f32.partialorder %v1303_v44, 8.507059e+37 }
 0x7d5   :  { %v5158_v9 = vpop.eup %5157 }
 0x7d6   :  { %v1295_v43 = vmul.f32 %v5158_v9, %v1293_v42  ;;  %vm1300_vm1 = vweird.f32 %v5158_v9  ;;  %v6248_v42 = vmul.f32 0.35355338, %v616_v37 }
 0x7d7   :  { %vm1301_vm3 = vmor %vm1299_vm2, %vm1300_vm1 }
 0x7d8   :  { %v1296_v40 = vsub.f32 1.0, %v1295_v43 }
 0x7da   :  { %v1297_v28 = vmul.f32 %v5158_v9, %v1296_v40 }
 0x7dc   :  { %v1298_v47 = vadd.f32 %v5158_v9, %v1297_v28 }
 0x7de   :  { %v1302_v13 = vsel %vm1301_vm3, %v5158_v9, %v1298_v47  ;;  %v762_v9 = vpop.f32.mrf.mxu2 }
 0x7df   :  { %v1307_v49 = vsel %vm1304_vm4, %v1306_v35, %v1302_v13  ;;  %v6269_v43 = vadd.f32 %v762_v9, %v5999_v30 }
 0x7e0   :  { %v1308_v52 = vmul.f32 %v5154_v15, %v1307_v49  ;;  %v6152_v15 = vadd.f32 %v5995_v5, %v5960_v19  ;;  %v6176_v5 = vadd.f32 %v6007_v50, %v5960_v19  ;;  %v6192_v50 = vadd.f32 %v6010_v41, %v5960_v19 }
 0x7e1   :  { %v1336_v0 = vpop.permute.xlu0 %1335  ;;  %v6208_v41 = vadd.f32 %v6013_v57, %v5960_v19 }
 0x7e2   :  { %4948 = vmatmul.msk.f32.vlgmr.msrb.gmra.mxu3 %vm778_vm5, %v1308_v52  ;;  %4950 = vmatmul.msk.f32.vlgmr.msrb.gmra.mxu0 %vm778_vm5, %v1336_v0 }
 0x7e3   :  { %4958 = vmatpush.xpose.msk.msrb.mxu0 %vm778_vm5, %v1584_v55 }
 0x7e9   :  { %v1089_v56 = vpop.permute.xlu0 %1088 }
 0x7ea   :  { %4953 = vmatmul.msk.f32.vlgmr.msra.gmra.mxu3 %vm778_vm5, %v6101_v54  ;;  %v1099_v7 = vsel %vm778_vm5, %v6023_v51, %v1089_v56 }
 0x7ec   :  { %v1254_v45 = vpop.f32.mrf.mxu0 }
 0x7f1   :  { %v1093_v48 = vpop.permute.xlu0 %1092 }
 0x7f2   :  { %v1101_v2 = vsel %vm1100_vm6, %v1099_v7, %v1093_v48 }
 0x7f9   :  { %v1097_v62 = vpop.permute.xlu0 %1096 }
 0x7fa   :  { %v6139_v3 = vsel %vm1102_vm7, %v1101_v2, %v1097_v62 }
 0x801   :  { %v1662_v1 = vpop.permute.xlu0 %1661 }
 0x802   :  { %4961 = vmatpush.xpose.msk.msrb.mxu2 %vm778_vm5, %v1662_v1 }
 0x805   :  { %4962 = vmatmul.msk.f32.vlgmr.msrb.gmra.mxu2 %vm778_vm5, %v1660_v14  ;;  %v6273_v14 = vpack.i.bf16 %v6269_v43, %v6091_v4 }
 0x809   :  { %v1827_v63 = vpop.permute.xlu0 %1826 }
 0x85f   :  { %v1360_v38 = vpop.f32.mrf.mxu0 }
 0x860   :  { %v1363_v6 = vsel %vm778_vm5, %v1360_v38, -inf }
 0x861   :  { %1364 = vmax.xlane.f32.xlu1 %v1363_v6 }
 0x865   :  { %v6144_v46 = vpop.f32.mrf.mxu3 }
 0x86d   :  { %v1452_v51 = vpop.f32.mrf.mxu3 }
 0x86e   :  { %v1455_v26 = vsel %vm778_vm5, %v1452_v51, -inf }
 0x86f   :  { %1456 = vmax.xlane.f32.xlu2 %v1455_v26 }
 0x87a   :  { %1414 = vrot.lane.b32.xlu1 %v1254_v45, %s5285_s1 }
 0x882   :  { %1502 = vrot.lane.b32.xlu1 %v6101_v54, %s5282_s6 }
 0x887   :  { %1985 = vrot.lane.b32.xlu2 %v6152_v15, %s5284_s14 }
 0x88a   :  { %1828 = vrot.lane.b32.xlu1 %v6152_v15, %s5282_s6 }
 0x88f   :  { %1907 = vrot.lane.b32.xlu2 %v6152_v15, %s5283_s8 }
 0x892   :  { %1581 = vrot.lane.b32.xlu1 %v6101_v54, %s5283_s8  ;;  %v6186_v54 = vmul.f32 0.35355338, %v610_v23 }
 0x897   :  { %2309 = vrot.lane.b32.xlu2 %v6164_v8, %s5284_s14 }
 0x89a   :  { %2152 = vrot.lane.b32.xlu1 %v6164_v8, %s5282_s6 }
 0x89f   :  { %2231 = vrot.lane.b32.xlu2 %v6164_v8, %s5283_s8 }
 0x8a2   :  { %1905 = vrot.lane.b32.xlu1 %v6126_v39, %s5283_s8 }
 0x8a7   :  { %2633 = vrot.lane.b32.xlu2 %v6176_v5, %s5284_s14 }
 0x8aa   :  { %2476 = vrot.lane.b32.xlu1 %v6176_v5, %s5282_s6 }
 0x8af   :  { %2555 = vrot.lane.b32.xlu2 %v6176_v5, %s5283_s8 }
 0x8b2   :  { %2229 = vrot.lane.b32.xlu1 %v6186_v54, %s5283_s8 }
 0x8b7   :  { %2957 = vrot.lane.b32.xlu2 %v6192_v50, %s5284_s14 }
 0x8ba   :  { %2800 = vrot.lane.b32.xlu1 %v6192_v50, %s5282_s6 }
 0x8bf   :  { %2879 = vrot.lane.b32.xlu2 %v6192_v50, %s5283_s8 }
 0x8c2   :  { %2553 = vrot.lane.b32.xlu1 %v6202_v11, %s5283_s8 }
 0x8c7   :  { %3281 = vrot.lane.b32.xlu2 %v6208_v41, %s5284_s14 }
 0x8cf   :  { %3201 = vrot.lane.b32.xlu2 %v6214_v53, %s5283_s8 }
 0x8d4   :  { %v1365_v20 = vpop.xlane.xlu1 %1364 }
 0x8d5   :  { %v1366_v18 = vsub.f32 %v1360_v38, %v1365_v20 }
 0x8d7   :  { %v1367_v59 = vmul.f32 1.442695, %v1366_v18 }
 0x8d9   :  { %5159 = vpow2.f32 %v1367_v59 }
 0x8df   :  { %v6218_v16 = vpop.eup %5159 }
 0x8e0   :  { %v1369_v19 = vsel %vm778_vm5, %v6218_v16, 0.0 }
 0x8e1   :  { %1370 = vadd.xlane.f32.xlu0 %v1369_v19 }
 0x8e2   :  { %v1457_v57 = vpop.xlane.xlu2 %1456 }
 0x8e3   :  { %v1458_v21 = vsub.f32 %v1452_v51, %v1457_v57 }
 0x8e5   :  { %v1459_v22 = vmul.f32 1.442695, %v1458_v21 }
 0x8e7   :  { %5161 = vpow2.f32 %v1459_v22 }
 0x8ea   :  { %v1986_v24 = vpop.permute.xlu2 %1985 }
 0x8ec   :  { %v6222_v17 = vpop.permute.xlu1 %1414 }
 0x8ed   :  { %v6224_v60 = vpop.eup %5161 }
 0x8ee   :  { %v1461_v32 = vsel %vm778_vm5, %v6224_v60, 0.0 }
 0x8ef   :  { %1462 = vadd.xlane.f32.xlu1 %v1461_v32 }
 0x8f2   :  { %v1908_v28 = vpop.permute.xlu2 %1907 }
 0x8f4   :  { %v6228_v34 = vpop.permute.xlu1 %1502 }
 0x8f5   :  { %1983 = vrot.lane.b32.xlu0 %v6126_v39, %s5284_s14 }
 0x8fa   :  { %v2310_v13 = vpop.permute.xlu2 %2309 }
 0x8fc   :  { %v1829_v25 = vpop.permute.xlu1 %1828 }
 0x8fd   :  { %2150 = vrot.lane.b32.xlu0 %v6186_v54, %s5282_s6  ;;  %4967 = vmatpush.xpose.msk.msra.mxu2 %vm778_vm5, %v1829_v25 }
 0x900   :  { %4968 = vmatmul.msk.f32.vlgmr.msra.gmra.mxu2 %vm778_vm5, %v1827_v63 }
 0x901   :  { %4973 = vmatpush.xpose.msk.msrb.mxu2 %vm778_vm5, %v1986_v24 }
 0x902   :  { %v2232_v1 = vpop.permute.xlu2 %2231 }
 0x904   :  { %v6237_v29 = vpop.permute.xlu1 %1581 }
 0x905   :  { %2307 = vrot.lane.b32.xlu0 %v6186_v54, %s5284_s14 }
 0x908   :  { %3124 = vrot.lane.b32.xlu1 %v6208_v41, %s5282_s6 }
 0x90a   :  { %v2634_v20 = vpop.permute.xlu2 %2633 }
 0x90c   :  { %v2153_v27 = vpop.permute.xlu1 %2152 }
 0x90d   :  { %2474 = vrot.lane.b32.xlu0 %v6202_v11, %s5282_s6  ;;  %4979 = vmatpush.xpose.msk.msra.mxu2 %vm778_vm5, %v2153_v27 }
 0x910   :  { %2877 = vrot.lane.b32.xlu1 %v6248_v42, %s5283_s8 }
 0x912   :  { %v2556_v22 = vpop.permute.xlu2 %2555 }
 0x914   :  { %v6262_v31 = vpop.permute.xlu1 %1905 }
 0x915   :  { %2631 = vrot.lane.b32.xlu0 %v6202_v11, %s5284_s14 }
 0x918   :  { %3203 = vrot.lane.b32.xlu1 %v6208_v41, %s5283_s8 }
 0x91c   :  { %v2477_v12 = vpop.permute.xlu1 %2476 }
 0x91d   :  { %2798 = vrot.lane.b32.xlu0 %v6248_v42, %s5282_s6 }
 0x924   :  { %v6277_v40 = vpop.permute.xlu1 %2229 }
 0x925   :  { %2955 = vrot.lane.b32.xlu0 %v6248_v42, %s5284_s14 }
 0x92c   :  { %v2801_v58 = vpop.permute.xlu1 %2800 }
 0x92d   :  { %3122 = vrot.lane.b32.xlu0 %v6214_v53, %s5282_s6 }
 0x934   :  { %v6279_v47 = vpop.permute.xlu1 %2553 }
 0x935   :  { %3279 = vrot.lane.b32.xlu0 %v6214_v53, %s5284_s14 }
 0x93d   :  { %1418 = vrot.lane.b32.xlu0 %v6144_v46, %s5286_s30 }
 0x945   :  { %5101 = vrot.lane.b32.xlu0 %v6273_v14, %s5283_s8 }
 0x954   :  { %v1371_v44 = vpop.xlane.xlu0 %1370 }
 0x955   :  { %5163 = vrcp.f32 %v1371_v44  ;;  %v1383_v0 = vand.u32 2147483648, %v1371_v44  ;;  %v1381_v4 = vand.u32 2147483647, %v1371_v44  ;;  %vm1377_vm9 = vweird.f32 %v1371_v44 }
 0x957   :  { %v1384_v48 = vor.u32 1.1754944e-38, %v1383_v0  ;;  %vm1382_vm11 = vcmp.eq.f32.partialorder %v1381_v4, 8.507059e+37 }
 0x95b   :  { %v5164_v35 = vpop.eup %5163 }
 0x95c   :  { %v1373_v49 = vmul.f32 %v5164_v35, %v1371_v44  ;;  %vm1378_vm8 = vweird.f32 %v5164_v35 }
 0x95d   :  { %vm1379_vm10 = vmor %vm1377_vm9, %vm1378_vm8 }
 0x95e   :  { %v1374_v52 = vsub.f32 1.0, %v1373_v49 }
 0x960   :  { %v1375_v55 = vmul.f32 %v5164_v35, %v1374_v52 }
 0x962   :  { %v1376_v56 = vadd.f32 %v5164_v35, %v1375_v55  ;;  %v1463_v7 = vpop.xlane.xlu1 %1462 }
 0x963   :  { %5165 = vrcp.f32 %v1463_v7  ;;  %v1475_v26 = vand.u32 2147483648, %v1463_v7  ;;  %v1473_v33 = vand.u32 2147483647, %v1463_v7  ;;  %vm1469_vm14 = vweird.f32 %v1463_v7 }
 0x964   :  { %v1380_v2 = vsel %vm1379_vm10, %v5164_v35, %v1376_v56 }
 0x965   :  { %v1385_v62 = vsel %vm1382_vm11, %v1384_v48, %v1380_v2  ;;  %v1476_v59 = vor.u32 1.1754944e-38, %v1475_v26  ;;  %vm1474_vm0 = vcmp.eq.f32.partialorder %v1473_v33, 8.507059e+37  ;;  %v5094_v48 = vunpack.i.h.bf16 %v6109_v10 }
 0x966   :  { %v1386_v45 = vmul.f32 %v6218_v16, %v1385_v62 }
 0x967   :  { %v1984_v38 = vpop.permute.xlu0 %1983 }
 0x968   :  { %4951 = vmatmul.msk.f32.vlgmr.msra.gmra.mxu1 %vm778_vm5, %v1386_v45  ;;  %4974 = vmatmul.msk.f32.vlgmr.msrb.gmra.mxu2 %vm778_vm5, %v1984_v38 }
 0x969   :  { %v5166_v6 = vpop.eup %5165  ;;  %4985 = vmatpush.xpose.msk.msrb.mxu2 %vm778_vm5, %v2310_v13 }
 0x96a   :  { %v1465_v46 = vmul.f32 %v5166_v6, %v1463_v7  ;;  %vm1470_vm13 = vweird.f32 %v5166_v6 }
 0x96b   :  { %vm1471_vm15 = vmor %vm1469_vm14, %vm1470_vm13 }
 0x96c   :  { %v1466_v51 = vsub.f32 1.0, %v1465_v46 }
 0x96e   :  { %v1467_v23 = vmul.f32 %v5166_v6, %v1466_v51 }
 0x96f   :  { %v2151_v61 = vpop.permute.xlu0 %2150 }
 0x970   :  { %v1468_v18 = vadd.f32 %v5166_v6, %v1467_v23  ;;  %4956 = vmatmul.msk.f32.vlgmr.msrb.gmra.mxu1 %vm778_vm5, %v6228_v34  ;;  %4980 = vmatmul.msk.f32.vlgmr.msra.gmra.mxu2 %vm778_vm5, %v2151_v61 }
 0x971   :  { %4991 = vmatpush.xpose.msk.msra.mxu2 %vm778_vm5, %v2477_v12  ;;  %v6357_v12 = vpop.f32.mrf.mxu2 }
 0x972   :  { %v1472_v16 = vsel %vm1471_vm15, %v5166_v6, %v1468_v18 }
 0x973   :  { %v1477_v19 = vsel %vm1474_vm0, %v1476_v59, %v1472_v16 }
 0x974   :  { %v1478_v57 = vmul.f32 %v6224_v60, %v1477_v19  ;;  %v2958_v60 = vpop.permute.xlu2 %2957 }
 0x976   :  { %4954 = vmatmul.msk.f32.vlgmr.msra.gmra.mxu0 %vm778_vm5, %v1478_v57 }
 0x977   :  { %4964 = vmatpush.xpose.msk.msra.mxu0 %vm778_vm5, %v6152_v15  ;;  %v2308_v21 = vpop.permute.xlu0 %2307 }
 0x978   :  { %4986 = vmatmul.msk.f32.vlgmr.msrb.gmra.mxu2 %vm778_vm5, %v2308_v21 }
 0x979   :  { %4997 = vmatpush.xpose.msk.msrb.mxu2 %vm778_vm5, %v2634_v20 }
 0x97a   :  { %v3125_v24 = vpop.permute.xlu1 %3124 }
 0x97c   :  { %v2880_v34 = vpop.permute.xlu2 %2879 }
 0x97e   :  { %4959 = vmatmul.msk.f32.vlgmr.msrb.gmra.mxu0 %vm778_vm5, %v6237_v29 }
 0x97f   :  { %4970 = vmatpush.xpose.msk.msrb.mxu0 %vm778_vm5, %v1908_v28  ;;  %v2475_v32 = vpop.permute.xlu0 %2474 }
 0x980   :  { %4992 = vmatmul.msk.f32.vlgmr.msra.gmra.mxu2 %vm778_vm5, %v2475_v32 }
 0x981   :  { %5003 = vmatpush.xpose.msk.msra.mxu2 %vm778_vm5, %v2801_v58 }
 0x982   :  { %v2878_v27 = vpop.permute.xlu1 %2877 }
 0x986   :  { %4965 = vmatmul.msk.f32.vlgmr.msra.gmra.mxu0 %vm778_vm5, %v6126_v39 }
 0x987   :  { %4976 = vmatpush.xpose.msk.msra.mxu0 %vm778_vm5, %v6164_v8  ;;  %v2632_v15 = vpop.permute.xlu0 %2631  ;;  %v3282_v8 = vpop.permute.xlu2 %3281 }
 0x988   :  { %4998 = vmatmul.msk.f32.vlgmr.msrb.gmra.mxu2 %vm778_vm5, %v2632_v15 }
 0x989   :  { %5009 = vmatpush.xpose.msk.msrb.mxu2 %vm778_vm5, %v2958_v60 }
 0x98e   :  { %4971 = vmatmul.msk.f32.vlgmr.msrb.gmra.mxu0 %vm778_vm5, %v6262_v31  ;;  %v3372_v31 = vld [vmem:[%s8357_s9] sm:$0xff] }
 0x98f   :  { %4982 = vmatpush.xpose.msk.msrb.mxu0 %vm778_vm5, %v2232_v1  ;;  %v2799_v25 = vpop.permute.xlu0 %2798  ;;  %v3202_v9 = vpop.permute.xlu2 %3201 }
 0x990   :  { %5004 = vmatmul.msk.f32.vlgmr.msra.gmra.mxu2 %vm778_vm5, %v2799_v25 }
 0x991   :  { %5015 = vmatpush.xpose.msk.msra.mxu2 %vm778_vm5, %v3125_v24 }
 0x996   :  { %4977 = vmatmul.msk.f32.vlgmr.msra.gmra.mxu0 %vm778_vm5, %v6186_v54  ;;  %v1425_v54 = vsel %vm778_vm5, %v6082_v36, %v6222_v17  ;;  %v3204_v36 = vpop.permute.xlu1 %3203  ;;  %v3375_v17 = vld [vmem:[%s8357_s9 + $0x18] sm:$0xff] }
 0x997   :  { %4988 = vmatpush.xpose.msk.msra.mxu0 %vm778_vm5, %v6176_v5  ;;  %v2956_v39 = vpop.permute.xlu0 %2955 }
 0x998   :  { %5010 = vmatmul.msk.f32.vlgmr.msrb.gmra.mxu2 %vm778_vm5, %v2956_v39 }
 0x999   :  { %5021 = vmatpush.xpose.msk.msrb.mxu2 %vm778_vm5, %v3282_v8 }
 0x99e   :  { %4983 = vmatmul.msk.f32.vlgmr.msrb.gmra.mxu0 %vm778_vm5, %v6277_v40 }
 0x99f   :  { %4994 = vmatpush.xpose.msk.msrb.mxu0 %vm778_vm5, %v2556_v22  ;;  %v3123_v63 = vpop.permute.xlu0 %3122 }
 0x9a0   :  { %5016 = vmatmul.msk.f32.vlgmr.msra.gmra.mxu2 %vm778_vm5, %v3123_v63 }
 0x9a6   :  { %4989 = vmatmul.msk.f32.vlgmr.msra.gmra.mxu0 %vm778_vm5, %v6202_v11 }
 0x9a7   :  { %5000 = vmatpush.xpose.msk.msra.mxu0 %vm778_vm5, %v6192_v50  ;;  %v3280_v5 = vpop.permute.xlu0 %3279 }
 0x9a8   :  { %5022 = vmatmul.msk.f32.vlgmr.msrb.gmra.mxu2 %vm778_vm5, %v3280_v5 }
 0x9ae   :  { %4995 = vmatmul.msk.f32.vlgmr.msrb.gmra.mxu0 %vm778_vm5, %v6279_v47 }
 0x9af   :  { %5006 = vmatpush.xpose.msk.msrb.mxu0 %vm778_vm5, %v2880_v34  ;;  %v1419_v29 = vpop.permute.xlu0 %1418 }
 0x9b0   :  { %v1426_v37 = vsel %vm1100_vm6, %v1425_v54, %v1419_v29 }
 0x9b6   :  { %5001 = vmatmul.msk.f32.vlgmr.msra.gmra.mxu0 %vm778_vm5, %v6248_v42  ;;  %v3373_v42 = vld [vmem:[%s8357_s9 + $0x8] sm:$0xff] }
 0x9b7   :  { %5012 = vmatpush.xpose.msk.msra.mxu0 %vm778_vm5, %v6208_v41  ;;  %v6337_v50 = vpop.permute.xlu0 %5101  ;;  %v3374_v41 = vld [vmem:[%s8357_s9 + $0x10] sm:$0xff] }
 0x9b8   :  { %v5103_v11 = vunpack.i.l.bf16 %v6337_v50 }
 0x9ba   :  { %1654 = vmatpush.msra.mxu1 %v5103_v11 }
 0x9bc   :  { %1821 = vmatpush.msrb.mxu1 %v6269_v43 }
 0x9be   :  { %5007 = vmatmul.msk.f32.vlgmr.msrb.gmra.mxu0 %vm778_vm5, %v2878_v27 }
 0x9bf   :  { %5018 = vmatpush.xpose.msk.msrb.mxu0 %vm778_vm5, %v3204_v36 }
 0x9c6   :  { %5013 = vmatmul.msk.f32.vlgmr.msra.gmra.mxu0 %vm778_vm5, %v6214_v53  ;;  %v6362_v53 = vpop.f32.mrf.mxu2 }
 0x9c7   :  { %3416 = vmatpush.msra.mxu0 %v3375_v17 }
 0x9c9   :  { %3417 = vmatpush.msra.mxu0 %v3374_v41 }
 0x9cb   :  { %3418 = vmatpush.msra.mxu0 %v3373_v42 }
 0x9cd   :  { %3419 = vmatpush.msra.mxu0 %v3372_v31 }
 0x9ce   :  { %5019 = vmatmul.msk.f32.vlgmr.msrb.gmra.mxu0 %vm778_vm5, %v3202_v9  ;;  %v6364_v40 = vpop.f32.mrf.mxu2 }
 0x9d6   :  { %5024 = vmatmul.msk.f32.vlgmr.msra.gmra.mxu0 %vm223_vm12, %v6139_v3  ;;  %v6367_v28 = vpop.f32.mrf.mxu2 }
 0x9de   :  { %v1684_v35 = vpop.f32.mrf.mxu2 }
 0x9df   :  { %v1687_v3 = vsel %vm778_vm5, %v1684_v35, -inf }
 0x9e5   :  { %v1410_v58 = vpop.f32.mrf.mxu1 }
 0x9e6   :  { %1422 = vrot.lane.b32.xlu1 %v1410_v58, %s5287_s15  ;;  %v1851_v13 = vpop.f32.mrf.mxu2 }
 0x9e7   :  { %v1854_v49 = vsel %vm778_vm5, %v1851_v13, -inf }
 0x9ed   :  { %v6369_v44 = vpop.f32.mrf.mxu1 }
 0x9ee   :  { %5096 = vrot.lane.b32.xlu1 %v6273_v14, %s5282_s6  ;;  %v1530_v47 = vsel %vm778_vm5, %v6369_v44, -inf  ;;  %v2008_v52 = vpop.f32.mrf.mxu2 }
 0x9ef   :  { %1531 = vmax.xlane.f32.xlu2 %v1530_v47  ;;  %v2011_v0 = vsel %vm778_vm5, %v2008_v52, -inf }
 0x9f3   :  { %v6429_v36 = vpop.f32.mrf.mxu0 }
 0x9f6   :  { %v2175_v14 = vpop.f32.mrf.mxu2 }
 0x9f7   :  { %1688 = vmax.xlane.f32.xlu2 %v1687_v3  ;;  %v2178_v10 = vsel %vm778_vm5, %v2175_v14, -inf }
 0x9fb   :  { %v6431_v31 = vpop.f32.mrf.mxu0 }
 0x9fe   :  { %v2332_v62 = vpop.f32.mrf.mxu2 }
 0x9ff   :  { %v2335_v33 = vsel %vm778_vm5, %v2332_v62, -inf }
 0xa06   :  { %v6384_v6 = vpop.f32.mrf.mxu2 }
 0xa07   :  { %v2502_v59 = vsel %vm778_vm5, %v6384_v6, -inf }
 0xa0e   :  { %v6390_v26 = vpop.f32.mrf.mxu2 }
 0xa0f   :  { %v2659_v32 = vsel %vm778_vm5, %v6390_v26, -inf }
 0xa16   :  { %v6393_v23 = vpop.f32.mrf.mxu2 }
 0xa17   :  { %v2826_v24 = vsel %vm778_vm5, %v6393_v23, -inf }
 0xa18   :  { %1855 = vmax.xlane.f32.xlu1 %v1854_v49 }
 0xa1e   :  { %v6398_v16 = vpop.f32.mrf.mxu2 }
 0xa1f   :  { %v2983_v54 = vsel %vm778_vm5, %v6398_v16, -inf }
 0xa20   :  { %2012 = vmax.xlane.f32.xlu1 %v2011_v0 }
 0xa26   :  { %v6406_v15 = vpop.f32.mrf.mxu2 }
 0xa27   :  { %v3150_v39 = vsel %vm778_vm5, %v6406_v15, -inf }
 0xa2e   :  { %v6417_v5 = vpop.f32.mrf.mxu2 }
 0xa2f   :  { %v3307_v29 = vsel %vm778_vm5, %v6417_v5, -inf }
 0xa58   :  { %v1423_v55 = vpop.permute.xlu1 %1422 }
 0xa59   :  { %v1427_v4 = vsel %vm1102_vm7, %v1426_v37, %v1423_v55 }
 0xa5a   :  { %5025 = vmatmul.msk.f32.gmra.mxu0 %vm223_vm12, %v1427_v4 }
 0xa60   :  { %v6380_v56 = vpop.permute.xlu1 %5096 }
 0xa61   :  { %v5098_v7 = vunpack.i.l.bf16 %v6380_v56 }
 0xa62   :  { %v1532_v2 = vpop.xlane.xlu2 %1531 }
 0xa63   :  { %1576 = vmatpush.msrb.mxu3 %v5098_v7  ;;  %v1533_v25 = vsub.f32 %v6369_v44, %v1532_v2 }
 0xa65   :  { %1732 = vmatpush.msra.mxu3 %v5094_v48  ;;  %v1534_v63 = vmul.f32 1.442695, %v1533_v25 }
 0xa6a   :  { %v1689_v1 = vpop.xlane.xlu2 %1688 }
 0xa6b   :  { %v1690_v45 = vsub.f32 %v1684_v35, %v1689_v1 }
 0xa6d   :  { %v1691_v38 = vmul.f32 1.442695, %v1690_v45 }
 0xa6f   :  { %5167 = vpow2.f32 %v1691_v38 }
 0xa75   :  { %v6386_v46 = vpop.eup %5167 }
 0xa76   :  { %v1693_v51 = vsel %vm778_vm5, %v6386_v46, 0.0 }
 0xa77   :  { %1694 = vadd.xlane.f32.xlu2 %v1693_v51 }
 0xa7f   :  { %2179 = vmax.xlane.f32.xlu2 %v2178_v10 }
 0xa87   :  { %2336 = vmax.xlane.f32.xlu2 %v2335_v33 }
 0xa8b   :  { %v1856_v61 = vpop.xlane.xlu1 %1855 }
 0xa8c   :  { %v1857_v20 = vsub.f32 %v1851_v13, %v1856_v61  ;;  %v6437_v13 = vpop.f32.mrf.mxu0 }
 0xa8d   :  { %v1779_v55 = vsel %vm778_vm5, %v6437_v13, -inf }
 0xa8e   :  { %v1858_v18 = vmul.f32 1.442695, %v1857_v20  ;;  %v6475_v20 = vadd.f32 %v6362_v53, %v5999_v30 }
 0xa8f   :  { %2503 = vmax.xlane.f32.xlu2 %v2502_v59 }
 0xa90   :  { %5169 = vpow2.f32 %v1858_v18 }
 0xa93   :  { %v2013_v19 = vpop.xlane.xlu1 %2012 }
 0xa94   :  { %v2014_v57 = vsub.f32 %v2008_v52, %v2013_v19  ;;  %v6453_v45 = vpop.f32.mrf.mxu0 }
 0xa96   :  { %v6400_v21 = vpop.eup %5169  ;;  %v2015_v22 = vmul.f32 1.442695, %v2014_v57 }
 0xa97   :  { %2660 = vmax.xlane.f32.xlu2 %v2659_v32  ;;  %v1860_v60 = vsel %vm778_vm5, %v6400_v21, 0.0 }
 0xa98   :  { %5171 = vpow2.f32 %v2015_v22  ;;  %1861 = vadd.xlane.f32.xlu1 %v1860_v60 }
 0xa99   :  { %5173 = vpow2.f32 %v1534_v63 }
 0xa9c   :  { %v6465_v10 = vpop.f32.mrf.mxu0 }
 0xa9e   :  { %v6408_v34 = vpop.eup %5171 }
 0xa9f   :  { %2827 = vmax.xlane.f32.xlu2 %v2826_v24  ;;  %v2017_v8 = vsel %vm778_vm5, %v6408_v34, 0.0  ;;  %v6423_v37 = vpop.eup %5173 }
 0xaa0   :  { %3151 = vmax.xlane.f32.xlu1 %v3150_v39  ;;  %2018 = vadd.xlane.f32.xlu0 %v2017_v8  ;;  %v1536_v27 = vsel %vm778_vm5, %v6423_v37, 0.0 }
 0xaa7   :  { %2984 = vmax.xlane.f32.xlu2 %v2983_v54 }
 0xaa8   :  { %3308 = vmax.xlane.f32.xlu0 %v3307_v29 }
 0xab0   :  { %1537 = vadd.xlane.f32.xlu0 %v1536_v27 }
 0xaea   :  { %v6427_v11 = vpop.xlane.xlu2 %1694 }
 0xaeb   :  { %vm1701_vm9 = vweird.f32 %v6427_v11 }
 0xaf2   :  { %v2180_v17 = vpop.xlane.xlu2 %2179 }
 0xaf3   :  { %v2181_v41 = vsub.f32 %v2175_v14, %v2180_v17 }
 0xaf5   :  { %v2182_v42 = vmul.f32 1.442695, %v2181_v41 }
 0xaf7   :  { %5175 = vpow2.f32 %v2182_v42 }
 0xafa   :  { %v2337_v9 = vpop.xlane.xlu2 %2336 }
 0xafb   :  { %v2338_v58 = vsub.f32 %v2332_v62, %v2337_v9  ;;  %v1609_v62 = vsel %vm778_vm5, %v6431_v31, -inf }
 0xafd   :  { %v6433_v44 = vpop.eup %5175  ;;  %v2339_v47 = vmul.f32 1.442695, %v2338_v58 }
 0xafe   :  { %v2184_v35 = vsel %vm778_vm5, %v6433_v44, 0.0 }
 0xaff   :  { %5177 = vpow2.f32 %v2339_v47  ;;  %2185 = vadd.xlane.f32.xlu2 %v2184_v35  ;;  %v1707_v35 = vand.u32 2147483648, %v6427_v11 }
 0xb02   :  { %v2504_v3 = vpop.xlane.xlu2 %2503 }
 0xb03   :  { %v2505_v49 = vsub.f32 %v6384_v6, %v2504_v3 }
 0xb05   :  { %v6440_v52 = vpop.eup %5177  ;;  %v2506_v0 = vmul.f32 1.442695, %v2505_v49  ;;  %v1705_v49 = vand.u32 2147483647, %v6427_v11 }
 0xb06   :  { %v2341_v4 = vsel %vm778_vm5, %v6440_v52, 0.0 }
 0xb07   :  { %5179 = vpow2.f32 %v2506_v0  ;;  %1780 = vmax.xlane.f32.xlu2 %v1779_v55  ;;  %2342 = vadd.xlane.f32.xlu1 %v2341_v4  ;;  %v5099_v55 = vunpack.i.h.bf16 %v6380_v56  ;;  %vm1706_vm11 = vcmp.eq.f32.partialorder %v1705_v49, 8.507059e+37 }
 0xb0a   :  { %v2661_v14 = vpop.xlane.xlu2 %2660 }
 0xb0b   :  { %v2662_v7 = vsub.f32 %v6390_v26, %v2661_v14  ;;  %v6463_v26 = vadd.f32 %v6357_v12, %v5999_v30  ;;  %v1862_v59 = vpop.xlane.xlu1 %1861  ;;  %v6477_v12 = vpop.f32.mrf.mxu0 }
 0xb0c   :  { %vm1868_vm14 = vweird.f32 %v1862_v59 }
 0xb0d   :  { %v6447_v48 = vpop.eup %5179  ;;  %v2663_v2 = vmul.f32 1.442695, %v2662_v7  ;;  %v5105_v61 = vpack.i.bf16 %v6463_v26, %v6269_v43  ;;  %v5110_v22 = vpack.i.bf16 %v6475_v20, %v6463_v26 }
 0xb0e   :  { %v2508_v1 = vsel %vm778_vm5, %v6447_v48, 0.0 }
 0xb0f   :  { %5181 = vpow2.f32 %v2663_v2  ;;  %1610 = vmax.xlane.f32.xlu1 %v1609_v62  ;;  %2509 = vadd.xlane.f32.xlu0 %v2508_v1  ;;  %v1708_v62 = vor.u32 1.1754944e-38, %v1707_v35 }
 0xb10   :  { %5183 = vrcp.f32 %v6427_v11 }
 0xb12   :  { %v2828_v43 = vpop.xlane.xlu2 %2827 }
 0xb13   :  { %v6455_v38 = vpop.xlane.xlu0 %2018  ;;  %v6484_v39 = vpop.f32.mrf.mxu0 }
 0xb15   :  { %v6457_v6 = vpop.eup %5181 }
 0xb16   :  { %v2665_v51 = vsel %vm778_vm5, %v6457_v6, 0.0  ;;  %v5184_v18 = vpop.eup %5183 }
 0xb17   :  { %2666 = vadd.xlane.f32.xlu0 %v2665_v51  ;;  %v1697_v57 = vmul.f32 %v5184_v18, %v6427_v11  ;;  %vm1702_vm3 = vweird.f32 %v5184_v18  ;;  %v1874_v11 = vand.u32 2147483648, %v1862_v59 }
 0xb18   :  { %vm1703_vm10 = vmor %vm1701_vm9, %vm1702_vm3 }
 0xb19   :  { %v1698_v60 = vsub.f32 1.0, %v1697_v57 }
 0xb1a   :  { %v2985_v58 = vpop.xlane.xlu2 %2984 }
 0xb1b   :  { %v6467_v33 = vpop.xlane.xlu0 %3308  ;;  %v1699_v8 = vmul.f32 %v5184_v18, %v1698_v60  ;;  %v2986_v4 = vsub.f32 %v6398_v16, %v2985_v58  ;;  %v6493_v2 = vpop.f32.mrf.mxu0 }
 0xb1c   :  { %v6534_v58 = vpop.xlane.xlu1 %3151 }
 0xb1d   :  { %v1700_v42 = vadd.f32 %v5184_v18, %v1699_v8  ;;  %v2987_v51 = vmul.f32 1.442695, %v2986_v4  ;;  %v2103_v8 = vsel %vm778_vm5, %v6465_v10, -inf }
 0xb1f   :  { %5106 = vrot.lane.b32.xlu2 %v5105_v61, %s5284_s14  ;;  %v1704_v14 = vsel %vm1703_vm10, %v5184_v18, %v1700_v42  ;;  %v1875_v18 = vor.u32 1.1754944e-38, %v1874_v11 }
 0xb20   :  { %v1709_v1 = vsel %vm1706_vm11, %v1708_v62, %v1704_v14  ;;  %v2029_v62 = vand.u32 2147483647, %v6455_v38 }
 0xb21   :  { %v1710_v56 = vmul.f32 %v6386_v46, %v1709_v1 }
 0xb23   :  { %v1538_v19 = vpop.xlane.xlu0 %1537  ;;  %v6498_v57 = vpop.f32.mrf.mxu0 }
 0xb24   :  { %5185 = vrcp.f32 %v1538_v19  ;;  %v1550_v63 = vand.u32 2147483648, %v1538_v19  ;;  %v1548_v27 = vand.u32 2147483647, %v1538_v19  ;;  %vm1544_vm2 = vweird.f32 %v1538_v19 }
 0xb25   :  { %5187 = vrcp.f32 %v1862_v59 }
 0xb26   :  { %v1551_v41 = vor.u32 1.1754944e-38, %v1550_v63  ;;  %vm1549_vm8 = vcmp.eq.f32.partialorder %v1548_v27, 8.507059e+37  ;;  %5189 = vpow2.f32 %v2987_v51  ;;  %v2751_v63 = vsel %vm778_vm5, %v6498_v57, -inf }
 0xb28   :  { %5111 = vrot.lane.b32.xlu1 %v5110_v22, %s5282_s6 }
 0xb2a   :  { %v5186_v32 = vpop.eup %5185 }
 0xb2b   :  { %v1540_v25 = vmul.f32 %v5186_v32, %v1538_v19  ;;  %5116 = vrot.lane.b32.xlu0 %v5110_v22, %s5283_s8  ;;  %v5188_v53 = vpop.eup %5187  ;;  %vm1545_vm1 = vweird.f32 %v5186_v32  ;;  %v2829_v19 = vsub.f32 %v6393_v23, %v2828_v43 }
 0xb2c   :  { %v1864_v54 = vmul.f32 %v5188_v53, %v1862_v59  ;;  %vm1546_vm4 = vmor %vm1544_vm2, %vm1545_vm1  ;;  %vm1869_vm13 = vweird.f32 %v5188_v53  ;;  %vm2025_vm2 = vweird.f32 %v6455_v38 }
 0xb2d   :  { %v1541_v24 = vsub.f32 1.0, %v1540_v25  ;;  %vm1870_vm15 = vmor %vm1868_vm14, %vm1869_vm13  ;;  %v2830_v60 = vmul.f32 1.442695, %v2829_v19 }
 0xb2e   :  { %v1865_v9 = vsub.f32 1.0, %v1864_v54 }
 0xb2f   :  { %v1542_v29 = vmul.f32 %v5186_v32, %v1541_v24  ;;  %5191 = vpow2.f32 %v2830_v60 }
 0xb30   :  { %v1866_v7 = vmul.f32 %v5188_v53, %v1865_v9  ;;  %5193 = vrcp.f32 %v6455_v38  ;;  %v2581_v9 = vsel %vm778_vm5, %v6493_v2, -inf }
 0xb31   :  { %v1543_v17 = vadd.f32 %v5186_v32, %v1542_v29  ;;  %v2257_v29 = vsel %vm778_vm5, %v6477_v12, -inf }
 0xb32   :  { %v1867_v61 = vadd.f32 %v5188_v53, %v1866_v7  ;;  %v2031_v7 = vand.u32 2147483648, %v6455_v38 }
 0xb33   :  { %v1547_v47 = vsel %vm1546_vm4, %v5186_v32, %v1543_v17  ;;  %v6500_v32 = vpop.eup %5189  ;;  %v2427_v17 = vsel %vm778_vm5, %v6484_v39, -inf  ;;  %vm2030_vm4 = vcmp.eq.f32.partialorder %v2029_v62, 8.507059e+37 }
 0xb34   :  { %v1552_v3 = vsel %vm1549_vm8, %v1551_v41, %v1547_v47  ;;  %v1871_v16 = vsel %vm1870_vm15, %v5188_v53, %v1867_v61  ;;  %v2989_v46 = vsel %vm778_vm5, %v6500_v32, 0.0  ;;  %v2032_v61 = vor.u32 1.1754944e-38, %v2031_v7 }
 0xb35   :  { %v1553_v0 = vmul.f32 %v6423_v37, %v1552_v3  ;;  %v1872_v37 = vand.u32 2147483647, %v1862_v59  ;;  %v6506_v59 = vpop.f32.mrf.mxu0  ;;  %v6508_v53 = vpop.eup %5191 }
 0xb36   :  { %v2905_v23 = vsel %vm778_vm5, %v6506_v59, -inf  ;;  %v2832_v43 = vsel %vm778_vm5, %v6508_v53, 0.0  ;;  %v5194_v41 = vpop.eup %5193 }
 0xb37   :  { %4957 = vmatmul.msk.f32.vlgmr.msrb.gmra.mxu3 %vm778_vm5, %v1553_v0  ;;  %vm1873_vm0 = vcmp.eq.f32.partialorder %v1872_v37, 8.507059e+37  ;;  %v2021_v42 = vmul.f32 %v5194_v41, %v6455_v38  ;;  %vm2026_vm1 = vweird.f32 %v5194_v41 }
 0xb38   :  { %1900 = vmatpush.msrb.mxu3 %v5099_v55  ;;  %v1876_v22 = vsel %vm1873_vm0, %v1875_v18, %v1871_v16  ;;  %vm2027_vm3 = vmor %vm2025_vm2, %vm2026_vm1 }
 0xb39   :  { %v1877_v25 = vmul.f32 %v6400_v21, %v1876_v22  ;;  %v1933_v21 = vsel %vm778_vm5, %v6453_v45, -inf  ;;  %v2022_v35 = vsub.f32 1.0, %v2021_v42 }
 0xb3b   :  { %v2023_v3 = vmul.f32 %v5194_v41, %v2022_v35 }
 0xb3d   :  { %v6516_v24 = vpop.f32.mrf.mxu0  ;;  %v2024_v4 = vadd.f32 %v5194_v41, %v2023_v3 }
 0xb3e   :  { %v3075_v49 = vsel %vm778_vm5, %v6516_v24, -inf }
 0xb3f   :  { %4963 = vmatmul.msk.f32.vlgmr.msra.gmra.mxu3 %vm778_vm5, %v1710_v56  ;;  %v2028_v51 = vsel %vm2027_vm3, %v5194_v41, %v2024_v4 }
 0xb40   :  { %v2033_v56 = vsel %vm2030_vm4, %v2032_v61, %v2028_v51 }
 0xb41   :  { %v2034_v38 = vmul.f32 %v6408_v34, %v2033_v56 }
 0xb45   :  { %v6522_v54 = vpop.f32.mrf.mxu0 }
 0xb46   :  { %v3229_v27 = vsel %vm778_vm5, %v6522_v54, -inf }
 0xb47   :  { %4969 = vmatmul.msk.f32.vlgmr.msrb.gmra.mxu3 %vm778_vm5, %v1877_v25 }
 0xb48   :  { %2990 = vadd.xlane.f32.xlu2 %v2989_v46 }
 0xb50   :  { %2906 = vmax.xlane.f32.xlu2 %v2905_v23 }
 0xb52   :  { %2833 = vadd.xlane.f32.xlu1 %v2832_v43 }
 0xb55   :  { %1934 = vmax.xlane.f32.xlu0 %v1933_v21 }
 0xb5a   :  { %2104 = vmax.xlane.f32.xlu1 %v2103_v8 }
 0xb5d   :  { %2752 = vmax.xlane.f32.xlu0 %v2751_v63 }
 0xb62   :  { %2258 = vmax.xlane.f32.xlu1 %v2257_v29 }
 0xb65   :  { %3230 = vmax.xlane.f32.xlu0 %v3229_v27 }
 0xb6a   :  { %2428 = vmax.xlane.f32.xlu1 %v2427_v17 }
 0xb72   :  { %2582 = vmax.xlane.f32.xlu1 %v2581_v9  ;;  %v2186_v47 = vpop.xlane.xlu2 %2185 }
 0xb73   :  { %5195 = vrcp.f32 %v2186_v47  ;;  %v2198_v17 = vand.u32 2147483648, %v2186_v47  ;;  %vm2192_vm9 = vweird.f32 %v2186_v47  ;;  %v2196_v41 = vand.u32 2147483647, %v2186_v47 }
 0xb75   :  { %v2199_v3 = vor.u32 1.1754944e-38, %v2198_v17  ;;  %vm2197_vm11 = vcmp.eq.f32.partialorder %v2196_v41, 8.507059e+37 }
 0xb79   :  { %v5196_v37 = vpop.eup %5195 }
 0xb7a   :  { %v6538_v0 = vpop.xlane.xlu1 %2342  ;;  %3076 = vmax.xlane.f32.xlu1 %v3075_v49  ;;  %v1781_v55 = vpop.xlane.xlu2 %1780  ;;  %v2188_v60 = vmul.f32 %v5196_v37, %v2186_v47  ;;  %vm2193_vm8 = vweird.f32 %v5196_v37 }
 0xb7b   :  { %v1782_v14 = vsub.f32 %v6437_v13, %v1781_v55  ;;  %vm2194_vm10 = vmor %vm2192_vm9, %vm2193_vm8  ;;  %v2355_v7 = vand.u32 2147483648, %v6538_v0  ;;  %vm2349_vm14 = vweird.f32 %v6538_v0 }
 0xb7c   :  { %v2189_v46 = vsub.f32 1.0, %v2188_v60 }
 0xb7d   :  { %v1783_v1 = vmul.f32 1.442695, %v1782_v14  ;;  %v2356_v56 = vor.u32 1.1754944e-38, %v2355_v7 }
 0xb7e   :  { %v2190_v21 = vmul.f32 %v5196_v37, %v2189_v46 }
 0xb7f   :  { %5197 = vpow2.f32 %v1783_v1  ;;  %v2353_v1 = vand.u32 2147483647, %v6538_v0 }
 0xb80   :  { %5199 = vrcp.f32 %v6538_v0  ;;  %v2191_v63 = vadd.f32 %v5196_v37, %v2190_v21 }
 0xb81   :  { %vm2354_vm0 = vcmp.eq.f32.partialorder %v2353_v1, 8.507059e+37 }
 0xb82   :  { %v1611_v11 = vpop.xlane.xlu1 %1610  ;;  %v5107_v18 = vpop.permute.xlu2 %5106  ;;  %v2195_v42 = vsel %vm2194_vm10, %v5196_v37, %v2191_v63 }
 0xb83   :  { %v1612_v16 = vsub.f32 %v6431_v31, %v1611_v11  ;;  %v5108_v19 = vunpack.i.l.bf16 %v5107_v18  ;;  %v2510_v31 = vpop.xlane.xlu0 %2509  ;;  %v2200_v49 = vsel %vm2197_vm11, %v2199_v3, %v2195_v42  ;;  %v5109_v51 = vunpack.i.h.bf16 %v5107_v18 }
 0xb84   :  { %v2201_v47 = vmul.f32 %v6433_v44, %v2200_v49  ;;  %vm2516_vm2 = vweird.f32 %v2510_v31 }
 0xb85   :  { %v1613_v13 = vmul.f32 1.442695, %v1612_v16  ;;  %v6546_v22 = vpop.eup %5197  ;;  %2056 = vmatpush.msra.mxu3 %v5108_v19  ;;  %v2522_v19 = vand.u32 2147483648, %v2510_v31 }
 0xb86   :  { %v1785_v25 = vsel %vm778_vm5, %v6546_v22, 0.0  ;;  %4975 = vmatmul.msk.f32.vlgmr.msra.gmra.mxu3 %vm778_vm5, %v2034_v38  ;;  %v5200_v23 = vpop.eup %5199 }
 0xb87   :  { %5201 = vpow2.f32 %v1613_v13  ;;  %1786 = vadd.xlane.f32.xlu1 %v1785_v25  ;;  %v2345_v8 = vmul.f32 %v5200_v23, %v6538_v0  ;;  %vm2350_vm13 = vweird.f32 %v5200_v23  ;;  %v2520_v0 = vand.u32 2147483647, %v2510_v31 }
 0xb88   :  { %5203 = vrcp.f32 %v2510_v31  ;;  %vm2351_vm15 = vmor %vm2349_vm14, %vm2350_vm13  ;;  %v2523_v60 = vor.u32 1.1754944e-38, %v2522_v19 }
 0xb89   :  { %v2346_v29 = vsub.f32 1.0, %v2345_v8  ;;  %vm2521_vm4 = vcmp.eq.f32.partialorder %v2520_v0, 8.507059e+37 }
 0xb8b   :  { %v2347_v9 = vmul.f32 %v5200_v23, %v2346_v29  ;;  %v6566_v46 = vpop.xlane.xlu0 %2666 }
 0xb8d   :  { %v6552_v43 = vpop.eup %5201  ;;  %v2348_v55 = vadd.f32 %v5200_v23, %v2347_v9 }
 0xb8e   :  { %v1615_v34 = vsel %vm778_vm5, %v6552_v43, 0.0  ;;  %v5204_v27 = vpop.eup %5203 }
 0xb8f   :  { %1616 = vadd.xlane.f32.xlu2 %v1615_v34  ;;  %v2512_v35 = vmul.f32 %v5204_v27, %v2510_v31  ;;  %v2352_v61 = vsel %vm2351_vm15, %v5200_v23, %v2348_v55  ;;  %vm2517_vm1 = vweird.f32 %v5204_v27 }
 0xb90   :  { %v2357_v16 = vsel %vm2354_vm0, %v2356_v56, %v2352_v61  ;;  %vm2518_vm3 = vmor %vm2516_vm2, %vm2517_vm1 }
 0xb91   :  { %v2513_v4 = vsub.f32 1.0, %v2512_v35  ;;  %v2358_v44 = vmul.f32 %v6440_v52, %v2357_v16 }
 0xb93   :  { %v2514_v11 = vmul.f32 %v5204_v27, %v2513_v4 }
 0xb95   :  { %v2515_v13 = vadd.f32 %v5204_v27, %v2514_v11 }
 0xb97   :  { %v2519_v18 = vsel %vm2518_vm3, %v5204_v27, %v2515_v13 }
 0xb98   :  { %v2524_v38 = vsel %vm2521_vm4, %v2523_v60, %v2519_v18 }
 0xb99   :  { %v2525_v25 = vmul.f32 %v6447_v48, %v2524_v38 }
 0xb9a   :  { %v5112_v14 = vpop.permute.xlu1 %5111 }
 0xb9b   :  { %v5113_v62 = vunpack.i.l.bf16 %v5112_v14  ;;  %v5114_v37 = vunpack.i.h.bf16 %v5112_v14 }
 0xb9d   :  { %2224 = vmatpush.msrb.mxu3 %v5113_v62  ;;  %v6568_v23 = vpop.permute.xlu0 %5116 }
 0xb9e   :  { %4981 = vmatmul.msk.f32.vlgmr.msrb.gmra.mxu3 %vm778_vm5, %v2201_v47 }
 0xb9f   :  { %2380 = vmatpush.msra.mxu3 %v5109_v51 }
 0xba1   :  { %2548 = vmatpush.msrb.mxu3 %v5114_v37 }
 0xba6   :  { %4987 = vmatmul.msk.f32.vlgmr.msra.gmra.mxu3 %vm778_vm5, %v2358_v44 }
 0xbae   :  { %4993 = vmatmul.msk.f32.vlgmr.msrb.gmra.mxu3 %vm778_vm5, %v2525_v25 }
 0xbbb   :  { %v6576_v48 = vpop.xlane.xlu2 %2990 }
 0xbc3   :  { %v2907_v49 = vpop.xlane.xlu2 %2906 }
 0xbc5   :  { %v6570_v21 = vpop.xlane.xlu1 %2833 }
 0xbc8   :  { %v1935_v31 = vpop.xlane.xlu0 %1934 }
 0xbc9   :  { %v1936_v52 = vsub.f32 %v6453_v45, %v1935_v31  ;;  %v3153_v45 = vsub.f32 %v6406_v15, %v6534_v58 }
 0xbcb   :  { %v1937_v8 = vmul.f32 1.442695, %v1936_v52  ;;  %v3154_v3 = vmul.f32 1.442695, %v3153_v45 }
 0xbcd   :  { %5205 = vpow2.f32 %v1937_v8  ;;  %v2105_v34 = vpop.xlane.xlu1 %2104 }
 0xbce   :  { %v2106_v63 = vsub.f32 %v6465_v10, %v2105_v34 }
 0xbd0   :  { %v2107_v29 = vmul.f32 1.442695, %v2106_v63  ;;  %v6593_v58 = vpop.xlane.xlu0 %2752 }
 0xbd2   :  { %5207 = vpow2.f32 %v2107_v29 }
 0xbd3   :  { %v6574_v27 = vpop.eup %5205 }
 0xbd4   :  { %v1939_v17 = vsel %vm778_vm5, %v6574_v27, 0.0 }
 0xbd5   :  { %1940 = vadd.xlane.f32.xlu0 %v1939_v17  ;;  %v2259_v41 = vpop.xlane.xlu1 %2258 }
 0xbd6   :  { %v2260_v42 = vsub.f32 %v6477_v12, %v2259_v41  ;;  %v2908_v12 = vsub.f32 %v6506_v59, %v2907_v49 }
 0xbd8   :  { %v6581_v9 = vpop.eup %5207  ;;  %v2261_v35 = vmul.f32 1.442695, %v2260_v42  ;;  %v2909_v62 = vmul.f32 1.442695, %v2908_v12  ;;  %v3231_v37 = vpop.xlane.xlu0 %3230 }
 0xbd9   :  { %v2109_v10 = vsel %vm778_vm5, %v6581_v9, 0.0  ;;  %v3232_v19 = vsub.f32 %v6522_v54, %v3231_v37  ;;  %v6620_v54 = vadd.f32 %v6364_v40, %v5999_v30 }
 0xbda   :  { %5209 = vpow2.f32 %v2261_v35  ;;  %2110 = vadd.xlane.f32.xlu2 %v2109_v10 }
 0xbdb   :  { %5211 = vpow2.f32 %v3154_v3  ;;  %v3233_v60 = vmul.f32 1.442695, %v3232_v19  ;;  %v5120_v29 = vpack.i.bf16 %v6620_v54, %v6475_v20 }
 0xbdd   :  { %v2429_v55 = vpop.xlane.xlu1 %2428 }
 0xbde   :  { %v2430_v4 = vsub.f32 %v6484_v39, %v2429_v55 }
 0xbe0   :  { %v6588_v14 = vpop.eup %5209  ;;  %v2431_v7 = vmul.f32 1.442695, %v2430_v4 }
 0xbe1   :  { %v2263_v15 = vsel %vm778_vm5, %v6588_v14, 0.0  ;;  %v6595_v47 = vpop.eup %5211 }
 0xbe2   :  { %5213 = vpow2.f32 %v2431_v7  ;;  %2264 = vadd.xlane.f32.xlu1 %v2263_v15  ;;  %v3156_v11 = vsel %vm778_vm5, %v6595_v47, 0.0 }
 0xbe3   :  { %5215 = vpow2.f32 %v2909_v62 }
 0xbe5   :  { %v2583_v1 = vpop.xlane.xlu1 %2582 }
 0xbe6   :  { %v2584_v51 = vsub.f32 %v6493_v2, %v2583_v1 }
 0xbe8   :  { %v6598_v39 = vpop.eup %5213  ;;  %v2585_v61 = vmul.f32 1.442695, %v2584_v51  ;;  %v5104_v51 = vunpack.i.h.bf16 %v6337_v50 }
 0xbe9   :  { %v2433_v59 = vsel %vm778_vm5, %v6598_v39, 0.0  ;;  %v6604_v16 = vpop.eup %5215 }
 0xbea   :  { %5217 = vpow2.f32 %v2585_v61  ;;  %2434 = vadd.xlane.f32.xlu0 %v2433_v59  ;;  %3157 = vadd.xlane.f32.xlu1 %v3156_v11  ;;  %v2911_v18 = vsel %vm778_vm5, %v6604_v16, 0.0  ;;  %v1578_v61 = vpop.f32.mrf.mxu3  ;;  %v2754_v59 = vsub.f32 %v6498_v57, %v6593_v58  ;;  %v3310_v57 = vsub.f32 %v6417_v5, %v6467_v33 }
 0xbeb   :  { %v6656_v5 = vadd.f32 %v6367_v28, %v5999_v30 }
 0xbec   :  { %v3311_v19 = vmul.f32 1.442695, %v3310_v57 }
 0xbed   :  { %v3077_v56 = vpop.xlane.xlu1 %3076 }
 0xbee   :  { %v3078_v13 = vsub.f32 %v6516_v24, %v3077_v56 }
 0xbf0   :  { %v6607_v2 = vpop.eup %5217  ;;  %v3079_v0 = vmul.f32 1.442695, %v3078_v13  ;;  %v2755_v13 = vmul.f32 1.442695, %v2754_v59 }
 0xbf1   :  { %v2587_v44 = vsel %vm778_vm5, %v6607_v2, 0.0 }
 0xbf2   :  { %5219 = vpow2.f32 %v3079_v0  ;;  %2588 = vadd.xlane.f32.xlu2 %v2587_v44  ;;  %2912 = vadd.xlane.f32.xlu1 %v2911_v18  ;;  %v1734_v50 = vpop.f32.mrf.mxu3 }
 0xbf3   :  { %5221 = vpow2.f32 %v3233_v60 }
 0xbf8   :  { %v6614_v38 = vpop.eup %5219 }
 0xbf9   :  { %v3081_v24 = vsel %vm778_vm5, %v6614_v38, 0.0  ;;  %v6622_v31 = vpop.eup %5221 }
 0xbfa   :  { %3082 = vadd.xlane.f32.xlu1 %v3081_v24  ;;  %v1787_v25 = vpop.xlane.xlu1 %1786  ;;  %v3235_v52 = vsel %vm778_vm5, %v6622_v31, 0.0 }
 0xbfb   :  { %5223 = vrcp.f32 %v1787_v25  ;;  %v1799_v7 = vand.u32 2147483648, %v1787_v25  ;;  %vm1793_vm14 = vweird.f32 %v1787_v25  ;;  %v1797_v62 = vand.u32 2147483647, %v1787_v25 }
 0xbfd   :  { %v1800_v37 = vor.u32 1.1754944e-38, %v1799_v7  ;;  %vm1798_vm0 = vcmp.eq.f32.partialorder %v1797_v62, 8.507059e+37  ;;  %v5118_v62 = vunpack.i.l.bf16 %v6568_v23 }
 0xbfe   :  { %2851 = vrot.lane.b32.xlu0 %v6620_v54, %s5282_s6 }
 0xc01   :  { %v5224_v34 = vpop.eup %5223 }
 0xc02   :  { %3236 = vadd.xlane.f32.xlu1 %v3235_v52  ;;  %v1617_v8 = vpop.xlane.xlu2 %1616  ;;  %v1789_v63 = vmul.f32 %v5224_v34, %v1787_v25  ;;  %vm1794_vm11 = vweird.f32 %v5224_v34 }
 0xc03   :  { %5225 = vrcp.f32 %v1617_v8  ;;  %v1629_v45 = vand.u32 2147483648, %v1617_v8  ;;  %v1627_v3 = vand.u32 2147483647, %v1617_v8  ;;  %vm1623_vm9 = vweird.f32 %v1617_v8  ;;  %vm1795_vm15 = vmor %vm1793_vm14, %vm1794_vm11 }
 0xc04   :  { %v1790_v40 = vsub.f32 1.0, %v1789_v63  ;;  %5227 = vpow2.f32 %v2755_v13 }
 0xc05   :  { %v1630_v55 = vor.u32 1.1754944e-38, %v1629_v45  ;;  %vm1628_vm13 = vcmp.eq.f32.partialorder %v1627_v3, 8.507059e+37  ;;  %5229 = vpow2.f32 %v3311_v19 }
 0xc06   :  { %v1791_v35 = vmul.f32 %v5224_v34, %v1790_v40 }
 0xc08   :  { %v1792_v4 = vadd.f32 %v5224_v34, %v1791_v35 }
 0xc09   :  { %v5226_v17 = vpop.eup %5225 }
 0xc0a   :  { %v1619_v41 = vmul.f32 %v5226_v17, %v1617_v8  ;;  %5121 = vrot.lane.b32.xlu2 %v5120_v29, %s5284_s14  ;;  %vm1624_vm8 = vweird.f32 %v5226_v17  ;;  %v1796_v11 = vsel %vm1795_vm15, %v5224_v34, %v1792_v4  ;;  %v6644_v58 = vpop.eup %5227 }
 0xc0b   :  { %vm1625_vm10 = vmor %vm1623_vm9, %vm1624_vm8  ;;  %v1801_v56 = vsel %vm1798_vm0, %v1800_v37, %v1796_v11  ;;  %v2757_v0 = vsel %vm778_vm5, %v6644_v58, 0.0  ;;  %v6649_v44 = vpop.eup %5229 }
 0xc0c   :  { %v1620_v42 = vsub.f32 1.0, %v1619_v41  ;;  %v3313_v18 = vsel %vm778_vm5, %v6649_v44, 0.0 }
 0xc0e   :  { %v1621_v10 = vmul.f32 %v5226_v17, %v1620_v42 }
 0xc10   :  { %v1622_v49 = vadd.f32 %v5226_v17, %v1621_v10 }
 0xc12   :  { %v1626_v12 = vsel %vm1625_vm10, %v5226_v17, %v1622_v49 }
 0xc13   :  { %v1631_v15 = vsel %vm1628_vm13, %v1630_v55, %v1626_v12 }
 0xc14   :  { %v1632_v1 = vmul.f32 %v6552_v43, %v1631_v15  ;;  %v1802_v43 = vmul.f32 %v6546_v22, %v1801_v56  ;;  %v1902_v22 = vpop.f32.mrf.mxu3 }
 0xc16   :  { %4960 = vmatmul.msk.f32.vlgmr.msra.gmra.mxu1 %vm778_vm5, %v1632_v1 }
 0xc17   :  { %1978 = vmatpush.msra.mxu1 %v5104_v51 }
 0xc1b   :  { %2929 = vrot.lane.b32.xlu1 %v6620_v54, %s5283_s8 }
 0xc1e   :  { %4966 = vmatmul.msk.f32.vlgmr.msrb.gmra.mxu1 %vm778_vm5, %v1802_v43 }
 0xc1f   :  { %2145 = vmatpush.msrb.mxu1 %v6463_v26  ;;  %v2058_v26 = vpop.f32.mrf.mxu3 }
 0xc23   :  { %1738 = vrot.lane.b32.xlu1 %v1578_v61, %s5285_s1 }
 0xc27   :  { %v6660_v33 = vpop.f32.mrf.mxu3 }
 0xc28   :  { %2758 = vadd.xlane.f32.xlu0 %v2757_v0 }
 0xc2b   :  { %2062 = vrot.lane.b32.xlu1 %v1902_v22, %s5285_s1 }
 0xc2f   :  { %v6664_v60 = vpop.f32.mrf.mxu3 }
 0xc33   :  { %3314 = vadd.xlane.f32.xlu2 %v3313_v18  ;;  %2070 = vrot.lane.b32.xlu1 %v2058_v26, %s5287_s15 }
 0xc37   :  { %v2550_v52 = vpop.f32.mrf.mxu3 }
 0xc3c   :  { %3175 = vrot.lane.b32.xlu0 %v6656_v5, %s5282_s6 }
 0xc44   :  { %3331 = vrot.lane.b32.xlu0 %v6656_v5, %s5284_s14 }
 0xc48   :  { %v1941_v24 = vpop.xlane.xlu0 %1940 }
 0xc49   :  { %5231 = vrcp.f32 %v1941_v24  ;;  %v1953_v34 = vand.u32 2147483648, %v1941_v24  ;;  %v1951_v17 = vand.u32 2147483647, %v1941_v24  ;;  %vm1947_vm2 = vweird.f32 %v1941_v24 }
 0xc4b   :  { %1746 = vrot.lane.b32.xlu2 %v1734_v50, %s5287_s15  ;;  %v1954_v35 = vor.u32 1.1754944e-38, %v1953_v34  ;;  %vm1952_vm4 = vcmp.eq.f32.partialorder %v1951_v17, 8.507059e+37 }
 0xc4c   :  { %3253 = vrot.lane.b32.xlu0 %v6656_v5, %s5283_s8 }
 0xc4d   :  { %v2111_v25 = vpop.xlane.xlu2 %2110 }
 0xc4e   :  { %5233 = vrcp.f32 %v2111_v25  ;;  %v2123_v4 = vand.u32 2147483648, %v2111_v25  ;;  %v2121_v7 = vand.u32 2147483647, %v2111_v25  ;;  %vm2117_vm9 = vweird.f32 %v2111_v25 }
 0xc4f   :  { %v5232_v30 = vpop.eup %5231  ;;  %5235 = vrcp.f32 %v6566_v46 }
 0xc50   :  { %v1943_v28 = vmul.f32 %v5232_v30, %v1941_v24  ;;  %vm1948_vm1 = vweird.f32 %v5232_v30  ;;  %v2124_v59 = vor.u32 1.1754944e-38, %v2123_v4  ;;  %vm2122_vm11 = vcmp.eq.f32.partialorder %v2121_v7, 8.507059e+37 }
 0xc51   :  { %vm1949_vm3 = vmor %vm1947_vm2, %vm1948_vm1  ;;  %vm2673_vm2 = vweird.f32 %v6566_v46 }
 0xc52   :  { %v1944_v8 = vsub.f32 1.0, %v1943_v28 }
 0xc53   :  { %2710 = vrot.lane.b32.xlu2 %v2550_v52, %s5285_s1 }
 0xc54   :  { %v5234_v63 = vpop.eup %5233  ;;  %v1945_v29 = vmul.f32 %v5232_v30, %v1944_v8 }
 0xc55   :  { %v2113_v40 = vmul.f32 %v5234_v63, %v2111_v25  ;;  %v2265_v41 = vpop.xlane.xlu1 %2264  ;;  %v6671_v45 = vpop.eup %5235  ;;  %vm2118_vm8 = vweird.f32 %v5234_v63 }
 0xc56   :  { %v1946_v42 = vadd.f32 %v5232_v30, %v1945_v29  ;;  %5237 = vrcp.f32 %v2265_v41  ;;  %v2669_v12 = vmul.f32 %v6671_v45, %v6566_v46  ;;  %vm2119_vm10 = vmor %vm2117_vm9, %vm2118_vm8  ;;  %v2277_v57 = vand.u32 2147483648, %v2265_v41 }
 0xc57   :  { %v2114_v10 = vsub.f32 1.0, %v2113_v40  ;;  %5239 = vrcp.f32 %v6570_v21  ;;  %v2275_v19 = vand.u32 2147483647, %v2265_v41  ;;  %vm2271_vm14 = vweird.f32 %v2265_v41 }
 0xc58   :  { %v1950_v3 = vsel %vm1949_vm3, %v5232_v30, %v1946_v42  ;;  %v2670_v56 = vsub.f32 1.0, %v2669_v12  ;;  %v2278_v30 = vor.u32 1.1754944e-38, %v2277_v57  ;;  %vm2674_vm1 = vweird.f32 %v6671_v45 }
 0xc59   :  { %v1955_v49 = vsel %vm1952_vm4, %v1954_v35, %v1950_v3  ;;  %v2115_v55 = vmul.f32 %v5234_v63, %v2114_v10  ;;  %vm2276_vm0 = vcmp.eq.f32.partialorder %v2275_v19, 8.507059e+37  ;;  %v2679_v29 = vand.u32 2147483648, %v6566_v46  ;;  %vm6700_vm4 = vmor %vm2673_vm2, %vm2674_vm1 }
 0xc5a   :  { %v1956_v15 = vmul.f32 %v6574_v27, %v1955_v49  ;;  %v2671_v22 = vmul.f32 %v6671_v45, %v2670_v56 }
 0xc5b   :  { %v2116_v1 = vadd.f32 %v5234_v63, %v2115_v55  ;;  %v5119_v55 = vunpack.i.h.bf16 %v6568_v23  ;;  %v2680_v12 = vor.u32 1.1754944e-38, %v2679_v29 }
 0xc5c   :  { %v5238_v51 = vpop.eup %5237  ;;  %4972 = vmatmul.msk.f32.vlgmr.msra.gmra.mxu1 %vm778_vm5, %v1956_v15 }
 0xc5d   :  { %v2120_v61 = vsel %vm2119_vm10, %v5234_v63, %v2116_v1  ;;  %v2267_v11 = vmul.f32 %v5238_v51, %v2265_v41  ;;  %2302 = vmatpush.msra.mxu1 %v5118_v62  ;;  %v2435_v37 = vpop.xlane.xlu0 %2434  ;;  %v6679_v43 = vpop.eup %5239  ;;  %vm2272_vm13 = vweird.f32 %v5238_v51 }
 0xc5e   :  { %5241 = vrcp.f32 %v2435_v37  ;;  %v2125_v13 = vsel %vm2122_vm11, %v2124_v59, %v2120_v61  ;;  %v2836_v24 = vmul.f32 %v6679_v43, %v6570_v21  ;;  %vm2273_vm15 = vmor %vm2271_vm14, %vm2272_vm13  ;;  %v6692_v63 = vpop.xlane.xlu1 %3157  ;;  %v2447_v42 = vand.u32 2147483648, %v2435_v37 }
 0xc5f   :  { %v2268_v27 = vsub.f32 1.0, %v2267_v11  ;;  %v2126_v0 = vmul.f32 %v6581_v9, %v2125_v13  ;;  %5243 = vrcp.f32 %v6576_v48  ;;  %v2672_v9 = vadd.f32 %v6671_v45, %v2671_v22 }
 0xc60   :  { %v2837_v17 = vsub.f32 1.0, %v2836_v24  ;;  %v2445_v10 = vand.u32 2147483647, %v2435_v37  ;;  %vm2441_vm8 = vweird.f32 %v2435_v37  ;;  %vm2841_vm13 = vweird.f32 %v6679_v43 }
 0xc61   :  { %v2269_v50 = vmul.f32 %v5238_v51, %v2268_v27  ;;  %v2676_v49 = vsel %vm6700_vm4, %v6671_v45, %v2672_v9  ;;  %vm2840_vm14 = vweird.f32 %v6570_v21 }
 0xc62   :  { %v2838_v7 = vmul.f32 %v6679_v43, %v2837_v17  ;;  %vm2446_vm11 = vcmp.eq.f32.partialorder %v2445_v10, 8.507059e+37 }
 0xc63   :  { %v2270_v26 = vadd.f32 %v5238_v51, %v2269_v50  ;;  %v2844_v50 = vand.u32 2147483647, %v6570_v21 }
 0xc64   :  { %v5242_v18 = vpop.eup %5241  ;;  %4978 = vmatmul.msk.f32.vlgmr.msrb.gmra.mxu1 %vm778_vm5, %v2126_v0  ;;  %v2839_v59 = vadd.f32 %v6679_v43, %v2838_v7 }
 0xc65   :  { %v2274_v25 = vsel %vm2273_vm15, %v5238_v51, %v2270_v26  ;;  %v2437_v28 = vmul.f32 %v5242_v18, %v2435_v37  ;;  %2469 = vmatpush.msrb.mxu1 %v6475_v20  ;;  %v6688_v52 = vpop.xlane.xlu2 %2588  ;;  %v6697_v40 = vpop.eup %5243  ;;  %v2677_v20 = vand.u32 2147483647, %v6566_v46  ;;  %vm2442_vm3 = vweird.f32 %v5242_v18  ;;  %vm6724_vm15 = vmor %vm2840_vm14, %vm2841_vm13 }
 0xc66   :  { %v2279_v8 = vsel %vm2276_vm0, %v2278_v30, %v2274_v25  ;;  %5245 = vrcp.f32 %v6688_v52  ;;  %v2993_v46 = vmul.f32 %v6697_v40, %v6576_v48  ;;  %vm2443_vm9 = vmor %vm2441_vm8, %vm2442_vm3  ;;  %v2846_v37 = vand.u32 2147483648, %v6570_v21  ;;  %v6718_v56 = vpop.xlane.xlu1 %2912 }
 0xc67   :  { %v2438_v34 = vsub.f32 1.0, %v2437_v28  ;;  %v2280_v3 = vmul.f32 %v6588_v14, %v2279_v8  ;;  %vm2678_vm10 = vcmp.eq.f32.partialorder %v2677_v20, 8.507059e+37  ;;  %v2448_v14 = vor.u32 1.1754944e-38, %v2447_v42 }
 0xc68   :  { %v2681_v1 = vsel %vm2678_vm10, %v2680_v12, %v2676_v49  ;;  %v2994_v61 = vsub.f32 1.0, %v2993_v46  ;;  %v2601_v57 = vand.u32 2147483648, %v6688_v52  ;;  %v2599_v26 = vand.u32 2147483647, %v6688_v52 }
 0xc69   :  { %v2439_v41 = vmul.f32 %v5242_v18, %v2438_v34  ;;  %v2682_v11 = vmul.f32 %v6457_v6, %v2681_v1  ;;  %v2843_v21 = vsel %vm6724_vm15, %v6679_v43, %v2839_v59  ;;  %vm2595_vm1 = vweird.f32 %v6688_v52 }
 0xc6a   :  { %vm2845_vm2 = vcmp.eq.f32.partialorder %v2844_v50, 8.507059e+37  ;;  %v2602_v30 = vor.u32 1.1754944e-38, %v2601_v57  ;;  %vm2600_vm4 = vcmp.eq.f32.partialorder %v2599_v26, 8.507059e+37  ;;  %vm2998_vm8 = vweird.f32 %v6697_v40 }
 0xc6b   :  { %v2440_v4 = vadd.f32 %v5242_v18, %v2439_v41  ;;  %v3003_v34 = vand.u32 2147483648, %v6576_v48  ;;  %5247 = vrcp.f32 %v6692_v63  ;;  %vm3164_vm14 = vweird.f32 %v6692_v63 }
 0xc6c   :  { %4984 = vmatmul.msk.f32.vlgmr.msra.gmra.mxu1 %vm778_vm5, %v2280_v3  ;;  %v5246_v62 = vpop.eup %5245  ;;  %5249 = vrcp.f32 %v6718_v56  ;;  %v3170_v1 = vand.u32 2147483648, %v6692_v63 }
 0xc6d   :  { %v2444_v15 = vsel %vm2443_vm9, %v5242_v18, %v2440_v4  ;;  %2626 = vmatpush.msra.mxu1 %v5119_v55  ;;  %v5122_v45 = vpop.permute.xlu2 %5121  ;;  %v2591_v51 = vmul.f32 %v5246_v62, %v6688_v52  ;;  %vm2596_vm0 = vweird.f32 %v5246_v62  ;;  %v2995_v18 = vmul.f32 %v6697_v40, %v2994_v61 }
 0xc6e   :  { %v2449_v23 = vsel %vm2446_vm11, %v2448_v14, %v2444_v15  ;;  %v5123_v27 = vunpack.i.l.bf16 %v5122_v45  ;;  %v5124_v24 = vunpack.i.h.bf16 %v5122_v45  ;;  %vm2597_vm3 = vmor %vm2595_vm1, %vm2596_vm0  ;;  %vm2997_vm9 = vweird.f32 %v6576_v48  ;;  %v6744_v17 = vpop.xlane.xlu1 %3082 }
 0xc6f   :  { %v2592_v13 = vsub.f32 1.0, %v2591_v51  ;;  %v2450_v0 = vmul.f32 %v6598_v39, %v2449_v23  ;;  %v2847_v39 = vor.u32 1.1754944e-38, %v2846_v37  ;;  %v2996_v43 = vadd.f32 %v6697_v40, %v2995_v18  ;;  %vm2999_vm10 = vmor %vm2997_vm9, %vm2998_vm8 }
 0xc70   :  { %v2852_v19 = vpop.permute.xlu0 %2851  ;;  %2704 = vmatpush.msra.mxu3 %v5123_v27  ;;  %v3001_v52 = vand.u32 2147483647, %v6576_v48  ;;  %v3004_v41 = vor.u32 1.1754944e-38, %v3003_v34  ;;  %v3168_v23 = vand.u32 2147483647, %v6692_v63  ;;  %v3171_v50 = vor.u32 1.1754944e-38, %v3170_v1 }
 0xc71   :  { %v2593_v6 = vmul.f32 %v5246_v62, %v2592_v13  ;;  %4999 = vmatmul.msk.f32.vlgmr.msra.gmra.mxu3 %vm778_vm5, %v2682_v11  ;;  %v2848_v28 = vsel %vm2845_vm2, %v2847_v39, %v2843_v21  ;;  %v3000_v20 = vsel %vm2999_vm10, %v6697_v40, %v2996_v43  ;;  %v2925_v18 = vand.u32 2147483648, %v6718_v56 }
 0xc72   :  { %2872 = vmatpush.msrb.mxu3 %v2852_v19  ;;  %vm3002_vm11 = vcmp.eq.f32.partialorder %v3001_v52, 8.507059e+37  ;;  %vm3169_vm1 = vcmp.eq.f32.partialorder %v3168_v23, 8.507059e+37  ;;  %vm2919_vm9 = vweird.f32 %v6718_v56  ;;  %v2923_v39 = vand.u32 2147483647, %v6718_v56 }
 0xc73   :  { %v2594_v25 = vadd.f32 %v5246_v62, %v2593_v6  ;;  %v3005_v42 = vsel %vm3002_vm11, %v3004_v41, %v3000_v20 }
 0xc74   :  { %4990 = vmatmul.msk.f32.vlgmr.msrb.gmra.mxu1 %vm778_vm5, %v2450_v0  ;;  %3028 = vmatpush.msra.mxu3 %v5124_v24  ;;  %v3006_v35 = vmul.f32 %v6500_v32, %v3005_v42  ;;  %vm2924_vm11 = vcmp.eq.f32.partialorder %v2923_v39, 8.507059e+37  ;;  %v3095_v42 = vand.u32 2147483648, %v6744_v17 }
 0xc75   :  { %2793 = vmatpush.msrb.mxu1 %v6620_v54  ;;  %v2598_v9 = vsel %vm2597_vm3, %v5246_v62, %v2594_v25  ;;  %v2849_v54 = vmul.f32 %v6508_v53, %v2848_v28 }
 0xc76   :  { %v2603_v8 = vsel %vm2600_vm4, %v2602_v30, %v2598_v9  ;;  %v6751_v48 = vpop.xlane.xlu1 %3236 }
 0xc77   :  { %v2604_v29 = vmul.f32 %v6607_v2, %v2603_v8  ;;  %v5248_v2 = vpop.eup %5247 }
 0xc78   :  { %v3160_v40 = vmul.f32 %v5248_v2, %v6692_v63  ;;  %v6757_v49 = vpop.eup %5249  ;;  %vm3165_vm13 = vweird.f32 %v5248_v2 }
 0xc79   :  { %5005 = vmatmul.msk.f32.vlgmr.msrb.gmra.mxu3 %vm778_vm5, %v2849_v54  ;;  %v2915_v4 = vmul.f32 %v6757_v49, %v6718_v56  ;;  %vm6765_vm15 = vmor %vm3164_vm14, %vm3165_vm13  ;;  %vm2920_vm3 = vweird.f32 %v6757_v49  ;;  %v2926_v56 = vor.u32 1.1754944e-38, %v2925_v18  ;;  %v3448_v18 = vld [vmem:[%s8359_s2 + $0x8] sm:$0x1] }
 0xc7a   :  { %v3161_v3 = vsub.f32 1.0, %v3160_v40  ;;  %vm2921_vm10 = vmor %vm2919_vm9, %vm2920_vm3  ;;  %vm3243_vm9 = vweird.f32 %v6751_v48 }
 0xc7b   :  { %v2916_v7 = vsub.f32 1.0, %v2915_v4 }
 0xc7c   :  { %4996 = vmatmul.msk.f32.vlgmr.msra.gmra.mxu1 %vm778_vm5, %v2604_v29  ;;  %v3162_v55 = vmul.f32 %v5248_v2, %v3161_v3 }
 0xc7d   :  { %v2917_v61 = vmul.f32 %v6757_v49, %v2916_v7  ;;  %v3247_v7 = vand.u32 2147483647, %v6751_v48 }
 0xc7e   :  { %v3163_v12 = vadd.f32 %v5248_v2, %v3162_v55  ;;  %v3096_v55 = vor.u32 1.1754944e-38, %v3095_v42 }
 0xc7f   :  { %v2918_v0 = vadd.f32 %v6757_v49, %v2917_v61 }
 0xc80   :  { %v3167_v45 = vsel %vm6765_vm15, %v5248_v2, %v3163_v12  ;;  %v3249_v12 = vand.u32 2147483648, %v6751_v48 }
 0xc81   :  { %5011 = vmatmul.msk.f32.vlgmr.msra.gmra.mxu3 %vm778_vm5, %v3006_v35  ;;  %v3172_v19 = vsel %vm3169_vm1, %v3171_v50, %v3167_v45  ;;  %v2922_v43 = vsel %vm2921_vm10, %v6757_v49, %v2918_v0 }
 0xc82   :  { %v3173_v30 = vmul.f32 %v6595_v47, %v3172_v19  ;;  %v6842_v19 = vld [vmem:[%s8358_s10] ss:$0 sm:$0xff] }
 0xc8d   :  { %v2930_v53 = vpop.permute.xlu1 %2929 }
 0xc8e   :  { %2950 = vmatpush.msra.mxu1 %v2930_v53 }
 0xc93   :  { %v1656_v10 = vpop.f32.mrf.mxu1 }
 0xc94   :  { %1742 = vrot.lane.b32.xlu0 %v1656_v10, %s5286_s30 }
 0xc9b   :  { %v2759_v32 = vpop.xlane.xlu0 %2758  ;;  %v6816_v45 = vpop.f32.mrf.mxu1 }
 0xc9c   :  { %5251 = vrcp.f32 %v2759_v32  ;;  %v2771_v11 = vand.u32 2147483648, %v2759_v32  ;;  %v2769_v27 = vand.u32 2147483647, %v2759_v32  ;;  %vm2765_vm2 = vweird.f32 %v2759_v32 }
 0xc9d   :  { %5253 = vrcp.f32 %v6744_v17 }
 0xc9e   :  { %5255 = vrcp.f32 %v6751_v48  ;;  %v2772_v63 = vor.u32 1.1754944e-38, %v2771_v11  ;;  %vm2770_vm8 = vcmp.eq.f32.partialorder %v2769_v27, 8.507059e+37  ;;  %v1739_v11 = vpop.permute.xlu1 %1738 }
 0xca2   :  { %v5252_v46 = vpop.eup %5251 }
 0xca3   :  { %v6762_v15 = vpop.eup %5253  ;;  %v2761_v14 = vmul.f32 %v5252_v46, %v2759_v32  ;;  %vm2766_vm0 = vweird.f32 %v5252_v46 }
 0xca4   :  { %v3085_v59 = vmul.f32 %v6762_v15, %v6744_v17  ;;  %vm2767_vm4 = vmor %vm2765_vm2, %vm2766_vm0  ;;  %v6779_v26 = vpop.eup %5255  ;;  %vm3090_vm14 = vweird.f32 %v6762_v15  ;;  %vm3089_vm0 = vweird.f32 %v6744_v17 }
 0xca5   :  { %v2762_v51 = vsub.f32 1.0, %v2761_v14  ;;  %v3239_v34 = vmul.f32 %v6779_v26, %v6751_v48  ;;  %vm3091_vm2 = vmor %vm3089_vm0, %vm3090_vm14  ;;  %v3250_v14 = vor.u32 1.1754944e-38, %v3249_v12  ;;  %vm3491_vm14 = vcmask 1042434  }
 0xca6   :  { %v3315_v37 = vpop.xlane.xlu2 %3314  ;;  %v3086_v22 = vsub.f32 1.0, %v3085_v59  ;;  %vm3497_vm0 = vcmask 1044484  }
 0xca7   :  { %v2763_v13 = vmul.f32 %v5252_v46, %v2762_v51  ;;  %5257 = vrcp.f32 %v3315_v37  ;;  %v3327_v47 = vand.u32 2147483648, %v3315_v37  ;;  %v3325_v29 = vand.u32 2147483647, %v3315_v37 }
 0xca8   :  { %v3087_v8 = vmul.f32 %v6762_v15, %v3086_v22  ;;  %v3240_v41 = vsub.f32 1.0, %v3239_v34  ;;  %vm3321_vm15 = vweird.f32 %v3315_v37 }
 0xca9   :  { %v2764_v57 = vadd.f32 %v5252_v46, %v2763_v13  ;;  %v3328_v2 = vor.u32 1.1754944e-38, %v3327_v47  ;;  %vm3326_vm3 = vcmp.eq.f32.partialorder %v3325_v29, 8.507059e+37  ;;  %v3450_v47 = vld [vmem:[%s8359_s2 + $0x18] sm:$0x1] }
 0xcaa   :  { %v3088_v20 = vadd.f32 %v6762_v15, %v3087_v8  ;;  %v3241_v49 = vmul.f32 %v6779_v26, %v3240_v41  ;;  %v2063_v8 = vpop.permute.xlu1 %2062  ;;  %v3451_v41 = vld [vmem:[%s8359_s2 + $0x20] sm:$0x1] }
 0xcab   :  { %v2768_v6 = vsel %vm2767_vm4, %v5252_v46, %v2764_v57 }
 0xcac   :  { %v2773_v21 = vsel %vm2770_vm8, %v2772_v63, %v2768_v6  ;;  %v3092_v3 = vsel %vm3091_vm2, %v6762_v15, %v3088_v20  ;;  %vm3244_vm8 = vweird.f32 %v6779_v26  ;;  %vm3503_vm2 = vcmask 1046534  }
 0xcad   :  { %v5258_v24 = vpop.eup %5257  ;;  %v2774_v25 = vmul.f32 %v6644_v58, %v2773_v21  ;;  %v2927_v58 = vsel %vm2924_vm11, %v2926_v56, %v2922_v43  ;;  %vm3245_vm10 = vmor %vm3243_vm9, %vm3244_vm8  ;;  %vm3248_vm11 = vcmp.eq.f32.partialorder %v3247_v7, 8.507059e+37  ;;  %v3453_v7 = vld [vmem:[%s8359_s2 + $0x30] sm:$0x1] }
 0xcae   :  { %v3317_v28 = vmul.f32 %v5258_v24, %v3315_v37  ;;  %v3176_v9 = vpop.permute.xlu0 %3175  ;;  %vm3322_vm13 = vweird.f32 %v5258_v24  ;;  %v2928_v53 = vmul.f32 %v6604_v16, %v2927_v58  ;;  %v1747_v13 = vpop.permute.xlu2 %1746 }
 0xcaf   :  { %5002 = vmatmul.msk.f32.vlgmr.msrb.gmra.mxu1 %vm778_vm5, %v2774_v25  ;;  %3196 = vmatpush.msrb.mxu3 %v3176_v9  ;;  %vm3323_vm1 = vmor %vm3321_vm15, %vm3322_vm13  ;;  %v3449_v25 = vld [vmem:[%s8359_s2 + $0x10] sm:$0x1]  ;;  %v3447_v9 = vld [vmem:[%s8359_s2] sm:$0x1]  ;;  %vm3488_vm13 = vcmask 1041409   ;;  %vm3494_vm15 = vcmask 1043459  }
 0xcb0   :  { %v3318_v52 = vsub.f32 1.0, %v3317_v28  ;;  %3117 = vmatpush.msrb.mxu1 %v6656_v5  ;;  %5017 = vmatmul.msk.f32.vlgmr.msrb.gmra.mxu3 %vm778_vm5, %v3173_v30  ;;  %v3093_v5 = vand.u32 2147483647, %v6744_v17  ;;  %v3242_v17 = vadd.f32 %v6779_v26, %v3241_v49  ;;  %v3647_v49 = vld [vmem:[%s8359_s2 + $0x11] sm:$0x1] }
 0xcb2   :  { %v3319_v54 = vmul.f32 %v5258_v24, %v3318_v52  ;;  %vm3094_vm4 = vcmp.eq.f32.partialorder %v3093_v5, 8.507059e+37  ;;  %v2071_v12 = vpop.permute.xlu1 %2070 }
 0xcb3   :  { %v3097_v4 = vsel %vm3094_vm4, %v3096_v55, %v3092_v3  ;;  %vm3636_vm4 = vcmask 253952  }
 0xcb4   :  { %v3320_v35 = vadd.f32 %v5258_v24, %v3319_v54  ;;  %v3098_v46 = vmul.f32 %v6614_v38, %v3097_v4 }
 0xcb6   :  { %v3324_v10 = vsel %vm3323_vm1, %v5258_v24, %v3320_v35  ;;  %v3332_v40 = vpop.permute.xlu0 %3331  ;;  %vm3500_vm1 = vcmask 1045509  }
 0xcb7   :  { %v3329_v32 = vsel %vm3326_vm3, %v3328_v2, %v3324_v10  ;;  %5008 = vmatmul.msk.f32.vlgmr.msra.gmra.mxu1 %vm778_vm5, %v2928_v53  ;;  %3352 = vmatpush.msra.mxu3 %v3332_v40  ;;  %v3646_v53 = vld [vmem:[%s8359_s2 + $0x9] sm:$0x1]  ;;  %v3452_v10 = vld [vmem:[%s8359_s2 + $0x28] sm:$0x1]  ;;  %vm3506_vm3 = vcmask 1047559  }
 0xcb8   :  { %v3330_v16 = vmul.f32 %v6649_v44, %v3329_v32  ;;  %v3246_v44 = vsel %vm3245_vm10, %v6779_v26, %v3242_v17 }
 0xcb9   :  { %v3251_v62 = vsel %vm3248_vm11, %v3250_v14, %v3246_v44  ;;  %v3645_v14 = vld [vmem:[%s8359_s2 + $0x1] sm:$0x1] }
 0xcba   :  { %5023 = vmatmul.msk.f32.vlgmr.msra.gmra.mxu3 %vm778_vm5, %v3330_v16  ;;  %v3252_v1 = vmul.f32 %v6622_v31, %v3251_v62  ;;  %v2073_v16 = vsel %vm778_vm5, %v6816_v45, %v2063_v8 }
 0xcbe   :  { %v3254_v15 = vpop.permute.xlu0 %3253 }
 0xcbf   :  { %5014 = vmatmul.msk.f32.vlgmr.msrb.gmra.mxu1 %vm778_vm5, %v3098_v46 }
 0xcc0   :  { %3274 = vmatpush.msra.mxu1 %v3254_v15 }
 0xcc7   :  { %5020 = vmatmul.msk.f32.vlgmr.msra.gmra.mxu1 %vm778_vm5, %v3252_v1 }
 0xcd9   :  { %v1980_v38 = vpop.f32.mrf.mxu1 }
 0xcda   :  { %2066 = vrot.lane.b32.xlu0 %v1980_v38, %s5286_s30 }
 0xce1   :  { %v6819_v48 = vpop.f32.mrf.mxu1 }
 0xce2   :  { %2386 = vrot.lane.b32.xlu0 %v6660_v33, %s5285_s1  ;;  %v1749_v33 = vsel %vm778_vm5, %v6429_v36, %v1739_v11  ;;  %v3421_v36 = vpop.f32.mrf.mxu0 }
 0xce3   :  { %v6847_v22 = vadd.f32 %v6842_v19, %v3421_v36 }
 0xce5   :  { %v3456_v6 = vrot.slane %v6847_v22, 1  ;;  %v3457_v24 = vrot.slane %v6847_v22, 2  ;;  %v3458_v34 = vrot.slane %v6847_v22, 3  ;;  %v6877_v58 = vadd.f32 %v3447_v9, %v6847_v22 }
 0xce6   :  { %v3459_v54 = vrot.slane %v6847_v22, 4  ;;  %v3460_v5 = vrot.slane %v6847_v22, 5  ;;  %v3461_v17 = vrot.slane %v6847_v22, 6 }
 0xce7   :  { %v6860_v30 = vadd.f32 %v3456_v6, %v3448_v18  ;;  %v6868_v43 = vadd.f32 %v3457_v24, %v3449_v25  ;;  %v6885_v42 = vadd.f32 %v3458_v34, %v3450_v47  ;;  %v3650_v24 = vld [vmem:[%s8359_s2 + $0x29] sm:$0x1] }
 0xce8   :  { %v6897_v40 = vadd.f32 %v3459_v54, %v3451_v41  ;;  %v6913_v15 = vadd.f32 %v3460_v5, %v3452_v10  ;;  %v6933_v11 = vadd.f32 %v3461_v17, %v3453_v7 }
 0xce9   :  { %v2304_v23 = vpop.f32.mrf.mxu1  ;;  %v3487_v56 = vrot.slane %v6860_v30, 7  ;;  %v3490_v29 = vrot.slane %v6868_v43, 6  ;;  %v3493_v55 = vrot.slane %v6885_v42, 5 }
 0xcea   :  { %2390 = vrot.lane.b32.xlu1 %v2304_v23, %s5286_s30  ;;  %2394 = vrot.lane.b32.xlu0 %v6664_v60, %s5287_s15  ;;  %v3424_v39 = vpop.f32.mrf.mxu0  ;;  %v3496_v45 = vrot.slane %v6897_v40, 4  ;;  %v3502_v18 = vrot.slane %v6933_v11, 2 }
 0xceb   :  { %v6863_v28 = vadd.f32 %v6842_v19, %v3424_v39  ;;  %v3489_v35 = vsel %vm3488_vm13, %v3487_v56, %v6877_v58 }
 0xcec   :  { %v3492_v3 = vsel %vm3491_vm14, %v3490_v29, %v3489_v35  ;;  %v3652_v35 = vld [vmem:[%s8359_s2 + $0x39] sm:$0x1] }
 0xced   :  { %v3654_v20 = vrot.slane %v6863_v28, 1  ;;  %v3655_v2 = vrot.slane %v6863_v28, 2  ;;  %v3495_v44 = vsel %vm3494_vm15, %v3493_v55, %v3492_v3  ;;  %v3656_v38 = vrot.slane %v6863_v28, 3 }
 0xcee   :  { %v3659_v56 = vrot.slane %v6863_v28, 6  ;;  %v3660_v41 = vrot.slane %v6863_v28, 7 }
 0xcef   :  { %v6903_v32 = vadd.f32 %v3654_v20, %v3646_v53  ;;  %v6919_v62 = vadd.f32 %v3655_v2, %v3647_v49 }
 0xcf1   :  { %v6826_v51 = vpop.f32.mrf.mxu1  ;;  %v3685_v23 = vrot.slane %v6903_v32, 7 }
 0xcf4   :  { %v2706_v31 = vpop.f32.mrf.mxu3 }
 0xcf5   :  { %2718 = vrot.lane.b32.xlu0 %v2706_v31, %s5287_s15  ;;  %v3462_v31 = vrot.slane %v6847_v22, 7 }
 0xcf9   :  { %v2628_v61 = vpop.f32.mrf.mxu1 }
 0xcfa   :  { %2714 = vrot.lane.b32.xlu1 %v2628_v61, %s5286_s30  ;;  %v3648_v61 = vld [vmem:[%s8359_s2 + $0x19] sm:$0x1] }
 0xcfc   :  { %v2874_v59 = vpop.f32.mrf.mxu3 }
 0xcfd   :  { %3034 = vrot.lane.b32.xlu2 %v2874_v59, %s5285_s1  ;;  %v3454_v59 = vld [vmem:[%s8359_s2 + $0x38] sm:$0x1] }
 0xd04   :  { %v3030_v27 = vpop.f32.mrf.mxu3 }
 0xd05   :  { %3042 = vrot.lane.b32.xlu0 %v3030_v27, %s5287_s15  ;;  %v3657_v27 = vrot.slane %v6863_v28, 4 }
 0xd06   :  { %v1743_v37 = vpop.permute.xlu0 %1742 }
 0xd07   :  { %v1750_v60 = vsel %vm1100_vm6, %v1749_v33, %v1743_v37  ;;  %v3498_v33 = vsel %vm3497_vm0, %v3496_v45, %v3495_v44  ;;  %v6937_v37 = vadd.f32 %v3645_v14, %v6863_v28  ;;  %v2711_v14 = vpop.permute.xlu2 %2710 }
 0xd08   :  { %v1751_v50 = vsel %vm1102_vm7, %v1750_v60, %v1747_v13  ;;  %v3499_v13 = vrot.slane %v6913_v15, 3  ;;  %v3687_v60 = vrot.slane %v6919_v62, 6 }
 0xd09   :  { %5026 = vmatmul.msk.f32.gmra.mxu0 %vm223_vm12, %v1751_v50  ;;  %v3649_v50 = vld [vmem:[%s8359_s2 + $0x21] sm:$0x1]  ;;  %v3686_v36 = vsel %vm3488_vm13, %v3685_v23, %v6937_v37 }
 0xd0a   :  { %v3501_v22 = vsel %vm3500_vm1, %v3499_v13, %v3498_v33  ;;  %v6957_v39 = vadd.f32 %v3657_v27, %v3649_v50  ;;  %v3688_v25 = vsel %vm3491_vm14, %v3687_v60, %v3686_v36 }
 0xd0b   :  { %v3504_v9 = vsel %vm3503_vm2, %v3502_v18, %v3501_v22  ;;  %v3823_v22 = vld [vmem:[%s8359_s2 + $0xa] sm:$0x1] }
 0xd0c   :  { %v3691_v20 = vrot.slane %v6957_v39, 4 }
 0xd2c   :  { %v6837_v57 = vpop.f32.mrf.mxu1 }
 0xd33   :  { %v3198_v63 = vpop.f32.mrf.mxu3 }
 0xd34   :  { %v2952_v0 = vpop.f32.mrf.mxu1  ;;  %3358 = vrot.lane.b32.xlu2 %v3198_v63, %s5285_s1  ;;  %v6945_v63 = vadd.f32 %v3656_v38, %v3648_v61 }
 0xd35   :  { %3038 = vrot.lane.b32.xlu1 %v2952_v0, %s5286_s30  ;;  %v6949_v0 = vadd.f32 %v3462_v31, %v3454_v59 }
 0xd36   :  { %v3689_v8 = vrot.slane %v6945_v63, 5 }
 0xd37   :  { %v3505_v34 = vrot.slane %v6949_v0, 1 }
 0xd38   :  { %v3690_v54 = vsel %vm3494_vm15, %v3689_v8, %v3688_v25  ;;  %v3822_v25 = vld [vmem:[%s8359_s2 + $0x2] sm:$0x1] }
 0xd39   :  { %v3507_v29 = vsel %vm3506_vm3, %v3505_v34, %v3504_v9  ;;  %v3692_v5 = vsel %vm3497_vm0, %v3691_v20, %v3690_v54  ;;  %v3825_v20 = vld [vmem:[%s8359_s2 + $0x1a] sm:$0x1] }
 0xd3a   :  { %v3509_v49 = vsel %vm223_vm12, %v3507_v29, 0.0 }
 0xd3c   :  { %v6850_v26 = vpop.f32.mrf.mxu1 }
 0xd3d   :  { %v3354_v21 = vpop.f32.mrf.mxu3 }
 0xd3e   :  { %3366 = vrot.lane.b32.xlu0 %v3354_v21, %s5287_s15  ;;  %v3658_v21 = vrot.slane %v6863_v28, 5 }
 0xd40   :  { %v6967_v47 = vadd.f32 %v3658_v21, %v3650_v24  ;;  %v5288_v24 = vmov 32.0  }
 0xd41   :  { %5259 = vrcp.f32 %v5288_v24  ;;  %v3999_v24 = vld [vmem:[%s8359_s2 + $0x3] sm:$0x1] }
 0xd42   :  { %v3693_v55 = vrot.slane %v6967_v47, 3 }
 0xd44   :  { %v3276_v52 = vpop.f32.mrf.mxu1  ;;  %v3694_v17 = vsel %vm3500_vm1, %v3693_v55, %v3692_v5 }
 0xd45   :  { %3362 = vrot.lane.b32.xlu1 %v3276_v52, %s5286_s30  ;;  %v3651_v52 = vld [vmem:[%s8359_s2 + $0x31] sm:$0x1] }
 0xd46   :  { %v6976_v53 = vadd.f32 %v3659_v56, %v3651_v52 }
 0xd4c   :  { %v2067_v4 = vpop.permute.xlu0 %2066 }
 0xd4d   :  { %v2074_v46 = vsel %vm1100_vm6, %v2073_v16, %v2067_v4  ;;  %v6985_v4 = vadd.f32 %v3660_v41, %v3652_v35 }
 0xd4e   :  { %v2075_v1 = vsel %vm1102_vm7, %v2074_v46, %v2071_v12  ;;  %v3695_v12 = vrot.slane %v6976_v53, 2 }
 0xd4f   :  { %5027 = vmatmul.msk.f32.gmra.mxu0 %vm223_vm12, %v2075_v1  ;;  %v3697_v46 = vrot.slane %v6985_v4, 1  ;;  %v2721_v1 = vsel %vm778_vm5, %v6826_v51, %v2711_v14 }
 0xd54   :  { %v2387_v6 = vpop.permute.xlu0 %2386 }
 0xd55   :  { %v2397_v2 = vsel %vm778_vm5, %v6819_v48, %v2387_v6  ;;  %v3696_v48 = vsel %vm3503_vm2, %v3695_v12, %v3694_v17 }
 0xd56   :  { %v3698_v7 = vsel %vm3506_vm3, %v3697_v46, %v3696_v48 }
 0xd57   :  { %v3700_v44 = vsel %vm223_vm12, %v3698_v7, 0.0  ;;  %v3035_v61 = vpop.permute.xlu2 %3034  ;;  %v3828_v7 = vld [vmem:[%s8359_s2 + $0x32] sm:$0x1] }
 0xd58   :  { %v3045_v59 = vsel %vm778_vm5, %v6837_v57, %v3035_v61  ;;  %v3824_v57 = vld [vmem:[%s8359_s2 + $0x12] sm:$0x1] }
 0xd5c   :  { %v2391_v10 = vpop.permute.xlu1 %2390  ;;  %v2395_v3 = vpop.permute.xlu0 %2394 }
 0xd5d   :  { %v2398_v16 = vsel %vm1100_vm6, %v2397_v2, %v2391_v10  ;;  %3510 = vadd.xlane.f32.xlu2 %v3509_v49  ;;  %v5260_v2 = vpop.eup %5259  ;;  %v3826_v10 = vld [vmem:[%s8359_s2 + $0x22] sm:$0x1] }
 0xd5e   :  { %v2399_v28 = vsel %vm1102_vm7, %v2398_v16, %v2395_v3  ;;  %v3513_v16 = vmul.f32 32.0, %v5260_v2 }
 0xd5f   :  { %5028 = vmatmul.msk.f32.gmra.mxu0 %vm223_vm12, %v2399_v28  ;;  %v3827_v28 = vld [vmem:[%s8359_s2 + $0x2a] sm:$0x1] }
 0xd67   :  { %v2719_v38 = vpop.permute.xlu0 %2718 }
 0xd68   :  { %3701 = vadd.xlane.f32.xlu0 %v3700_v44 }
 0xd6c   :  { %v2715_v45 = vpop.permute.xlu1 %2714 }
 0xd6d   :  { %v2722_v23 = vsel %vm1100_vm6, %v2721_v1, %v2715_v45  ;;  %v3514_v1 = vsub.f32 1.0, %v3513_v16 }
 0xd6e   :  { %v2723_v31 = vsel %vm1102_vm7, %v2722_v23, %v2719_v38  ;;  %v3829_v23 = vld [vmem:[%s8359_s2 + $0x3a] sm:$0x1] }
 0xd6f   :  { %5029 = vmatmul.msk.f32.gmra.mxu0 %vm223_vm12, %v2723_v31 }
 0xd77   :  { %v3043_v13 = vpop.permute.xlu0 %3042 }
 0xd86   :  { %v3427_v27 = vpop.f32.mrf.mxu0 }
 0xd87   :  { %v3428_v51 = vadd.f32 %v6842_v19, %v3427_v27 }
 0xd89   :  { %v3831_v36 = vrot.slane %v3428_v51, 1  ;;  %v3832_v6 = vrot.slane %v3428_v51, 2  ;;  %v3833_v56 = vrot.slane %v3428_v51, 3  ;;  %v7026_v35 = vadd.f32 %v3822_v25, %v3428_v51  ;;  %v4000_v25 = vld [vmem:[%s8359_s2 + $0xb] sm:$0x1] }
 0xd8a   :  { %v3834_v5 = vrot.slane %v3428_v51, 4  ;;  %v3835_v55 = vrot.slane %v3428_v51, 5  ;;  %v3836_v46 = vrot.slane %v3428_v51, 6  ;;  %v3837_v38 = vrot.slane %v3428_v51, 7 }
 0xd8b   :  { %v7011_v18 = vadd.f32 %v3831_v36, %v3823_v22  ;;  %v7016_v9 = vadd.f32 %v3832_v6, %v3824_v57  ;;  %v7033_v3 = vadd.f32 %v3833_v56, %v3825_v20 }
 0xd8c   :  { %v7040_v17 = vadd.f32 %v3834_v5, %v3826_v10  ;;  %v7047_v44 = vadd.f32 %v3835_v55, %v3827_v28  ;;  %v7054_v31 = vadd.f32 %v3836_v46, %v3828_v7 }
 0xd8d   :  { %v3862_v52 = vrot.slane %v7011_v18, 7  ;;  %v3866_v48 = vrot.slane %v7033_v3, 5 }
 0xd8e   :  { %v3359_v21 = vpop.permute.xlu2 %3358  ;;  %v3868_v45 = vrot.slane %v7040_v17, 4 }
 0xd8f   :  { %v3369_v8 = vsel %vm778_vm5, %v6850_v26, %v3359_v21  ;;  %v3864_v26 = vrot.slane %v7016_v9, 6  ;;  %v3863_v49 = vsel %vm3488_vm13, %v3862_v52, %v7026_v35  ;;  %vm3517_vm5 = vweird.f32 %v5260_v2 }
 0xd91   :  { %v3865_v12 = vsel %vm3491_vm14, %v3864_v26, %v3863_v49 }
 0xd92   :  { %v3867_v14 = vsel %vm3494_vm15, %v3866_v48, %v3865_v12  ;;  %v4001_v12 = vld [vmem:[%s8359_s2 + $0x13] sm:$0x1] }
 0xd93   :  { %v3869_v61 = vsel %vm3497_vm0, %v3868_v45, %v3867_v14 }
 0xda7   :  { %v3039_v33 = vpop.permute.xlu1 %3038 }
 0xda8   :  { %v3046_v60 = vsel %vm1100_vm6, %v3045_v59, %v3039_v33  ;;  %v3870_v59 = vrot.slane %v7047_v44, 3  ;;  %v3515_v33 = vmul.f32 %v5260_v2, %v3514_v1 }
 0xda9   :  { %v3047_v50 = vsel %vm1102_vm7, %v3046_v60, %v3043_v13  ;;  %v7058_v13 = vadd.f32 %v3837_v38, %v3829_v23  ;;  %v3872_v60 = vrot.slane %v7054_v31, 2 }
 0xdaa   :  { %5030 = vmatmul.msk.f32.gmra.mxu0 %vm223_vm12, %v3047_v50  ;;  %v3871_v27 = vsel %vm3500_vm1, %v3870_v59, %v3869_v61  ;;  %v3516_v50 = vadd.f32 %v5260_v2, %v3515_v33  ;;  %v4004_v33 = vld [vmem:[%s8359_s2 + $0x2b] sm:$0x1] }
 0xdab   :  { %v3873_v51 = vsel %vm3503_vm2, %v3872_v60, %v3871_v27  ;;  %v3874_v36 = vrot.slane %v7058_v13, 1  ;;  %v4005_v27 = vld [vmem:[%s8359_s2 + $0x33] sm:$0x1] }
 0xdac   :  { %v7068_v21 = vsel %vm3517_vm5, %v5260_v2, %v3516_v50 }
 0xdad   :  { %v3875_v57 = vsel %vm3506_vm3, %v3874_v36, %v3873_v51 }
 0xdae   :  { %v7078_v56 = vsel %vm223_vm12, %v3875_v57, 0.0 }
 0xdb0   :  { %v3367_v54 = vpop.permute.xlu0 %3366 }
 0xdb7   :  { %v3363_v34 = vpop.permute.xlu1 %3362 }
 0xdb8   :  { %v3370_v29 = vsel %vm1100_vm6, %v3369_v8, %v3363_v34 }
 0xdb9   :  { %v3371_v41 = vsel %vm1102_vm7, %v3370_v29, %v3367_v54 }
 0xdba   :  { %5031 = vmatmul.msk.f32.gmra.mxu0 %vm223_vm12, %v3371_v41 }
 0xdcc   :  { %v3430_v22 = vpop.f32.mrf.mxu0 }
 0xdcd   :  { %v7065_v6 = vadd.f32 %v6842_v19, %v3430_v22 }
 0xdcf   :  { %v4008_v8 = vrot.slane %v7065_v6, 1  ;;  %v4009_v52 = vrot.slane %v7065_v6, 2  ;;  %v4010_v29 = vrot.slane %v7065_v6, 3  ;;  %v4011_v20 = vrot.slane %v7065_v6, 4 }
 0xdd0   :  { %v3511_v34 = vpop.xlane.xlu2 %3510  ;;  %v4012_v41 = vrot.slane %v7065_v6, 5  ;;  %v4013_v5 = vrot.slane %v7065_v6, 6  ;;  %v7088_v2 = vadd.f32 %v3999_v24, %v7065_v6 }
 0xdd1   :  { %v3519_v54 = vmul.f32 %v7068_v21, %v3511_v34  ;;  %v7090_v10 = vadd.f32 %v4008_v8, %v4000_v25 }
 0xdd2   :  { %8433 = vst [vmem:[#allocation2_spill] sm:$0xff] %v7088_v2 }
 0xdd3   :  { %8434 = vst [vmem:[#allocation3_spill] sm:$0xff] %v7090_v10  ;;  %v3521_v49 = vrot.slane %v3519_v54, 1  ;;  %v3522_v55 = vrot.slane %v3519_v54, 2  ;;  %v3523_v16 = vrot.slane %v3519_v54, 3  ;;  %v3524_v28 = vrot.slane %v3519_v54, 4 }
 0xdd4   :  { %v3525_v48 = vrot.slane %v3519_v54, 5  ;;  %v3526_v46 = vrot.slane %v3519_v54, 6  ;;  %v3527_v7 = vrot.slane %v3519_v54, 7  ;;  %v7096_v14 = vsub.f32 %v6877_v58, %v3519_v54 }
 0xdd5   :  { %v7099_v1 = vsub.f32 %v6860_v30, %v3521_v49  ;;  %v7102_v45 = vsub.f32 %v6868_v43, %v3522_v55  ;;  %v7105_v38 = vsub.f32 %v6885_v42, %v3523_v16  ;;  %v7108_v23 = vsub.f32 %v6897_v40, %v3524_v28  ;;  %v4002_v30 = vld [vmem:[%s8359_s2 + $0x1b] sm:$0x1] }
 0xdd6   :  { %v7111_v61 = vsub.f32 %v6913_v15, %v3525_v48  ;;  %v7114_v59 = vsub.f32 %v6933_v11, %v3526_v46  ;;  %v7117_v58 = vsub.f32 %v6949_v0, %v3527_v7  ;;  %v7122_v43 = vadd.f32 %v4009_v52, %v4001_v12  ;;  %v4003_v0 = vld [vmem:[%s8359_s2 + $0x23] sm:$0x1] }
 0xdd7   :  { %v3545_v42 = vmul.f32 %v7099_v1, %v7099_v1  ;;  %v3546_v40 = vmul.f32 %v7102_v45, %v7102_v45  ;;  %v3547_v15 = vmul.f32 %v7105_v38, %v7105_v38  ;;  %v3548_v11 = vmul.f32 %v7108_v23, %v7108_v23 }
 0xdd8   :  { %v3549_v60 = vmul.f32 %v7111_v61, %v7111_v61  ;;  %v3550_v50 = vmul.f32 %v7114_v59, %v7114_v59  ;;  %v3551_v51 = vmul.f32 %v7117_v58, %v7117_v58  ;;  %v4039_v36 = vrot.slane %v7090_v10, 7 }
 0xdd9   :  { %v3544_v22 = vmul.f32 %v7096_v14, %v7096_v14  ;;  %v3560_v57 = vrot.slane %v3545_v42, 7  ;;  %v3562_v24 = vrot.slane %v3546_v40, 6  ;;  %v7150_v25 = vadd.f32 %v4010_v29, %v4002_v30  ;;  %v4178_v42 = vld [vmem:[%s8359_s2 + $0x14] sm:$0x1]  ;;  %v4179_v40 = vld [vmem:[%s8359_s2 + $0x1c] sm:$0x1] }
 0xdda   :  { %v3564_v8 = vrot.slane %v3547_v15, 5  ;;  %v7152_v34 = vadd.f32 %v4011_v20, %v4003_v0  ;;  %v7154_v52 = vadd.f32 %v4012_v41, %v4004_v33  ;;  %v7156_v54 = vadd.f32 %v4013_v5, %v4005_v27  ;;  %v4177_v20 = vld [vmem:[%s8359_s2 + $0xc] sm:$0x1]  ;;  %v4176_v33 = vld [vmem:[%s8359_s2 + $0x4] sm:$0x1] }
 0xddb   :  { %v3702_v49 = vpop.xlane.xlu0 %3701  ;;  %v3561_v55 = vsel %vm3488_vm13, %v3560_v57, %v3544_v22  ;;  %v3566_v16 = vrot.slane %v3548_v11, 4  ;;  %v3568_v28 = vrot.slane %v3549_v60, 3  ;;  %v3570_v12 = vrot.slane %v3550_v50, 2  ;;  %v4180_v27 = vld [vmem:[%s8359_s2 + $0x24] sm:$0x1] }
 0xddc   :  { %v7160_v48 = vmul.f32 %v3702_v49, %v7068_v21  ;;  %v3433_v46 = vpop.f32.mrf.mxu0  ;;  %v3563_v29 = vsel %vm3491_vm14, %v3562_v24, %v3561_v55  ;;  %v3572_v7 = vrot.slane %v3551_v51, 1  ;;  %v7168_v41 = vsel %vm3488_vm13, %v4039_v36, %v7088_v2  ;;  %v4181_v22 = vld [vmem:[%s8359_s2 + $0x2c] sm:$0x1]  ;;  %v4182_v55 = vld [vmem:[%s8359_s2 + $0x34] sm:$0x1] }
 0xddd   :  { %v3434_v5 = vadd.f32 %v6842_v19, %v3433_v46  ;;  %v3565_v30 = vsel %vm3494_vm15, %v3564_v8, %v3563_v29 }
 0xdde   :  { %v3567_v0 = vsel %vm3497_vm0, %v3566_v16, %v3565_v30  ;;  %v3705_v60 = vrot.slane %v7160_v48, 1  ;;  %v3706_v50 = vrot.slane %v7160_v48, 2  ;;  %v3707_v51 = vrot.slane %v7160_v48, 3 }
 0xddf   :  { %v3569_v36 = vsel %vm3500_vm1, %v3568_v28, %v3567_v0  ;;  %v4185_v57 = vrot.slane %v3434_v5, 1  ;;  %v4186_v24 = vrot.slane %v3434_v5, 2  ;;  %v4187_v8 = vrot.slane %v3434_v5, 3  ;;  %v4183_v28 = vld [vmem:[%s8359_s2 + $0x3c] sm:$0x1] }
 0xde0   :  { %v3571_v49 = vsel %vm3503_vm2, %v3570_v12, %v3569_v36  ;;  %v4188_v16 = vrot.slane %v3434_v5, 4  ;;  %v4189_v46 = vrot.slane %v3434_v5, 5  ;;  %v4190_v29 = vrot.slane %v3434_v5, 6 }
 0xde1   :  { %v3573_v30 = vsel %vm3506_vm3, %v3572_v7, %v3571_v49  ;;  %v4191_v0 = vrot.slane %v3434_v5, 7  ;;  %v7202_v26 = vadd.f32 %v4185_v57, %v4177_v20  ;;  %v7206_v36 = vadd.f32 %v4186_v24, %v4178_v42 }
 0xde2   :  { %v3575_v12 = vsel %vm223_vm12, %v3573_v30, 0.0  ;;  %v7208_v11 = vadd.f32 %v4187_v8, %v4179_v40  ;;  %v7210_v15 = vadd.f32 %v4188_v16, %v4180_v27  ;;  %v7212_v2 = vadd.f32 %v4176_v33, %v3434_v5 }
 0xde3   :  { %3576 = vadd.xlane.f32.xlu1 %v3575_v12  ;;  %v7214_v7 = vadd.f32 %v4189_v46, %v4181_v22  ;;  %v7216_v49 = vadd.f32 %v4190_v29, %v4182_v55  ;;  %v4216_v20 = vrot.slane %v7202_v26, 7  ;;  %v7219_v57 = vadd.f32 %v4191_v0, %v4183_v28 }
 0xde4   :  { %v4218_v10 = vrot.slane %v7206_v36, 6  ;;  %v4220_v42 = vrot.slane %v7208_v11, 5  ;;  %v3708_v40 = vrot.slane %v7160_v48, 4  ;;  %v4222_v5 = vrot.slane %v7210_v15, 4 }
 0xde5   :  { %v4217_v27 = vsel %vm3488_vm13, %v4216_v20, %v7212_v2  ;;  %v4224_v33 = vrot.slane %v7214_v7, 3  ;;  %v4226_v22 = vrot.slane %v7216_v49, 2  ;;  %v3709_v8 = vrot.slane %v7160_v48, 5 }
 0xde6   :  { %v4219_v24 = vsel %vm3491_vm14, %v4218_v10, %v4217_v27  ;;  %v3710_v55 = vrot.slane %v7160_v48, 6  ;;  %v3711_v16 = vrot.slane %v7160_v48, 7  ;;  %v7236_v29 = vsub.f32 %v6937_v37, %v7160_v48 }
 0xde7   :  { %v4221_v46 = vsel %vm3494_vm15, %v4220_v42, %v4219_v24  ;;  %v7239_v30 = vsub.f32 %v6903_v32, %v3705_v60  ;;  %v7242_v28 = vsub.f32 %v6919_v62, %v3706_v50  ;;  %v7246_v0 = vsub.f32 %v6945_v63, %v3707_v51 }
 0xde8   :  { %v4223_v10 = vsel %vm3497_vm0, %v4222_v5, %v4221_v46  ;;  %v7249_v12 = vsub.f32 %v6957_v39, %v3708_v40  ;;  %v7252_v20 = vsub.f32 %v6967_v47, %v3709_v8  ;;  %v4228_v48 = vrot.slane %v7219_v57, 1 }
 0xde9   :  { %8435 = vst [vmem:[#allocation4_spill] sm:$0xff] %v7246_v0  ;;  %v4225_v37 = vsel %vm3500_vm1, %v4224_v33, %v4223_v10  ;;  %v7257_v32 = vsub.f32 %v6976_v53, %v3710_v55  ;;  %v7260_v62 = vsub.f32 %v6985_v4, %v3711_v16  ;;  %v3729_v63 = vmul.f32 %v7239_v30, %v7239_v30  ;;  %v4006_v10 = vld [vmem:[%s8359_s2 + $0x3b] sm:$0x1] }
 0xdea   :  { %8436 = vst [vmem:[#allocation5_spill] sm:$0xff] %v7249_v12  ;;  %v4227_v60 = vsel %vm3503_vm2, %v4226_v22, %v4225_v37  ;;  %v3730_v39 = vmul.f32 %v7242_v28, %v7242_v28  ;;  %v3731_v47 = vmul.f32 %v7246_v0, %v7246_v0  ;;  %v3728_v53 = vmul.f32 %v7236_v29, %v7236_v29 }
 0xdeb   :  { %8437 = vst [vmem:[#allocation6_spill] sm:$0xff] %v7252_v20  ;;  %3878 = vadd.xlane.f32.xlu1 %v7078_v56  ;;  %v4229_v50 = vsel %vm3506_vm3, %v4228_v48, %v4227_v60  ;;  %v3732_v4 = vmul.f32 %v7249_v12, %v7249_v12  ;;  %v8440_v51 = vrot.slane %v7122_v43, 6  ;;  %v3733_v5 = vmul.f32 %v7252_v20, %v7252_v20  ;;  %v4360_v20 = vld [vmem:[%s8359_s2 + $0x3d] sm:$0x1] }
 0xdec   :  { %8438 = vst [vmem:[#allocation7_spill] sm:$0xff] %v7257_v32  ;;  %v3436_v40 = vpop.f32.mrf.mxu0  ;;  %v4231_v27 = vsel %vm223_vm12, %v4229_v50, 0.0  ;;  %v3744_v56 = vrot.slane %v3729_v63, 7  ;;  %v3746_v33 = vrot.slane %v3730_v39, 6  ;;  %v3734_v24 = vmul.f32 %v7257_v32, %v7257_v32  ;;  %v4354_v39 = vld [vmem:[%s8359_s2 + $0xd] sm:$0x1] }
 0xded   :  { %8439 = vst [vmem:[#allocation8_spill] sm:$0xff] %v7260_v62  ;;  %v4042_v42 = vsel %vm3491_vm14, %v8440_v51, %v7168_v41  ;;  %v3437_v22 = vadd.f32 %v6842_v19, %v3436_v40  ;;  %4232 = vadd.xlane.f32.xlu0 %v4231_v27  ;;  %v4047_v8 = vrot.slane %v7154_v52, 3  ;;  %v4049_v55 = vrot.slane %v7156_v54, 2  ;;  %v4355_v40 = vld [vmem:[%s8359_s2 + $0x15] sm:$0x1] }
 0xdee   :  { %v3735_v41 = vmul.f32 %v7260_v62, %v7260_v62  ;;  %v3745_v16 = vsel %vm3488_vm13, %v3744_v56, %v3728_v53  ;;  %v3748_v46 = vrot.slane %v3731_v47, 5  ;;  %v8441_v37 = vrot.slane %v7150_v25, 5 }
 0xdef   :  { %v3747_v60 = vsel %vm3491_vm14, %v3746_v33, %v3745_v16  ;;  %v3750_v63 = vrot.slane %v3732_v4, 4  ;;  %v4362_v50 = vrot.slane %v3437_v22, 1  ;;  %v4363_v51 = vrot.slane %v3437_v22, 2  ;;  %v4356_v16 = vld [vmem:[%s8359_s2 + $0x1d] sm:$0x1] }
 0xdf0   :  { %v4044_v48 = vsel %vm3494_vm15, %v8441_v37, %v4042_v42  ;;  %v3749_v53 = vsel %vm3494_vm15, %v3748_v46, %v3747_v60  ;;  %v3752_v47 = vrot.slane %v3733_v5, 3  ;;  %v4364_v27 = vrot.slane %v3437_v22, 3  ;;  %v4357_v5 = vld [vmem:[%s8359_s2 + $0x25] sm:$0x1] }
 0xdf1   :  { %v4365_v56 = vrot.slane %v3437_v22, 4  ;;  %v3751_v42 = vsel %vm3497_vm0, %v3750_v63, %v3749_v53  ;;  %v3754_v37 = vrot.slane %v3734_v24, 2  ;;  %v8442_v4 = vrot.slane %v7152_v34, 4  ;;  %v4353_v24 = vld [vmem:[%s8359_s2 + $0x5] sm:$0x1] }
 0xdf2   :  { %v4366_v46 = vrot.slane %v3437_v22, 5  ;;  %v3753_v60 = vsel %vm3500_vm1, %v3752_v47, %v3751_v42  ;;  %v3756_v62 = vrot.slane %v3735_v41, 1  ;;  %v8443_v32 = vrot.slane %v7065_v6, 7  ;;  %v4359_v47 = vld [vmem:[%s8359_s2 + $0x35] sm:$0x1] }
 0xdf3   :  { %v4046_v33 = vsel %vm3497_vm0, %v8442_v4, %v4044_v48  ;;  %v4358_v48 = vld [vmem:[%s8359_s2 + $0x2d] sm:$0x1]  ;;  %v4367_v53 = vrot.slane %v3437_v22, 6  ;;  %v3755_v4 = vsel %vm3503_vm2, %v3754_v37, %v3753_v60  ;;  %v4368_v41 = vrot.slane %v3437_v22, 7 }
 0xdf4   :  { %v7317_v63 = vadd.f32 %v8443_v32, %v4006_v10  ;;  %v7329_v42 = vadd.f32 %v4362_v50, %v4354_v39  ;;  %v7331_v6 = vadd.f32 %v4363_v51, %v4355_v40  ;;  %v3757_v32 = vsel %vm3506_vm3, %v3756_v62, %v3755_v4 }
 0xdf5   :  { %v4048_v10 = vsel %vm3500_vm1, %v4047_v8, %v4046_v33  ;;  %v7338_v12 = vadd.f32 %v4364_v27, %v4356_v16  ;;  %v7340_v37 = vadd.f32 %v4365_v56, %v4357_v5  ;;  %v3759_v60 = vsel %vm223_vm12, %v3757_v32, 0.0 }
 0xdf6   :  { %v7343_v0 = vadd.f32 %v4353_v24, %v3437_v22  ;;  %v7345_v39 = vadd.f32 %v4366_v46, %v4358_v48  ;;  %v4393_v50 = vrot.slane %v7329_v42, 7  ;;  %3760 = vadd.xlane.f32.xlu2 %v3759_v60  ;;  %v7348_v62 = vadd.f32 %v4367_v53, %v4359_v47 }
 0xdf7   :  { %v4395_v8 = vrot.slane %v7331_v6, 6  ;;  %v4050_v51 = vsel %vm3503_vm2, %v4049_v55, %v4048_v10  ;;  %v7352_v40 = vadd.f32 %v4368_v41, %v4360_v20  ;;  %v4397_v56 = vrot.slane %v7338_v12, 5 }
 0xdf8   :  { %8444 = vst [vmem:[#allocation9_spill] sm:$0xff] %v7345_v39  ;;  %v4394_v27 = vsel %vm3488_vm13, %v4393_v50, %v7343_v0  ;;  %v4051_v22 = vrot.slane %v7317_v63, 1  ;;  %v4399_v16 = vrot.slane %v7340_v37, 4  ;;  %v4401_v46 = vrot.slane %v7345_v39, 3  ;;  %v4531_v50 = vld [vmem:[%s8359_s2 + $0xe] sm:$0x1] }
 0xdf9   :  { %8445 = vst [vmem:[#allocation10_spill] sm:$0xff] %v7348_v62  ;;  %v4396_v33 = vsel %vm3491_vm14, %v4395_v8, %v4394_v27  ;;  %v4403_v55 = vrot.slane %v7348_v62, 2  ;;  %v4405_v53 = vrot.slane %v7352_v40, 1  ;;  %v4532_v8 = vld [vmem:[%s8359_s2 + $0x16] sm:$0x1] }
 0xdfa   :  { %8446 = vst [vmem:[#allocation11_spill] sm:$0xff] %v7352_v40  ;;  %v4398_v5 = vsel %vm3494_vm15, %v4397_v56, %v4396_v33  ;;  %v4052_v24 = vsel %vm3506_vm3, %v4051_v22, %v4050_v51  ;;  %v4533_v51 = vld [vmem:[%s8359_s2 + $0x1e] sm:$0x1]  ;;  %v4534_v27 = vld [vmem:[%s8359_s2 + $0x26] sm:$0x1] }
 0xdfb   :  { %v4400_v20 = vsel %vm3497_vm0, %v4399_v16, %v4398_v5  ;;  %v4054_v47 = vsel %vm223_vm12, %v4052_v24, 0.0  ;;  %v4530_v5 = vld [vmem:[%s8359_s2 + $0x6] sm:$0x1] }
 0xdfc   :  { %v4402_v48 = vsel %vm3500_vm1, %v4401_v46, %v4400_v20  ;;  %v4535_v46 = vld [vmem:[%s8359_s2 + $0x2e] sm:$0x1] }
 0xdfd   :  { %v4404_v4 = vsel %vm3503_vm2, %v4403_v55, %v4402_v48  ;;  %v4536_v55 = vld [vmem:[%s8359_s2 + $0x36] sm:$0x1] }
 0xdfe   :  { %v4406_v41 = vsel %vm3506_vm3, %v4405_v53, %v4404_v4  ;;  %4055 = vadd.xlane.f32.xlu2 %v4054_v47 }
 0xdff   :  { %v4408_v32 = vsel %vm223_vm12, %v4406_v41, 0.0  ;;  %v4537_v41 = vld [vmem:[%s8359_s2 + $0x3e] sm:$0x1] }
 0xe00   :  { %4409 = vadd.xlane.f32.xlu1 %v4408_v32 }
 0xe27   :  { %v3439_v10 = vpop.f32.mrf.mxu0 }
 0xe28   :  { %v3440_v60 = vadd.f32 %v6842_v19, %v3439_v10 }
 0xe2a   :  { %v4539_v56 = vrot.slane %v3440_v60, 1  ;;  %v4540_v22 = vrot.slane %v3440_v60, 2  ;;  %v4541_v33 = vrot.slane %v3440_v60, 3  ;;  %v4542_v16 = vrot.slane %v3440_v60, 4 }
 0xe2b   :  { %v4543_v24 = vrot.slane %v3440_v60, 5  ;;  %v4544_v20 = vrot.slane %v3440_v60, 6  ;;  %v4545_v48 = vrot.slane %v3440_v60, 7  ;;  %v7404_v10 = vadd.f32 %v4530_v5, %v3440_v60 }
 0xe2c   :  { %v7393_v53 = vadd.f32 %v4539_v56, %v4531_v50  ;;  %v7395_v4 = vadd.f32 %v4540_v22, %v4532_v8  ;;  %v7397_v47 = vadd.f32 %v4541_v33, %v4533_v51  ;;  %v7402_v32 = vadd.f32 %v4542_v16, %v4534_v27 }
 0xe2d   :  { %8451 = vst [vmem:[#allocation16_spill] sm:$0xff] %v7404_v10  ;;  %v7406_v40 = vadd.f32 %v4543_v24, %v4535_v46  ;;  %v7410_v50 = vadd.f32 %v4544_v20, %v4536_v55  ;;  %v7412_v8 = vadd.f32 %v4545_v48, %v4537_v41 }
 0xe2e   :  { %8447 = vst [vmem:[#allocation12_spill] sm:$0xff] %v7393_v53  ;;  %v4570_v62 = vrot.slane %v7393_v53, 7  ;;  %v4572_v39 = vrot.slane %v7395_v4, 6  ;;  %v4574_v56 = vrot.slane %v7397_v47, 5  ;;  %v4576_v60 = vrot.slane %v7402_v32, 4 }
 0xe2f   :  { %8448 = vst [vmem:[#allocation13_spill] sm:$0xff] %v7395_v4  ;;  %v4578_v33 = vrot.slane %v7406_v40, 3  ;;  %v4580_v5 = vrot.slane %v7410_v50, 2  ;;  %v4582_v24 = vrot.slane %v7412_v8, 1 }
 0xe30   :  { %8449 = vst [vmem:[#allocation14_spill] sm:$0xff] %v7397_v47  ;;  %v4571_v51 = vsel %vm3488_vm13, %v4570_v62, %v7404_v10 }
 0xe31   :  { %8450 = vst [vmem:[#allocation15_spill] sm:$0xff] %v7402_v32  ;;  %v4573_v27 = vsel %vm3491_vm14, %v4572_v39, %v4571_v51 }
 0xe32   :  { %8452 = vst [vmem:[#allocation17_spill] sm:$0xff] %v7406_v40  ;;  %v4575_v22 = vsel %vm3494_vm15, %v4574_v56, %v4573_v27  ;;  %v4708_v56 = vld [vmem:[%s8359_s2 + $0xf] sm:$0x1] }
 0xe33   :  { %8453 = vst [vmem:[#allocation18_spill] sm:$0xff] %v7410_v50  ;;  %v4577_v16 = vsel %vm3497_vm0, %v4576_v60, %v4575_v22 }
 0xe34   :  { %8454 = vst [vmem:[#allocation19_spill] sm:$0xff] %v7412_v8  ;;  %v4579_v46 = vsel %vm3500_vm1, %v4578_v33, %v4577_v16  ;;  %v4707_v33 = vld [vmem:[%s8359_s2 + $0x7] sm:$0x1] }
 0xe35   :  { %v4581_v62 = vsel %vm3503_vm2, %v4580_v5, %v4579_v46  ;;  %v4709_v5 = vld [vmem:[%s8359_s2 + $0x17] sm:$0x1]  ;;  %v4710_v46 = vld [vmem:[%s8359_s2 + $0x1f] sm:$0x1] }
 0xe36   :  { %v4583_v20 = vsel %vm3506_vm3, %v4582_v24, %v4581_v62 }
 0xe37   :  { %v4585_v39 = vsel %vm223_vm12, %v4583_v20, 0.0  ;;  %v3442_v55 = vpop.f32.mrf.mxu0 }
 0xe38   :  { %4586 = vadd.xlane.f32.xlu2 %v4585_v39  ;;  %v7429_v48 = vadd.f32 %v6842_v19, %v3442_v55 }
 0xe3a   :  { %v4716_v41 = vrot.slane %v7429_v48, 1  ;;  %v4717_v19 = vrot.slane %v7429_v48, 2  ;;  %v4718_v16 = vrot.slane %v7429_v48, 3  ;;  %v7452_v39 = vadd.f32 %v4707_v33, %v7429_v48 }
 0xe3c   :  { %v7436_v22 = vadd.f32 %v4716_v41, %v4708_v56  ;;  %8456 = vst [vmem:[#allocation21_spill] sm:$0xff] %v7452_v39  ;;  %v7456_v56 = vadd.f32 %v4717_v19, %v4709_v5 }
 0xe3e   :  { %8455 = vst [vmem:[#allocation20_spill] sm:$0xff] %v7436_v22  ;;  %v4747_v24 = vrot.slane %v7436_v22, 7 }
 0xe40   :  { %v7462_v22 = vsel %vm3488_vm13, %v4747_v24, %v7452_v39 }
 0xe41   :  { %8458 = vst [vmem:[#allocation23_spill] sm:$0xff] %v7462_v22 }
 0xe56   :  { %v3577_v51 = vpop.xlane.xlu1 %3576 }
 0xe57   :  { %v3578_v27 = vmul.f32 %v3577_v51, %v7068_v21 }
 0xe59   :  { %v3579_v60 = vadd.f32 1e-05, %v3578_v27  ;;  %v7458_v27 = vadd.f32 %v4718_v16, %v4710_v46 }
 0xe5b   :  { %5261 = vrsqrt.f32 %v3579_v60  ;;  %8457 = vst [vmem:[#allocation22_spill] sm:$0xff] %v7458_v27  ;;  %vm3586_vm6 = vweird.f32 %v3579_v60 }
 0xe5e   :  { %v3879_v62 = vpop.xlane.xlu1 %3878 }
 0xe5f   :  { %v3880_v20 = vmul.f32 %v3879_v62, %v7068_v21 }
 0xe60   :  { %v4233_v55 = vpop.xlane.xlu0 %4232 }
 0xe61   :  { %v5262_v8 = vpop.eup %5261  ;;  %v3882_v50 = vrot.slane %v3880_v20, 1  ;;  %v3883_v40 = vrot.slane %v3880_v20, 2  ;;  %v3884_v32 = vrot.slane %v3880_v20, 3  ;;  %v7465_v33 = vmul.f32 %v4233_v55, %v7068_v21 }
 0xe62   :  { %v3581_v62 = vmul.f32 %v5262_v8, %v3579_v60  ;;  %v3885_v41 = vrot.slane %v3880_v20, 4  ;;  %v3886_v47 = vrot.slane %v3880_v20, 5  ;;  %v3887_v51 = vrot.slane %v3880_v20, 6 }
 0xe63   :  { %v3888_v19 = vrot.slane %v3880_v20, 7  ;;  %v7468_v16 = vsub.f32 %v7026_v35, %v3880_v20  ;;  %v7471_v5 = vsub.f32 %v7011_v18, %v3882_v50  ;;  %v7474_v4 = vsub.f32 %v7016_v9, %v3883_v40 }
 0xe64   :  { %v3582_v46 = vmul.f32 %v5262_v8, %v3581_v62  ;;  %v7477_v24 = vsub.f32 %v7033_v3, %v3884_v32  ;;  %v7480_v55 = vsub.f32 %v7040_v17, %v3885_v41  ;;  %vm3587_vm7 = vweird.f32 %v5262_v8 }
 0xe65   :  { %8459 = vst [vmem:[#allocation24_spill] sm:$0xff] %v7468_v16  ;;  %v7483_v39 = vsub.f32 %v7047_v44, %v3886_v47  ;;  %v7486_v35 = vsub.f32 %v7054_v31, %v3887_v51  ;;  %v7489_v18 = vsub.f32 %v7058_v13, %v3888_v19  ;;  %v3906_v9 = vmul.f32 %v7471_v5, %v7471_v5  ;;  %vm3588_vm8 = vmor %vm3586_vm6, %vm3587_vm7 }
 0xe66   :  { %8460 = vst [vmem:[#allocation25_spill] sm:$0xff] %v7471_v5  ;;  %v3583_v50 = vmul.f32 0.5, %v3582_v46  ;;  %v3907_v3 = vmul.f32 %v7474_v4, %v7474_v4  ;;  %v3908_v17 = vmul.f32 %v7477_v24, %v7477_v24  ;;  %v7499_v44 = vmul.f32 %v7480_v55, %v7480_v55 }
 0xe67   :  { %8461 = vst [vmem:[#allocation26_spill] sm:$0xff] %v7474_v4  ;;  %v7503_v31 = vmul.f32 %v7483_v39, %v7483_v39  ;;  %v7507_v13 = vmul.f32 %v7486_v35, %v7486_v35  ;;  %v7511_v40 = vmul.f32 %v7489_v18, %v7489_v18  ;;  %v3905_v32 = vmul.f32 %v7468_v16, %v7468_v16 }
 0xe68   :  { %8462 = vst [vmem:[#allocation27_spill] sm:$0xff] %v7477_v24  ;;  %v3584_v47 = vsub.f32 1.5, %v3583_v50  ;;  %v3921_v20 = vrot.slane %v3906_v9, 7  ;;  %v3923_v41 = vrot.slane %v3907_v3, 6  ;;  %v3925_v62 = vrot.slane %v3908_v17, 5 }
 0xe69   :  { %8463 = vst [vmem:[#allocation28_spill] sm:$0xff] %v7480_v55  ;;  %v3761_v51 = vpop.xlane.xlu2 %3760  ;;  %v3927_v19 = vrot.slane %v7499_v44, 4  ;;  %v3929_v46 = vrot.slane %v7503_v31, 3  ;;  %v4236_v3 = vrot.slane %v7465_v33, 1  ;;  %v4237_v17 = vrot.slane %v7465_v33, 2 }
 0xe6a   :  { %8464 = vst [vmem:[#allocation29_spill] sm:$0xff] %v7483_v39  ;;  %v3585_v39 = vmul.f32 %v5262_v8, %v3584_v47  ;;  %v3762_v55 = vmul.f32 %v3761_v51, %v7068_v21  ;;  %v4238_v44 = vrot.slane %v7465_v33, 3  ;;  %v7530_v31 = vld [vmem:[%s8360_s11] ss:$0 sm:$0xff]  ;;  %v4239_v60 = vrot.slane %v7465_v33, 4 }
 0xe6b   :  { %8465 = vst [vmem:[#allocation30_spill] sm:$0xff] %v7486_v35  ;;  %v7539_v35 = vld [vmem:[%s8361_s12] ss:$0 sm:$0xff] }
 0xe6c   :  { %8466 = vst [vmem:[#allocation31_spill] sm:$0xff] %v7489_v18  ;;  %v3922_v18 = vsel %vm3488_vm13, %v3921_v20, %v3905_v32  ;;  %v3589_v47 = vsel %vm3588_vm8, %v5262_v8, %v3585_v39  ;;  %v7532_v32 = vadd.f32 1e-05, %v3762_v55 }
 0xe6d   :  { %v3924_v9 = vsel %vm3491_vm14, %v3923_v41, %v3922_v18  ;;  %v3591_v51 = vrot.slane %v3589_v47, 1  ;;  %v3592_v18 = vrot.slane %v3589_v47, 2  ;;  %v3593_v41 = vrot.slane %v3589_v47, 3 }
 0xe6e   :  { %v3926_v20 = vsel %vm3494_vm15, %v3925_v62, %v3924_v9  ;;  %v3594_v50 = vrot.slane %v3589_v47, 4  ;;  %v3595_v24 = vrot.slane %v3589_v47, 5  ;;  %v3596_v4 = vrot.slane %v3589_v47, 6 }
 0xe6f   :  { %v3597_v5 = vrot.slane %v3589_v47, 7  ;;  %v3606_v8 = vmul.f32 %v3589_v47, %v7096_v14  ;;  %v3607_v39 = vmul.f32 %v3591_v51, %v7099_v1  ;;  %v3608_v55 = vmul.f32 %v3592_v18, %v7102_v45 }
 0xe70   :  { %v3609_v62 = vmul.f32 %v3593_v41, %v7105_v38  ;;  %v3610_v9 = vmul.f32 %v3594_v50, %v7108_v23  ;;  %v3611_v16 = vmul.f32 %v3595_v24, %v7111_v61  ;;  %v3612_v53 = vmul.f32 %v3596_v4, %v7114_v59 }
 0xe71   :  { %v3613_v10 = vmul.f32 %v3597_v5, %v7117_v58  ;;  %v3617_v27 = vmul.f32 %v7530_v31, %v3606_v8  ;;  %v3618_v22 = vmul.f32 %v7530_v31, %v3607_v39  ;;  %v3619_v14 = vmul.f32 %v7530_v31, %v3608_v55  ;;  %v4056_v4 = vpop.xlane.xlu2 %4055 }
 0xe72   :  { %v3620_v1 = vmul.f32 %v7530_v31, %v3609_v62  ;;  %v3621_v45 = vmul.f32 %v7530_v31, %v3610_v9  ;;  %v3622_v38 = vmul.f32 %v7530_v31, %v3611_v16  ;;  %v3623_v23 = vmul.f32 %v7530_v31, %v3612_v53 }
 0xe73   :  { %v3624_v61 = vmul.f32 %v7530_v31, %v3613_v10  ;;  %v3628_v59 = vadd.f32 %v7539_v35, %v3617_v27  ;;  %v4410_v58 = vpop.xlane.xlu1 %4409  ;;  %v3629_v5 = vadd.f32 %v7539_v35, %v3618_v22  ;;  %v3630_v24 = vadd.f32 %v7539_v35, %v3619_v14 }
 0xe74   :  { %v3631_v50 = vadd.f32 %v7539_v35, %v3620_v1  ;;  %v4240_v47 = vrot.slane %v7465_v33, 5  ;;  %v3632_v51 = vadd.f32 %v7539_v35, %v3621_v45  ;;  %v3633_v16 = vadd.f32 %v7539_v35, %v3622_v38 }
 0xe75   :  { %v3634_v53 = vadd.f32 %v7539_v35, %v3623_v23  ;;  %3637 = vst.msk [vmem:[%s8362_s13] sm:$0x1] %vm3636_vm4, %v3628_v59  ;;  %5263 = vrsqrt.f32 %v7532_v32  ;;  %v3635_v10 = vadd.f32 %v7539_v35, %v3624_v61  ;;  %v7576_v22 = vmul.f32 %v4056_v4, %v7068_v21 }
 0xe76   :  { %3638 = vst.msk [vmem:[%s8362_s13 + $0x8] sm:$0x1] %vm3636_vm4, %v3629_v5  ;;  %v7579_v27 = vmul.f32 %v4410_v58, %v7068_v21  ;;  %v3928_v18 = vsel %vm3497_vm0, %v3927_v19, %v3926_v20  ;;  %v4241_v8 = vrot.slane %v7465_v33, 6  ;;  %v4242_v39 = vrot.slane %v7465_v33, 7 }
 0xe77   :  { %3639 = vst.msk [vmem:[%s8362_s13 + $0x10] sm:$0x1] %vm3636_vm4, %v3630_v24  ;;  %v3930_v41 = vsel %vm3500_vm1, %v3929_v46, %v3928_v18  ;;  %v7591_v55 = vsub.f32 %v7212_v2, %v7465_v33  ;;  %v8467_v19 = vrot.slane %v7507_v13, 2  ;;  %v7601_v62 = vsub.f32 %v7202_v26, %v4236_v3 }
 0xe78   :  { %3640 = vst.msk [vmem:[%s8362_s13 + $0x18] sm:$0x1] %vm3636_vm4, %v3631_v50  ;;  %v7604_v46 = vsub.f32 %v7206_v36, %v4237_v17  ;;  %v7607_v9 = vsub.f32 %v7208_v11, %v4238_v44  ;;  %v8468_v2 = vrot.slane %v7511_v40, 1  ;;  %v7617_v13 = vsub.f32 %v7210_v15, %v4239_v60 }
 0xe79   :  { %v3932_v20 = vsel %vm3503_vm2, %v8467_v19, %v3930_v41  ;;  %3641 = vst.msk [vmem:[%s8362_s13 + $0x20] sm:$0x1] %vm3636_vm4, %v3632_v51  ;;  %v7620_v26 = vsub.f32 %v7214_v7, %v4240_v47  ;;  %v7623_v36 = vsub.f32 %v7216_v49, %v4241_v8  ;;  %v7631_v40 = vsub.f32 %v7219_v57, %v4242_v39 }
 0xe7a   :  { %v3934_v33 = vsel %vm3506_vm3, %v8468_v2, %v3932_v20  ;;  %3642 = vst.msk [vmem:[%s8362_s13 + $0x28] sm:$0x1] %vm3636_vm4, %v3633_v16  ;;  %v4259_v15 = vmul.f32 %v7591_v55, %v7591_v55  ;;  %v4260_v7 = vmul.f32 %v7601_v62, %v7601_v62  ;;  %v4261_v49 = vmul.f32 %v7604_v46, %v7604_v46 }
 0xe7b   :  { %v3936_v11 = vsel %vm223_vm12, %v3934_v33, 0.0  ;;  %v5264_v3 = vpop.eup %5263  ;;  %3643 = vst.msk [vmem:[%s8362_s13 + $0x30] sm:$0x1] %vm3636_vm4, %v3634_v53  ;;  %v4262_v57 = vmul.f32 %v7607_v9, %v7607_v9  ;;  %v4263_v17 = vmul.f32 %v7617_v13, %v7617_v13  ;;  %v4749_v44 = vrot.slane %v7456_v56, 6  ;;  %v8469_v33 = vld [vmem:[#allocation3_spill] sm:$0xff] }
 0xe7c   :  { %3937 = vadd.xlane.f32.xlu0 %v3936_v11  ;;  %3644 = vst.msk [vmem:[%s8362_s13 + $0x38] sm:$0x1] %vm3636_vm4, %v3635_v10  ;;  %v3765_v60 = vmul.f32 %v5264_v3, %v7532_v32  ;;  %vm3770_vm9 = vweird.f32 %v7532_v32  ;;  %v4264_v14 = vmul.f32 %v7620_v26, %v7620_v26  ;;  %v4265_v1 = vmul.f32 %v7623_v36, %v7623_v36 }
 0xe7d   :  { %v4059_v45 = vrot.slane %v7576_v22, 1  ;;  %vm3771_vm10 = vweird.f32 %v5264_v3  ;;  %v4266_v38 = vmul.f32 %v7631_v40, %v7631_v40  ;;  %v4275_v23 = vrot.slane %v4260_v7, 7 }
 0xe7e   :  { %v4277_v61 = vrot.slane %v4261_v49, 6  ;;  %v3766_v59 = vmul.f32 %v5264_v3, %v3765_v60  ;;  %v4279_v4 = vrot.slane %v4262_v57, 5  ;;  %v4281_v58 = vrot.slane %v4263_v17, 4  ;;  %v8470_v49 = vld [vmem:[#allocation2_spill] sm:$0xff]  ;;  %vm3772_vm11 = vmor %vm3770_vm9, %vm3771_vm10 }
 0xe7f   :  { %v4283_v5 = vrot.slane %v4264_v14, 3  ;;  %v4276_v24 = vsel %vm3488_vm13, %v4275_v23, %v4259_v15  ;;  %v4285_v50 = vrot.slane %v4265_v1, 2  ;;  %v4060_v47 = vrot.slane %v7576_v22, 2 }
 0xe80   :  { %v4061_v51 = vrot.slane %v7576_v22, 3  ;;  %v3767_v16 = vmul.f32 0.5, %v3766_v59  ;;  %v4278_v53 = vsel %vm3491_vm14, %v4277_v61, %v4276_v24  ;;  %v4062_v10 = vrot.slane %v7576_v22, 4 }
 0xe81   :  { %v4063_v18 = vrot.slane %v7576_v22, 5  ;;  %v4280_v41 = vsel %vm3494_vm15, %v4279_v4, %v4278_v53  ;;  %v4287_v8 = vrot.slane %v4266_v38, 1  ;;  %v4064_v39 = vrot.slane %v7576_v22, 6  ;;  %v8472_v53 = vld [vmem:[#allocation5_spill] sm:$0xff] }
 0xe82   :  { %v4065_v19 = vrot.slane %v7576_v22, 7  ;;  %v3768_v20 = vsub.f32 1.5, %v3767_v16  ;;  %v4282_v2 = vsel %vm3497_vm0, %v4281_v58, %v4280_v41  ;;  %v7672_v11 = vsub.f32 %v8469_v33, %v4059_v45 }
 0xe83   :  { %v7675_v15 = vsub.f32 %v7122_v43, %v4060_v47  ;;  %v4284_v7 = vsel %vm3500_vm1, %v4283_v5, %v4282_v2  ;;  %v7680_v57 = vsub.f32 %v8470_v49, %v7576_v22  ;;  %v7683_v17 = vsub.f32 %v7150_v25, %v4061_v51  ;;  %v8471_v51 = vld [vmem:[#allocation4_spill] sm:$0xff] }
 0xe84   :  { %v7686_v60 = vsub.f32 %v7152_v34, %v4062_v10  ;;  %v3769_v14 = vmul.f32 %v5264_v3, %v3768_v20  ;;  %v4286_v1 = vsel %vm3503_vm2, %v4285_v50, %v4284_v7  ;;  %v7690_v45 = vsub.f32 %v7154_v52, %v4063_v18  ;;  %v8473_v18 = vld [vmem:[#allocation6_spill] sm:$0xff] }
 0xe85   :  { %v7693_v43 = vsub.f32 %v7156_v54, %v4064_v39  ;;  %v4288_v22 = vsel %vm3506_vm3, %v4287_v8, %v4286_v1  ;;  %v7700_v25 = vsub.f32 %v7317_v63, %v4065_v19  ;;  %v4083_v34 = vmul.f32 %v7672_v11, %v7672_v11  ;;  %v8474_v8 = vld [vmem:[#allocation7_spill] sm:$0xff]  ;;  %v8475_v19 = vld [vmem:[#allocation8_spill] sm:$0xff] }
 0xe86   :  { %v4084_v38 = vmul.f32 %v7675_v15, %v7675_v15  ;;  %v3773_v52 = vsel %vm3772_vm11, %v5264_v3, %v3769_v14  ;;  %v4290_v23 = vsel %vm223_vm12, %v4288_v22, 0.0  ;;  %v4085_v54 = vmul.f32 %v7683_v17, %v7683_v17 }
 0xe87   :  { %v7711_v32 = vmul.f32 %v7686_v60, %v7686_v60  ;;  %v3775_v61 = vrot.slane %v3773_v52, 1  ;;  %v3776_v59 = vrot.slane %v3773_v52, 2  ;;  %v3777_v63 = vrot.slane %v3773_v52, 3  ;;  %4291 = vadd.xlane.f32.xlu2 %v4290_v23 }
 0xe88   :  { %v3778_v4 = vrot.slane %v3773_v52, 4  ;;  %v3779_v58 = vrot.slane %v3773_v52, 5  ;;  %v3780_v5 = vrot.slane %v3773_v52, 6  ;;  %v3781_v24 = vrot.slane %v3773_v52, 7 }
 0xe89   :  { %v3790_v50 = vmul.f32 %v3773_v52, %v7236_v29  ;;  %v3791_v3 = vmul.f32 %v3775_v61, %v7239_v30  ;;  %v3792_v47 = vmul.f32 %v3776_v59, %v7242_v28  ;;  %v3793_v16 = vmul.f32 %v3777_v63, %v8471_v51 }
 0xe8a   :  { %v3794_v10 = vmul.f32 %v3778_v4, %v8472_v53  ;;  %v3795_v41 = vmul.f32 %v3779_v58, %v8473_v18  ;;  %v3796_v39 = vmul.f32 %v3780_v5, %v8474_v8  ;;  %v3797_v20 = vmul.f32 %v3781_v24, %v8475_v19 }
 0xe8b   :  { %v3798_v2 = vmul.f32 %v7530_v31, %v3790_v50  ;;  %v3799_v33 = vmul.f32 %v7530_v31, %v3791_v3  ;;  %v3800_v29 = vmul.f32 %v7530_v31, %v3792_v47  ;;  %v3801_v30 = vmul.f32 %v7530_v31, %v3793_v16 }
 0xe8c   :  { %v3802_v28 = vmul.f32 %v7530_v31, %v3794_v10  ;;  %v3803_v7 = vmul.f32 %v7530_v31, %v3795_v41  ;;  %v3804_v49 = vmul.f32 %v7530_v31, %v3796_v39  ;;  %v3805_v14 = vmul.f32 %v7530_v31, %v3797_v20  ;;  %v4711_v41 = vld [vmem:[%s8359_s2 + $0x27] sm:$0x1] }
 0xe8d   :  { %v3806_v1 = vadd.f32 %v7539_v35, %v3798_v2  ;;  %v3807_v22 = vadd.f32 %v7539_v35, %v3799_v33  ;;  %v3808_v52 = vadd.f32 %v7539_v35, %v3800_v29  ;;  %v3809_v23 = vadd.f32 %v7539_v35, %v3801_v30 }
 0xe8e   :  { %v4082_v61 = vmul.f32 %v7680_v57, %v7680_v57  ;;  %v3810_v59 = vadd.f32 %v7539_v35, %v3802_v28  ;;  %v3811_v63 = vadd.f32 %v7539_v35, %v3803_v7  ;;  %v3812_v4 = vadd.f32 %v7539_v35, %v3804_v49 }
 0xe8f   :  { %3814 = vst.msk [vmem:[%s8362_s13 + $0x1] sm:$0x1] %vm3636_vm4, %v3806_v1  ;;  %v4087_v58 = vmul.f32 %v7690_v45, %v7690_v45  ;;  %v4088_v5 = vmul.f32 %v7693_v43, %v7693_v43  ;;  %v4089_v24 = vmul.f32 %v7700_v25, %v7700_v25  ;;  %v4098_v50 = vrot.slane %v4083_v34, 7  ;;  %v8476_v1 = vld [vmem:[#allocation9_spill] sm:$0xff] }
 0xe90   :  { %3815 = vst.msk [vmem:[%s8362_s13 + $0x9] sm:$0x1] %vm3636_vm4, %v3807_v22  ;;  %v4100_v3 = vrot.slane %v4084_v38, 6  ;;  %v3813_v47 = vadd.f32 %v7539_v35, %v3805_v14  ;;  %v4102_v51 = vrot.slane %v4085_v54, 5  ;;  %v4104_v16 = vrot.slane %v7711_v32, 4  ;;  %v8477_v22 = vld [vmem:[#allocation10_spill] sm:$0xff] }
 0xe91   :  { %3816 = vst.msk [vmem:[%s8362_s13 + $0x11] sm:$0x1] %vm3636_vm4, %v3808_v52  ;;  %v4413_v53 = vrot.slane %v7579_v27, 1  ;;  %v4099_v34 = vsel %vm3488_vm13, %v4098_v50, %v4082_v61  ;;  %v4106_v38 = vrot.slane %v4087_v58, 3  ;;  %v4108_v10 = vrot.slane %v4088_v5, 2  ;;  %v8480_v50 = vld [vmem:[#allocation23_spill] sm:$0xff] }
 0xe92   :  { %3817 = vst.msk [vmem:[%s8362_s13 + $0x19] sm:$0x1] %vm3636_vm4, %v3809_v23  ;;  %v4414_v18 = vrot.slane %v7579_v27, 2  ;;  %v4101_v54 = vsel %vm3491_vm14, %v4100_v3, %v4099_v34  ;;  %v4415_v32 = vrot.slane %v7579_v27, 3  ;;  %v4416_v8 = vrot.slane %v7579_v27, 4 }
 0xe93   :  { %3818 = vst.msk [vmem:[%s8362_s13 + $0x21] sm:$0x1] %vm3636_vm4, %v3810_v59  ;;  %v4417_v39 = vrot.slane %v7579_v27, 5  ;;  %v4103_v19 = vsel %vm3494_vm15, %v4102_v51, %v4101_v54  ;;  %v4110_v20 = vrot.slane %v4089_v24, 1  ;;  %v4418_v2 = vrot.slane %v7579_v27, 6 }
 0xe94   :  { %3819 = vst.msk [vmem:[%s8362_s13 + $0x29] sm:$0x1] %vm3636_vm4, %v3811_v63  ;;  %v4419_v33 = vrot.slane %v7579_v27, 7  ;;  %v4105_v29 = vsel %vm3497_vm0, %v4104_v16, %v4103_v19  ;;  %v7789_v30 = vsub.f32 %v7329_v42, %v4413_v53  ;;  %v7792_v28 = vsub.f32 %v7331_v6, %v4414_v18  ;;  %v4712_v58 = vld [vmem:[%s8359_s2 + $0x2f] sm:$0x1] }
 0xe95   :  { %3820 = vst.msk [vmem:[%s8362_s13 + $0x31] sm:$0x1] %vm3636_vm4, %v3812_v4  ;;  %v7795_v7 = vsub.f32 %v7338_v12, %v4415_v32  ;;  %v4107_v49 = vsel %vm3500_vm1, %v4106_v38, %v4105_v29  ;;  %v7804_v14 = vsub.f32 %v7343_v0, %v7579_v27  ;;  %v7807_v42 = vsub.f32 %v7340_v37, %v4416_v8  ;;  %v8479_v27 = vld [vmem:[#allocation11_spill] sm:$0xff] }
 0xe96   :  { %3821 = vst.msk [vmem:[%s8362_s13 + $0x39] sm:$0x1] %vm3636_vm4, %v3813_v47  ;;  %v7810_v6 = vsub.f32 %v8476_v1, %v4417_v39  ;;  %v4109_v12 = vsel %vm3503_vm2, %v4108_v10, %v4107_v49  ;;  %v7814_v52 = vsub.f32 %v8477_v22, %v4418_v2  ;;  %v4437_v23 = vmul.f32 %v7789_v30, %v7789_v30  ;;  %v8481_v47 = vld [vmem:[#allocation22_spill] sm:$0xff]  ;;  %v4713_v39 = vld [vmem:[%s8359_s2 + $0x37] sm:$0x1] }
 0xe97   :  { %v8478_v61 = vrot.slane %v7429_v48, 4  ;;  %v4111_v0 = vsel %vm3506_vm3, %v4110_v20, %v4109_v12  ;;  %v7824_v37 = vsub.f32 %v8479_v27, %v4419_v33  ;;  %v4438_v63 = vmul.f32 %v7792_v28, %v7792_v28 }
 0xe98   :  { %v4439_v4 = vmul.f32 %v7795_v7, %v7795_v7  ;;  %v4113_v5 = vsel %vm223_vm12, %v4111_v0, 0.0  ;;  %v4440_v24 = vmul.f32 %v7807_v42, %v7807_v42  ;;  %v4750_v3 = vsel %vm3491_vm14, %v4749_v44, %v8480_v50 }
 0xe99   :  { %v7820_v59 = vadd.f32 %v8478_v61, %v4711_v41  ;;  %v4751_v51 = vrot.slane %v8481_v47, 5  ;;  %4114 = vadd.xlane.f32.xlu1 %v4113_v5  ;;  %v4436_v16 = vmul.f32 %v7804_v14, %v7804_v14  ;;  %v4441_v53 = vmul.f32 %v7810_v6, %v7810_v6 }
 0xe9a   :  { %v4452_v34 = vrot.slane %v4437_v23, 7  ;;  %v4454_v38 = vrot.slane %v4438_v63, 6  ;;  %v4442_v10 = vmul.f32 %v7814_v52, %v7814_v52  ;;  %v4721_v18 = vrot.slane %v7429_v48, 6  ;;  %v4714_v23 = vld [vmem:[%s8359_s2 + $0x3f] sm:$0x1] }
 0xe9b   :  { %v8482_v41 = vrot.slane %v7429_v48, 5  ;;  %v4443_v44 = vmul.f32 %v7824_v37, %v7824_v37  ;;  %v4456_v8 = vrot.slane %v4439_v4, 5  ;;  %v4752_v19 = vsel %vm3494_vm15, %v4751_v51, %v4750_v3 }
 0xe9c   :  { %v4453_v32 = vsel %vm3488_vm13, %v4452_v34, %v4436_v16  ;;  %v4458_v2 = vrot.slane %v4440_v24, 4  ;;  %v4753_v33 = vrot.slane %v7820_v59, 4  ;;  %v4460_v49 = vrot.slane %v4441_v53, 3 }
 0xe9d   :  { %v7850_v54 = vadd.f32 %v8482_v41, %v4712_v58  ;;  %v4455_v20 = vsel %vm3491_vm14, %v4454_v38, %v4453_v32  ;;  %v4722_v1 = vrot.slane %v7429_v48, 7  ;;  %v4462_v22 = vrot.slane %v4442_v10, 2 }
 0xe9e   :  { %v4457_v29 = vsel %vm3494_vm15, %v4456_v8, %v4455_v20  ;;  %v7867_v61 = vadd.f32 %v4721_v18, %v4713_v39  ;;  %v4754_v0 = vsel %vm3497_vm0, %v4753_v33, %v4752_v19  ;;  %v4464_v63 = vrot.slane %v4443_v44, 1  ;;  %v8483_v20 = vld [vmem:[#allocation16_spill] sm:$0xff] }
 0xe9f   :  { %v4459_v12 = vsel %vm3497_vm0, %v4458_v2, %v4457_v29  ;;  %v4755_v4 = vrot.slane %v7850_v54, 3  ;;  %v7874_v5 = vadd.f32 %v4722_v1, %v4714_v23  ;;  %v8484_v33 = vld [vmem:[#allocation12_spill] sm:$0xff]  ;;  %v8488_v23 = vld [vmem:[#allocation15_spill] sm:$0xff] }
 0xea0   :  { %v4461_v27 = vsel %vm3500_vm1, %v4460_v49, %v4459_v12  ;;  %v4757_v3 = vrot.slane %v7867_v61, 2  ;;  %v8485_v49 = vld [vmem:[#allocation13_spill] sm:$0xff]  ;;  %v8486_v12 = vld [vmem:[#allocation14_spill] sm:$0xff] }
 0xea1   :  { %v4463_v58 = vsel %vm3503_vm2, %v4462_v22, %v4461_v27  ;;  %v4756_v24 = vsel %vm3500_vm1, %v4755_v4, %v4754_v0  ;;  %v4759_v16 = vrot.slane %v7874_v5, 1  ;;  %v8490_v27 = vld [vmem:[#allocation17_spill] sm:$0xff]  ;;  %v8492_v4 = vld [vmem:[#allocation18_spill] sm:$0xff] }
 0xea2   :  { %v4465_v48 = vsel %vm3506_vm3, %v4464_v63, %v4463_v58  ;;  %v4758_v51 = vsel %vm3503_vm2, %v4757_v3, %v4756_v24 }
 0xea3   :  { %v4467_v50 = vsel %vm223_vm12, %v4465_v48, 0.0  ;;  %v4760_v53 = vsel %vm3506_vm3, %v4759_v16, %v4758_v51  ;;  %v8494_v48 = vld [vmem:[#allocation19_spill] sm:$0xff] }
 0xea4   :  { %4468 = vadd.xlane.f32.xlu0 %v4467_v50  ;;  %v4762_v34 = vsel %vm223_vm12, %v4760_v53, 0.0 }
 0xeab   :  { %v4587_v38 = vpop.xlane.xlu2 %4586 }
 0xeac   :  { %4763 = vadd.xlane.f32.xlu0 %v4762_v34  ;;  %v4588_v10 = vmul.f32 %v4587_v38, %v7068_v21 }
 0xeae   :  { %v4590_v18 = vrot.slane %v4588_v10, 1  ;;  %v4591_v41 = vrot.slane %v4588_v10, 2  ;;  %v4592_v44 = vrot.slane %v4588_v10, 3  ;;  %v4593_v32 = vrot.slane %v4588_v10, 4 }
 0xeaf   :  { %v4594_v8 = vrot.slane %v4588_v10, 5  ;;  %v4595_v39 = vrot.slane %v4588_v10, 6  ;;  %v4596_v19 = vrot.slane %v4588_v10, 7  ;;  %v7885_v2 = vsub.f32 %v8483_v20, %v4588_v10 }
 0xeb0   :  { %v7888_v29 = vsub.f32 %v8484_v33, %v4590_v18  ;;  %v7891_v1 = vsub.f32 %v8485_v49, %v4591_v41  ;;  %v7894_v22 = vsub.f32 %v8486_v12, %v4592_v44  ;;  %v7897_v0 = vsub.f32 %v8488_v23, %v4593_v32 }
 0xeb1   :  { %v7900_v63 = vsub.f32 %v8490_v27, %v4594_v8  ;;  %v7903_v58 = vsub.f32 %v8492_v4, %v4595_v39  ;;  %v7906_v24 = vsub.f32 %v8494_v48, %v4596_v19  ;;  %v4613_v53 = vmul.f32 %v7885_v2, %v7885_v2 }
 0xeb2   :  { %8487 = vst [vmem:[#allocation3_spill] sm:$0xff] %v7894_v22  ;;  %v4614_v50 = vmul.f32 %v7888_v29, %v7888_v29  ;;  %v4615_v3 = vmul.f32 %v7891_v1, %v7891_v1  ;;  %v4616_v51 = vmul.f32 %v7894_v22, %v7894_v22  ;;  %v4617_v16 = vmul.f32 %v7897_v0, %v7897_v0 }
 0xeb3   :  { %8489 = vst [vmem:[#allocation2_spill] sm:$0xff] %v7897_v0  ;;  %v4618_v34 = vmul.f32 %v7900_v63, %v7900_v63  ;;  %v4619_v18 = vmul.f32 %v7903_v58, %v7903_v58  ;;  %v4620_v41 = vmul.f32 %v7906_v24, %v7906_v24 }
 0xeb4   :  { %8491 = vst [vmem:[#allocation4_spill] sm:$0xff] %v7900_v63  ;;  %v4629_v38 = vrot.slane %v4614_v50, 7  ;;  %v4631_v10 = vrot.slane %v4615_v3, 6  ;;  %v4633_v32 = vrot.slane %v4616_v51, 5  ;;  %v4635_v39 = vrot.slane %v4617_v16, 4 }
 0xeb5   :  { %8493 = vst [vmem:[#allocation5_spill] sm:$0xff] %v7903_v58  ;;  %v4637_v20 = vrot.slane %v4618_v34, 3  ;;  %v4639_v49 = vrot.slane %v4619_v18, 2  ;;  %v4641_v23 = vrot.slane %v4620_v41, 1 }
 0xeb6   :  { %8495 = vst [vmem:[#allocation6_spill] sm:$0xff] %v7906_v24  ;;  %v4630_v44 = vsel %vm3488_vm13, %v4629_v38, %v4613_v53  ;;  %v8503_v24 = vld [vmem:[#allocation31_spill] sm:$0xff] }
 0xeb7   :  { %v4632_v8 = vsel %vm3491_vm14, %v4631_v10, %v4630_v44 }
 0xeb8   :  { %v4634_v19 = vsel %vm3494_vm15, %v4633_v32, %v4632_v8 }
 0xeb9   :  { %v4636_v33 = vsel %vm3497_vm0, %v4635_v39, %v4634_v19 }
 0xeba   :  { %v4638_v12 = vsel %vm3500_vm1, %v4637_v20, %v4636_v33 }
 0xebb   :  { %v4640_v27 = vsel %vm3503_vm2, %v4639_v49, %v4638_v12 }
 0xebc   :  { %v4642_v4 = vsel %vm3506_vm3, %v4641_v23, %v4640_v27  ;;  %v8496_v27 = vld [vmem:[#allocation24_spill] sm:$0xff] }
 0xebd   :  { %v4644_v48 = vsel %vm223_vm12, %v4642_v4, 0.0 }
 0xebe   :  { %4645 = vadd.xlane.f32.xlu1 %v4644_v48  ;;  %v8497_v48 = vld [vmem:[#allocation25_spill] sm:$0xff] }
 0xeef   :  { %v3938_v50 = vpop.xlane.xlu0 %3937 }
 0xef0   :  { %v3939_v3 = vmul.f32 %v3938_v50, %v7068_v21 }
 0xef2   :  { %v3940_v51 = vadd.f32 1e-05, %v3939_v3  ;;  %v8498_v3 = vld [vmem:[#allocation26_spill] sm:$0xff] }
 0xef4   :  { %5265 = vrsqrt.f32 %v3940_v51  ;;  %vm3947_vm6 = vweird.f32 %v3940_v51 }
 0xefa   :  { %v5266_v16 = vpop.eup %5265  ;;  %v4292_v34 = vpop.xlane.xlu2 %4291 }
 0xefb   :  { %v3942_v53 = vmul.f32 %v5266_v16, %v3940_v51  ;;  %v4293_v38 = vmul.f32 %v4292_v34, %v7068_v21  ;;  %vm3948_vm5 = vweird.f32 %v5266_v16  ;;  %v8499_v34 = vld [vmem:[#allocation27_spill] sm:$0xff] }
 0xefc   :  { %vm3949_vm7 = vmor %vm3947_vm6, %vm3948_vm5 }
 0xefd   :  { %v3943_v10 = vmul.f32 %v5266_v16, %v3942_v53  ;;  %v4294_v41 = vadd.f32 1e-05, %v4293_v38 }
 0xeff   :  { %v3944_v18 = vmul.f32 0.5, %v3943_v10  ;;  %5267 = vrsqrt.f32 %v4294_v41  ;;  %v8500_v10 = vld [vmem:[#allocation28_spill] sm:$0xff]  ;;  %vm4301_vm9 = vweird.f32 %v4294_v41 }
 0xf01   :  { %v3945_v44 = vsub.f32 1.5, %v3944_v18  ;;  %v8501_v18 = vld [vmem:[#allocation29_spill] sm:$0xff] }
 0xf03   :  { %v3946_v32 = vmul.f32 %v5266_v16, %v3945_v44 }
 0xf05   :  { %v3950_v8 = vsel %vm3949_vm7, %v5266_v16, %v3946_v32  ;;  %v8502_v16 = vld [vmem:[#allocation30_spill] sm:$0xff]  ;;  %v5268_v0 = vpop.eup %5267 }
 0xf06   :  { %v3952_v39 = vrot.slane %v3950_v8, 1  ;;  %v3953_v19 = vrot.slane %v3950_v8, 2  ;;  %v3954_v20 = vrot.slane %v3950_v8, 3  ;;  %v3955_v33 = vrot.slane %v3950_v8, 4 }
 0xf07   :  { %v3956_v49 = vrot.slane %v3950_v8, 5  ;;  %v3957_v12 = vrot.slane %v3950_v8, 6  ;;  %v3958_v23 = vrot.slane %v3950_v8, 7  ;;  %v3967_v4 = vmul.f32 %v3950_v8, %v8496_v27 }
 0xf08   :  { %v3968_v50 = vmul.f32 %v3952_v39, %v8497_v48  ;;  %v3969_v53 = vmul.f32 %v3953_v19, %v8498_v3  ;;  %v3970_v38 = vmul.f32 %v3954_v20, %v8499_v34  ;;  %v3971_v51 = vmul.f32 %v3955_v33, %v8500_v10 }
 0xf09   :  { %v3972_v44 = vmul.f32 %v3956_v49, %v8501_v18  ;;  %v3973_v32 = vmul.f32 %v3957_v12, %v8502_v16  ;;  %v3974_v58 = vmul.f32 %v3958_v23, %v8503_v24  ;;  %v3975_v63 = vmul.f32 %v7530_v31, %v3967_v4 }
 0xf0a   :  { %v3976_v22 = vmul.f32 %v7530_v31, %v3968_v50  ;;  %v3977_v8 = vmul.f32 %v7530_v31, %v3969_v53  ;;  %v3978_v39 = vmul.f32 %v7530_v31, %v3970_v38  ;;  %v3979_v19 = vmul.f32 %v7530_v31, %v3971_v51 }
 0xf0b   :  { %v3980_v20 = vmul.f32 %v7530_v31, %v3972_v44  ;;  %v3981_v33 = vmul.f32 %v7530_v31, %v3973_v32  ;;  %v3983_v49 = vadd.f32 %v7539_v35, %v3975_v63  ;;  %v3982_v12 = vmul.f32 %v7530_v31, %v3974_v58 }
 0xf0c   :  { %v3984_v24 = vadd.f32 %v7539_v35, %v3976_v22  ;;  %v3985_v23 = vadd.f32 %v7539_v35, %v3977_v8  ;;  %v3986_v27 = vadd.f32 %v7539_v35, %v3978_v39  ;;  %v3987_v4 = vadd.f32 %v7539_v35, %v3979_v19  ;;  %v4115_v50 = vpop.xlane.xlu1 %4114 }
 0xf0d   :  { %3991 = vst.msk [vmem:[%s8362_s13 + $0x2] sm:$0x1] %vm3636_vm4, %v3983_v49  ;;  %v4296_v48 = vmul.f32 %v5268_v0, %v4294_v41  ;;  %v3988_v3 = vadd.f32 %v7539_v35, %v3980_v20  ;;  %v4116_v22 = vmul.f32 %v4115_v50, %v7068_v21  ;;  %v3989_v63 = vadd.f32 %v7539_v35, %v3981_v33 }
 0xf0e   :  { %3992 = vst.msk [vmem:[%s8362_s13 + $0xa] sm:$0x1] %vm3636_vm4, %v3984_v24  ;;  %v3990_v53 = vadd.f32 %v7539_v35, %v3982_v12  ;;  %vm4302_vm8 = vweird.f32 %v5268_v0 }
 0xf0f   :  { %3993 = vst.msk [vmem:[%s8362_s13 + $0x12] sm:$0x1] %vm3636_vm4, %v3985_v23  ;;  %v4297_v58 = vmul.f32 %v5268_v0, %v4296_v48  ;;  %v7983_v38 = vadd.f32 1e-05, %v4116_v22  ;;  %vm4303_vm10 = vmor %vm4301_vm9, %vm4302_vm8 }
 0xf10   :  { %3994 = vst.msk [vmem:[%s8362_s13 + $0x1a] sm:$0x1] %vm3636_vm4, %v3986_v27 }
 0xf11   :  { %3995 = vst.msk [vmem:[%s8362_s13 + $0x22] sm:$0x1] %vm3636_vm4, %v3987_v4  ;;  %v4298_v34 = vmul.f32 0.5, %v4297_v58  ;;  %5269 = vrsqrt.f32 %v7983_v38  ;;  %vm4124_vm5 = vweird.f32 %v7983_v38 }
 0xf12   :  { %3996 = vst.msk [vmem:[%s8362_s13 + $0x2a] sm:$0x1] %vm3636_vm4, %v3988_v3 }
 0xf13   :  { %3997 = vst.msk [vmem:[%s8362_s13 + $0x32] sm:$0x1] %vm3636_vm4, %v3989_v63  ;;  %v4299_v10 = vsub.f32 1.5, %v4298_v34 }
 0xf14   :  { %3998 = vst.msk [vmem:[%s8362_s13 + $0x3a] sm:$0x1] %vm3636_vm4, %v3990_v53 }
 0xf15   :  { %v4300_v51 = vmul.f32 %v5268_v0, %v4299_v10 }
 0xf17   :  { %v4304_v18 = vsel %vm4303_vm10, %v5268_v0, %v4300_v51  ;;  %v4469_v44 = vpop.xlane.xlu0 %4468  ;;  %v5270_v50 = vpop.eup %5269 }
 0xf18   :  { %v4306_v16 = vrot.slane %v4304_v18, 1  ;;  %v4307_v32 = vrot.slane %v4304_v18, 2  ;;  %v4308_v8 = vrot.slane %v4304_v18, 3  ;;  %v4309_v39 = vrot.slane %v4304_v18, 4 }
 0xf19   :  { %v4310_v19 = vrot.slane %v4304_v18, 5  ;;  %v4311_v20 = vrot.slane %v4304_v18, 6  ;;  %v4312_v33 = vrot.slane %v4304_v18, 7  ;;  %v4321_v49 = vmul.f32 %v4304_v18, %v7591_v55 }
 0xf1a   :  { %v4322_v12 = vmul.f32 %v4306_v16, %v7601_v62  ;;  %v4323_v24 = vmul.f32 %v4307_v32, %v7604_v46  ;;  %v4324_v41 = vmul.f32 %v4308_v8, %v7607_v9  ;;  %v4325_v23 = vmul.f32 %v4309_v39, %v7617_v13 }
 0xf1b   :  { %v4326_v0 = vmul.f32 %v4310_v19, %v7620_v26  ;;  %v4327_v27 = vmul.f32 %v4311_v20, %v7623_v36  ;;  %v4328_v4 = vmul.f32 %v4312_v33, %v7631_v40  ;;  %v4329_v48 = vmul.f32 %v7530_v31, %v4321_v49 }
 0xf1c   :  { %v4330_v3 = vmul.f32 %v7530_v31, %v4322_v12  ;;  %v4331_v55 = vmul.f32 %v7530_v31, %v4323_v24  ;;  %v4332_v62 = vmul.f32 %v7530_v31, %v4324_v41  ;;  %v4333_v46 = vmul.f32 %v7530_v31, %v4325_v23  ;;  %v8504_v23 = vld [vmem:[#allocation21_spill] sm:$0xff] }
 0xf1d   :  { %v4334_v9 = vmul.f32 %v7530_v31, %v4326_v0  ;;  %v4335_v13 = vmul.f32 %v7530_v31, %v4327_v27  ;;  %v4337_v26 = vadd.f32 %v7539_v35, %v4329_v48  ;;  %v4336_v36 = vmul.f32 %v7530_v31, %v4328_v4  ;;  %v8505_v4 = vld [vmem:[#allocation20_spill] sm:$0xff] }
 0xf1e   :  { %v4338_v40 = vadd.f32 %v7539_v35, %v4330_v3  ;;  %v4339_v22 = vadd.f32 %v7539_v35, %v4331_v55  ;;  %v4340_v63 = vadd.f32 %v7539_v35, %v4332_v62  ;;  %v4341_v58 = vadd.f32 %v7539_v35, %v4333_v46 }
 0xf1f   :  { %4345 = vst.msk [vmem:[%s8362_s13 + $0x4] sm:$0x1] %vm3636_vm4, %v4337_v26  ;;  %v4119_v53 = vmul.f32 %v5270_v50, %v7983_v38  ;;  %v4764_v34 = vpop.xlane.xlu0 %4763  ;;  %v4342_v10 = vadd.f32 %v7539_v35, %v4334_v9  ;;  %v4470_v51 = vmul.f32 %v4469_v44, %v7068_v21  ;;  %v4343_v16 = vadd.f32 %v7539_v35, %v4335_v13 }
 0xf20   :  { %4346 = vst.msk [vmem:[%s8362_s13 + $0xc] sm:$0x1] %vm3636_vm4, %v4338_v40  ;;  %v4765_v18 = vmul.f32 %v4764_v34, %v7068_v21  ;;  %v4344_v8 = vadd.f32 %v7539_v35, %v4336_v36  ;;  %vm4125_vm11 = vweird.f32 %v5270_v50 }
 0xf21   :  { %4347 = vst.msk [vmem:[%s8362_s13 + $0x14] sm:$0x1] %vm3636_vm4, %v4339_v22  ;;  %v4120_v32 = vmul.f32 %v5270_v50, %v4119_v53  ;;  %v8037_v39 = vadd.f32 1e-05, %v4470_v51  ;;  %vm4126_vm6 = vmor %vm4124_vm5, %vm4125_vm11 }
 0xf22   :  { %4348 = vst.msk [vmem:[%s8362_s13 + $0x1c] sm:$0x1] %vm3636_vm4, %v4340_v63  ;;  %v4767_v44 = vrot.slane %v4765_v18, 1  ;;  %v4768_v19 = vrot.slane %v4765_v18, 2  ;;  %v4769_v33 = vrot.slane %v4765_v18, 3  ;;  %v4770_v49 = vrot.slane %v4765_v18, 4 }
 0xf23   :  { %4349 = vst.msk [vmem:[%s8362_s13 + $0x24] sm:$0x1] %vm3636_vm4, %v4341_v58  ;;  %v4121_v20 = vmul.f32 0.5, %v4120_v32  ;;  %v4771_v12 = vrot.slane %v4765_v18, 5  ;;  %v4772_v24 = vrot.slane %v4765_v18, 6  ;;  %v4773_v41 = vrot.slane %v4765_v18, 7 }
 0xf24   :  { %4350 = vst.msk [vmem:[%s8362_s13 + $0x2c] sm:$0x1] %vm3636_vm4, %v4342_v10  ;;  %v8048_v0 = vsub.f32 %v8504_v23, %v4765_v18  ;;  %v8055_v48 = vsub.f32 %v8505_v4, %v4767_v44  ;;  %v8058_v3 = vsub.f32 %v7456_v56, %v4768_v19  ;;  %v8061_v55 = vsub.f32 %v8481_v47, %v4769_v33 }
 0xf25   :  { %4351 = vst.msk [vmem:[%s8362_s13 + $0x34] sm:$0x1] %vm3636_vm4, %v4343_v16  ;;  %v4122_v27 = vsub.f32 1.5, %v4121_v20  ;;  %v8069_v62 = vsub.f32 %v7820_v59, %v4770_v49  ;;  %v8072_v46 = vsub.f32 %v7850_v54, %v4771_v12  ;;  %5271 = vrsqrt.f32 %v8037_v39 }
 0xf26   :  { %4352 = vst.msk [vmem:[%s8362_s13 + $0x3c] sm:$0x1] %vm3636_vm4, %v4344_v8  ;;  %v8076_v56 = vsub.f32 %v7867_v61, %v4772_v24  ;;  %v4791_v47 = vmul.f32 %v8055_v48, %v8055_v48  ;;  %v8082_v13 = vsub.f32 %v7874_v5, %v4773_v41  ;;  %v4790_v59 = vmul.f32 %v8048_v0, %v8048_v0 }
 0xf27   :  { %v4123_v9 = vmul.f32 %v5270_v50, %v4122_v27  ;;  %v4792_v54 = vmul.f32 %v8058_v3, %v8058_v3  ;;  %v4793_v38 = vmul.f32 %v8061_v55, %v8061_v55  ;;  %v4794_v61 = vmul.f32 %v8069_v62, %v8069_v62 }
 0xf28   :  { %v4795_v36 = vmul.f32 %v8072_v46, %v8072_v46  ;;  %v4806_v40 = vrot.slane %v4791_v47, 7  ;;  %v4796_v4 = vmul.f32 %v8076_v56, %v8076_v56 }
 0xf29   :  { %v4127_v26 = vsel %vm4126_vm6, %v5270_v50, %v4123_v9  ;;  %v4808_v12 = vrot.slane %v4792_v54, 6  ;;  %v4797_v9 = vmul.f32 %v8082_v13, %v8082_v13  ;;  %v4810_v54 = vrot.slane %v4793_v38, 5 }
 0xf2a   :  { %v4129_v22 = vrot.slane %v4127_v26, 1  ;;  %v4130_v5 = vrot.slane %v4127_v26, 2  ;;  %v4131_v63 = vrot.slane %v4127_v26, 3  ;;  %v4132_v58 = vrot.slane %v4127_v26, 4 }
 0xf2b   :  { %v4133_v53 = vrot.slane %v4127_v26, 5  ;;  %v4134_v34 = vrot.slane %v4127_v26, 6  ;;  %v4135_v10 = vrot.slane %v4127_v26, 7  ;;  %v4144_v51 = vmul.f32 %v4127_v26, %v7680_v57  ;;  %v5272_v8 = vpop.eup %5271 }
 0xf2c   :  { %v4145_v18 = vmul.f32 %v4129_v22, %v7672_v11  ;;  %v4146_v50 = vmul.f32 %v4130_v5, %v7675_v15  ;;  %v4147_v16 = vmul.f32 %v4131_v63, %v7683_v17  ;;  %v4148_v32 = vmul.f32 %v4132_v58, %v7686_v60 }
 0xf2d   :  { %v4149_v44 = vmul.f32 %v4133_v53, %v7690_v45  ;;  %v4150_v19 = vmul.f32 %v4134_v34, %v7693_v43  ;;  %v4151_v20 = vmul.f32 %v4135_v10, %v7700_v25  ;;  %v4152_v33 = vmul.f32 %v7530_v31, %v4144_v51 }
 0xf2e   :  { %v4153_v49 = vmul.f32 %v7530_v31, %v4145_v18  ;;  %v4154_v57 = vmul.f32 %v7530_v31, %v4146_v50  ;;  %v4155_v11 = vmul.f32 %v7530_v31, %v4147_v16  ;;  %v4156_v15 = vmul.f32 %v7530_v31, %v4148_v32 }
 0xf2f   :  { %v4157_v17 = vmul.f32 %v7530_v31, %v4149_v44  ;;  %v4158_v60 = vmul.f32 %v7530_v31, %v4150_v19  ;;  %v4160_v45 = vadd.f32 %v7539_v35, %v4152_v33  ;;  %v4159_v43 = vmul.f32 %v7530_v31, %v4151_v20 }
 0xf30   :  { %v4161_v25 = vadd.f32 %v7539_v35, %v4153_v49  ;;  %v4162_v24 = vadd.f32 %v7539_v35, %v4154_v57  ;;  %v4163_v41 = vadd.f32 %v7539_v35, %v4155_v11  ;;  %v4164_v23 = vadd.f32 %v7539_v35, %v4156_v15 }
 0xf31   :  { %4168 = vst.msk [vmem:[%s8362_s13 + $0x3] sm:$0x1] %vm3636_vm4, %v4160_v45  ;;  %v4473_v27 = vmul.f32 %v5272_v8, %v8037_v39  ;;  %v4165_v31 = vadd.f32 %v7539_v35, %v4157_v17  ;;  %v4807_v47 = vsel %vm3488_vm13, %v4806_v40, %v4790_v59  ;;  %v4166_v26 = vadd.f32 %v7539_v35, %v4158_v60  ;;  %v4646_v58 = vpop.xlane.xlu1 %4645 }
 0xf32   :  { %4169 = vst.msk [vmem:[%s8362_s13 + $0xb] sm:$0x1] %vm3636_vm4, %v4161_v25  ;;  %v4809_v5 = vsel %vm3491_vm14, %v4808_v12, %v4807_v47  ;;  %v4812_v63 = vrot.slane %v4794_v61, 4  ;;  %v4167_v53 = vadd.f32 %v7539_v35, %v4159_v43  ;;  %v4814_v38 = vrot.slane %v4795_v36, 3 }
 0xf33   :  { %4170 = vst.msk [vmem:[%s8362_s13 + $0x13] sm:$0x1] %vm3636_vm4, %v4162_v24  ;;  %v4474_v22 = vmul.f32 %v5272_v8, %v4473_v27  ;;  %v4811_v59 = vsel %vm3494_vm15, %v4810_v54, %v4809_v5  ;;  %v4647_v40 = vmul.f32 %v4646_v58, %v7068_v21  ;;  %v4816_v10 = vrot.slane %v4796_v4, 2 }
 0xf34   :  { %4171 = vst.msk [vmem:[%s8362_s13 + $0x1b] sm:$0x1] %vm3636_vm4, %v4163_v41  ;;  %v4813_v61 = vsel %vm3497_vm0, %v4812_v63, %v4811_v59  ;;  %v4818_v51 = vrot.slane %v4797_v9, 1  ;;  %vm4479_vm13 = vweird.f32 %v5272_v8  ;;  %vm4478_vm14 = vweird.f32 %v8037_v39  ;;  %v8179_v41 = vld [vmem:[%s8360_s11] ss:$0 sm:$0xff] }
 0xf35   :  { %4172 = vst.msk [vmem:[%s8362_s13 + $0x23] sm:$0x1] %vm3636_vm4, %v4164_v23  ;;  %v4475_v34 = vmul.f32 0.5, %v4474_v22  ;;  %v4815_v35 = vsel %vm3500_vm1, %v4814_v38, %v4813_v61  ;;  %v8153_v36 = vadd.f32 1e-05, %v4647_v40  ;;  %vm4480_vm15 = vmor %vm4478_vm14, %vm4479_vm13 }
 0xf36   :  { %4173 = vst.msk [vmem:[%s8362_s13 + $0x2b] sm:$0x1] %vm3636_vm4, %v4165_v31  ;;  %v4817_v50 = vsel %vm3503_vm2, %v4816_v10, %v4815_v35  ;;  %v8191_v23 = vld [vmem:[%s8361_s12] ss:$0 sm:$0xff] }
 0xf37   :  { %4174 = vst.msk [vmem:[%s8362_s13 + $0x33] sm:$0x1] %vm3636_vm4, %v4166_v26  ;;  %v4476_v18 = vsub.f32 1.5, %v4475_v34  ;;  %v4819_v16 = vsel %vm3506_vm3, %v4818_v51, %v4817_v50  ;;  %5273 = vrsqrt.f32 %v8153_v36  ;;  %vm4655_vm0 = vweird.f32 %v8153_v36 }
 0xf38   :  { %4175 = vst.msk [vmem:[%s8362_s13 + $0x3b] sm:$0x1] %vm3636_vm4, %v4167_v53  ;;  %v4821_v44 = vsel %vm223_vm12, %v4819_v16, 0.0 }
 0xf39   :  { %v4477_v32 = vmul.f32 %v5272_v8, %v4476_v18  ;;  %4822 = vadd.xlane.f32.xlu2 %v4821_v44 }
 0xf3b   :  { %v4481_v19 = vsel %vm4480_vm15, %v5272_v8, %v4477_v32 }
 0xf3c   :  { %v4483_v20 = vrot.slane %v4481_v19, 1  ;;  %v4484_v33 = vrot.slane %v4481_v19, 2  ;;  %v4485_v49 = vrot.slane %v4481_v19, 3  ;;  %v4486_v57 = vrot.slane %v4481_v19, 4 }
 0xf3d   :  { %v4487_v11 = vrot.slane %v4481_v19, 5  ;;  %v4488_v15 = vrot.slane %v4481_v19, 6  ;;  %v4489_v17 = vrot.slane %v4481_v19, 7  ;;  %v4498_v60 = vmul.f32 %v4481_v19, %v7804_v14  ;;  %v8506_v19 = vld [vmem:[#allocation3_spill] sm:$0xff] }
 0xf3e   :  { %v4499_v45 = vmul.f32 %v4483_v20, %v7789_v30  ;;  %v4500_v39 = vmul.f32 %v4484_v33, %v7792_v28  ;;  %v4501_v12 = vmul.f32 %v4485_v49, %v7795_v7  ;;  %v4502_v43 = vmul.f32 %v4486_v57, %v7807_v42  ;;  %v5274_v30 = vpop.eup %5273  ;;  %v8507_v33 = vld [vmem:[#allocation2_spill] sm:$0xff] }
 0xf3f   :  { %v4503_v25 = vmul.f32 %v4487_v11, %v7810_v6  ;;  %v4504_v8 = vmul.f32 %v4488_v15, %v7814_v52  ;;  %v4505_v24 = vmul.f32 %v4489_v17, %v7824_v37  ;;  %v4506_v14 = vmul.f32 %v8179_v41, %v4498_v60  ;;  %v8509_v11 = vld [vmem:[#allocation5_spill] sm:$0xff]  ;;  %v8510_v17 = vld [vmem:[#allocation6_spill] sm:$0xff] }
 0xf40   :  { %v4507_v28 = vmul.f32 %v8179_v41, %v4499_v45  ;;  %v4508_v7 = vmul.f32 %v8179_v41, %v4500_v39  ;;  %v4509_v42 = vmul.f32 %v8179_v41, %v4501_v12  ;;  %v4510_v6 = vmul.f32 %v8179_v41, %v4502_v43 }
 0xf41   :  { %v4511_v52 = vmul.f32 %v8179_v41, %v4503_v25  ;;  %v4512_v37 = vmul.f32 %v8179_v41, %v4504_v8  ;;  %v4514_v27 = vadd.f32 %v8191_v23, %v4506_v14  ;;  %v4513_v4 = vmul.f32 %v8179_v41, %v4505_v24 }
 0xf42   :  { %v4515_v31 = vadd.f32 %v8191_v23, %v4507_v28  ;;  %v4516_v9 = vadd.f32 %v8191_v23, %v4508_v7  ;;  %v4517_v47 = vadd.f32 %v8191_v23, %v4509_v42  ;;  %v4518_v54 = vadd.f32 %v8191_v23, %v4510_v6 }
 0xf43   :  { %4522 = vst.msk [vmem:[%s8362_s13 + $0x5] sm:$0x1] %vm3636_vm4, %v4514_v27  ;;  %v4650_v26 = vmul.f32 %v5274_v30, %v8153_v36  ;;  %v4519_v22 = vadd.f32 %v8191_v23, %v4511_v52  ;;  %v4520_v5 = vadd.f32 %v8191_v23, %v4512_v37  ;;  %v4521_v58 = vadd.f32 %v8191_v23, %v4513_v4  ;;  %v8508_v36 = vld [vmem:[#allocation4_spill] sm:$0xff] }
 0xf44   :  { %4523 = vst.msk [vmem:[%s8362_s13 + $0xd] sm:$0x1] %vm3636_vm4, %v4515_v31  ;;  %vm4656_vm12 = vweird.f32 %v5274_v30 }
 0xf45   :  { %4524 = vst.msk [vmem:[%s8362_s13 + $0x15] sm:$0x1] %vm3636_vm4, %v4516_v9  ;;  %v4651_v63 = vmul.f32 %v5274_v30, %v4650_v26  ;;  %vm4657_vm1 = vmor %vm4655_vm0, %vm4656_vm12 }
 0xf46   :  { %4525 = vst.msk [vmem:[%s8362_s13 + $0x1d] sm:$0x1] %vm3636_vm4, %v4517_v47 }
 0xf47   :  { %4526 = vst.msk [vmem:[%s8362_s13 + $0x25] sm:$0x1] %vm3636_vm4, %v4518_v54  ;;  %v4652_v53 = vmul.f32 0.5, %v4651_v63 }
 0xf48   :  { %4527 = vst.msk [vmem:[%s8362_s13 + $0x2d] sm:$0x1] %vm3636_vm4, %v4519_v22 }
 0xf49   :  { %4528 = vst.msk [vmem:[%s8362_s13 + $0x35] sm:$0x1] %vm3636_vm4, %v4520_v5  ;;  %v4653_v59 = vsub.f32 1.5, %v4652_v53 }
 0xf4a   :  { %4529 = vst.msk [vmem:[%s8362_s13 + $0x3d] sm:$0x1] %vm3636_vm4, %v4521_v58 }
 0xf4b   :  { %v4654_v38 = vmul.f32 %v5274_v30, %v4653_v59 }
 0xf4d   :  { %v4658_v40 = vsel %vm4657_vm1, %v5274_v30, %v4654_v38 }
 0xf4e   :  { %v4660_v34 = vrot.slane %v4658_v40, 1  ;;  %v4661_v61 = vrot.slane %v4658_v40, 2  ;;  %v4662_v10 = vrot.slane %v4658_v40, 3  ;;  %v4663_v35 = vrot.slane %v4658_v40, 4 }
 0xf4f   :  { %v4664_v51 = vrot.slane %v4658_v40, 5  ;;  %v4665_v18 = vrot.slane %v4658_v40, 6  ;;  %v4666_v50 = vrot.slane %v4658_v40, 7  ;;  %v4675_v16 = vmul.f32 %v4658_v40, %v7885_v2 }
 0xf50   :  { %v4676_v32 = vmul.f32 %v4660_v34, %v7888_v29  ;;  %v4677_v44 = vmul.f32 %v4661_v61, %v7891_v1  ;;  %v4678_v20 = vmul.f32 %v4662_v10, %v8506_v19  ;;  %v4679_v49 = vmul.f32 %v4663_v35, %v8507_v33 }
 0xf51   :  { %v4680_v57 = vmul.f32 %v4664_v51, %v8508_v36  ;;  %v4681_v15 = vmul.f32 %v4665_v18, %v8509_v11  ;;  %v4682_v60 = vmul.f32 %v4666_v50, %v8510_v17  ;;  %v4683_v45 = vmul.f32 %v8179_v41, %v4675_v16 }
 0xf52   :  { %v4684_v39 = vmul.f32 %v8179_v41, %v4676_v32  ;;  %v4685_v2 = vmul.f32 %v8179_v41, %v4677_v44  ;;  %v4686_v29 = vmul.f32 %v8179_v41, %v4678_v20  ;;  %v4687_v1 = vmul.f32 %v8179_v41, %v4679_v49 }
 0xf53   :  { %v4688_v12 = vmul.f32 %v8179_v41, %v4680_v57  ;;  %v4689_v43 = vmul.f32 %v8179_v41, %v4681_v15  ;;  %v4691_v25 = vadd.f32 %v8191_v23, %v4683_v45  ;;  %v4690_v8 = vmul.f32 %v8179_v41, %v4682_v60 }
 0xf54   :  { %v4692_v24 = vadd.f32 %v8191_v23, %v4684_v39  ;;  %v4693_v14 = vadd.f32 %v8191_v23, %v4685_v2  ;;  %v4694_v30 = vadd.f32 %v8191_v23, %v4686_v29  ;;  %v4695_v28 = vadd.f32 %v8191_v23, %v4687_v1 }
 0xf55   :  { %4699 = vst.msk [vmem:[%s8362_s13 + $0x6] sm:$0x1] %vm3636_vm4, %v4691_v25  ;;  %v4696_v7 = vadd.f32 %v8191_v23, %v4688_v12  ;;  %v4697_v42 = vadd.f32 %v8191_v23, %v4689_v43  ;;  %v4698_v6 = vadd.f32 %v8191_v23, %v4690_v8 }
 0xf56   :  { %4700 = vst.msk [vmem:[%s8362_s13 + $0xe] sm:$0x1] %vm3636_vm4, %v4692_v24 }
 0xf57   :  { %4701 = vst.msk [vmem:[%s8362_s13 + $0x16] sm:$0x1] %vm3636_vm4, %v4693_v14 }
 0xf58   :  { %4702 = vst.msk [vmem:[%s8362_s13 + $0x1e] sm:$0x1] %vm3636_vm4, %v4694_v30 }
 0xf59   :  { %4703 = vst.msk [vmem:[%s8362_s13 + $0x26] sm:$0x1] %vm3636_vm4, %v4695_v28 }
 0xf5a   :  { %4704 = vst.msk [vmem:[%s8362_s13 + $0x2e] sm:$0x1] %vm3636_vm4, %v4696_v7 }
 0xf5b   :  { %4705 = vst.msk [vmem:[%s8362_s13 + $0x36] sm:$0x1] %vm3636_vm4, %v4697_v42 }
 0xf5c   :  { %4706 = vst.msk [vmem:[%s8362_s13 + $0x3e] sm:$0x1] %vm3636_vm4, %v4698_v6 }
 0xfac   :  { %v4823_v52 = vpop.xlane.xlu2 %4822 }
 0xfad   :  { %v4824_v37 = vmul.f32 %v4823_v52, %v7068_v21 }
 0xfaf   :  { %v4825_v27 = vadd.f32 1e-05, %v4824_v37 }
 0xfb1   :  { %5275 = vrsqrt.f32 %v4825_v27  ;;  %vm4832_vm3 = vweird.f32 %v4825_v27 }
 0xfb7   :  { %v5276_v4 = vpop.eup %5275 }
 0xfb8   :  { %v4827_v31 = vmul.f32 %v5276_v4, %v4825_v27  ;;  %vm4833_vm2 = vweird.f32 %v5276_v4 }
 0xfb9   :  { %vm4834_vm7 = vmor %vm4832_vm3, %vm4833_vm2 }
 0xfba   :  { %v4828_v9 = vmul.f32 %v5276_v4, %v4827_v31 }
 0xfbc   :  { %v4829_v47 = vmul.f32 0.5, %v4828_v9 }
 0xfbe   :  { %v4830_v54 = vsub.f32 1.5, %v4829_v47 }
 0xfc0   :  { %v4831_v26 = vmul.f32 %v5276_v4, %v4830_v54 }
 0xfc2   :  { %v4835_v22 = vsel %vm4834_vm7, %v5276_v4, %v4831_v26 }
 0xfc3   :  { %v4837_v5 = vrot.slane %v4835_v22, 1  ;;  %v4838_v63 = vrot.slane %v4835_v22, 2  ;;  %v4839_v58 = vrot.slane %v4835_v22, 3  ;;  %v4840_v53 = vrot.slane %v4835_v22, 4 }
 0xfc4   :  { %v4841_v59 = vrot.slane %v4835_v22, 5  ;;  %v4842_v38 = vrot.slane %v4835_v22, 6  ;;  %v4843_v40 = vrot.slane %v4835_v22, 7  ;;  %v4852_v21 = vmul.f32 %v4835_v22, %v8048_v0 }
 0xfc5   :  { %v4853_v34 = vmul.f32 %v4837_v5, %v8055_v48  ;;  %v4854_v61 = vmul.f32 %v4838_v63, %v8058_v3  ;;  %v4855_v10 = vmul.f32 %v4839_v58, %v8061_v55  ;;  %v4856_v35 = vmul.f32 %v4840_v53, %v8069_v62 }
 0xfc6   :  { %v4857_v51 = vmul.f32 %v4841_v59, %v8072_v46  ;;  %v4858_v18 = vmul.f32 %v4842_v38, %v8076_v56  ;;  %v4859_v50 = vmul.f32 %v4843_v40, %v8082_v13  ;;  %v4860_v16 = vmul.f32 %v8179_v41, %v4852_v21 }
 0xfc7   :  { %v4861_v32 = vmul.f32 %v8179_v41, %v4853_v34  ;;  %v4862_v0 = vmul.f32 %v8179_v41, %v4854_v61  ;;  %v4863_v48 = vmul.f32 %v8179_v41, %v4855_v10  ;;  %v4864_v3 = vmul.f32 %v8179_v41, %v4856_v35 }
 0xfc8   :  { %v4865_v55 = vmul.f32 %v8179_v41, %v4857_v51  ;;  %v4866_v62 = vmul.f32 %v8179_v41, %v4858_v18  ;;  %v4868_v46 = vadd.f32 %v8191_v23, %v4860_v16  ;;  %v4867_v56 = vmul.f32 %v8179_v41, %v4859_v50 }
 0xfc9   :  { %v4869_v13 = vadd.f32 %v8191_v23, %v4861_v32  ;;  %v4870_v44 = vadd.f32 %v8191_v23, %v4862_v0  ;;  %v4871_v19 = vadd.f32 %v8191_v23, %v4863_v48  ;;  %v4872_v20 = vadd.f32 %v8191_v23, %v4864_v3 }
 0xfca   :  { %4876 = vst.msk [vmem:[%s8362_s13 + $0x7] sm:$0x1] %vm3636_vm4, %v4868_v46  ;;  %v4873_v33 = vadd.f32 %v8191_v23, %v4865_v55  ;;  %v4874_v41 = vadd.f32 %v8191_v23, %v4866_v62  ;;  %v4875_v49 = vadd.f32 %v8191_v23, %v4867_v56 }
 0xfcb   :  { %4877 = vst.msk [vmem:[%s8362_s13 + $0xf] sm:$0x1] %vm3636_vm4, %v4869_v13 }
 0xfcc   :  { %4878 = vst.msk [vmem:[%s8362_s13 + $0x17] sm:$0x1] %vm3636_vm4, %v4870_v44 }
 0xfcd   :  { %4879 = vst.msk [vmem:[%s8362_s13 + $0x1f] sm:$0x1] %vm3636_vm4, %v4871_v19 }
 0xfce   :  { %4880 = vst.msk [vmem:[%s8362_s13 + $0x27] sm:$0x1] %vm3636_vm4, %v4872_v20 }
 0xfcf   :  { %4881 = vst.msk [vmem:[%s8362_s13 + $0x2f] sm:$0x1] %vm3636_vm4, %v4873_v33 }
 0xfd0   :  { %4882 = vst.msk [vmem:[%s8362_s13 + $0x37] sm:$0x1] %vm3636_vm4, %v4874_v41 }
 0xfd1   :  { %4883 = vst.msk [vmem:[%s8362_s13 + $0x3f] sm:$0x1] %vm3636_vm4, %v4875_v49 }

</bundles_post_ra>
